<compile_context>
chip_gen: v5e
topology: v5e:2x2
jax: 0.10.0
libtpu: 0.0.40
codegen_flags: <defaults>
</compile_context>

<pallas_src>
import functools

import jax
import jax.numpy as jnp
from jax.experimental import pallas as pl
from jax.experimental.pallas import tpu as pltpu

C_PAD = 128                                   # padded channel width (MXU lanes)
N_SCORE, N_BBOX, N_LANDMARK = 2, 8, 20
N_HEAD = N_SCORE + N_BBOX + N_LANDMARK        # 30


# ----------------------------------- kernel -----------------------------------
def _make_kernel(bt, h, w, cin):
    """Builds the fused OutputBlock kernel for B_TILE=bt images per grid step."""
    del cin  # input arrives already zero-padded to C_PAD lanes
    hw = h * w
    rows = (h + 2) * w          # flattened rows per image incl. 1-row top/bottom pad
    assert w % 8 == 0 and hw % 8 == 0 and rows % 8 == 0

    def kernel(x_ref, w_ref, b_ref, scale_ref, out_ref, xpad_ref, slab_ref):
        # x_ref     : (bt, hw, C_PAD)        input activation (channels zero-padded)
        # w_ref     : (4, 9*C_PAD, C_PAD)    bf16 tap-major weights (l0, l1, l2, heads)
        # b_ref     : (4, 1, C_PAD)          f32 biases (zero-padded)
        # scale_ref : (1,) f32 in SMEM       bbox scale parameter
        # out_ref   : (bt, hw, C_PAD)        cols 0:2 score, 2:10 bbox, 10:30 landmark
        # xpad_ref  : (bt*rows, C_PAD) f32   flattened zero-padded activation scratch
        # slab_ref  : (bt*hw, 9*C_PAD) bf16  im2col slab (one 128-lane group per tap)
        pad_zero = jnp.zeros((w, C_PAD), jnp.float32)
        # pixel x-position of every flattened row (for dx = +/-1 edge masking)
        pos = jax.lax.broadcasted_iota(jnp.int32, (rows, C_PAD), 0) % w
        left_edge = pos == 0
        right_edge = pos == (w - 1)

        # Per-image init: zero ONLY the top/bottom padding rows (the interior is fully
        # overwritten below), then drop the input activation into the interior.
        for b in range(bt):
            base = b * rows
            xpad_ref[base:base + w, :] = pad_zero                       # top pad row
            xpad_ref[base + w + hw:base + rows, :] = pad_zero           # bottom pad row
            xpad_ref[base + w:base + w + hw, :] = x_ref[b]              # interior

        def build_slab():
            # In-kernel im2col into the lane-tile-aligned bf16 slab.
            for b in range(bt):
                base = b * rows
                cen = xpad_ref[base:base + rows, :]                     # (rows, 128) f32
                # left neighbour  (dx=-1): value[i] = cen[i-1], zero at x == 0
                lft = jnp.where(left_edge, 0.0,
                                pltpu.roll(cen, shift=1, axis=0))
                # right neighbour (dx=+1): value[i] = cen[i+1], zero at x == w-1
                rgt = jnp.where(right_edge, 0.0,
                                pltpu.roll(cen, shift=rows - 1, axis=0))
                variants = (lft, cen, rgt)                              # dx = -1, 0, +1
                for t in range(9):
                    dy, dx = divmod(t, 3)
                    tap = variants[dx][dy * w:dy * w + hw, :]           # aligned slice
                    slab_ref[b * hw:(b + 1) * hw,
                             t * C_PAD:(t + 1) * C_PAD] = tap.astype(jnp.bfloat16)

        def conv3x3(layer):
            # One K = 9*128 MXU GEMM per layer (bf16 operands, f32 accumulation).
            build_slab()
            acc = jnp.dot(slab_ref[...], w_ref[layer],
                          preferred_element_type=jnp.float32)
            return acc + b_ref[layer]                                   # (bt*hw, 128)

        # Trunk: three conv+ReLU layers; activation stays resident in VMEM (f32).
        for layer in range(3):
            act = jnp.maximum(conv3x3(layer), 0.0)
            for b in range(bt):
                base = b * rows
                xpad_ref[base + w:base + w + hw, :] = act[b * hw:(b + 1) * hw, :]

        # Fused heads (score | bbox | landmark): single GEMM + per-column activation.
        head = conv3x3(3)
        col = jax.lax.broadcasted_iota(jnp.int32, head.shape, 1)
        head = jnp.where(col < N_SCORE, jax.nn.sigmoid(head),
                         jnp.where(col < N_SCORE + N_BBOX,
                                   head * scale_ref[0], head))
        out_ref[...] = head.reshape(bt, hw, C_PAD).astype(out_ref.dtype)

    return kernel


# --------------------------- parameter preprocessing ---------------------------
def _prep_conv(w_oihw, b):
    """PyTorch OIHW (Cout, Cin, 3, 3) -> tap-major (9*C_PAD, C_PAD) bf16, zero-padded."""
    cout, cin = w_oihw.shape[0], w_oihw.shape[1]
    wt = jnp.transpose(w_oihw, (2, 3, 1, 0)).reshape(9, cin, cout)
    wt = jnp.pad(wt, ((0, 0), (0, C_PAD - cin), (0, C_PAD - cout)))
    wt = wt.reshape(9 * C_PAD, C_PAD).astype(jnp.bfloat16)     # rows = tap*128 + cin
    bt = jnp.pad(b, (0, C_PAD - cout)).reshape(1, C_PAD).astype(jnp.float32)
    return wt, bt


def prepare_params(p):
    """One-time repack of module parameters (hoisted off the forward path)."""
    w_head = jnp.concatenate([p["score"][0], p["bbox"][0], p["landmark"][0]], axis=0)
    b_head = jnp.concatenate([p["score"][1], p["bbox"][1], p["landmark"][1]], axis=0)
    layers = [p["l0"], p["l1"], p["l2"], (w_head, b_head)]
    ws, bs = zip(*(_prep_conv(w, b) for w, b in layers))
    return {
        "w": jnp.stack(ws),                                     # (4, 9*128, 128) bf16
        "b": jnp.stack(bs),                                     # (4, 1, 128) f32
        "scale": jnp.reshape(p["scale"].astype(jnp.float32), (1,)),
    }


def pick_batch_tile(n, hw):
    """Fold batch into the GEMM M dim on single-TC chips; keep >=2 steps on v7x."""
    try:
        kind = jax.devices()[0].device_kind.lower()
    except Exception:  # pragma: no cover - defensive
        kind = ""
    is_v7 = ("v7" in kind) or ("7x" in kind)
    min_steps = 2 if is_v7 else 1
    best = 1
    for bt in range(1, n + 1):
        if n % bt == 0 and (n // bt) >= min_steps and bt * hw <= 512:
            best = bt
    return best


# ----------------------------------- forward -----------------------------------
@functools.partial(jax.jit, static_argnames=("b_tile",))
def output_block_forward(x_nchw, prep, *, b_tile=1):
    """Matches OutputBlock.forward (shapes, dtypes, axis order)."""
    n, cin, h, w = x_nchw.shape
    hw = h * w
    assert n % b_tile == 0 and w % 8 == 0

    x = jnp.transpose(x_nchw, (0, 2, 3, 1)).astype(jnp.float32)           # NCHW -> NHWC
    x = jnp.pad(x, ((0, 0), (0, 0), (0, 0), (0, C_PAD - cin)))
    x = x.reshape(n, hw, C_PAD)                                           # pixel-major

    out = pl.pallas_call(
        _make_kernel(b_tile, h, w, cin),
        out_shape=jax.ShapeDtypeStruct((n, hw, C_PAD), jnp.float32),
        grid_spec=pltpu.PrefetchScalarGridSpec(
            num_scalar_prefetch=0,
            grid=(n // b_tile,),
            in_specs=[
                pl.BlockSpec((b_tile, hw, C_PAD), lambda i: (i, 0, 0)),
                # constant index_map -> weights/bias DMA'd once across the grid
                pl.BlockSpec((4, 9 * C_PAD, C_PAD), lambda i: (0, 0, 0)),
                pl.BlockSpec((4, 1, C_PAD), lambda i: (0, 0, 0)),
                pl.BlockSpec(memory_space=pltpu.MemorySpace.SMEM),
            ],
            out_specs=pl.BlockSpec((b_tile, hw, C_PAD), lambda i: (i, 0, 0)),
            scratch_shapes=[
                pltpu.VMEM((b_tile * (h + 2) * w, C_PAD), jnp.float32),   # padded act
                pltpu.VMEM((b_tile * hw, 9 * C_PAD), jnp.bfloat16),       # im2col slab
            ],
        ),
        compiler_params=pltpu.CompilerParams(
            dimension_semantics=("parallel",)),
    )(x, prep["w"], prep["b"], prep["scale"])

    out = out.reshape(n, h, w, C_PAD)
    score_nhwc = out[..., :N_SCORE]
    bbox_nhwc = out[..., N_SCORE:N_SCORE + N_BBOX]
    landmark_nhwc = out[..., N_SCORE + N_BBOX:N_HEAD]

    def permute_reshape(y_nhwc, last):
        # torch: NCHW.permute(2,3,0,1) == NHWC -> (H,W,N,C) -> (-1,last)
        return jnp.transpose(y_nhwc, (1, 2, 0, 3)).reshape(-1, last)

    return (permute_reshape(score_nhwc, 1),
            permute_reshape(bbox_nhwc, 4),
            permute_reshape(landmark_nhwc, 10))


# ---------------------------- synthetic init (spec shapes) ----------------------------
def init_params(key):
    def conv_params(k, cin, cout):
        k1, k2 = jax.random.split(k)
        w = jax.random.normal(k1, (cout, cin, 3, 3), jnp.float32) / jnp.sqrt(9.0 * cin)
        b = jax.random.normal(k2, (cout,), jnp.float32) * 0.01
        return w, b

    keys = jax.random.split(key, 6)
    return {
        "l0": conv_params(keys[0], 56, 80),
        "l1": conv_params(keys[1], 80, 80),
        "l2": conv_params(keys[2], 80, 80),
        "score": conv_params(keys[3], 80, 2),
        "bbox": conv_params(keys[4], 80, 8),
        "landmark": conv_params(keys[5], 80, 20),
        "scale": jnp.float32(0.0),        # nn.Parameter(torch.tensor(0.0))
    }


# ------------------------------ pure-JAX reference ------------------------------
def _ref_conv(x_nchw, w, b):
    y = jax.lax.conv_general_dilated(
        x_nchw, w, (1, 1), "SAME",
        dimension_numbers=("NCHW", "OIHW", "NCHW"),
        precision=jax.lax.Precision.HIGHEST)
    return y + b.reshape(1, -1, 1, 1)


def ref_forward(x, p):
    h = jax.nn.relu(_ref_conv(x, *p["l0"]))
    h = jax.nn.relu(_ref_conv(h, *p["l1"]))
    h = jax.nn.relu(_ref_conv(h, *p["l2"]))
    score = jax.nn.sigmoid(
        jnp.transpose(_ref_conv(h, *p["score"]), (2, 3, 0, 1)).reshape(-1, 1))
    bbox = jnp.transpose(_ref_conv(h, *p["bbox"]) * p["scale"],
                         (2, 3, 0, 1)).reshape(-1, 4)
    landmark = jnp.transpose(_ref_conv(h, *p["landmark"]),
                             (2, 3, 0, 1)).reshape(-1, 10)
    return score, bbox, landmark


if __name__ == "__main__":
    key = jax.random.PRNGKey(0)
    k_x, k_p = jax.random.split(key)
    x = jax.random.normal(k_x, (2, 56, 8, 8), jnp.float32)    # NCHW; Cin fixed at 56
    params = init_params(k_p)

    b_tile = pick_batch_tile(x.shape[0], x.shape[2] * x.shape[3])

    # scale=0.0 matches the module init; 0.37 exercises the bbox-scale path.
    for scale_val in (0.0, 0.37):
        params["scale"] = jnp.float32(scale_val)
        prep = prepare_params(params)

        score, bbox, landmark = output_block_forward(x, prep, b_tile=b_tile)
        jax.block_until_ready((score, bbox, landmark))

        # shapes follow torch semantics (H*W*N*C / last rows)
        assert score.shape == (8 * 8 * 2 * 2, 1)
        assert bbox.shape == (8 * 8 * 2 * 2, 4)
        assert landmark.shape == (8 * 8 * 2 * 2, 10)

        rs, rb, rl = ref_forward(x, params)
        # bf16 matmul operands (f32 accumulation) vs a pure-f32 reference -> 2e-2 tol.
        for a, r in ((score, rs), (bbox, rb), (landmark, rl)):
            assert jnp.allclose(a, r, rtol=2e-2, atol=2e-2), "mismatch vs reference"

    print("KERNEL_OK")
</pallas_src>

<mosaic_0001>
module attributes {stable_mosaic.version = 11 : i64} {
  func.func @kernel(%arg0: i32, %arg1: memref<2x64x128xf32, #tpu.memory_space<vmem>>, %arg2: memref<4x1152x128xbf16, #tpu.memory_space<vmem>>, %arg3: memref<4x1x128xf32, #tpu.memory_space<vmem>>, %arg4: memref<1xf32, #tpu.memory_space<smem>>, %arg5: memref<2x64x128xf32, #tpu.memory_space<vmem>>, %arg6: memref<160x128xf32, #tpu.memory_space<vmem>>, %arg7: memref<128x1152xbf16, #tpu.memory_space<vmem>>) attributes {dimension_semantics = [#tpu.dimension_semantics<parallel>], iteration_bounds = array<i64: 1>, scalar_prefetch = 0 : i64, scratch_operands = 2 : i64, tpu.core_type = #tpu.core_type<tc>, window_params = [{transform_indices = @transform_0, window_bounds = array<i64: 2, 64, 128>}, {pipeline_mode = #tpu.pipeline_mode<synchronous>, transform_indices = @transform_1, window_bounds = array<i64: 4, 1152, 128>}, {pipeline_mode = #tpu.pipeline_mode<synchronous>, transform_indices = @transform_2, window_bounds = array<i64: 4, 1, 128>}, {transform_indices = @transform_3, window_bounds = array<i64: 1>}, {transform_indices = @transform_4, window_bounds = array<i64: 2, 64, 128>}]} {
    %cst = arith.constant 0.000000e+00 : f32
    %0 = vector.broadcast %cst : f32 to vector<8x128xf32>
    %1 = tpu.iota {dimensions = array<i32: 0>} : vector<80x128xi32>
    %c8_i32 = arith.constant 8 : i32
    %c0_i32 = arith.constant 0 : i32
    %2 = arith.cmpi eq, %c8_i32, %c0_i32 : i32
    %c1_i32 = arith.constant 1 : i32
    %3 = arith.select %2, %c1_i32, %c8_i32 : i32
    %4 = vector.broadcast %3 : i32 to vector<80x128xi32>
    %5 = arith.remsi %1, %4 : vector<80x128xi32>
    %c0_i32_0 = arith.constant 0 : i32
    %6 = vector.broadcast %c0_i32_0 : i32 to vector<80x128xi32>
    %7 = arith.cmpi ne, %5, %6 : vector<80x128xi32>
    %c0_i32_1 = arith.constant 0 : i32
    %8 = vector.broadcast %c0_i32_1 : i32 to vector<80x128xi32>
    %9 = arith.cmpi slt, %5, %8 : vector<80x128xi32>
    %c0_i32_2 = arith.constant 0 : i32
    %10 = arith.cmpi slt, %3, %c0_i32_2 : i32
    %11 = vector.broadcast %10 : i1 to vector<80x128xi1>
    %12 = vector.broadcast %11 : vector<80x128xi1> to vector<80x128xi1>
    %13 = arith.xori %9, %12 : vector<80x128xi1>
    %14 = arith.andi %13, %7 : vector<80x128xi1>
    %15 = vector.broadcast %3 : i32 to vector<80x128xi32>
    %16 = arith.addi %5, %15 : vector<80x128xi32>
    %17 = arith.select %14, %16, %5 : vector<80x128xi1>, vector<80x128xi32>
    %c0_i32_3 = arith.constant 0 : i32
    %18 = vector.broadcast %c0_i32_3 : i32 to vector<80x128xi32>
    %19 = arith.cmpi eq, %17, %18 : vector<80x128xi32>
    %c7_i32 = arith.constant 7 : i32
    %20 = vector.broadcast %c7_i32 : i32 to vector<80x128xi32>
    %21 = arith.cmpi eq, %17, %20 : vector<80x128xi32>
    %c0 = arith.constant 0 : index
    %c0_4 = arith.constant 0 : index
    %22 = vector.load %arg6[%c0, %c0_4] : memref<160x128xf32, #tpu.memory_space<vmem>>, vector<8x128xf32>
    tpu.vector_store %arg6[%c0, %c0_4], %0 {strides = array<i32>} : memref<160x128xf32, #tpu.memory_space<vmem>>, vector<8x128xf32>,
    %c72 = arith.constant 72 : index
    %c0_5 = arith.constant 0 : index
    %23 = vector.load %arg6[%c72, %c0_5] : memref<160x128xf32, #tpu.memory_space<vmem>>, vector<8x128xf32>
    tpu.vector_store %arg6[%c72, %c0_5], %0 {strides = array<i32>} : memref<160x128xf32, #tpu.memory_space<vmem>>, vector<8x128xf32>,
    %c0_6 = arith.constant 0 : index
    %c0_7 = arith.constant 0 : index
    %c0_8 = arith.constant 0 : index
    %24 = vector.load %arg1[%c0_6, %c0_7, %c0_8] : memref<2x64x128xf32, #tpu.memory_space<vmem>>, vector<1x64x128xf32>
    %25 = vector.shape_cast %24 : vector<1x64x128xf32> to vector<64x128xf32>
    %c8 = arith.constant 8 : index
    %c0_9 = arith.constant 0 : index
    %26 = vector.load %arg6[%c8, %c0_9] : memref<160x128xf32, #tpu.memory_space<vmem>>, vector<64x128xf32>
    tpu.vector_store %arg6[%c8, %c0_9], %25 {strides = array<i32>} : memref<160x128xf32, #tpu.memory_space<vmem>>, vector<64x128xf32>,
    %c80 = arith.constant 80 : index
    %c0_10 = arith.constant 0 : index
    %27 = vector.load %arg6[%c80, %c0_10] : memref<160x128xf32, #tpu.memory_space<vmem>>, vector<8x128xf32>
    tpu.vector_store %arg6[%c80, %c0_10], %0 {strides = array<i32>} : memref<160x128xf32, #tpu.memory_space<vmem>>, vector<8x128xf32>,
    %c152 = arith.constant 152 : index
    %c0_11 = arith.constant 0 : index
    %28 = vector.load %arg6[%c152, %c0_11] : memref<160x128xf32, #tpu.memory_space<vmem>>, vector<8x128xf32>
    tpu.vector_store %arg6[%c152, %c0_11], %0 {strides = array<i32>} : memref<160x128xf32, #tpu.memory_space<vmem>>, vector<8x128xf32>,
    %c1 = arith.constant 1 : index
    %c0_12 = arith.constant 0 : index
    %c0_13 = arith.constant 0 : index
    %29 = vector.load %arg1[%c1, %c0_12, %c0_13] : memref<2x64x128xf32, #tpu.memory_space<vmem>>, vector<1x64x128xf32>
    %30 = vector.shape_cast %29 : vector<1x64x128xf32> to vector<64x128xf32>
    %c88 = arith.constant 88 : index
    %c0_14 = arith.constant 0 : index
    %31 = vector.load %arg6[%c88, %c0_14] : memref<160x128xf32, #tpu.memory_space<vmem>>, vector<64x128xf32>
    tpu.vector_store %arg6[%c88, %c0_14], %30 {strides = array<i32>} : memref<160x128xf32, #tpu.memory_space<vmem>>, vector<64x128xf32>,
    %c0_15 = arith.constant 0 : index
    %c0_16 = arith.constant 0 : index
    %32 = vector.load %arg6[%c0_15, %c0_16] : memref<160x128xf32, #tpu.memory_space<vmem>>, vector<80x128xf32>
    %c1_i32_17 = arith.constant 1 : i32
    %33 = tpu.dynamic_rotate %32 by %c1_i32_17 dim 0 : vector<80x128xf32>, i32 -> vector<80x128xf32>
    %cst_18 = arith.constant 0.000000e+00 : f32
    %34 = vector.broadcast %cst_18 : f32 to vector<80x128xf32>
    %35 = arith.select %19, %34, %33 : vector<80x128xi1>, vector<80x128xf32>
    %c79_i32 = arith.constant 79 : i32
    %36 = tpu.dynamic_rotate %32 by %c79_i32 dim 0 : vector<80x128xf32>, i32 -> vector<80x128xf32>
    %cst_19 = arith.constant 0.000000e+00 : f32
    %37 = vector.broadcast %cst_19 : f32 to vector<80x128xf32>
    %38 = arith.select %21, %37, %36 : vector<80x128xi1>, vector<80x128xf32>
    %39 = vector.extract_strided_slice %35 {offsets = [0, 0], sizes = [64, 128], strides = [1, 1]} : vector<80x128xf32> to vector<64x128xf32>
    %40 = arith.truncf %39 : vector<64x128xf32> to vector<64x128xbf16>
    %c0_20 = arith.constant 0 : index
    %c0_21 = arith.constant 0 : index
    %41 = vector.load %arg7[%c0_20, %c0_21] : memref<128x1152xbf16, #tpu.memory_space<vmem>>, vector<64x128xbf16>
    tpu.vector_store %arg7[%c0_20, %c0_21], %40 {strides = array<i32>} : memref<128x1152xbf16, #tpu.memory_space<vmem>>, vector<64x128xbf16>,
    %42 = vector.extract_strided_slice %32 {offsets = [0, 0], sizes = [64, 128], strides = [1, 1]} : vector<80x128xf32> to vector<64x128xf32>
    %43 = arith.truncf %42 : vector<64x128xf32> to vector<64x128xbf16>
    %c0_22 = arith.constant 0 : index
    %c128 = arith.constant 128 : index
    %44 = vector.load %arg7[%c0_22, %c128] : memref<128x1152xbf16, #tpu.memory_space<vmem>>, vector<64x128xbf16>
    tpu.vector_store %arg7[%c0_22, %c128], %43 {strides = array<i32>} : memref<128x1152xbf16, #tpu.memory_space<vmem>>, vector<64x128xbf16>,
    %45 = vector.extract_strided_slice %38 {offsets = [0, 0], sizes = [64, 128], strides = [1, 1]} : vector<80x128xf32> to vector<64x128xf32>
    %46 = arith.truncf %45 : vector<64x128xf32> to vector<64x128xbf16>
    %c0_23 = arith.constant 0 : index
    %c256 = arith.constant 256 : index
    %47 = vector.load %arg7[%c0_23, %c256] : memref<128x1152xbf16, #tpu.memory_space<vmem>>, vector<64x128xbf16>
    tpu.vector_store %arg7[%c0_23, %c256], %46 {strides = array<i32>} : memref<128x1152xbf16, #tpu.memory_space<vmem>>, vector<64x128xbf16>,
    %48 = vector.extract_strided_slice %35 {offsets = [8, 0], sizes = [64, 128], strides = [1, 1]} : vector<80x128xf32> to vector<64x128xf32>
    %49 = arith.truncf %48 : vector<64x128xf32> to vector<64x128xbf16>
    %c0_24 = arith.constant 0 : index
    %c384 = arith.constant 384 : index
    %50 = vector.load %arg7[%c0_24, %c384] : memref<128x1152xbf16, #tpu.memory_space<vmem>>, vector<64x128xbf16>
    tpu.vector_store %arg7[%c0_24, %c384], %49 {strides = array<i32>} : memref<128x1152xbf16, #tpu.memory_space<vmem>>, vector<64x128xbf16>,
    %51 = vector.extract_strided_slice %32 {offsets = [8, 0], sizes = [64, 128], strides = [1, 1]} : vector<80x128xf32> to vector<64x128xf32>
    %52 = arith.truncf %51 : vector<64x128xf32> to vector<64x128xbf16>
    %c0_25 = arith.constant 0 : index
    %c512 = arith.constant 512 : index
    %53 = vector.load %arg7[%c0_25, %c512] : memref<128x1152xbf16, #tpu.memory_space<vmem>>, vector<64x128xbf16>
    tpu.vector_store %arg7[%c0_25, %c512], %52 {strides = array<i32>} : memref<128x1152xbf16, #tpu.memory_space<vmem>>, vector<64x128xbf16>,
    %54 = vector.extract_strided_slice %38 {offsets = [8, 0], sizes = [64, 128], strides = [1, 1]} : vector<80x128xf32> to vector<64x128xf32>
    %55 = arith.truncf %54 : vector<64x128xf32> to vector<64x128xbf16>
    %c0_26 = arith.constant 0 : index
    %c640 = arith.constant 640 : index
    %56 = vector.load %arg7[%c0_26, %c640] : memref<128x1152xbf16, #tpu.memory_space<vmem>>, vector<64x128xbf16>
    tpu.vector_store %arg7[%c0_26, %c640], %55 {strides = array<i32>} : memref<128x1152xbf16, #tpu.memory_space<vmem>>, vector<64x128xbf16>,
    %57 = vector.extract_strided_slice %35 {offsets = [16, 0], sizes = [64, 128], strides = [1, 1]} : vector<80x128xf32> to vector<64x128xf32>
    %58 = arith.truncf %57 : vector<64x128xf32> to vector<64x128xbf16>
    %c0_27 = arith.constant 0 : index
    %c768 = arith.constant 768 : index
    %59 = vector.load %arg7[%c0_27, %c768] : memref<128x1152xbf16, #tpu.memory_space<vmem>>, vector<64x128xbf16>
    tpu.vector_store %arg7[%c0_27, %c768], %58 {strides = array<i32>} : memref<128x1152xbf16, #tpu.memory_space<vmem>>, vector<64x128xbf16>,
    %60 = vector.extract_strided_slice %32 {offsets = [16, 0], sizes = [64, 128], strides = [1, 1]} : vector<80x128xf32> to vector<64x128xf32>
    %61 = arith.truncf %60 : vector<64x128xf32> to vector<64x128xbf16>
    %c0_28 = arith.constant 0 : index
    %c896 = arith.constant 896 : index
    %62 = vector.load %arg7[%c0_28, %c896] : memref<128x1152xbf16, #tpu.memory_space<vmem>>, vector<64x128xbf16>
    tpu.vector_store %arg7[%c0_28, %c896], %61 {strides = array<i32>} : memref<128x1152xbf16, #tpu.memory_space<vmem>>, vector<64x128xbf16>,
    %63 = vector.extract_strided_slice %38 {offsets = [16, 0], sizes = [64, 128], strides = [1, 1]} : vector<80x128xf32> to vector<64x128xf32>
    %64 = arith.truncf %63 : vector<64x128xf32> to vector<64x128xbf16>
    %c0_29 = arith.constant 0 : index
    %c1024 = arith.constant 1024 : index
    %65 = vector.load %arg7[%c0_29, %c1024] : memref<128x1152xbf16, #tpu.memory_space<vmem>>, vector<64x128xbf16>
    tpu.vector_store %arg7[%c0_29, %c1024], %64 {strides = array<i32>} : memref<128x1152xbf16, #tpu.memory_space<vmem>>, vector<64x128xbf16>,
    %c80_30 = arith.constant 80 : index
    %c0_31 = arith.constant 0 : index
    %66 = vector.load %arg6[%c80_30, %c0_31] : memref<160x128xf32, #tpu.memory_space<vmem>>, vector<80x128xf32>
    %c1_i32_32 = arith.constant 1 : i32
    %67 = tpu.dynamic_rotate %66 by %c1_i32_32 dim 0 : vector<80x128xf32>, i32 -> vector<80x128xf32>
    %cst_33 = arith.constant 0.000000e+00 : f32
    %68 = vector.broadcast %cst_33 : f32 to vector<80x128xf32>
    %69 = arith.select %19, %68, %67 : vector<80x128xi1>, vector<80x128xf32>
    %c79_i32_34 = arith.constant 79 : i32
    %70 = tpu.dynamic_rotate %66 by %c79_i32_34 dim 0 : vector<80x128xf32>, i32 -> vector<80x128xf32>
    %cst_35 = arith.constant 0.000000e+00 : f32
    %71 = vector.broadcast %cst_35 : f32 to vector<80x128xf32>
    %72 = arith.select %21, %71, %70 : vector<80x128xi1>, vector<80x128xf32>
    %73 = vector.extract_strided_slice %69 {offsets = [0, 0], sizes = [64, 128], strides = [1, 1]} : vector<80x128xf32> to vector<64x128xf32>
    %74 = arith.truncf %73 : vector<64x128xf32> to vector<64x128xbf16>
    %c64 = arith.constant 64 : index
    %c0_36 = arith.constant 0 : index
    %75 = vector.load %arg7[%c64, %c0_36] : memref<128x1152xbf16, #tpu.memory_space<vmem>>, vector<64x128xbf16>
    tpu.vector_store %arg7[%c64, %c0_36], %74 {strides = array<i32>} : memref<128x1152xbf16, #tpu.memory_space<vmem>>, vector<64x128xbf16>,
    %76 = vector.extract_strided_slice %66 {offsets = [0, 0], sizes = [64, 128], strides = [1, 1]} : vector<80x128xf32> to vector<64x128xf32>
    %77 = arith.truncf %76 : vector<64x128xf32> to vector<64x128xbf16>
    %c64_37 = arith.constant 64 : index
    %c128_38 = arith.constant 128 : index
    %78 = vector.load %arg7[%c64_37, %c128_38] : memref<128x1152xbf16, #tpu.memory_space<vmem>>, vector<64x128xbf16>
    tpu.vector_store %arg7[%c64_37, %c128_38], %77 {strides = array<i32>} : memref<128x1152xbf16, #tpu.memory_space<vmem>>, vector<64x128xbf16>,
    %79 = vector.extract_strided_slice %72 {offsets = [0, 0], sizes = [64, 128], strides = [1, 1]} : vector<80x128xf32> to vector<64x128xf32>
    %80 = arith.truncf %79 : vector<64x128xf32> to vector<64x128xbf16>
    %c64_39 = arith.constant 64 : index
    %c256_40 = arith.constant 256 : index
    %81 = vector.load %arg7[%c64_39, %c256_40] : memref<128x1152xbf16, #tpu.memory_space<vmem>>, vector<64x128xbf16>
    tpu.vector_store %arg7[%c64_39, %c256_40], %80 {strides = array<i32>} : memref<128x1152xbf16, #tpu.memory_space<vmem>>, vector<64x128xbf16>,
    %82 = vector.extract_strided_slice %69 {offsets = [8, 0], sizes = [64, 128], strides = [1, 1]} : vector<80x128xf32> to vector<64x128xf32>
    %83 = arith.truncf %82 : vector<64x128xf32> to vector<64x128xbf16>
    %c64_41 = arith.constant 64 : index
    %c384_42 = arith.constant 384 : index
    %84 = vector.load %arg7[%c64_41, %c384_42] : memref<128x1152xbf16, #tpu.memory_space<vmem>>, vector<64x128xbf16>
    tpu.vector_store %arg7[%c64_41, %c384_42], %83 {strides = array<i32>} : memref<128x1152xbf16, #tpu.memory_space<vmem>>, vector<64x128xbf16>,
    %85 = vector.extract_strided_slice %66 {offsets = [8, 0], sizes = [64, 128], strides = [1, 1]} : vector<80x128xf32> to vector<64x128xf32>
    %86 = arith.truncf %85 : vector<64x128xf32> to vector<64x128xbf16>
    %c64_43 = arith.constant 64 : index
    %c512_44 = arith.constant 512 : index
    %87 = vector.load %arg7[%c64_43, %c512_44] : memref<128x1152xbf16, #tpu.memory_space<vmem>>, vector<64x128xbf16>
    tpu.vector_store %arg7[%c64_43, %c512_44], %86 {strides = array<i32>} : memref<128x1152xbf16, #tpu.memory_space<vmem>>, vector<64x128xbf16>,
    %88 = vector.extract_strided_slice %72 {offsets = [8, 0], sizes = [64, 128], strides = [1, 1]} : vector<80x128xf32> to vector<64x128xf32>
    %89 = arith.truncf %88 : vector<64x128xf32> to vector<64x128xbf16>
    %c64_45 = arith.constant 64 : index
    %c640_46 = arith.constant 640 : index
    %90 = vector.load %arg7[%c64_45, %c640_46] : memref<128x1152xbf16, #tpu.memory_space<vmem>>, vector<64x128xbf16>
    tpu.vector_store %arg7[%c64_45, %c640_46], %89 {strides = array<i32>} : memref<128x1152xbf16, #tpu.memory_space<vmem>>, vector<64x128xbf16>,
    %91 = vector.extract_strided_slice %69 {offsets = [16, 0], sizes = [64, 128], strides = [1, 1]} : vector<80x128xf32> to vector<64x128xf32>
    %92 = arith.truncf %91 : vector<64x128xf32> to vector<64x128xbf16>
    %c64_47 = arith.constant 64 : index
    %c768_48 = arith.constant 768 : index
    %93 = vector.load %arg7[%c64_47, %c768_48] : memref<128x1152xbf16, #tpu.memory_space<vmem>>, vector<64x128xbf16>
    tpu.vector_store %arg7[%c64_47, %c768_48], %92 {strides = array<i32>} : memref<128x1152xbf16, #tpu.memory_space<vmem>>, vector<64x128xbf16>,
    %94 = vector.extract_strided_slice %66 {offsets = [16, 0], sizes = [64, 128], strides = [1, 1]} : vector<80x128xf32> to vector<64x128xf32>
    %95 = arith.truncf %94 : vector<64x128xf32> to vector<64x128xbf16>
    %c64_49 = arith.constant 64 : index
    %c896_50 = arith.constant 896 : index
    %96 = vector.load %arg7[%c64_49, %c896_50] : memref<128x1152xbf16, #tpu.memory_space<vmem>>, vector<64x128xbf16>
    tpu.vector_store %arg7[%c64_49, %c896_50], %95 {strides = array<i32>} : memref<128x1152xbf16, #tpu.memory_space<vmem>>, vector<64x128xbf16>,
    %97 = vector.extract_strided_slice %72 {offsets = [16, 0], sizes = [64, 128], strides = [1, 1]} : vector<80x128xf32> to vector<64x128xf32>
    %98 = arith.truncf %97 : vector<64x128xf32> to vector<64x128xbf16>
    %c64_51 = arith.constant 64 : index
    %c1024_52 = arith.constant 1024 : index
    %99 = vector.load %arg7[%c64_51, %c1024_52] : memref<128x1152xbf16, #tpu.memory_space<vmem>>, vector<64x128xbf16>
    tpu.vector_store %arg7[%c64_51, %c1024_52], %98 {strides = array<i32>} : memref<128x1152xbf16, #tpu.memory_space<vmem>>, vector<64x128xbf16>,
    %c0_53 = arith.constant 0 : index
    %c0_54 = arith.constant 0 : index
    %100 = vector.load %arg7[%c0_53, %c0_54] : memref<128x1152xbf16, #tpu.memory_space<vmem>>, vector<128x1152xbf16>
    %c0_55 = arith.constant 0 : index
    %c0_56 = arith.constant 0 : index
    %c0_57 = arith.constant 0 : index
    %101 = vector.load %arg2[%c0_55, %c0_56, %c0_57] : memref<4x1152x128xbf16, #tpu.memory_space<vmem>>, vector<1x1152x128xbf16>
    %102 = vector.shape_cast %101 : vector<1x1152x128xbf16> to vector<1152x128xbf16>
    %cst_58 = arith.constant dense<0.000000e+00> : vector<128x128xf32>
    %103 = tpu.matmul %100, %102, %cst_58 {dimension_numbers = #tpu.dot_dimension_numbers<[1], [0], [0], [1], [0, 0, 1, 1], [], []>} : vector<128x1152xbf16>, vector<1152x128xbf16>, vector<128x128xf32> -> vector<128x128xf32>
    %c0_59 = arith.constant 0 : index
    %c0_60 = arith.constant 0 : index
    %c0_61 = arith.constant 0 : index
    %104 = vector.load %arg3[%c0_59, %c0_60, %c0_61] : memref<4x1x128xf32, #tpu.memory_space<vmem>>, vector<1x1x128xf32>
    %105 = vector.shape_cast %104 : vector<1x1x128xf32> to vector<1x128xf32>
    %106 = vector.broadcast %105 : vector<1x128xf32> to vector<128x128xf32>
    %107 = arith.addf %103, %106 : vector<128x128xf32>
    %cst_62 = arith.constant 0.000000e+00 : f32
    %108 = vector.broadcast %cst_62 : f32 to vector<128x128xf32>
    %109 = arith.maximumf %107, %108 : vector<128x128xf32>
    %110 = vector.extract_strided_slice %109 {offsets = [0, 0], sizes = [64, 128], strides = [1, 1]} : vector<128x128xf32> to vector<64x128xf32>
    %c8_63 = arith.constant 8 : index
    %c0_64 = arith.constant 0 : index
    %111 = vector.load %arg6[%c8_63, %c0_64] : memref<160x128xf32, #tpu.memory_space<vmem>>, vector<64x128xf32>
    tpu.vector_store %arg6[%c8_63, %c0_64], %110 {strides = array<i32>} : memref<160x128xf32, #tpu.memory_space<vmem>>, vector<64x128xf32>,
    %112 = vector.extract_strided_slice %109 {offsets = [64, 0], sizes = [64, 128], strides = [1, 1]} : vector<128x128xf32> to vector<64x128xf32>
    %c88_65 = arith.constant 88 : index
    %c0_66 = arith.constant 0 : index
    %113 = vector.load %arg6[%c88_65, %c0_66] : memref<160x128xf32, #tpu.memory_space<vmem>>, vector<64x128xf32>
    tpu.vector_store %arg6[%c88_65, %c0_66], %112 {strides = array<i32>} : memref<160x128xf32, #tpu.memory_space<vmem>>, vector<64x128xf32>,
    %c0_67 = arith.constant 0 : index
    %c0_68 = arith.constant 0 : index
    %114 = vector.load %arg6[%c0_67, %c0_68] : memref<160x128xf32, #tpu.memory_space<vmem>>, vector<80x128xf32>
    %c1_i32_69 = arith.constant 1 : i32
    %115 = tpu.dynamic_rotate %114 by %c1_i32_69 dim 0 : vector<80x128xf32>, i32 -> vector<80x128xf32>
    %cst_70 = arith.constant 0.000000e+00 : f32
    %116 = vector.broadcast %cst_70 : f32 to vector<80x128xf32>
    %117 = arith.select %19, %116, %115 : vector<80x128xi1>, vector<80x128xf32>
    %c79_i32_71 = arith.constant 79 : i32
    %118 = tpu.dynamic_rotate %114 by %c79_i32_71 dim 0 : vector<80x128xf32>, i32 -> vector<80x128xf32>
    %cst_72 = arith.constant 0.000000e+00 : f32
    %119 = vector.broadcast %cst_72 : f32 to vector<80x128xf32>
    %120 = arith.select %21, %119, %118 : vector<80x128xi1>, vector<80x128xf32>
    %121 = vector.extract_strided_slice %117 {offsets = [0, 0], sizes = [64, 128], strides = [1, 1]} : vector<80x128xf32> to vector<64x128xf32>
    %122 = arith.truncf %121 : vector<64x128xf32> to vector<64x128xbf16>
    %c0_73 = arith.constant 0 : index
    %c0_74 = arith.constant 0 : index
    %123 = vector.load %arg7[%c0_73, %c0_74] : memref<128x1152xbf16, #tpu.memory_space<vmem>>, vector<64x128xbf16>
    tpu.vector_store %arg7[%c0_73, %c0_74], %122 {strides = array<i32>} : memref<128x1152xbf16, #tpu.memory_space<vmem>>, vector<64x128xbf16>,
    %124 = vector.extract_strided_slice %114 {offsets = [0, 0], sizes = [64, 128], strides = [1, 1]} : vector<80x128xf32> to vector<64x128xf32>
    %125 = arith.truncf %124 : vector<64x128xf32> to vector<64x128xbf16>
    %c0_75 = arith.constant 0 : index
    %c128_76 = arith.constant 128 : index
    %126 = vector.load %arg7[%c0_75, %c128_76] : memref<128x1152xbf16, #tpu.memory_space<vmem>>, vector<64x128xbf16>
    tpu.vector_store %arg7[%c0_75, %c128_76], %125 {strides = array<i32>} : memref<128x1152xbf16, #tpu.memory_space<vmem>>, vector<64x128xbf16>,
    %127 = vector.extract_strided_slice %120 {offsets = [0, 0], sizes = [64, 128], strides = [1, 1]} : vector<80x128xf32> to vector<64x128xf32>
    %128 = arith.truncf %127 : vector<64x128xf32> to vector<64x128xbf16>
    %c0_77 = arith.constant 0 : index
    %c256_78 = arith.constant 256 : index
    %129 = vector.load %arg7[%c0_77, %c256_78] : memref<128x1152xbf16, #tpu.memory_space<vmem>>, vector<64x128xbf16>
    tpu.vector_store %arg7[%c0_77, %c256_78], %128 {strides = array<i32>} : memref<128x1152xbf16, #tpu.memory_space<vmem>>, vector<64x128xbf16>,
    %130 = vector.extract_strided_slice %117 {offsets = [8, 0], sizes = [64, 128], strides = [1, 1]} : vector<80x128xf32> to vector<64x128xf32>
    %131 = arith.truncf %130 : vector<64x128xf32> to vector<64x128xbf16>
    %c0_79 = arith.constant 0 : index
    %c384_80 = arith.constant 384 : index
    %132 = vector.load %arg7[%c0_79, %c384_80] : memref<128x1152xbf16, #tpu.memory_space<vmem>>, vector<64x128xbf16>
    tpu.vector_store %arg7[%c0_79, %c384_80], %131 {strides = array<i32>} : memref<128x1152xbf16, #tpu.memory_space<vmem>>, vector<64x128xbf16>,
    %133 = vector.extract_strided_slice %114 {offsets = [8, 0], sizes = [64, 128], strides = [1, 1]} : vector<80x128xf32> to vector<64x128xf32>
    %134 = arith.truncf %133 : vector<64x128xf32> to vector<64x128xbf16>
    %c0_81 = arith.constant 0 : index
    %c512_82 = arith.constant 512 : index
    %135 = vector.load %arg7[%c0_81, %c512_82] : memref<128x1152xbf16, #tpu.memory_space<vmem>>, vector<64x128xbf16>
    tpu.vector_store %arg7[%c0_81, %c512_82], %134 {strides = array<i32>} : memref<128x1152xbf16, #tpu.memory_space<vmem>>, vector<64x128xbf16>,
    %136 = vector.extract_strided_slice %120 {offsets = [8, 0], sizes = [64, 128], strides = [1, 1]} : vector<80x128xf32> to vector<64x128xf32>
    %137 = arith.truncf %136 : vector<64x128xf32> to vector<64x128xbf16>
    %c0_83 = arith.constant 0 : index
    %c640_84 = arith.constant 640 : index
    %138 = vector.load %arg7[%c0_83, %c640_84] : memref<128x1152xbf16, #tpu.memory_space<vmem>>, vector<64x128xbf16>
    tpu.vector_store %arg7[%c0_83, %c640_84], %137 {strides = array<i32>} : memref<128x1152xbf16, #tpu.memory_space<vmem>>, vector<64x128xbf16>,
    %139 = vector.extract_strided_slice %117 {offsets = [16, 0], sizes = [64, 128], strides = [1, 1]} : vector<80x128xf32> to vector<64x128xf32>
    %140 = arith.truncf %139 : vector<64x128xf32> to vector<64x128xbf16>
    %c0_85 = arith.constant 0 : index
    %c768_86 = arith.constant 768 : index
    %141 = vector.load %arg7[%c0_85, %c768_86] : memref<128x1152xbf16, #tpu.memory_space<vmem>>, vector<64x128xbf16>
    tpu.vector_store %arg7[%c0_85, %c768_86], %140 {strides = array<i32>} : memref<128x1152xbf16, #tpu.memory_space<vmem>>, vector<64x128xbf16>,
    %142 = vector.extract_strided_slice %114 {offsets = [16, 0], sizes = [64, 128], strides = [1, 1]} : vector<80x128xf32> to vector<64x128xf32>
    %143 = arith.truncf %142 : vector<64x128xf32> to vector<64x128xbf16>
    %c0_87 = arith.constant 0 : index
    %c896_88 = arith.constant 896 : index
    %144 = vector.load %arg7[%c0_87, %c896_88] : memref<128x1152xbf16, #tpu.memory_space<vmem>>, vector<64x128xbf16>
    tpu.vector_store %arg7[%c0_87, %c896_88], %143 {strides = array<i32>} : memref<128x1152xbf16, #tpu.memory_space<vmem>>, vector<64x128xbf16>,
    %145 = vector.extract_strided_slice %120 {offsets = [16, 0], sizes = [64, 128], strides = [1, 1]} : vector<80x128xf32> to vector<64x128xf32>
    %146 = arith.truncf %145 : vector<64x128xf32> to vector<64x128xbf16>
    %c0_89 = arith.constant 0 : index
    %c1024_90 = arith.constant 1024 : index
    %147 = vector.load %arg7[%c0_89, %c1024_90] : memref<128x1152xbf16, #tpu.memory_space<vmem>>, vector<64x128xbf16>
    tpu.vector_store %arg7[%c0_89, %c1024_90], %146 {strides = array<i32>} : memref<128x1152xbf16, #tpu.memory_space<vmem>>, vector<64x128xbf16>,
    %c80_91 = arith.constant 80 : index
    %c0_92 = arith.constant 0 : index
    %148 = vector.load %arg6[%c80_91, %c0_92] : memref<160x128xf32, #tpu.memory_space<vmem>>, vector<80x128xf32>
    %c1_i32_93 = arith.constant 1 : i32
    %149 = tpu.dynamic_rotate %148 by %c1_i32_93 dim 0 : vector<80x128xf32>, i32 -> vector<80x128xf32>
    %cst_94 = arith.constant 0.000000e+00 : f32
    %150 = vector.broadcast %cst_94 : f32 to vector<80x128xf32>
    %151 = arith.select %19, %150, %149 : vector<80x128xi1>, vector<80x128xf32>
    %c79_i32_95 = arith.constant 79 : i32
    %152 = tpu.dynamic_rotate %148 by %c79_i32_95 dim 0 : vector<80x128xf32>, i32 -> vector<80x128xf32>
    %cst_96 = arith.constant 0.000000e+00 : f32
    %153 = vector.broadcast %cst_96 : f32 to vector<80x128xf32>
    %154 = arith.select %21, %153, %152 : vector<80x128xi1>, vector<80x128xf32>
    %155 = vector.extract_strided_slice %151 {offsets = [0, 0], sizes = [64, 128], strides = [1, 1]} : vector<80x128xf32> to vector<64x128xf32>
    %156 = arith.truncf %155 : vector<64x128xf32> to vector<64x128xbf16>
    %c64_97 = arith.constant 64 : index
    %c0_98 = arith.constant 0 : index
    %157 = vector.load %arg7[%c64_97, %c0_98] : memref<128x1152xbf16, #tpu.memory_space<vmem>>, vector<64x128xbf16>
    tpu.vector_store %arg7[%c64_97, %c0_98], %156 {strides = array<i32>} : memref<128x1152xbf16, #tpu.memory_space<vmem>>, vector<64x128xbf16>,
    %158 = vector.extract_strided_slice %148 {offsets = [0, 0], sizes = [64, 128], strides = [1, 1]} : vector<80x128xf32> to vector<64x128xf32>
    %159 = arith.truncf %158 : vector<64x128xf32> to vector<64x128xbf16>
    %c64_99 = arith.constant 64 : index
    %c128_100 = arith.constant 128 : index
    %160 = vector.load %arg7[%c64_99, %c128_100] : memref<128x1152xbf16, #tpu.memory_space<vmem>>, vector<64x128xbf16>
    tpu.vector_store %arg7[%c64_99, %c128_100], %159 {strides = array<i32>} : memref<128x1152xbf16, #tpu.memory_space<vmem>>, vector<64x128xbf16>,
    %161 = vector.extract_strided_slice %154 {offsets = [0, 0], sizes = [64, 128], strides = [1, 1]} : vector<80x128xf32> to vector<64x128xf32>
    %162 = arith.truncf %161 : vector<64x128xf32> to vector<64x128xbf16>
    %c64_101 = arith.constant 64 : index
    %c256_102 = arith.constant 256 : index
    %163 = vector.load %arg7[%c64_101, %c256_102] : memref<128x1152xbf16, #tpu.memory_space<vmem>>, vector<64x128xbf16>
    tpu.vector_store %arg7[%c64_101, %c256_102], %162 {strides = array<i32>} : memref<128x1152xbf16, #tpu.memory_space<vmem>>, vector<64x128xbf16>,
    %164 = vector.extract_strided_slice %151 {offsets = [8, 0], sizes = [64, 128], strides = [1, 1]} : vector<80x128xf32> to vector<64x128xf32>
    %165 = arith.truncf %164 : vector<64x128xf32> to vector<64x128xbf16>
    %c64_103 = arith.constant 64 : index
    %c384_104 = arith.constant 384 : index
    %166 = vector.load %arg7[%c64_103, %c384_104] : memref<128x1152xbf16, #tpu.memory_space<vmem>>, vector<64x128xbf16>
    tpu.vector_store %arg7[%c64_103, %c384_104], %165 {strides = array<i32>} : memref<128x1152xbf16, #tpu.memory_space<vmem>>, vector<64x128xbf16>,
    %167 = vector.extract_strided_slice %148 {offsets = [8, 0], sizes = [64, 128], strides = [1, 1]} : vector<80x128xf32> to vector<64x128xf32>
    %168 = arith.truncf %167 : vector<64x128xf32> to vector<64x128xbf16>
    %c64_105 = arith.constant 64 : index
    %c512_106 = arith.constant 512 : index
    %169 = vector.load %arg7[%c64_105, %c512_106] : memref<128x1152xbf16, #tpu.memory_space<vmem>>, vector<64x128xbf16>
    tpu.vector_store %arg7[%c64_105, %c512_106], %168 {strides = array<i32>} : memref<128x1152xbf16, #tpu.memory_space<vmem>>, vector<64x128xbf16>,
    %170 = vector.extract_strided_slice %154 {offsets = [8, 0], sizes = [64, 128], strides = [1, 1]} : vector<80x128xf32> to vector<64x128xf32>
    %171 = arith.truncf %170 : vector<64x128xf32> to vector<64x128xbf16>
    %c64_107 = arith.constant 64 : index
    %c640_108 = arith.constant 640 : index
    %172 = vector.load %arg7[%c64_107, %c640_108] : memref<128x1152xbf16, #tpu.memory_space<vmem>>, vector<64x128xbf16>
    tpu.vector_store %arg7[%c64_107, %c640_108], %171 {strides = array<i32>} : memref<128x1152xbf16, #tpu.memory_space<vmem>>, vector<64x128xbf16>,
    %173 = vector.extract_strided_slice %151 {offsets = [16, 0], sizes = [64, 128], strides = [1, 1]} : vector<80x128xf32> to vector<64x128xf32>
    %174 = arith.truncf %173 : vector<64x128xf32> to vector<64x128xbf16>
    %c64_109 = arith.constant 64 : index
    %c768_110 = arith.constant 768 : index
    %175 = vector.load %arg7[%c64_109, %c768_110] : memref<128x1152xbf16, #tpu.memory_space<vmem>>, vector<64x128xbf16>
    tpu.vector_store %arg7[%c64_109, %c768_110], %174 {strides = array<i32>} : memref<128x1152xbf16, #tpu.memory_space<vmem>>, vector<64x128xbf16>,
    %176 = vector.extract_strided_slice %148 {offsets = [16, 0], sizes = [64, 128], strides = [1, 1]} : vector<80x128xf32> to vector<64x128xf32>
    %177 = arith.truncf %176 : vector<64x128xf32> to vector<64x128xbf16>
    %c64_111 = arith.constant 64 : index
    %c896_112 = arith.constant 896 : index
    %178 = vector.load %arg7[%c64_111, %c896_112] : memref<128x1152xbf16, #tpu.memory_space<vmem>>, vector<64x128xbf16>
    tpu.vector_store %arg7[%c64_111, %c896_112], %177 {strides = array<i32>} : memref<128x1152xbf16, #tpu.memory_space<vmem>>, vector<64x128xbf16>,
    %179 = vector.extract_strided_slice %154 {offsets = [16, 0], sizes = [64, 128], strides = [1, 1]} : vector<80x128xf32> to vector<64x128xf32>
    %180 = arith.truncf %179 : vector<64x128xf32> to vector<64x128xbf16>
    %c64_113 = arith.constant 64 : index
    %c1024_114 = arith.constant 1024 : index
    %181 = vector.load %arg7[%c64_113, %c1024_114] : memref<128x1152xbf16, #tpu.memory_space<vmem>>, vector<64x128xbf16>
    tpu.vector_store %arg7[%c64_113, %c1024_114], %180 {strides = array<i32>} : memref<128x1152xbf16, #tpu.memory_space<vmem>>, vector<64x128xbf16>,
    %c0_115 = arith.constant 0 : index
    %c0_116 = arith.constant 0 : index
    %182 = vector.load %arg7[%c0_115, %c0_116] : memref<128x1152xbf16, #tpu.memory_space<vmem>>, vector<128x1152xbf16>
    %c1_117 = arith.constant 1 : index
    %c0_118 = arith.constant 0 : index
    %c0_119 = arith.constant 0 : index
    %183 = vector.load %arg2[%c1_117, %c0_118, %c0_119] : memref<4x1152x128xbf16, #tpu.memory_space<vmem>>, vector<1x1152x128xbf16>
    %184 = vector.shape_cast %183 : vector<1x1152x128xbf16> to vector<1152x128xbf16>
    %cst_120 = arith.constant dense<0.000000e+00> : vector<128x128xf32>
    %185 = tpu.matmul %182, %184, %cst_120 {dimension_numbers = #tpu.dot_dimension_numbers<[1], [0], [0], [1], [0, 0, 1, 1], [], []>} : vector<128x1152xbf16>, vector<1152x128xbf16>, vector<128x128xf32> -> vector<128x128xf32>
    %c1_121 = arith.constant 1 : index
    %c0_122 = arith.constant 0 : index
    %c0_123 = arith.constant 0 : index
    %186 = vector.load %arg3[%c1_121, %c0_122, %c0_123] : memref<4x1x128xf32, #tpu.memory_space<vmem>>, vector<1x1x128xf32>
    %187 = vector.shape_cast %186 : vector<1x1x128xf32> to vector<1x128xf32>
    %188 = vector.broadcast %187 : vector<1x128xf32> to vector<128x128xf32>
    %189 = arith.addf %185, %188 : vector<128x128xf32>
    %cst_124 = arith.constant 0.000000e+00 : f32
    %190 = vector.broadcast %cst_124 : f32 to vector<128x128xf32>
    %191 = arith.maximumf %189, %190 : vector<128x128xf32>
    %192 = vector.extract_strided_slice %191 {offsets = [0, 0], sizes = [64, 128], strides = [1, 1]} : vector<128x128xf32> to vector<64x128xf32>
    %c8_125 = arith.constant 8 : index
    %c0_126 = arith.constant 0 : index
    %193 = vector.load %arg6[%c8_125, %c0_126] : memref<160x128xf32, #tpu.memory_space<vmem>>, vector<64x128xf32>
    tpu.vector_store %arg6[%c8_125, %c0_126], %192 {strides = array<i32>} : memref<160x128xf32, #tpu.memory_space<vmem>>, vector<64x128xf32>,
    %194 = vector.extract_strided_slice %191 {offsets = [64, 0], sizes = [64, 128], strides = [1, 1]} : vector<128x128xf32> to vector<64x128xf32>
    %c88_127 = arith.constant 88 : index
    %c0_128 = arith.constant 0 : index
    %195 = vector.load %arg6[%c88_127, %c0_128] : memref<160x128xf32, #tpu.memory_space<vmem>>, vector<64x128xf32>
    tpu.vector_store %arg6[%c88_127, %c0_128], %194 {strides = array<i32>} : memref<160x128xf32, #tpu.memory_space<vmem>>, vector<64x128xf32>,
    %c0_129 = arith.constant 0 : index
    %c0_130 = arith.constant 0 : index
    %196 = vector.load %arg6[%c0_129, %c0_130] : memref<160x128xf32, #tpu.memory_space<vmem>>, vector<80x128xf32>
    %c1_i32_131 = arith.constant 1 : i32
    %197 = tpu.dynamic_rotate %196 by %c1_i32_131 dim 0 : vector<80x128xf32>, i32 -> vector<80x128xf32>
    %cst_132 = arith.constant 0.000000e+00 : f32
    %198 = vector.broadcast %cst_132 : f32 to vector<80x128xf32>
    %199 = arith.select %19, %198, %197 : vector<80x128xi1>, vector<80x128xf32>
    %c79_i32_133 = arith.constant 79 : i32
    %200 = tpu.dynamic_rotate %196 by %c79_i32_133 dim 0 : vector<80x128xf32>, i32 -> vector<80x128xf32>
    %cst_134 = arith.constant 0.000000e+00 : f32
    %201 = vector.broadcast %cst_134 : f32 to vector<80x128xf32>
    %202 = arith.select %21, %201, %200 : vector<80x128xi1>, vector<80x128xf32>
    %203 = vector.extract_strided_slice %199 {offsets = [0, 0], sizes = [64, 128], strides = [1, 1]} : vector<80x128xf32> to vector<64x128xf32>
    %204 = arith.truncf %203 : vector<64x128xf32> to vector<64x128xbf16>
    %c0_135 = arith.constant 0 : index
    %c0_136 = arith.constant 0 : index
    %205 = vector.load %arg7[%c0_135, %c0_136] : memref<128x1152xbf16, #tpu.memory_space<vmem>>, vector<64x128xbf16>
    tpu.vector_store %arg7[%c0_135, %c0_136], %204 {strides = array<i32>} : memref<128x1152xbf16, #tpu.memory_space<vmem>>, vector<64x128xbf16>,
    %206 = vector.extract_strided_slice %196 {offsets = [0, 0], sizes = [64, 128], strides = [1, 1]} : vector<80x128xf32> to vector<64x128xf32>
    %207 = arith.truncf %206 : vector<64x128xf32> to vector<64x128xbf16>
    %c0_137 = arith.constant 0 : index
    %c128_138 = arith.constant 128 : index
    %208 = vector.load %arg7[%c0_137, %c128_138] : memref<128x1152xbf16, #tpu.memory_space<vmem>>, vector<64x128xbf16>
    tpu.vector_store %arg7[%c0_137, %c128_138], %207 {strides = array<i32>} : memref<128x1152xbf16, #tpu.memory_space<vmem>>, vector<64x128xbf16>,
    %209 = vector.extract_strided_slice %202 {offsets = [0, 0], sizes = [64, 128], strides = [1, 1]} : vector<80x128xf32> to vector<64x128xf32>
    %210 = arith.truncf %209 : vector<64x128xf32> to vector<64x128xbf16>
    %c0_139 = arith.constant 0 : index
    %c256_140 = arith.constant 256 : index
    %211 = vector.load %arg7[%c0_139, %c256_140] : memref<128x1152xbf16, #tpu.memory_space<vmem>>, vector<64x128xbf16>
    tpu.vector_store %arg7[%c0_139, %c256_140], %210 {strides = array<i32>} : memref<128x1152xbf16, #tpu.memory_space<vmem>>, vector<64x128xbf16>,
    %212 = vector.extract_strided_slice %199 {offsets = [8, 0], sizes = [64, 128], strides = [1, 1]} : vector<80x128xf32> to vector<64x128xf32>
    %213 = arith.truncf %212 : vector<64x128xf32> to vector<64x128xbf16>
    %c0_141 = arith.constant 0 : index
    %c384_142 = arith.constant 384 : index
    %214 = vector.load %arg7[%c0_141, %c384_142] : memref<128x1152xbf16, #tpu.memory_space<vmem>>, vector<64x128xbf16>
    tpu.vector_store %arg7[%c0_141, %c384_142], %213 {strides = array<i32>} : memref<128x1152xbf16, #tpu.memory_space<vmem>>, vector<64x128xbf16>,
    %215 = vector.extract_strided_slice %196 {offsets = [8, 0], sizes = [64, 128], strides = [1, 1]} : vector<80x128xf32> to vector<64x128xf32>
    %216 = arith.truncf %215 : vector<64x128xf32> to vector<64x128xbf16>
    %c0_143 = arith.constant 0 : index
    %c512_144 = arith.constant 512 : index
    %217 = vector.load %arg7[%c0_143, %c512_144] : memref<128x1152xbf16, #tpu.memory_space<vmem>>, vector<64x128xbf16>
    tpu.vector_store %arg7[%c0_143, %c512_144], %216 {strides = array<i32>} : memref<128x1152xbf16, #tpu.memory_space<vmem>>, vector<64x128xbf16>,
    %218 = vector.extract_strided_slice %202 {offsets = [8, 0], sizes = [64, 128], strides = [1, 1]} : vector<80x128xf32> to vector<64x128xf32>
    %219 = arith.truncf %218 : vector<64x128xf32> to vector<64x128xbf16>
    %c0_145 = arith.constant 0 : index
    %c640_146 = arith.constant 640 : index
    %220 = vector.load %arg7[%c0_145, %c640_146] : memref<128x1152xbf16, #tpu.memory_space<vmem>>, vector<64x128xbf16>
    tpu.vector_store %arg7[%c0_145, %c640_146], %219 {strides = array<i32>} : memref<128x1152xbf16, #tpu.memory_space<vmem>>, vector<64x128xbf16>,
    %221 = vector.extract_strided_slice %199 {offsets = [16, 0], sizes = [64, 128], strides = [1, 1]} : vector<80x128xf32> to vector<64x128xf32>
    %222 = arith.truncf %221 : vector<64x128xf32> to vector<64x128xbf16>
    %c0_147 = arith.constant 0 : index
    %c768_148 = arith.constant 768 : index
    %223 = vector.load %arg7[%c0_147, %c768_148] : memref<128x1152xbf16, #tpu.memory_space<vmem>>, vector<64x128xbf16>
    tpu.vector_store %arg7[%c0_147, %c768_148], %222 {strides = array<i32>} : memref<128x1152xbf16, #tpu.memory_space<vmem>>, vector<64x128xbf16>,
    %224 = vector.extract_strided_slice %196 {offsets = [16, 0], sizes = [64, 128], strides = [1, 1]} : vector<80x128xf32> to vector<64x128xf32>
    %225 = arith.truncf %224 : vector<64x128xf32> to vector<64x128xbf16>
    %c0_149 = arith.constant 0 : index
    %c896_150 = arith.constant 896 : index
    %226 = vector.load %arg7[%c0_149, %c896_150] : memref<128x1152xbf16, #tpu.memory_space<vmem>>, vector<64x128xbf16>
    tpu.vector_store %arg7[%c0_149, %c896_150], %225 {strides = array<i32>} : memref<128x1152xbf16, #tpu.memory_space<vmem>>, vector<64x128xbf16>,
    %227 = vector.extract_strided_slice %202 {offsets = [16, 0], sizes = [64, 128], strides = [1, 1]} : vector<80x128xf32> to vector<64x128xf32>
    %228 = arith.truncf %227 : vector<64x128xf32> to vector<64x128xbf16>
    %c0_151 = arith.constant 0 : index
    %c1024_152 = arith.constant 1024 : index
    %229 = vector.load %arg7[%c0_151, %c1024_152] : memref<128x1152xbf16, #tpu.memory_space<vmem>>, vector<64x128xbf16>
    tpu.vector_store %arg7[%c0_151, %c1024_152], %228 {strides = array<i32>} : memref<128x1152xbf16, #tpu.memory_space<vmem>>, vector<64x128xbf16>,
    %c80_153 = arith.constant 80 : index
    %c0_154 = arith.constant 0 : index
    %230 = vector.load %arg6[%c80_153, %c0_154] : memref<160x128xf32, #tpu.memory_space<vmem>>, vector<80x128xf32>
    %c1_i32_155 = arith.constant 1 : i32
    %231 = tpu.dynamic_rotate %230 by %c1_i32_155 dim 0 : vector<80x128xf32>, i32 -> vector<80x128xf32>
    %cst_156 = arith.constant 0.000000e+00 : f32
    %232 = vector.broadcast %cst_156 : f32 to vector<80x128xf32>
    %233 = arith.select %19, %232, %231 : vector<80x128xi1>, vector<80x128xf32>
    %c79_i32_157 = arith.constant 79 : i32
    %234 = tpu.dynamic_rotate %230 by %c79_i32_157 dim 0 : vector<80x128xf32>, i32 -> vector<80x128xf32>
    %cst_158 = arith.constant 0.000000e+00 : f32
    %235 = vector.broadcast %cst_158 : f32 to vector<80x128xf32>
    %236 = arith.select %21, %235, %234 : vector<80x128xi1>, vector<80x128xf32>
    %237 = vector.extract_strided_slice %233 {offsets = [0, 0], sizes = [64, 128], strides = [1, 1]} : vector<80x128xf32> to vector<64x128xf32>
    %238 = arith.truncf %237 : vector<64x128xf32> to vector<64x128xbf16>
    %c64_159 = arith.constant 64 : index
    %c0_160 = arith.constant 0 : index
    %239 = vector.load %arg7[%c64_159, %c0_160] : memref<128x1152xbf16, #tpu.memory_space<vmem>>, vector<64x128xbf16>
    tpu.vector_store %arg7[%c64_159, %c0_160], %238 {strides = array<i32>} : memref<128x1152xbf16, #tpu.memory_space<vmem>>, vector<64x128xbf16>,
    %240 = vector.extract_strided_slice %230 {offsets = [0, 0], sizes = [64, 128], strides = [1, 1]} : vector<80x128xf32> to vector<64x128xf32>
    %241 = arith.truncf %240 : vector<64x128xf32> to vector<64x128xbf16>
    %c64_161 = arith.constant 64 : index
    %c128_162 = arith.constant 128 : index
    %242 = vector.load %arg7[%c64_161, %c128_162] : memref<128x1152xbf16, #tpu.memory_space<vmem>>, vector<64x128xbf16>
    tpu.vector_store %arg7[%c64_161, %c128_162], %241 {strides = array<i32>} : memref<128x1152xbf16, #tpu.memory_space<vmem>>, vector<64x128xbf16>,
    %243 = vector.extract_strided_slice %236 {offsets = [0, 0], sizes = [64, 128], strides = [1, 1]} : vector<80x128xf32> to vector<64x128xf32>
    %244 = arith.truncf %243 : vector<64x128xf32> to vector<64x128xbf16>
    %c64_163 = arith.constant 64 : index
    %c256_164 = arith.constant 256 : index
    %245 = vector.load %arg7[%c64_163, %c256_164] : memref<128x1152xbf16, #tpu.memory_space<vmem>>, vector<64x128xbf16>
    tpu.vector_store %arg7[%c64_163, %c256_164], %244 {strides = array<i32>} : memref<128x1152xbf16, #tpu.memory_space<vmem>>, vector<64x128xbf16>,
    %246 = vector.extract_strided_slice %233 {offsets = [8, 0], sizes = [64, 128], strides = [1, 1]} : vector<80x128xf32> to vector<64x128xf32>
    %247 = arith.truncf %246 : vector<64x128xf32> to vector<64x128xbf16>
    %c64_165 = arith.constant 64 : index
    %c384_166 = arith.constant 384 : index
    %248 = vector.load %arg7[%c64_165, %c384_166] : memref<128x1152xbf16, #tpu.memory_space<vmem>>, vector<64x128xbf16>
    tpu.vector_store %arg7[%c64_165, %c384_166], %247 {strides = array<i32>} : memref<128x1152xbf16, #tpu.memory_space<vmem>>, vector<64x128xbf16>,
    %249 = vector.extract_strided_slice %230 {offsets = [8, 0], sizes = [64, 128], strides = [1, 1]} : vector<80x128xf32> to vector<64x128xf32>
    %250 = arith.truncf %249 : vector<64x128xf32> to vector<64x128xbf16>
    %c64_167 = arith.constant 64 : index
    %c512_168 = arith.constant 512 : index
    %251 = vector.load %arg7[%c64_167, %c512_168] : memref<128x1152xbf16, #tpu.memory_space<vmem>>, vector<64x128xbf16>
    tpu.vector_store %arg7[%c64_167, %c512_168], %250 {strides = array<i32>} : memref<128x1152xbf16, #tpu.memory_space<vmem>>, vector<64x128xbf16>,
    %252 = vector.extract_strided_slice %236 {offsets = [8, 0], sizes = [64, 128], strides = [1, 1]} : vector<80x128xf32> to vector<64x128xf32>
    %253 = arith.truncf %252 : vector<64x128xf32> to vector<64x128xbf16>
    %c64_169 = arith.constant 64 : index
    %c640_170 = arith.constant 640 : index
    %254 = vector.load %arg7[%c64_169, %c640_170] : memref<128x1152xbf16, #tpu.memory_space<vmem>>, vector<64x128xbf16>
    tpu.vector_store %arg7[%c64_169, %c640_170], %253 {strides = array<i32>} : memref<128x1152xbf16, #tpu.memory_space<vmem>>, vector<64x128xbf16>,
    %255 = vector.extract_strided_slice %233 {offsets = [16, 0], sizes = [64, 128], strides = [1, 1]} : vector<80x128xf32> to vector<64x128xf32>
    %256 = arith.truncf %255 : vector<64x128xf32> to vector<64x128xbf16>
    %c64_171 = arith.constant 64 : index
    %c768_172 = arith.constant 768 : index
    %257 = vector.load %arg7[%c64_171, %c768_172] : memref<128x1152xbf16, #tpu.memory_space<vmem>>, vector<64x128xbf16>
    tpu.vector_store %arg7[%c64_171, %c768_172], %256 {strides = array<i32>} : memref<128x1152xbf16, #tpu.memory_space<vmem>>, vector<64x128xbf16>,
    %258 = vector.extract_strided_slice %230 {offsets = [16, 0], sizes = [64, 128], strides = [1, 1]} : vector<80x128xf32> to vector<64x128xf32>
    %259 = arith.truncf %258 : vector<64x128xf32> to vector<64x128xbf16>
    %c64_173 = arith.constant 64 : index
    %c896_174 = arith.constant 896 : index
    %260 = vector.load %arg7[%c64_173, %c896_174] : memref<128x1152xbf16, #tpu.memory_space<vmem>>, vector<64x128xbf16>
    tpu.vector_store %arg7[%c64_173, %c896_174], %259 {strides = array<i32>} : memref<128x1152xbf16, #tpu.memory_space<vmem>>, vector<64x128xbf16>,
    %261 = vector.extract_strided_slice %236 {offsets = [16, 0], sizes = [64, 128], strides = [1, 1]} : vector<80x128xf32> to vector<64x128xf32>
    %262 = arith.truncf %261 : vector<64x128xf32> to vector<64x128xbf16>
    %c64_175 = arith.constant 64 : index
    %c1024_176 = arith.constant 1024 : index
    %263 = vector.load %arg7[%c64_175, %c1024_176] : memref<128x1152xbf16, #tpu.memory_space<vmem>>, vector<64x128xbf16>
    tpu.vector_store %arg7[%c64_175, %c1024_176], %262 {strides = array<i32>} : memref<128x1152xbf16, #tpu.memory_space<vmem>>, vector<64x128xbf16>,
    %c0_177 = arith.constant 0 : index
    %c0_178 = arith.constant 0 : index
    %264 = vector.load %arg7[%c0_177, %c0_178] : memref<128x1152xbf16, #tpu.memory_space<vmem>>, vector<128x1152xbf16>
    %c2 = arith.constant 2 : index
    %c0_179 = arith.constant 0 : index
    %c0_180 = arith.constant 0 : index
    %265 = vector.load %arg2[%c2, %c0_179, %c0_180] : memref<4x1152x128xbf16, #tpu.memory_space<vmem>>, vector<1x1152x128xbf16>
    %266 = vector.shape_cast %265 : vector<1x1152x128xbf16> to vector<1152x128xbf16>
    %cst_181 = arith.constant dense<0.000000e+00> : vector<128x128xf32>
    %267 = tpu.matmul %264, %266, %cst_181 {dimension_numbers = #tpu.dot_dimension_numbers<[1], [0], [0], [1], [0, 0, 1, 1], [], []>} : vector<128x1152xbf16>, vector<1152x128xbf16>, vector<128x128xf32> -> vector<128x128xf32>
    %c2_182 = arith.constant 2 : index
    %c0_183 = arith.constant 0 : index
    %c0_184 = arith.constant 0 : index
    %268 = vector.load %arg3[%c2_182, %c0_183, %c0_184] : memref<4x1x128xf32, #tpu.memory_space<vmem>>, vector<1x1x128xf32>
    %269 = vector.shape_cast %268 : vector<1x1x128xf32> to vector<1x128xf32>
    %270 = vector.broadcast %269 : vector<1x128xf32> to vector<128x128xf32>
    %271 = arith.addf %267, %270 : vector<128x128xf32>
    %cst_185 = arith.constant 0.000000e+00 : f32
    %272 = vector.broadcast %cst_185 : f32 to vector<128x128xf32>
    %273 = arith.maximumf %271, %272 : vector<128x128xf32>
    %274 = vector.extract_strided_slice %273 {offsets = [0, 0], sizes = [64, 128], strides = [1, 1]} : vector<128x128xf32> to vector<64x128xf32>
    %c8_186 = arith.constant 8 : index
    %c0_187 = arith.constant 0 : index
    %275 = vector.load %arg6[%c8_186, %c0_187] : memref<160x128xf32, #tpu.memory_space<vmem>>, vector<64x128xf32>
    tpu.vector_store %arg6[%c8_186, %c0_187], %274 {strides = array<i32>} : memref<160x128xf32, #tpu.memory_space<vmem>>, vector<64x128xf32>,
    %276 = vector.extract_strided_slice %273 {offsets = [64, 0], sizes = [64, 128], strides = [1, 1]} : vector<128x128xf32> to vector<64x128xf32>
    %c88_188 = arith.constant 88 : index
    %c0_189 = arith.constant 0 : index
    %277 = vector.load %arg6[%c88_188, %c0_189] : memref<160x128xf32, #tpu.memory_space<vmem>>, vector<64x128xf32>
    tpu.vector_store %arg6[%c88_188, %c0_189], %276 {strides = array<i32>} : memref<160x128xf32, #tpu.memory_space<vmem>>, vector<64x128xf32>,
    %c0_190 = arith.constant 0 : index
    %c0_191 = arith.constant 0 : index
    %278 = vector.load %arg6[%c0_190, %c0_191] : memref<160x128xf32, #tpu.memory_space<vmem>>, vector<80x128xf32>
    %c1_i32_192 = arith.constant 1 : i32
    %279 = tpu.dynamic_rotate %278 by %c1_i32_192 dim 0 : vector<80x128xf32>, i32 -> vector<80x128xf32>
    %cst_193 = arith.constant 0.000000e+00 : f32
    %280 = vector.broadcast %cst_193 : f32 to vector<80x128xf32>
    %281 = arith.select %19, %280, %279 : vector<80x128xi1>, vector<80x128xf32>
    %c79_i32_194 = arith.constant 79 : i32
    %282 = tpu.dynamic_rotate %278 by %c79_i32_194 dim 0 : vector<80x128xf32>, i32 -> vector<80x128xf32>
    %cst_195 = arith.constant 0.000000e+00 : f32
    %283 = vector.broadcast %cst_195 : f32 to vector<80x128xf32>
    %284 = arith.select %21, %283, %282 : vector<80x128xi1>, vector<80x128xf32>
    %285 = vector.extract_strided_slice %281 {offsets = [0, 0], sizes = [64, 128], strides = [1, 1]} : vector<80x128xf32> to vector<64x128xf32>
    %286 = arith.truncf %285 : vector<64x128xf32> to vector<64x128xbf16>
    %c0_196 = arith.constant 0 : index
    %c0_197 = arith.constant 0 : index
    %287 = vector.load %arg7[%c0_196, %c0_197] : memref<128x1152xbf16, #tpu.memory_space<vmem>>, vector<64x128xbf16>
    tpu.vector_store %arg7[%c0_196, %c0_197], %286 {strides = array<i32>} : memref<128x1152xbf16, #tpu.memory_space<vmem>>, vector<64x128xbf16>,
    %288 = vector.extract_strided_slice %278 {offsets = [0, 0], sizes = [64, 128], strides = [1, 1]} : vector<80x128xf32> to vector<64x128xf32>
    %289 = arith.truncf %288 : vector<64x128xf32> to vector<64x128xbf16>
    %c0_198 = arith.constant 0 : index
    %c128_199 = arith.constant 128 : index
    %290 = vector.load %arg7[%c0_198, %c128_199] : memref<128x1152xbf16, #tpu.memory_space<vmem>>, vector<64x128xbf16>
    tpu.vector_store %arg7[%c0_198, %c128_199], %289 {strides = array<i32>} : memref<128x1152xbf16, #tpu.memory_space<vmem>>, vector<64x128xbf16>,
    %291 = vector.extract_strided_slice %284 {offsets = [0, 0], sizes = [64, 128], strides = [1, 1]} : vector<80x128xf32> to vector<64x128xf32>
    %292 = arith.truncf %291 : vector<64x128xf32> to vector<64x128xbf16>
    %c0_200 = arith.constant 0 : index
    %c256_201 = arith.constant 256 : index
    %293 = vector.load %arg7[%c0_200, %c256_201] : memref<128x1152xbf16, #tpu.memory_space<vmem>>, vector<64x128xbf16>
    tpu.vector_store %arg7[%c0_200, %c256_201], %292 {strides = array<i32>} : memref<128x1152xbf16, #tpu.memory_space<vmem>>, vector<64x128xbf16>,
    %294 = vector.extract_strided_slice %281 {offsets = [8, 0], sizes = [64, 128], strides = [1, 1]} : vector<80x128xf32> to vector<64x128xf32>
    %295 = arith.truncf %294 : vector<64x128xf32> to vector<64x128xbf16>
    %c0_202 = arith.constant 0 : index
    %c384_203 = arith.constant 384 : index
    %296 = vector.load %arg7[%c0_202, %c384_203] : memref<128x1152xbf16, #tpu.memory_space<vmem>>, vector<64x128xbf16>
    tpu.vector_store %arg7[%c0_202, %c384_203], %295 {strides = array<i32>} : memref<128x1152xbf16, #tpu.memory_space<vmem>>, vector<64x128xbf16>,
    %297 = vector.extract_strided_slice %278 {offsets = [8, 0], sizes = [64, 128], strides = [1, 1]} : vector<80x128xf32> to vector<64x128xf32>
    %298 = arith.truncf %297 : vector<64x128xf32> to vector<64x128xbf16>
    %c0_204 = arith.constant 0 : index
    %c512_205 = arith.constant 512 : index
    %299 = vector.load %arg7[%c0_204, %c512_205] : memref<128x1152xbf16, #tpu.memory_space<vmem>>, vector<64x128xbf16>
    tpu.vector_store %arg7[%c0_204, %c512_205], %298 {strides = array<i32>} : memref<128x1152xbf16, #tpu.memory_space<vmem>>, vector<64x128xbf16>,
    %300 = vector.extract_strided_slice %284 {offsets = [8, 0], sizes = [64, 128], strides = [1, 1]} : vector<80x128xf32> to vector<64x128xf32>
    %301 = arith.truncf %300 : vector<64x128xf32> to vector<64x128xbf16>
    %c0_206 = arith.constant 0 : index
    %c640_207 = arith.constant 640 : index
    %302 = vector.load %arg7[%c0_206, %c640_207] : memref<128x1152xbf16, #tpu.memory_space<vmem>>, vector<64x128xbf16>
    tpu.vector_store %arg7[%c0_206, %c640_207], %301 {strides = array<i32>} : memref<128x1152xbf16, #tpu.memory_space<vmem>>, vector<64x128xbf16>,
    %303 = vector.extract_strided_slice %281 {offsets = [16, 0], sizes = [64, 128], strides = [1, 1]} : vector<80x128xf32> to vector<64x128xf32>
    %304 = arith.truncf %303 : vector<64x128xf32> to vector<64x128xbf16>
    %c0_208 = arith.constant 0 : index
    %c768_209 = arith.constant 768 : index
    %305 = vector.load %arg7[%c0_208, %c768_209] : memref<128x1152xbf16, #tpu.memory_space<vmem>>, vector<64x128xbf16>
    tpu.vector_store %arg7[%c0_208, %c768_209], %304 {strides = array<i32>} : memref<128x1152xbf16, #tpu.memory_space<vmem>>, vector<64x128xbf16>,
    %306 = vector.extract_strided_slice %278 {offsets = [16, 0], sizes = [64, 128], strides = [1, 1]} : vector<80x128xf32> to vector<64x128xf32>
    %307 = arith.truncf %306 : vector<64x128xf32> to vector<64x128xbf16>
    %c0_210 = arith.constant 0 : index
    %c896_211 = arith.constant 896 : index
    %308 = vector.load %arg7[%c0_210, %c896_211] : memref<128x1152xbf16, #tpu.memory_space<vmem>>, vector<64x128xbf16>
    tpu.vector_store %arg7[%c0_210, %c896_211], %307 {strides = array<i32>} : memref<128x1152xbf16, #tpu.memory_space<vmem>>, vector<64x128xbf16>,
    %309 = vector.extract_strided_slice %284 {offsets = [16, 0], sizes = [64, 128], strides = [1, 1]} : vector<80x128xf32> to vector<64x128xf32>
    %310 = arith.truncf %309 : vector<64x128xf32> to vector<64x128xbf16>
    %c0_212 = arith.constant 0 : index
    %c1024_213 = arith.constant 1024 : index
    %311 = vector.load %arg7[%c0_212, %c1024_213] : memref<128x1152xbf16, #tpu.memory_space<vmem>>, vector<64x128xbf16>
    tpu.vector_store %arg7[%c0_212, %c1024_213], %310 {strides = array<i32>} : memref<128x1152xbf16, #tpu.memory_space<vmem>>, vector<64x128xbf16>,
    %c80_214 = arith.constant 80 : index
    %c0_215 = arith.constant 0 : index
    %312 = vector.load %arg6[%c80_214, %c0_215] : memref<160x128xf32, #tpu.memory_space<vmem>>, vector<80x128xf32>
    %c1_i32_216 = arith.constant 1 : i32
    %313 = tpu.dynamic_rotate %312 by %c1_i32_216 dim 0 : vector<80x128xf32>, i32 -> vector<80x128xf32>
    %cst_217 = arith.constant 0.000000e+00 : f32
    %314 = vector.broadcast %cst_217 : f32 to vector<80x128xf32>
    %315 = arith.select %19, %314, %313 : vector<80x128xi1>, vector<80x128xf32>
    %c79_i32_218 = arith.constant 79 : i32
    %316 = tpu.dynamic_rotate %312 by %c79_i32_218 dim 0 : vector<80x128xf32>, i32 -> vector<80x128xf32>
    %cst_219 = arith.constant 0.000000e+00 : f32
    %317 = vector.broadcast %cst_219 : f32 to vector<80x128xf32>
    %318 = arith.select %21, %317, %316 : vector<80x128xi1>, vector<80x128xf32>
    %319 = vector.extract_strided_slice %315 {offsets = [0, 0], sizes = [64, 128], strides = [1, 1]} : vector<80x128xf32> to vector<64x128xf32>
    %320 = arith.truncf %319 : vector<64x128xf32> to vector<64x128xbf16>
    %c64_220 = arith.constant 64 : index
    %c0_221 = arith.constant 0 : index
    %321 = vector.load %arg7[%c64_220, %c0_221] : memref<128x1152xbf16, #tpu.memory_space<vmem>>, vector<64x128xbf16>
    tpu.vector_store %arg7[%c64_220, %c0_221], %320 {strides = array<i32>} : memref<128x1152xbf16, #tpu.memory_space<vmem>>, vector<64x128xbf16>,
    %322 = vector.extract_strided_slice %312 {offsets = [0, 0], sizes = [64, 128], strides = [1, 1]} : vector<80x128xf32> to vector<64x128xf32>
    %323 = arith.truncf %322 : vector<64x128xf32> to vector<64x128xbf16>
    %c64_222 = arith.constant 64 : index
    %c128_223 = arith.constant 128 : index
    %324 = vector.load %arg7[%c64_222, %c128_223] : memref<128x1152xbf16, #tpu.memory_space<vmem>>, vector<64x128xbf16>
    tpu.vector_store %arg7[%c64_222, %c128_223], %323 {strides = array<i32>} : memref<128x1152xbf16, #tpu.memory_space<vmem>>, vector<64x128xbf16>,
    %325 = vector.extract_strided_slice %318 {offsets = [0, 0], sizes = [64, 128], strides = [1, 1]} : vector<80x128xf32> to vector<64x128xf32>
    %326 = arith.truncf %325 : vector<64x128xf32> to vector<64x128xbf16>
    %c64_224 = arith.constant 64 : index
    %c256_225 = arith.constant 256 : index
    %327 = vector.load %arg7[%c64_224, %c256_225] : memref<128x1152xbf16, #tpu.memory_space<vmem>>, vector<64x128xbf16>
    tpu.vector_store %arg7[%c64_224, %c256_225], %326 {strides = array<i32>} : memref<128x1152xbf16, #tpu.memory_space<vmem>>, vector<64x128xbf16>,
    %328 = vector.extract_strided_slice %315 {offsets = [8, 0], sizes = [64, 128], strides = [1, 1]} : vector<80x128xf32> to vector<64x128xf32>
    %329 = arith.truncf %328 : vector<64x128xf32> to vector<64x128xbf16>
    %c64_226 = arith.constant 64 : index
    %c384_227 = arith.constant 384 : index
    %330 = vector.load %arg7[%c64_226, %c384_227] : memref<128x1152xbf16, #tpu.memory_space<vmem>>, vector<64x128xbf16>
    tpu.vector_store %arg7[%c64_226, %c384_227], %329 {strides = array<i32>} : memref<128x1152xbf16, #tpu.memory_space<vmem>>, vector<64x128xbf16>,
    %331 = vector.extract_strided_slice %312 {offsets = [8, 0], sizes = [64, 128], strides = [1, 1]} : vector<80x128xf32> to vector<64x128xf32>
    %332 = arith.truncf %331 : vector<64x128xf32> to vector<64x128xbf16>
    %c64_228 = arith.constant 64 : index
    %c512_229 = arith.constant 512 : index
    %333 = vector.load %arg7[%c64_228, %c512_229] : memref<128x1152xbf16, #tpu.memory_space<vmem>>, vector<64x128xbf16>
    tpu.vector_store %arg7[%c64_228, %c512_229], %332 {strides = array<i32>} : memref<128x1152xbf16, #tpu.memory_space<vmem>>, vector<64x128xbf16>,
    %334 = vector.extract_strided_slice %318 {offsets = [8, 0], sizes = [64, 128], strides = [1, 1]} : vector<80x128xf32> to vector<64x128xf32>
    %335 = arith.truncf %334 : vector<64x128xf32> to vector<64x128xbf16>
    %c64_230 = arith.constant 64 : index
    %c640_231 = arith.constant 640 : index
    %336 = vector.load %arg7[%c64_230, %c640_231] : memref<128x1152xbf16, #tpu.memory_space<vmem>>, vector<64x128xbf16>
    tpu.vector_store %arg7[%c64_230, %c640_231], %335 {strides = array<i32>} : memref<128x1152xbf16, #tpu.memory_space<vmem>>, vector<64x128xbf16>,
    %337 = vector.extract_strided_slice %315 {offsets = [16, 0], sizes = [64, 128], strides = [1, 1]} : vector<80x128xf32> to vector<64x128xf32>
    %338 = arith.truncf %337 : vector<64x128xf32> to vector<64x128xbf16>
    %c64_232 = arith.constant 64 : index
    %c768_233 = arith.constant 768 : index
    %339 = vector.load %arg7[%c64_232, %c768_233] : memref<128x1152xbf16, #tpu.memory_space<vmem>>, vector<64x128xbf16>
    tpu.vector_store %arg7[%c64_232, %c768_233], %338 {strides = array<i32>} : memref<128x1152xbf16, #tpu.memory_space<vmem>>, vector<64x128xbf16>,
    %340 = vector.extract_strided_slice %312 {offsets = [16, 0], sizes = [64, 128], strides = [1, 1]} : vector<80x128xf32> to vector<64x128xf32>
    %341 = arith.truncf %340 : vector<64x128xf32> to vector<64x128xbf16>
    %c64_234 = arith.constant 64 : index
    %c896_235 = arith.constant 896 : index
    %342 = vector.load %arg7[%c64_234, %c896_235] : memref<128x1152xbf16, #tpu.memory_space<vmem>>, vector<64x128xbf16>
    tpu.vector_store %arg7[%c64_234, %c896_235], %341 {strides = array<i32>} : memref<128x1152xbf16, #tpu.memory_space<vmem>>, vector<64x128xbf16>,
    %343 = vector.extract_strided_slice %318 {offsets = [16, 0], sizes = [64, 128], strides = [1, 1]} : vector<80x128xf32> to vector<64x128xf32>
    %344 = arith.truncf %343 : vector<64x128xf32> to vector<64x128xbf16>
    %c64_236 = arith.constant 64 : index
    %c1024_237 = arith.constant 1024 : index
    %345 = vector.load %arg7[%c64_236, %c1024_237] : memref<128x1152xbf16, #tpu.memory_space<vmem>>, vector<64x128xbf16>
    tpu.vector_store %arg7[%c64_236, %c1024_237], %344 {strides = array<i32>} : memref<128x1152xbf16, #tpu.memory_space<vmem>>, vector<64x128xbf16>,
    %c0_238 = arith.constant 0 : index
    %c0_239 = arith.constant 0 : index
    %346 = vector.load %arg7[%c0_238, %c0_239] : memref<128x1152xbf16, #tpu.memory_space<vmem>>, vector<128x1152xbf16>
    %c3 = arith.constant 3 : index
    %c0_240 = arith.constant 0 : index
    %c0_241 = arith.constant 0 : index
    %347 = vector.load %arg2[%c3, %c0_240, %c0_241] : memref<4x1152x128xbf16, #tpu.memory_space<vmem>>, vector<1x1152x128xbf16>
    %348 = vector.shape_cast %347 : vector<1x1152x128xbf16> to vector<1152x128xbf16>
    %cst_242 = arith.constant dense<0.000000e+00> : vector<128x128xf32>
    %349 = tpu.matmul %346, %348, %cst_242 {dimension_numbers = #tpu.dot_dimension_numbers<[1], [0], [0], [1], [0, 0, 1, 1], [], []>} : vector<128x1152xbf16>, vector<1152x128xbf16>, vector<128x128xf32> -> vector<128x128xf32>
    %c3_243 = arith.constant 3 : index
    %c0_244 = arith.constant 0 : index
    %c0_245 = arith.constant 0 : index
    %350 = vector.load %arg3[%c3_243, %c0_244, %c0_245] : memref<4x1x128xf32, #tpu.memory_space<vmem>>, vector<1x1x128xf32>
    %351 = vector.shape_cast %350 : vector<1x1x128xf32> to vector<1x128xf32>
    %352 = vector.broadcast %351 : vector<1x128xf32> to vector<128x128xf32>
    %353 = arith.addf %349, %352 : vector<128x128xf32>
    %354 = tpu.iota {dimensions = array<i32: 1>} : vector<128x128xi32>
    %c2_i32 = arith.constant 2 : i32
    %355 = vector.broadcast %c2_i32 : i32 to vector<128x128xi32>
    %356 = arith.cmpi slt, %354, %355 : vector<128x128xi32>
    %357 = arith.negf %353 : vector<128x128xf32>
    %358 = math.exp %357 : vector<128x128xf32>
    %cst_246 = arith.constant 1.000000e+00 : f32
    %359 = vector.broadcast %cst_246 : f32 to vector<128x128xf32>
    %360 = arith.addf %359, %358 : vector<128x128xf32>
    %361 = arith.divf %359, %360 : vector<128x128xf32>
    %c10_i32 = arith.constant 10 : i32
    %362 = vector.broadcast %c10_i32 : i32 to vector<128x128xi32>
    %363 = arith.cmpi slt, %354, %362 : vector<128x128xi32>
    %c0_247 = arith.constant 0 : index
    %364 = memref.load %arg4[%c0_247] : memref<1xf32, #tpu.memory_space<smem>>
    %365 = vector.broadcast %364 : f32 to vector<128x128xf32>
    %366 = arith.mulf %353, %365 : vector<128x128xf32>
    %367 = arith.select %363, %366, %353 : vector<128x128xi1>, vector<128x128xf32>
    %368 = arith.select %356, %361, %367 : vector<128x128xi1>, vector<128x128xf32>
    %369 = vector.shape_cast %368 : vector<128x128xf32> to vector<2x64x128xf32>
    %c0_248 = arith.constant 0 : index
    %c0_249 = arith.constant 0 : index
    %c0_250 = arith.constant 0 : index
    %370 = vector.load %arg5[%c0_248, %c0_249, %c0_250] : memref<2x64x128xf32, #tpu.memory_space<vmem>>, vector<2x64x128xf32>
    tpu.vector_store %arg5[%c0_248, %c0_249, %c0_250], %369 {strides = array<i32>} : memref<2x64x128xf32, #tpu.memory_space<vmem>>, vector<2x64x128xf32>,
    return
  }
  func.func @transform_0(%arg0: i32) -> (i32, i32, i32) {
    %c0_i32 = arith.constant 0 : i32
    %c0_i32_0 = arith.constant 0 : i32
    %c0_i32_1 = arith.constant 0 : i32
    return %arg0, %c0_i32, %c0_i32_0 : i32, i32, i32
  }
  func.func @transform_1(%arg0: i32) -> (i32, i32, i32) {
    %c0_i32 = arith.constant 0 : i32
    %c0_i32_0 = arith.constant 0 : i32
    %c0_i32_1 = arith.constant 0 : i32
    %c0_i32_2 = arith.constant 0 : i32
    return %c0_i32, %c0_i32_0, %c0_i32_1 : i32, i32, i32
  }
  func.func @transform_2(%arg0: i32) -> (i32, i32, i32) {
    %c0_i32 = arith.constant 0 : i32
    %c0_i32_0 = arith.constant 0 : i32
    %c0_i32_1 = arith.constant 0 : i32
    %c0_i32_2 = arith.constant 0 : i32
    return %c0_i32, %c0_i32_0, %c0_i32_1 : i32, i32, i32
  }
  func.func @transform_3(%arg0: i32) -> i32 {
    %c0_i32 = arith.constant 0 : i32
    %c0_i32_0 = arith.constant 0 : i32
    return %c0_i32 : i32
  }
  func.func @transform_4(%arg0: i32) -> (i32, i32, i32) {
    %c0_i32 = arith.constant 0 : i32
    %c0_i32_0 = arith.constant 0 : i32
    %c0_i32_1 = arith.constant 0 : i32
    return %arg0, %c0_i32, %c0_i32_0 : i32, i32, i32
  }
}

</mosaic_0001>

<bundles_post_ra>
// kernel: output_block_forward.1
= control target key start
LH: loop header
LB: loop body
LE: loop exit
PB: predicated region body
PF: predicated region fallthrough
CT: control target
= control target key end

     0   :  { %10 = vsyncpa [#allocation6], 0  ;;  %s13225_s0 = inlined_call_operand.vmem [shape: f32[2,64,128], index: 0, kind: input, shape index: {}]   ;;  %s13226_s1 = inlined_call_operand.hbm [shape: bf16[4,1152,128], index: 1, kind: input, shape index: {}]   ;;  %s13227_s2 = inlined_call_operand.hbm [shape: f32[4,1,128], index: 2, kind: input, shape index: {}]   ;;  %s13228_s3 = inlined_call_operand.<no memory space> [shape: f32[1], index: 3, kind: input, shape index: {}]   ;;  %s13229_s4 = inlined_call_operand.vmem [shape: f32[2,64,128], index: 4, kind: output, shape index: {}]  }
   0x1   :  { %s18_s17 = sshll.u32 %s13226_s1, 4  ;;  %s19_s17 = int_to_ptr.hbm [resolvable:$true] %s18_s17 }
   0x2   :  { %11 = vsyncpa [#allocation8], 0  ;;  %s11009_s18 = smov [#allocation5]   ;;  %s31_s22 = sshll.u32 %s13227_s2, 4  ;;  %s32_s22 = int_to_ptr.hbm [resolvable:$true] %s31_s22 }
   0x3   :  { %s20_s19 = sshll.u32 %s11009_s18, 4  ;;  %s11010_s23 = smov 64   ;;  %s21_s19 = int_to_ptr.vmem [resolvable:$true] %s20_s19 }
   0x4   :  { %s11011_s24 = smov 4   ;;  %s11012_s25 = smov [#allocation7]  }
   0x5   :  { %26 = dma.hbm_to_vmem [thread:$0]  %s19_s17, 36864, %s21_s19, [#allocation6], %s11010_s23, %s11010_s23, %s11011_s24  }
   0x6   :  { %s33_s26 = sshll.u32 %s11012_s25, 4  ;;  %s11013_s27 = smov 16   ;;  %s34_s26 = int_to_ptr.vmem [resolvable:$true] %s33_s26 }
   0x7   :  { %s11014_s28 = smov 1  }
   0x8   :  { %39 = dma.hbm_to_vmem [thread:$0]  %s32_s22, 64, %s34_s26, [#allocation8], %s11013_s27, %s11013_s27, %s11014_s28  }
   0x9   :  { %11005 = dma.done.wait [#allocation6], 36864  }
   0xa   :  { %11006 = vsyncadd [#allocation6], 4294930432 }
   0xb   :  { %11007 = dma.done.wait [#allocation8], 64  }
   0xc   :  { %11008 = vsyncadd [#allocation8], 4294967232  ;;  %v13240_v0 = vlaneseq  ;;  %v13241_v1 = vmov 0.0|0.0   ;;  %v11016_v3 = vmov 0.0   ;;  %v10381_v6 = vld [vmem:[#allocation5 + $0x38] sm:$0xff]  ;;  %v10380_v13 = vld [vmem:[#allocation5 + $0x30] sm:$0xff] }
   0xd   :  { %334 = vst [vmem:[#allocation3 + $0x4] sm:$0xf] %v13241_v1  ;;  %v11053_v4 = vrot.slane %v11016_v3, 7  ;;  %v10397_v7 = vld [vmem:[#allocation5 + $0xb8] sm:$0xff]  ;;  %1612 = vmatpush.bf16.msra.mxu0 %v10381_v6  ;;  %v10396_v14 = vld [vmem:[#allocation5 + $0xb0] sm:$0xff]  ;;  %v10379_v19 = vld [vmem:[#allocation5 + $0x28] sm:$0xff] }
   0xe   :  { %v11050_v2 = vshrl.u32 %v13240_v0, 7  ;;  %402 = vst [vmem:[#allocation3 + $0x118] sm:$0xf] %v13241_v1  ;;  %v10389_v8 = vld [vmem:[#allocation5 + $0x78] sm:$0xff]  ;;  %1710 = vmatpush.bf16.msra.mxu2 %v10397_v7  ;;  %v10388_v16 = vld [vmem:[#allocation5 + $0x70] sm:$0xff]  ;;  %v10395_v20 = vld [vmem:[#allocation5 + $0xa8] sm:$0xff] }
   0xf   :  { %506 = vst [vmem:[#allocation3 + $0x124] sm:$0xf] %v13241_v1  ;;  %v10405_v10 = vld [vmem:[#allocation5 + $0xf8] sm:$0xff]  ;;  %1661 = vmatpush.bf16.msra.mxu1 %v10389_v8  ;;  %v10404_v17 = vld [vmem:[#allocation5 + $0xf0] sm:$0xff]  ;;  %v10387_v23 = vld [vmem:[#allocation5 + $0x68] sm:$0xff]  ;;  %v11071_v25 = vrot.slane %v11016_v3, 1 }
  0x10   :  { %v65_v5 = vand.u32 7, %v11050_v2  ;;  %574 = vst [vmem:[#allocation3 + $0x238] sm:$0xf] %v13241_v1  ;;  %v52_v11 = vadd.s32 8, %v11050_v2  ;;  %v11063_v15 = vadd.s32 16, %v11050_v2  ;;  %1759 = vmatpush.bf16.msra.mxu3 %v10405_v10  ;;  %v11069_v22 = vadd.s32 24, %v11050_v2 }
  0x11   :  { %1613 = vmatpush.bf16.msra.mxu0 %v10380_v13  ;;  %v10403_v24 = vld [vmem:[#allocation5 + $0xe8] sm:$0xff]  ;;  %v10378_v26 = vld [vmem:[#allocation5 + $0x20] sm:$0xff]  ;;  %v13274_v27 = vmov 0  ;;  %v13277_v28 = vmov 0  ;;  %vm13230_vm3 = vcmp.lt.s32.totalorder %v11050_v2, 1  ;;  %vm13231_vm4 = vcmp.lt.s32.totalorder %v11050_v2, 7 }
  0x12   :  { %vm181_vm0 = vcmp.eq.s32.totalorder %v65_v5, 0  ;;  %v72_v18 = vand.u32 7, %v52_v11  ;;  %1711 = vmatpush.bf16.msra.mxu2 %v10396_v14  ;;  %v79_v21 = vand.u32 7, %v11063_v15  ;;  %vm11077_vm2 = vcmp.eq.s32.totalorder %v65_v5, 7  ;;  %v10394_v29 = vld [vmem:[#allocation5 + $0xa0] sm:$0xff]  ;;  %v204_v38 = vld [vmem:[%s13225_s0 + $0x8] sm:$0xff] }
  0x13   :  { %v269_v9 = vsel %vm181_vm0, 0.0, %v11053_v4  ;;  %1662 = vmatpush.bf16.msra.mxu1 %v10388_v16  ;;  %v13278_v28 = vsel %vm11077_vm2, 4294967295, %v13277_v28  ;;  %v10386_v30 = vld [vmem:[#allocation5 + $0x60] sm:$0xff]  ;;  %v13280_v32 = vmov 0  ;;  %v86_v34 = vand.u32 7, %v11069_v22  ;;  %v10377_v41 = vld [vmem:[#allocation5 + $0x18] sm:$0xff] }
  0x14   :  { %v11060_v12 = vpack.c.bf16 %v269_v9, %v269_v9  ;;  %1760 = vmatpush.bf16.msra.mxu3 %v10404_v17  ;;  %vm11073_vm1 = vcmp.eq.s32.totalorder %v72_v18, 0  ;;  %13279 = vst [vmem:[#allocation13_spill] sm:$0xff] %v13278_v28  ;;  %v203_v31 = vld [vmem:[%s13225_s0] sm:$0xff]  ;;  %vm11086_vm5 = vcmp.eq.s32.totalorder %v72_v18, 7  ;;  %vm11092_vm6 = vcmp.eq.s32.totalorder %v79_v21, 0  ;;  %v10393_v42 = vld [vmem:[#allocation5 + $0x98] sm:$0xff] }
  0x15   :  { %v13275_v27 = vsel %vm11073_vm1, 4294967295, %v13274_v27  ;;  %1614 = vmatpush.bf16.msra.mxu0 %v10379_v19  ;;  %v13281_v32 = vsel %vm11086_vm5, 4294967295, %v13280_v32  ;;  %v10402_v35 = vld [vmem:[#allocation5 + $0xe0] sm:$0xff]  ;;  %v249_v36 = vrot.slane %v203_v31, 7  ;;  %v280_v39 = vrot.slane %v203_v31, 1  ;;  %v10385_v47 = vld [vmem:[#allocation5 + $0x58] sm:$0xff] }
  0x16   :  { %13273 = vst [vmem:[#allocation11_spill] sm:$0xff] %v11060_v12  ;;  %1712 = vmatpush.bf16.msra.mxu2 %v10395_v20  ;;  %v327_v40 = vpack.c.bf16 %v203_v31, %v203_v31  ;;  %v281_v43 = vrot.slane %v204_v38, 1  ;;  %v11103_v44 = vld [vmem:[#allocation3 + $0x4] sm:$0xf]  ;;  %v250_v45 = vrot.slane %v204_v38, 7  ;;  %v11105_v46 = vpack.c.bf16 %v204_v38, %v204_v38  ;;  %v11116_v50 = vld [vmem:[%s13225_s0 + $0x10] sm:$0xff] }
  0x17   :  { %318 = vst [vmem:[#allocation3] sm:$0xf] %v11060_v12  ;;  %1663 = vmatpush.bf16.msra.mxu1 %v10387_v23  ;;  %v267_v48 = vsel %vm13230_vm3, %v11053_v4, %v249_v36  ;;  %v298_v49 = vsel %vm13231_vm4, %v11071_v25, %v280_v39  ;;  %v11121_v51 = vld [vmem:[%s13225_s0 + $0x18] sm:$0xff]  ;;  %v251_v60 = vrot.slane %v11116_v50, 7  ;;  %v282_v61 = vrot.slane %v11116_v50, 1  ;;  %v10376_v7 = vld [vmem:[#allocation5 + $0x10] sm:$0xff] }
  0x18   :  { %490 = vst [vmem:[#allocation3 + $0x120] sm:$0xf] %v11060_v12  ;;  %1761 = vmatpush.bf16.msra.mxu3 %v10403_v24  ;;  %v270_v52 = vsel %vm11073_vm1, 0.0, %v267_v48  ;;  %v297_v53 = vsel %vm13231_vm4, %v280_v39, %v281_v43  ;;  %v300_v54 = vsel %vm11077_vm2, 0.0, %v298_v49  ;;  %v266_v55 = vsel %vm13230_vm3, %v249_v36, %v250_v45  ;;  %v10401_v56 = vld [vmem:[#allocation5 + $0xd8] sm:$0xff]  ;;  %v10392_v8 = vld [vmem:[#allocation5 + $0x90] sm:$0xff] }
  0x19   :  { %13276 = vst [vmem:[#allocation12_spill] sm:$0xff] %v13275_v27  ;;  %1615 = vmatpush.bf16.msra.mxu0 %v10378_v26  ;;  %v311_v57 = vpack.c.bf16 %v270_v52, %v270_v52  ;;  %v301_v58 = vsel %vm11086_vm5, 0.0, %v297_v53  ;;  %v342_v59 = vpack.c.bf16 %v300_v54, %v300_v54  ;;  %v11138_v62 = vadd.s32 32, %v11050_v2  ;;  %v10384_v10 = vld [vmem:[#allocation5 + $0x50] sm:$0xff]  ;;  %v10375_v15 = vld [vmem:[#allocation5 + $0x8] sm:$0xff]  ;;  %v10382_v36 = vld [vmem:[#allocation5 + $0x40] sm:$0xff] }
  0x1a   :  { %13282 = vst [vmem:[#allocation14_spill] sm:$0xff] %v13281_v32  ;;  %1713 = vmatpush.bf16.msra.mxu2 %v10394_v29  ;;  %v343_v63 = vpack.c.bf16 %v301_v58, %v301_v58  ;;  %v271_v3 = vsel %vm11092_vm6, 0.0, %v266_v55  ;;  %vm11144_vm7 = vcmp.eq.s32.totalorder %v86_v34, 0  ;;  %v283_v6 = vrot.slane %v11121_v51, 1  ;;  %v10400_v11 = vld [vmem:[#allocation5 + $0xd0] sm:$0xff]  ;;  %v10383_v24 = vld [vmem:[#allocation5 + $0x48] sm:$0xff] }
  0x1b   :  { %335 = vst [vmem:[#allocation3 + $0x28] sm:$0xf] %v327_v40  ;;  %1664 = vmatpush.bf16.msra.mxu1 %v10386_v30  ;;  %v265_v9 = vsel %vm13230_vm3, %v250_v45, %v251_v60  ;;  %v312_v14 = vpack.c.bf16 %v271_v3, %v271_v3  ;;  %vm11160_vm8 = vcmp.eq.s32.totalorder %v79_v21, 7  ;;  %v13287_v17 = vmov 0  ;;  %v10391_v21 = vld [vmem:[#allocation5 + $0x88] sm:$0xff]  ;;  %v10374_v30 = vld [vmem:[#allocation5] sm:$0xff] }
  0x1c   :  { %2179 = vst [vmem:[#allocation3 + $0x4] sm:$0xf] %v13241_v1  ;;  %1762 = vmatpush.bf16.msra.mxu3 %v10402_v35  ;;  %v272_v16 = vsel %vm11144_vm7, 0.0, %v265_v9  ;;  %v13288_v17 = vsel %vm11160_vm8, 4294967295, %v13287_v17  ;;  %v296_v18 = vsel %vm13231_vm4, %v281_v43, %v282_v61  ;;  %vm11168_vm9 = vcmp.eq.s32.totalorder %v86_v34, 7  ;;  %v10399_v22 = vld [vmem:[#allocation5 + $0xc8] sm:$0xff] }
  0x1d   :  { %368 = vst [vmem:[#allocation3 + $0x10] sm:$0xf] %v327_v40  ;;  %1616 = vmatpush.bf16.msra.mxu0 %v10377_v41  ;;  %v13289_v19 = vmov 0  ;;  %v295_v20 = vsel %vm13231_vm4, %v282_v61, %v283_v6  ;;  %v313_v26 = vpack.c.bf16 %v272_v16, %v272_v16  ;;  %v302_v29 = vsel %vm11160_vm8, 0.0, %v296_v18  ;;  %v10390_v35 = vld [vmem:[#allocation5 + $0x80] sm:$0xff]  ;;  %v10413_v52 = vld [vmem:[#allocation5 + $0x138] sm:$0xff] }
  0x1e   :  { %v11097_v37 = vld [vmem:[#allocation3] sm:$0xf]  ;;  %336 = vst [vmem:[#allocation3 + $0x4c] sm:$0xf] %v11105_v46  ;;  %1714 = vmatpush.bf16.msra.mxu2 %v10393_v42  ;;  %v13290_v19 = vsel %vm11168_vm9, 4294967295, %v13289_v19  ;;  %v303_v31 = vsel %vm11168_vm9, 0.0, %v295_v20  ;;  %v344_v42 = vpack.c.bf16 %v302_v29, %v302_v29  ;;  %v329_v3 = vpack.c.bf16 %v11116_v50, %v11116_v50 }
  0x1f   :  { %2163 = vst [vmem:[#allocation3] sm:$0xf] %v11060_v12  ;;  %1665 = vmatpush.bf16.msra.mxu1 %v10385_v47  ;;  %v93_v34 = vand.u32 7, %v11138_v62  ;;  %v252_v38 = vrot.slane %v11121_v51, 7  ;;  %v56_v39 = vadd.s32 40, %v11050_v2  ;;  %v10398_v43 = vld [vmem:[#allocation5 + $0xc0] sm:$0xff]  ;;  %v345_v47 = vpack.c.bf16 %v303_v31, %v303_v31 }
  0x20   :  { %319 = vst [vmem:[#allocation3 + $0x24] sm:$0xf] %v311_v57  ;;  %1763 = vmatpush.bf16.msra.mxu3 %v10401_v56  ;;  %v11189_v48 = vld [vmem:[%s13225_s0 + $0x20] sm:$0xff]  ;;  %v11205_v61 = vld [vmem:[%s13225_s0 + $0x28] sm:$0xff]  ;;  %v13293_v9 = vmov 0  ;;  %v13297_v18 = vmov 0 }
  0x21   :  { %359 = vst [vmem:[#allocation3 + $0xc] sm:$0xf] %v311_v57  ;;  %1617 = vmatpush.bf16.msra.mxu0 %v10376_v7  ;;  %vm11192_vm10 = vcmp.eq.s32.totalorder %v93_v34, 0  ;;  %v264_v58 = vsel %vm13230_vm3, %v251_v60, %v252_v38  ;;  %v284_v7 = vrot.slane %v11189_v48, 1  ;;  %vm11221_vm12 = vcmp.eq.s32.totalorder %v93_v34, 7 }
  0x22   :  { %350 = vst [vmem:[#allocation3 + $0x8] sm:$0xf] %v342_v59  ;;  %1715 = vmatpush.bf16.msra.mxu2 %v10392_v8  ;;  %v7986_v45 = vld [vmem:[#allocation3 + $0x24] sm:$0xf0]  ;;  %v100_v59 = vand.u32 7, %v56_v39  ;;  %v273_v60 = vsel %vm11192_vm10, 0.0, %v264_v58 }
  0x23   :  { %351 = vst [vmem:[#allocation3 + $0x2c] sm:$0xf] %v343_v63  ;;  %v11176_v23 = vld [vmem:[#allocation3 + $0x4] sm:$0xf]  ;;  %1666 = vmatpush.bf16.msra.mxu1 %v10384_v10  ;;  %v7989_v57 = vor.u32 %v11103_v44, %v7986_v45  ;;  %v285_v8 = vrot.slane %v11205_v61, 1  ;;  %v314_v10 = vpack.c.bf16 %v273_v60, %v273_v60 }
  0x24   :  { %377 = vst [vmem:[#allocation3 + $0x14] sm:$0xf] %v343_v63  ;;  %1764 = vmatpush.bf16.msra.mxu3 %v10400_v11  ;;  %v10412_v63 = vld [vmem:[#allocation5 + $0x130] sm:$0xff]  ;;  %vm11213_vm11 = vcmp.eq.s32.totalorder %v100_v59, 0  ;;  %v13295_v11 = vmov 0  ;;  %vm11228_vm13 = vcmp.eq.s32.totalorder %v100_v59, 7 }
  0x25   :  { %4026 = vst [vmem:[#allocation3 + $0x4] sm:$0xf] %v13241_v1  ;;  %1618 = vmatpush.bf16.msra.mxu0 %v10375_v15  ;;  %v13294_v9 = vsel %vm11213_vm11, 4294967295, %v13293_v9  ;;  %v13296_v11 = vsel %vm11221_vm12, 4294967295, %v13295_v11  ;;  %v13298_v18 = vsel %vm11228_vm13, 4294967295, %v13297_v18  ;;  %v293_v20 = vsel %vm13231_vm4, %v284_v7, %v285_v8 }
  0x26   :  { %v11153_v13 = vld [vmem:[#allocation3] sm:$0xf]  ;;  %360 = vst [vmem:[#allocation3 + $0x30] sm:$0xf] %v312_v14  ;;  %1716 = vmatpush.bf16.msra.mxu2 %v10391_v21  ;;  %v294_v15 = vsel %vm13231_vm4, %v283_v6, %v284_v7  ;;  %v10311_v6 = vld [vmem:[#allocation3 + $0x4c] sm:$0xf] }
  0x27   :  { %4010 = vst [vmem:[#allocation3] sm:$0xf] %v11060_v12  ;;  %v10306_v40 = vld [vmem:[#allocation3 + $0x20] sm:$0xf0]  ;;  %1667 = vmatpush.bf16.msra.mxu1 %v10383_v24  ;;  %v304_v24 = vsel %vm11221_vm12, 0.0, %v294_v15 }
  0x28   :  { %320 = vst [vmem:[#allocation3 + $0x48] sm:$0xf] %v312_v14  ;;  %1765 = vmatpush.bf16.msra.mxu3 %v10399_v22  ;;  %v7985_v53 = vor.u32 %v10306_v40, %v11097_v37  ;;  %v10303_v55 = vld [vmem:[#allocation3 + $0xc] sm:$0xf]  ;;  %v253_v37 = vrot.slane %v11189_v48, 7  ;;  %v305_v22 = vsel %vm11228_vm13, 0.0, %v293_v20 }
  0x29   :  { %v7992_v41 = vld [vmem:[#allocation3 + $0x8] sm:$0xf]  ;;  %386 = vst [vmem:[#allocation3 + $0x18] sm:$0xf] %v312_v14  ;;  %1619 = vmatpush.bf16.msra.mxu0 %v10374_v30 }
  0x2a   :  { %321 = vst [vmem:[#allocation3 + $0x6c] sm:$0xf] %v313_v26  ;;  %v10307_v49 = vld [vmem:[#allocation3 + $0x28] sm:$0xf0]  ;;  %1717 = vmatpush.bf16.msra.mxu2 %v10390_v35  ;;  %v263_v50 = vsel %vm13230_vm3, %v252_v38, %v253_v37  ;;  %v58_v38 = vadd.s32 56, %v11050_v2 }
  0x2b   :  { %361 = vst [vmem:[#allocation3 + $0x54] sm:$0xf] %v313_v26  ;;  %v7993_v54 = vor.u32 %v10307_v49, %v7992_v41  ;;  %1668 = vmatpush.bf16.msra.mxu1 %v10382_v36  ;;  %v10411_v14 = vld [vmem:[#allocation5 + $0x128] sm:$0xff]  ;;  %v274_v16 = vsel %vm11213_vm11, 0.0, %v263_v50  ;;  %v347_v36 = vpack.c.bf16 %v305_v22, %v305_v22 }
  0x2c   :  { %387 = vst [vmem:[#allocation3 + $0x3c] sm:$0xf] %v313_v26  ;;  %1766 = vmatpush.bf16.msra.mxu3 %v10398_v43  ;;  %1620 = vmatmul.bf16.vlgmr.msra.gmra.mxu0 %v7985_v53  ;;  %v315_v21 = vpack.c.bf16 %v274_v16, %v274_v16  ;;  %v57_v26 = vadd.s32 48, %v11050_v2  ;;  %v11251_v43 = vld [vmem:[%s13225_s0 + $0x30] sm:$0xff]  ;;  %v114_v53 = vand.u32 7, %v58_v38  ;;  %v11311_v38 = vld [vmem:[%s13225_s0 + $0x40] sm:$0xff] }
  0x2d   :  { %352 = vst [vmem:[#allocation3 + $0x50] sm:$0xf] %v344_v42  ;;  %v7994_v62 = vld [vmem:[#allocation3 + $0x2c] sm:$0xf0]  ;;  %1808 = vmatpush.bf16.msrb.mxu0 %v10413_v52  ;;  %1718 = vmatmul.bf16.vlgmr.msra.gmra.mxu2 %v7993_v54  ;;  %v330_v52 = vpack.c.bf16 %v11121_v51, %v11121_v51  ;;  %v255_v54 = vrot.slane %v11251_v43, 7  ;;  %v11267_v51 = vld [vmem:[%s13225_s0 + $0x38] sm:$0xff] }
  0x2e   :  { %353 = vst [vmem:[#allocation3 + $0x74] sm:$0xf] %v345_v47  ;;  %v7997_v44 = vor.u32 %v10303_v55, %v7994_v62  ;;  %1669 = vmatmul.bf16.vlgmr.msra.gmra.mxu1 %v7989_v57  ;;  %v107_v41 = vand.u32 7, %v57_v26  ;;  %v13299_v57 = vmov 0  ;;  %v286_v59 = vrot.slane %v11251_v43, 1  ;;  %v10410_v62 = vld [vmem:[#allocation5 + $0x120] sm:$0xff] }
  0x2f   :  { %404 = vst [vmem:[#allocation3 + $0x20] sm:$0xf] %v344_v42  ;;  %v8020_v29 = vld [vmem:[#allocation3 + $0x48] sm:$0xf]  ;;  %vm11274_vm15 = vcmp.eq.s32.totalorder %v114_v53, 0  ;;  %v287_v60 = vrot.slane %v11267_v51, 1 }
  0x30   :  { %405 = vst [vmem:[#allocation3 + $0x44] sm:$0xf] %v345_v47  ;;  %1767 = vmatmul.bf16.vlgmr.msra.gmra.mxu3 %v7997_v44  ;;  %vm11256_vm14 = vcmp.eq.s32.totalorder %v107_v41, 0  ;;  %v331_v44 = vpack.c.bf16 %v11189_v48, %v11189_v48  ;;  %vm11283_vm0 = vcmp.eq.s32.totalorder %v107_v41, 7  ;;  %v13303_v48 = vmov 0 }
  0x31   :  { %378 = vst [vmem:[#allocation3 + $0x38] sm:$0xf] %v344_v42  ;;  %1809 = vmatpush.bf16.msrb.mxu0 %v10412_v63  ;;  %v10315_v30 = vld [vmem:[#allocation3 + $0x68] sm:$0xf0]  ;;  %v254_v42 = vrot.slane %v11205_v61, 7  ;;  %v13300_v57 = vsel %vm11256_vm14, 4294967295, %v13299_v57  ;;  %v292_v7 = vsel %vm13231_vm4, %v285_v8, %v286_v59  ;;  %v291_v16 = vsel %vm13231_vm4, %v286_v59, %v287_v60 }
  0x32   :  { %379 = vst [vmem:[#allocation3 + $0x5c] sm:$0xf] %v345_v47  ;;  %v8021_v39 = vor.u32 %v10315_v30, %v8020_v29  ;;  %v10312_v47 = vld [vmem:[#allocation3 + $0x54] sm:$0xf]  ;;  %v13301_v63 = vmov 0  ;;  %v13304_v48 = vsel %vm11283_vm0, 4294967295, %v13303_v48  ;;  %v333_v59 = vpack.c.bf16 %v11251_v43, %v11251_v43 }
  0x33   :  { %337 = vst [vmem:[#allocation3 + $0x70] sm:$0xf] %v329_v3  ;;  %v262_v58 = vsel %vm13230_vm3, %v253_v37, %v254_v42  ;;  %v13302_v63 = vsel %vm11274_vm15, 4294967295, %v13301_v63  ;;  %v306_v20 = vsel %vm11283_vm0, 0.0, %v292_v7  ;;  %v11306_v29 = vadd.s32 64, %v11050_v2 }
  0x34   :  { %369 = vst [vmem:[#allocation3 + $0x34] sm:$0xf] %v11105_v46  ;;  %v8028_v31 = vld [vmem:[#allocation3 + $0x50] sm:$0xf]  ;;  %v275_v37 = vsel %vm11256_vm14, 0.0, %v262_v58 }
  0x35   :  { %370 = vst [vmem:[#allocation3 + $0x58] sm:$0xf] %v329_v3  ;;  %1810 = vmatpush.bf16.msrb.mxu0 %v10411_v14  ;;  %v10316_v34 = vld [vmem:[#allocation3 + $0x70] sm:$0xf0]  ;;  %v316_v50 = vpack.c.bf16 %v275_v37, %v275_v37  ;;  %v13305_v14 = vmov 0 }
  0x36   :  { %395 = vst [vmem:[#allocation3 + $0x1c] sm:$0xf] %v11105_v46  ;;  %v346_v46 = vpack.c.bf16 %v304_v24, %v304_v24  ;;  %v8029_v40 = vor.u32 %v10316_v34, %v8028_v31 }
  0x37   :  { %396 = vst [vmem:[#allocation3 + $0x40] sm:$0xf] %v329_v3  ;;  %v261_v3 = vsel %vm13230_vm3, %v254_v42, %v255_v54  ;;  %vm11293_vm3 = vcmp.eq.s32.totalorder %v114_v53, 7  ;;  %v423_v42 = vrot.slane %v11311_v38, 7  ;;  %v332_v53 = vpack.c.bf16 %v11205_v61, %v11205_v61 }
  0x38   :  { %362 = vst [vmem:[#allocation3 + $0x78] sm:$0xf] %v314_v10  ;;  %v13306_v14 = vsel %vm11293_vm3, 4294967295, %v13305_v14  ;;  %v307_v26 = vsel %vm11293_vm3, 0.0, %v291_v16  ;;  %vm13309_vm3 = vcmp.lt.s32.totalorder %v11050_v2, 1  ;;  %v453_v61 = vrot.slane %v11311_v38, 1 }
  0x39   :  { %322 = vst [vmem:[#allocation3 + $0x90] sm:$0xf] %v314_v10  ;;  %1811 = vmatpush.bf16.msrb.mxu0 %v10410_v62  ;;  %vm13310_vm0 = vmmov %vm13309_vm3 }
  0x3a   :  { %v8022_v35 = vld [vmem:[#allocation3 + $0x6c] sm:$0xf0]  ;;  %388 = vst [vmem:[#allocation3 + $0x60] sm:$0xf] %v314_v10  ;;  %v276_v10 = vsel %vm11274_vm15, 0.0, %v261_v3  ;;  %v440_v62 = vsel %vm13310_vm0, %v11053_v4, %v423_v42 }
  0x3b   :  { %323 = vst [vmem:[#allocation3 + $0xb4] sm:$0xf] %v315_v21  ;;  %v8025_v45 = vor.u32 %v10311_v6, %v8022_v35  ;;  %v317_v22 = vpack.c.bf16 %v276_v10, %v276_v10  ;;  %v348_v35 = vpack.c.bf16 %v306_v20, %v306_v20  ;;  %v443_v43 = vsel %vm11073_vm1, 0.0, %v440_v62  ;;  %v11355_v20 = vld [vmem:[%s13225_s0 + $0x50] sm:$0xff] }
  0x3c   :  { %363 = vst [vmem:[#allocation3 + $0x9c] sm:$0xf] %v315_v21  ;;  %1625 = vmatmul.bf16.gmra.mxu0 %v8021_v39  ;;  %v121_v39 = vand.u32 7, %v11306_v29 }
  0x3d   :  { %389 = vst [vmem:[#allocation3 + $0x84] sm:$0xf] %v315_v21  ;;  %1723 = vmatmul.bf16.gmra.mxu2 %v8029_v40  ;;  %v256_v40 = vrot.slane %v11267_v51, 7 }
  0x3e   :  { %354 = vst [vmem:[#allocation3 + $0x98] sm:$0xf] %v346_v46  ;;  %1674 = vmatmul.bf16.gmra.mxu1 %v8025_v45  ;;  %v10409_v45 = vld [vmem:[#allocation5 + $0x118] sm:$0xff]  ;;  %vm11325_vm4 = vcmp.eq.s32.totalorder %v121_v39, 0 }
  0x3f   :  { %v8030_v49 = vld [vmem:[#allocation3 + $0x74] sm:$0xf0]  ;;  %355 = vst [vmem:[#allocation3 + $0xbc] sm:$0xf] %v347_v36  ;;  %v260_v58 = vsel %vm13309_vm3, %v255_v54, %v256_v40  ;;  %1812 = vmatpush.bf16.msrb.mxu0 %v10409_v45  ;;  %vm13311_vm3 = vcmp.lt.s32.totalorder %v11050_v2, 7 }
  0x40   :  { %v8033_v55 = vor.u32 %v10312_v47, %v8030_v49  ;;  %380 = vst [vmem:[#allocation3 + $0x80] sm:$0xf] %v346_v46  ;;  %v8056_v8 = vld [vmem:[#allocation3 + $0x90] sm:$0xf]  ;;  %v11319_v49 = vld [vmem:[%s13225_s0 + $0x48] sm:$0xff]  ;;  %v277_v37 = vsel %vm11325_vm4, 0.0, %v260_v58  ;;  %v470_v3 = vsel %vm13311_vm3, %v11071_v25, %v453_v61  ;;  %vm13312_vm0 = vmmov %vm13311_vm3 }
  0x41   :  { %381 = vst [vmem:[#allocation3 + $0xa4] sm:$0xf] %v347_v36  ;;  %v424_v16 = vrot.slane %v11319_v49, 7  ;;  %vm13313_vm3 = vcmp.lt.s32.totalorder %v11050_v2, 1 }
  0x42   :  { %1772 = vmatmul.bf16.gmra.mxu3 %v8033_v55  ;;  %406 = vst [vmem:[#allocation3 + $0x68] sm:$0xf] %v346_v46  ;;  %v10324_v15 = vld [vmem:[#allocation3 + $0xb0] sm:$0xf0]  ;;  %v13307_v55 = vmov 0 }
  0x43   :  { %407 = vst [vmem:[#allocation3 + $0x8c] sm:$0xf] %v347_v36  ;;  %v8057_v31 = vor.u32 %v10324_v15, %v8056_v8  ;;  %v349_v36 = vpack.c.bf16 %v307_v26, %v307_v26  ;;  %v10321_v41 = vld [vmem:[#allocation3 + $0x9c] sm:$0xf]  ;;  %v13308_v55 = vsel %vm11325_vm4, 4294967295, %v13307_v55 }
  0x44   :  { %338 = vst [vmem:[#allocation3 + $0x94] sm:$0xf] %v330_v52 }
  0x45   :  { %339 = vst [vmem:[#allocation3 + $0xb8] sm:$0xf] %v331_v44  ;;  %v8064_v21 = vld [vmem:[#allocation3 + $0x98] sm:$0xf] }
  0x46   :  { %371 = vst [vmem:[#allocation3 + $0x7c] sm:$0xf] %v330_v52  ;;  %v10325_v24 = vld [vmem:[#allocation3 + $0xb8] sm:$0xf0] }
  0x47   :  { %372 = vst [vmem:[#allocation3 + $0xa0] sm:$0xf] %v331_v44  ;;  %v8065_v34 = vor.u32 %v10325_v24, %v8064_v21  ;;  %v483_v21 = vpack.c.bf16 %v443_v43, %v443_v43  ;;  %v472_v24 = vsel %vm11077_vm2, 0.0, %v470_v3 }
  0x48   :  { %397 = vst [vmem:[#allocation3 + $0x64] sm:$0xf] %v330_v52 }
  0x49   :  { %398 = vst [vmem:[#allocation3 + $0x88] sm:$0xf] %v331_v44  ;;  %v454_v44 = vrot.slane %v11319_v49, 1 }
  0x4a   :  { %364 = vst [vmem:[#allocation3 + $0xc0] sm:$0xf] %v316_v50 }
  0x4b   :  { %v10320_v30 = vld [vmem:[#allocation3 + $0x94] sm:$0xf]  ;;  %324 = vst [vmem:[#allocation3 + $0xd8] sm:$0xf] %v316_v50  ;;  %v469_v10 = vsel %vm13312_vm0, %v453_v61, %v454_v44  ;;  %vm13314_vm0 = vmmov %vm13313_vm3 }
  0x4c   :  { %v8058_v6 = vld [vmem:[#allocation3 + $0xb4] sm:$0xf0]  ;;  %390 = vst [vmem:[#allocation3 + $0xa8] sm:$0xf] %v316_v50  ;;  %1630 = vmatmul.bf16.gmra.mxu0 %v8057_v31  ;;  %v358_v50 = vpack.c.bf16 %v277_v37, %v277_v37  ;;  %v425_v31 = vrot.slane %v11355_v20, 7  ;;  %v10408_v61 = vld [vmem:[#allocation5 + $0x110] sm:$0xff] }
  0x4d   :  { %v8061_v46 = vor.u32 %v10320_v30, %v8058_v6  ;;  %325 = vst [vmem:[#allocation3 + $0xfc] sm:$0xf] %v317_v22  ;;  %1728 = vmatmul.bf16.gmra.mxu2 %v8065_v34  ;;  %v514_v6 = vpack.c.bf16 %v472_v24, %v472_v24  ;;  %1813 = vmatpush.bf16.msrb.mxu0 %v10408_v61 }
  0x4e   :  { %365 = vst [vmem:[#allocation3 + $0xe4] sm:$0xf] %v317_v22  ;;  %v438_v58 = vsel %vm13314_vm0, %v424_v16, %v425_v31  ;;  %v500_v61 = vpack.c.bf16 %v11319_v49, %v11319_v49 }
  0x4f   :  { %391 = vst [vmem:[#allocation3 + $0xcc] sm:$0xf] %v317_v22  ;;  %1679 = vmatmul.bf16.gmra.mxu1 %v8061_v46  ;;  %v473_v22 = vsel %vm11086_vm5, 0.0, %v469_v10  ;;  %v11367_v46 = vld [vmem:[%s13225_s0 + $0x58] sm:$0xff] }
  0x50   :  { %356 = vst [vmem:[#allocation3 + $0xe0] sm:$0xf] %v348_v35  ;;  %v515_v45 = vpack.c.bf16 %v473_v22, %v473_v22 }
  0x51   :  { %v8066_v47 = vld [vmem:[#allocation3 + $0xbc] sm:$0xf0]  ;;  %357 = vst [vmem:[#allocation3 + $0x104] sm:$0xf] %v349_v36 }
  0x52   :  { %v8069_v52 = vor.u32 %v10321_v41, %v8066_v47  ;;  %382 = vst [vmem:[#allocation3 + $0xc8] sm:$0xf] %v348_v35  ;;  %v8092_v54 = vld [vmem:[#allocation3 + $0xd8] sm:$0xf]  ;;  %v8128_v41 = vld [vmem:[#allocation3 + $0x120] sm:$0xf] }
  0x53   :  { %383 = vst [vmem:[#allocation3 + $0xec] sm:$0xf] %v349_v36 }
  0x54   :  { %1777 = vmatmul.bf16.gmra.mxu3 %v8069_v52  ;;  %408 = vst [vmem:[#allocation3 + $0xb0] sm:$0xf] %v348_v35  ;;  %v10333_v7 = vld [vmem:[#allocation3 + $0xf8] sm:$0xf0]  ;;  %v439_v35 = vsel %vm13313_vm3, %v423_v42, %v424_v16  ;;  %v455_v52 = vrot.slane %v11355_v20, 1  ;;  %v499_v42 = vpack.c.bf16 %v11311_v38, %v11311_v38  ;;  %v445_v38 = vsel %vm11144_vm7, 0.0, %v438_v58 }
  0x55   :  { %409 = vst [vmem:[#allocation3 + $0xd4] sm:$0xf] %v349_v36  ;;  %v8093_v26 = vor.u32 %v10333_v7, %v8092_v54  ;;  %v10330_v62 = vld [vmem:[#allocation3 + $0xe4] sm:$0xf]  ;;  %vm13315_vm3 = vcmp.lt.s32.totalorder %v11050_v2, 7  ;;  %v485_v10 = vpack.c.bf16 %v445_v38, %v445_v38 }
  0x56   :  { %340 = vst [vmem:[#allocation3 + $0xdc] sm:$0xf] %v332_v53  ;;  %v468_v43 = vsel %vm13315_vm3, %v454_v44, %v455_v52  ;;  %v10338_v7 = vld [vmem:[#allocation3 + $0x124] sm:$0xf]  ;;  %vm13316_vm0 = vmmov %vm13315_vm3  ;;  %vm13317_vm3 = vcmp.lt.s32.totalorder %v11050_v2, 1 }
  0x57   :  { %341 = vst [vmem:[#allocation3 + $0x100] sm:$0xf] %v333_v59  ;;  %v8100_v8 = vld [vmem:[#allocation3 + $0xe0] sm:$0xf]  ;;  %v474_v16 = vsel %vm11160_vm8, 0.0, %v468_v43 }
  0x58   :  { %373 = vst [vmem:[#allocation3 + $0xc4] sm:$0xf] %v332_v53  ;;  %v10334_v15 = vld [vmem:[#allocation3 + $0x100] sm:$0xf0]  ;;  %v516_v24 = vpack.c.bf16 %v474_v16, %v474_v16 }
  0x59   :  { %374 = vst [vmem:[#allocation3 + $0xe8] sm:$0xf] %v333_v59  ;;  %v8101_v30 = vor.u32 %v10334_v15, %v8100_v8 }
  0x5a   :  { %399 = vst [vmem:[#allocation3 + $0xac] sm:$0xf] %v332_v53  ;;  %v444_v53 = vsel %vm11092_vm6, 0.0, %v439_v35 }
  0x5b   :  { %400 = vst [vmem:[#allocation3 + $0xd0] sm:$0xf] %v333_v59  ;;  %v456_v59 = vrot.slane %v11367_v46, 1  ;;  %v484_v54 = vpack.c.bf16 %v444_v53, %v444_v53 }
  0x5c   :  { %366 = vst [vmem:[#allocation3 + $0x108] sm:$0xf] %v358_v50  ;;  %1635 = vmatmul.bf16.gmra.mxu0 %v8093_v26  ;;  %v426_v26 = vrot.slane %v11367_v46, 7 }
  0x5d   :  { %v10329_v34 = vld [vmem:[#allocation3 + $0xdc] sm:$0xf]  ;;  %392 = vst [vmem:[#allocation3 + $0xf0] sm:$0xf] %v358_v50  ;;  %1733 = vmatmul.bf16.gmra.mxu2 %v8101_v30  ;;  %v467_v50 = vsel %vm13316_vm0, %v455_v52, %v456_v59  ;;  %vm13318_vm0 = vmmov %vm13317_vm3 }
  0x5e   :  { %v8094_v36 = vld [vmem:[#allocation3 + $0xfc] sm:$0xf0]  ;;  %491 = vst [vmem:[#allocation3 + $0x144] sm:$0xf] %v483_v21  ;;  %v475_v44 = vsel %vm11168_vm9, 0.0, %v467_v50  ;;  %v10421_v50 = vld [vmem:[#allocation5 + $0x178] sm:$0xff] }
  0x5f   :  { %v8097_v47 = vor.u32 %v10329_v34, %v8094_v36  ;;  %2335 = vst [vmem:[#allocation3 + $0x120] sm:$0xf] %v11060_v12  ;;  %v517_v22 = vpack.c.bf16 %v475_v44, %v475_v44  ;;  %v11397_v34 = vld [vmem:[%s13225_s0 + $0x60] sm:$0xff]  ;;  %v10428_v44 = vld [vmem:[#allocation5 + $0x1b0] sm:$0xff]  ;;  %1857 = vmatpush.bf16.msrb.mxu1 %v10421_v50 }
  0x60   :  { %531 = vst [vmem:[#allocation3 + $0x12c] sm:$0xf] %v483_v21  ;;  %v457_v52 = vrot.slane %v11397_v34, 1  ;;  %v10406_v50 = vld [vmem:[#allocation5 + $0x100] sm:$0xff] }
  0x61   :  { %1684 = vmatmul.bf16.gmra.mxu1 %v8097_v47  ;;  %522 = vst [vmem:[#allocation3 + $0x128] sm:$0xf] %v514_v6  ;;  %v11402_v6 = vld [vmem:[%s13225_s0 + $0x68] sm:$0xff]  ;;  %v427_v47 = vrot.slane %v11397_v34, 7 }
  0x62   :  { %523 = vst [vmem:[#allocation3 + $0x14c] sm:$0xf] %v515_v45 }
  0x63   :  { %v8102_v37 = vld [vmem:[#allocation3 + $0x104] sm:$0xf0]  ;;  %549 = vst [vmem:[#allocation3 + $0x134] sm:$0xf] %v515_v45 }
  0x64   :  { %v8105_v3 = vor.u32 %v10330_v62, %v8102_v37  ;;  %507 = vst [vmem:[#allocation3 + $0x148] sm:$0xf] %v499_v42  ;;  %v501_v62 = vpack.c.bf16 %v11355_v20, %v11355_v20  ;;  %v10407_v37 = vld [vmem:[#allocation5 + $0x108] sm:$0xff] }
  0x65   :  { %2351 = vst [vmem:[#allocation3 + $0x124] sm:$0xf] %v13241_v1  ;;  %v10342_v8 = vld [vmem:[#allocation3 + $0x140] sm:$0xf0]  ;;  %1814 = vmatpush.bf16.msrb.mxu0 %v10407_v37 }
  0x66   :  { %1782 = vmatmul.bf16.gmra.mxu3 %v8105_v3  ;;  %540 = vst [vmem:[#allocation3 + $0x130] sm:$0xf] %v499_v42  ;;  %v8129_v35 = vor.u32 %v10342_v8, %v8128_v41  ;;  %v458_v42 = vrot.slane %v11402_v6, 1  ;;  %v437_v41 = vsel %vm13317_vm3, %v425_v31, %v426_v26  ;;  %v436_v31 = vsel %vm13318_vm0, %v426_v26, %v427_v47  ;;  %v10427_v26 = vld [vmem:[#allocation5 + $0x1a8] sm:$0xff] }
  0x67   :  { %532 = vst [vmem:[#allocation3 + $0x150] sm:$0xf] %v484_v54  ;;  %v10339_v53 = vld [vmem:[#allocation3 + $0x12c] sm:$0xf]  ;;  %v446_v49 = vsel %vm11192_vm10, 0.0, %v437_v41  ;;  %vm13319_vm3 = vcmp.lt.s32.totalorder %v11050_v2, 7 }
  0x68   :  { %492 = vst [vmem:[#allocation3 + $0x168] sm:$0xf] %v484_v54  ;;  %v8136_v15 = vld [vmem:[#allocation3 + $0x128] sm:$0xf]  ;;  %v465_v20 = vsel %vm13319_vm3, %v457_v52, %v458_v42  ;;  %v486_v43 = vpack.c.bf16 %v446_v49, %v446_v49  ;;  %v447_v3 = vsel %vm11213_vm11, 0.0, %v436_v31  ;;  %vm13320_vm9 = vmmov %vm13319_vm3  ;;  %v11439_v49 = vld [vmem:[%s13225_s0 + $0x70] sm:$0xff] }
  0x69   :  { %v10343_v21 = vld [vmem:[#allocation3 + $0x148] sm:$0xf0]  ;;  %558 = vst [vmem:[#allocation3 + $0x138] sm:$0xf] %v484_v54  ;;  %v10429_v54 = vld [vmem:[#allocation5 + $0x1b8] sm:$0xff]  ;;  %v477_v16 = vsel %vm11228_vm13, 0.0, %v465_v20  ;;  %1815 = vmatpush.bf16.msrb.mxu0 %v10406_v50 }
  0x6a   :  { %493 = vst [vmem:[#allocation3 + $0x18c] sm:$0xf] %v485_v10  ;;  %v8137_v36 = vor.u32 %v10343_v21, %v8136_v15  ;;  %1906 = vmatpush.bf16.msrb.mxu2 %v10429_v54  ;;  %v10420_v15 = vld [vmem:[#allocation5 + $0x170] sm:$0xff]  ;;  %v428_v54 = vrot.slane %v11402_v6, 7  ;;  %v10418_v20 = vld [vmem:[#allocation5 + $0x160] sm:$0xff] }
  0x6b   :  { %v8130_v30 = vld [vmem:[#allocation3 + $0x144] sm:$0xf0]  ;;  %533 = vst [vmem:[#allocation3 + $0x174] sm:$0xf] %v485_v10  ;;  %v10436_v21 = vld [vmem:[#allocation5 + $0x1f0] sm:$0xff]  ;;  %1858 = vmatpush.bf16.msrb.mxu1 %v10420_v15 }
  0x6c   :  { %559 = vst [vmem:[#allocation3 + $0x15c] sm:$0xf] %v485_v10  ;;  %v8133_v45 = vor.u32 %v10338_v7, %v8130_v30  ;;  %1640 = vmatmul.bf16.gmra.mxu0 %v8129_v35  ;;  %v466_v7 = vsel %vm13320_vm9, %v456_v59, %v457_v52  ;;  %v10437_v10 = vld [vmem:[#allocation5 + $0x1f8] sm:$0xff]  ;;  %vm13321_vm9 = vmmov %vm13318_vm0 }
  0x6d   :  { %524 = vst [vmem:[#allocation3 + $0x170] sm:$0xf] %v516_v24  ;;  %1738 = vmatmul.bf16.gmra.mxu2 %v8137_v36  ;;  %1955 = vmatpush.bf16.msrb.mxu3 %v10437_v10  ;;  %v476_v59 = vsel %vm11221_vm12, 0.0, %v466_v7  ;;  %v429_v7 = vrot.slane %v11439_v49, 7  ;;  %v502_v10 = vpack.c.bf16 %v11367_v46, %v11367_v46  ;;  %v459_v46 = vrot.slane %v11439_v49, 1 }
  0x6e   :  { %525 = vst [vmem:[#allocation3 + $0x194] sm:$0xf] %v517_v22  ;;  %v8138_v58 = vld [vmem:[#allocation3 + $0x14c] sm:$0xf0]  ;;  %1907 = vmatpush.bf16.msrb.mxu2 %v10428_v44  ;;  %v518_v52 = vpack.c.bf16 %v476_v59, %v476_v59  ;;  %v11451_v44 = vld [vmem:[%s13225_s0 + $0x78] sm:$0xff] }
  0x6f   :  { %550 = vst [vmem:[#allocation3 + $0x158] sm:$0xf] %v516_v24  ;;  %v8141_v38 = vor.u32 %v10339_v53, %v8138_v58  ;;  %v8164_v8 = vld [vmem:[#allocation3 + $0x168] sm:$0xf]  ;;  %v10433_v59 = vld [vmem:[#allocation5 + $0x1d8] sm:$0xff] }
  0x70   :  { %551 = vst [vmem:[#allocation3 + $0x17c] sm:$0xf] %v517_v22  ;;  %v10419_v53 = vld [vmem:[#allocation5 + $0x168] sm:$0xff] }
  0x71   :  { %1689 = vmatmul.bf16.gmra.mxu1 %v8133_v45  ;;  %576 = vst [vmem:[#allocation3 + $0x140] sm:$0xf] %v516_v24  ;;  %v10351_v24 = vld [vmem:[#allocation3 + $0x188] sm:$0xf0]  ;;  %1956 = vmatpush.bf16.msrb.mxu3 %v10436_v21  ;;  %v503_v21 = vpack.c.bf16 %v11397_v34, %v11397_v34  ;;  %v10417_v34 = vld [vmem:[#allocation5 + $0x158] sm:$0xff] }
  0x72   :  { %577 = vst [vmem:[#allocation3 + $0x164] sm:$0xf] %v517_v22  ;;  %v487_v22 = vpack.c.bf16 %v447_v3, %v447_v3  ;;  %v10435_v58 = vld [vmem:[#allocation5 + $0x1e8] sm:$0xff]  ;;  %1908 = vmatpush.bf16.msrb.mxu2 %v10427_v26  ;;  %v10348_v31 = vld [vmem:[#allocation3 + $0x174] sm:$0xf]  ;;  %1859 = vmatpush.bf16.msrb.mxu1 %v10419_v53 }
  0x73   :  { %508 = vst [vmem:[#allocation3 + $0x16c] sm:$0xf] %v500_v61 }
  0x74   :  { %509 = vst [vmem:[#allocation3 + $0x190] sm:$0xf] %v501_v62  ;;  %v8172_v30 = vld [vmem:[#allocation3 + $0x170] sm:$0xf] }
  0x75   :  { %541 = vst [vmem:[#allocation3 + $0x154] sm:$0xf] %v500_v61  ;;  %v10352_v35 = vld [vmem:[#allocation3 + $0x190] sm:$0xf0]  ;;  %1957 = vmatpush.bf16.msrb.mxu3 %v10435_v58 }
  0x76   :  { %1787 = vmatmul.bf16.gmra.mxu3 %v8141_v38  ;;  %542 = vst [vmem:[#allocation3 + $0x178] sm:$0xf] %v501_v62  ;;  %v8173_v41 = vor.u32 %v10352_v35, %v8172_v30  ;;  %v10426_v38 = vld [vmem:[#allocation5 + $0x1a0] sm:$0xff]  ;;  %1860 = vmatpush.bf16.msrb.mxu1 %v10418_v20 }
  0x77   :  { %567 = vst [vmem:[#allocation3 + $0x13c] sm:$0xf] %v500_v61  ;;  %v8165_v61 = vor.u32 %v10351_v24, %v8164_v8  ;;  %1909 = vmatpush.bf16.msrb.mxu2 %v10426_v38  ;;  %v10425_v8 = vld [vmem:[#allocation5 + $0x198] sm:$0xff]  ;;  %v434_v24 = vsel %vm13318_vm0, %v428_v54, %v429_v7  ;;  %vm13323_vm0 = vnez %v13304_v48 }
  0x78   :  { %568 = vst [vmem:[#allocation3 + $0x160] sm:$0xf] %v501_v62  ;;  %v519_v62 = vpack.c.bf16 %v477_v16, %v477_v16  ;;  %v435_v16 = vsel %vm13321_vm9, %v427_v47, %v428_v54  ;;  %vm13322_vm9 = vmmov %vm13319_vm3 }
  0x79   :  { %534 = vst [vmem:[#allocation3 + $0x198] sm:$0xf] %v486_v43  ;;  %v448_v47 = vsel %vm11256_vm14, 0.0, %v435_v16 }
  0x7a   :  { %v10347_v36 = vld [vmem:[#allocation3 + $0x16c] sm:$0xf]  ;;  %494 = vst [vmem:[#allocation3 + $0x1b0] sm:$0xf] %v486_v43  ;;  %v488_v35 = vpack.c.bf16 %v448_v47, %v448_v47  ;;  %1861 = vmatpush.bf16.msrb.mxu1 %v10417_v34 }
  0x7b   :  { %v8166_v45 = vld [vmem:[#allocation3 + $0x18c] sm:$0xf0]  ;;  %560 = vst [vmem:[#allocation3 + $0x180] sm:$0xf] %v486_v43  ;;  %v10434_v43 = vld [vmem:[#allocation5 + $0x1e0] sm:$0xff]  ;;  %1910 = vmatpush.bf16.msrb.mxu2 %v10425_v8 }
  0x7c   :  { %495 = vst [vmem:[#allocation3 + $0x1d4] sm:$0xf] %v487_v22  ;;  %v8169_v37 = vor.u32 %v10347_v36, %v8166_v45  ;;  %1645 = vmatmul.bf16.gmra.mxu0 %v8165_v61  ;;  %1958 = vmatpush.bf16.msrb.mxu3 %v10434_v43  ;;  %v449_v36 = vsel %vm11274_vm15, 0.0, %v434_v24  ;;  %v464_v45 = vsel %vm13319_vm3, %v458_v42, %v459_v46  ;;  %v10416_v61 = vld [vmem:[#allocation5 + $0x150] sm:$0xff]  ;;  %vm13324_vm3 = vnez %v13306_v14  ;;  %v10430_v24 = vld [vmem:[#allocation5 + $0x1c0] sm:$0xff] }
  0x7d   :  { %535 = vst [vmem:[#allocation3 + $0x1bc] sm:$0xf] %v487_v22  ;;  %1743 = vmatmul.bf16.gmra.mxu2 %v8173_v41  ;;  %v10432_v41 = vld [vmem:[#allocation5 + $0x1d0] sm:$0xff]  ;;  %v489_v54 = vpack.c.bf16 %v449_v36, %v449_v36  ;;  %v478_v42 = vsel %vm13323_vm0, 0.0, %v464_v45  ;;  %v10445_v36 = vld [vmem:[#allocation5 + $0x238] sm:$0xff]  ;;  %v505_v45 = vpack.c.bf16 %v11439_v49, %v11439_v49  ;;  %vm13333_vm0 = vcmp.lt.s32.totalorder %v11050_v2, 7 }
  0x7e   :  { %561 = vst [vmem:[#allocation3 + $0x1a4] sm:$0xf] %v487_v22  ;;  %v460_v22 = vrot.slane %v11451_v44, 1  ;;  %1862 = vmatpush.bf16.msrb.mxu1 %v10416_v61  ;;  %v520_v50 = vpack.c.bf16 %v478_v42, %v478_v42  ;;  %2004 = vmatpush.bf16.msra.mxu0 %v10445_v36  ;;  %v10444_v42 = vld [vmem:[#allocation5 + $0x230] sm:$0xff]  ;;  %v8010_v36 = vld [vmem:[#allocation3 + $0x3c] sm:$0xf0] }
  0x7f   :  { %526 = vst [vmem:[#allocation3 + $0x1b8] sm:$0xf] %v518_v52 }
  0x80   :  { %v8174_v3 = vld [vmem:[#allocation3 + $0x194] sm:$0xf0]  ;;  %527 = vst [vmem:[#allocation3 + $0x1dc] sm:$0xf] %v519_v62  ;;  %v463_v58 = vsel %vm13322_vm9, %v459_v46, %v460_v22  ;;  %1959 = vmatpush.bf16.msrb.mxu3 %v10433_v59  ;;  %v430_v46 = vrot.slane %v11451_v44, 7  ;;  %v10414_v59 = vld [vmem:[#allocation5 + $0x140] sm:$0xff] }
  0x81   :  { %1694 = vmatmul.bf16.gmra.mxu1 %v8169_v37  ;;  %552 = vst [vmem:[#allocation3 + $0x1a0] sm:$0xf] %v518_v52  ;;  %v8177_v15 = vor.u32 %v10348_v31, %v8174_v3  ;;  %v8200_v26 = vld [vmem:[#allocation3 + $0x1b0] sm:$0xf]  ;;  %v10423_v37 = vld [vmem:[#allocation5 + $0x188] sm:$0xff]  ;;  %v479_v38 = vsel %vm13324_vm3, 0.0, %v463_v58 }
  0x82   :  { %553 = vst [vmem:[#allocation3 + $0x1c4] sm:$0xf] %v519_v62  ;;  %v521_v8 = vpack.c.bf16 %v479_v38, %v479_v38  ;;  %vm13325_vm9 = vcmp.lt.s32.totalorder %v11050_v2, 1  ;;  %2005 = vmatpush.bf16.msra.mxu0 %v10444_v42  ;;  %vm13328_vm3 = vcmp.lt.s32.totalorder %v11050_v2, 1 }
  0x83   :  { %578 = vst [vmem:[#allocation3 + $0x188] sm:$0xf] %v518_v52  ;;  %v10360_v30 = vld [vmem:[#allocation3 + $0x1d0] sm:$0xf0]  ;;  %v259_v42 = vsel %vm13328_vm3, %v256_v40, %v11053_v4  ;;  %vm13331_vm3 = vcmp.lt.s32.totalorder %v11050_v2, 7 }
  0x84   :  { %579 = vst [vmem:[#allocation3 + $0x1ac] sm:$0xf] %v519_v62  ;;  %v10424_v52 = vld [vmem:[#allocation5 + $0x190] sm:$0xff]  ;;  %v8201_v31 = vor.u32 %v10360_v30, %v8200_v26  ;;  %1960 = vmatpush.bf16.msrb.mxu3 %v10432_v41  ;;  %v10357_v47 = vld [vmem:[#allocation3 + $0x1bc] sm:$0xf]  ;;  %v504_v30 = vpack.c.bf16 %v11402_v6, %v11402_v6  ;;  %v290_v40 = vsel %vm13331_vm3, %v287_v60, %v11071_v25  ;;  %vm13332_vm3 = vcmp.lt.s32.totalorder %v11050_v2, 1 }
  0x85   :  { %510 = vst [vmem:[#allocation3 + $0x1b4] sm:$0xf] %v502_v10  ;;  %1911 = vmatpush.bf16.msrb.mxu2 %v10424_v52 }
  0x86   :  { %1792 = vmatmul.bf16.gmra.mxu3 %v8177_v15  ;;  %511 = vst [vmem:[#allocation3 + $0x1d8] sm:$0xf] %v503_v21  ;;  %v8208_v53 = vld [vmem:[#allocation3 + $0x1b8] sm:$0xf]  ;;  %v10415_v15 = vld [vmem:[#allocation5 + $0x148] sm:$0xff] }
  0x87   :  { %543 = vst [vmem:[#allocation3 + $0x19c] sm:$0xf] %v502_v10  ;;  %v10361_v62 = vld [vmem:[#allocation3 + $0x1d8] sm:$0xf0]  ;;  %1863 = vmatpush.bf16.msrb.mxu1 %v10415_v15  ;;  %v8002_v15 = vld [vmem:[#allocation3 + $0x34] sm:$0xf0] }
  0x88   :  { %544 = vst [vmem:[#allocation3 + $0x1c0] sm:$0xf] %v503_v21  ;;  %v8209_v20 = vor.u32 %v10361_v62, %v8208_v53 }
  0x89   :  { %569 = vst [vmem:[#allocation3 + $0x184] sm:$0xf] %v502_v10  ;;  %1912 = vmatpush.bf16.msrb.mxu2 %v10423_v37  ;;  %v10431_v10 = vld [vmem:[#allocation5 + $0x1c8] sm:$0xff] }
  0x8a   :  { %570 = vst [vmem:[#allocation3 + $0x1a8] sm:$0xf] %v503_v21  ;;  %v10422_v21 = vld [vmem:[#allocation5 + $0x180] sm:$0xff]  ;;  %1961 = vmatpush.bf16.msrb.mxu3 %v10431_v10  ;;  %v10309_v10 = vld [vmem:[#allocation3 + $0x38] sm:$0xf0] }
  0x8b   :  { %536 = vst [vmem:[#allocation3 + $0x1e0] sm:$0xf] %v488_v35  ;;  %1864 = vmatpush.bf16.msrb.mxu1 %v10414_v59 }
  0x8c   :  { %v10356_v43 = vld [vmem:[#allocation3 + $0x1b4] sm:$0xf]  ;;  %496 = vst [vmem:[#allocation3 + $0x1f8] sm:$0xf] %v488_v35  ;;  %1650 = vmatmul.bf16.gmra.mxu0 %v8201_v31 }
  0x8d   :  { %v8202_v3 = vld [vmem:[#allocation3 + $0x1d4] sm:$0xf0]  ;;  %562 = vst [vmem:[#allocation3 + $0x1c8] sm:$0xf] %v488_v35  ;;  %1748 = vmatmul.bf16.gmra.mxu2 %v8209_v20  ;;  %v433_v35 = vsel %vm13325_vm9, %v429_v7, %v430_v46 }
  0x8e   :  { %v8205_v16 = vor.u32 %v10356_v43, %v8202_v3  ;;  %497 = vst [vmem:[#allocation3 + $0x21c] sm:$0xf] %v489_v54  ;;  %1913 = vmatpush.bf16.msrb.mxu2 %v10422_v21  ;;  %1962 = vmatpush.bf16.msrb.mxu3 %v10430_v24  ;;  %v450_v6 = vsel %vm11325_vm4, 0.0, %v433_v35  ;;  %v8000_v43 = vld [vmem:[#allocation3 + $0x10] sm:$0xf]  ;;  %vm11517_vm4 = vcmp.eq.s32.totalorder %v121_v39, 7 }
  0x8f   :  { %537 = vst [vmem:[#allocation3 + $0x204] sm:$0xf] %v489_v54  ;;  %v530_v61 = vpack.c.bf16 %v450_v6, %v450_v6  ;;  %v10308_v3 = vld [vmem:[#allocation3 + $0x30] sm:$0xf0]  ;;  %v10305_v35 = vld [vmem:[#allocation3 + $0x1c] sm:$0xf] }
  0x90   :  { %563 = vst [vmem:[#allocation3 + $0x1ec] sm:$0xf] %v489_v54  ;;  %v8001_v21 = vor.u32 %v10308_v3, %v8000_v43  ;;  %v8013_v6 = vor.u32 %v10305_v35, %v8010_v36  ;;  %v8044_v3 = vld [vmem:[#allocation3 + $0x60] sm:$0xf] }
  0x91   :  { %1699 = vmatmul.bf16.gmra.mxu1 %v8205_v16  ;;  %528 = vst [vmem:[#allocation3 + $0x200] sm:$0xf] %v520_v50  ;;  %v11490_v16 = vld [vmem:[#allocation7] ss:$0 sm:$0xff] }
  0x92   :  { %v8210_v34 = vld [vmem:[#allocation3 + $0x1dc] sm:$0xf0]  ;;  %529 = vst [vmem:[#allocation3 + $0x224] sm:$0xf] %v521_v8 }
  0x93   :  { %v8213_v26 = vor.u32 %v10357_v47, %v8210_v34  ;;  %554 = vst [vmem:[#allocation3 + $0x1e8] sm:$0xf] %v520_v50  ;;  %v8236_v52 = vld [vmem:[#allocation3 + $0x1f8] sm:$0xf] }
  0x94   :  { %555 = vst [vmem:[#allocation3 + $0x20c] sm:$0xf] %v521_v8 }
  0x95   :  { %580 = vst [vmem:[#allocation3 + $0x1d0] sm:$0xf] %v520_v50  ;;  %v10369_v53 = vld [vmem:[#allocation3 + $0x218] sm:$0xf0]  ;;  %v8008_v50 = vld [vmem:[#allocation3 + $0x18] sm:$0xf] }
  0x96   :  { %1797 = vmatmul.bf16.gmra.mxu3 %v8213_v26  ;;  %581 = vst [vmem:[#allocation3 + $0x1f4] sm:$0xf] %v521_v8  ;;  %v8237_v49 = vor.u32 %v10369_v53, %v8236_v52  ;;  %v10366_v38 = vld [vmem:[#allocation3 + $0x204] sm:$0xf]  ;;  %v10304_v8 = vld [vmem:[#allocation3 + $0x14] sm:$0xf]  ;;  %v8009_v47 = vor.u32 %v10309_v10, %v8008_v50  ;;  %v367_v10 = vpack.c.bf16 %v11267_v51, %v11267_v51 }
  0x97   :  { %512 = vst [vmem:[#allocation3 + $0x1fc] sm:$0xf] %v504_v30  ;;  %v8005_v26 = vor.u32 %v10304_v8, %v8002_v15  ;;  %v11494_v53 = vadd.s32 72, %v11050_v2  ;;  %v10318_v50 = vld [vmem:[#allocation3 + $0x80] sm:$0xf0]  ;;  %v10855_v15 = vld [vmem:[#allocation5 + $0x848] sm:$0xff] }
  0x98   :  { %513 = vst [vmem:[#allocation3 + $0x220] sm:$0xf] %v505_v45  ;;  %v8244_v58 = vld [vmem:[#allocation3 + $0x200] sm:$0xf] }
  0x99   :  { %v10370_v7 = vld [vmem:[#allocation3 + $0x220] sm:$0xf0]  ;;  %545 = vst [vmem:[#allocation3 + $0x1e4] sm:$0xf] %v504_v30 }
  0x9a   :  { %546 = vst [vmem:[#allocation3 + $0x208] sm:$0xf] %v505_v45  ;;  %v8245_v41 = vor.u32 %v10370_v7, %v8244_v58 }
  0x9b   :  { %571 = vst [vmem:[#allocation3 + $0x1cc] sm:$0xf] %v504_v30 }
  0x9c   :  { %572 = vst [vmem:[#allocation3 + $0x1f0] sm:$0xf] %v505_v45  ;;  %1655 = vmatmul.bf16.gmra.mxu0 %v8237_v49  ;;  %v10443_v45 = vld [vmem:[#allocation5 + $0x228] sm:$0xff]  ;;  %v13243_v49 = vand.u32 7, %v11494_v53 }
  0x9d   :  { %538 = vst [vmem:[#allocation3 + $0x228] sm:$0xf] %v530_v61  ;;  %1753 = vmatmul.bf16.gmra.mxu2 %v8245_v41  ;;  %2006 = vmatpush.bf16.msra.mxu0 %v10443_v45 }
  0x9e   :  { %v10365_v62 = vld [vmem:[#allocation3 + $0x1fc] sm:$0xf]  ;;  %564 = vst [vmem:[#allocation3 + $0x210] sm:$0xf] %v530_v61  ;;  %vm11502_vm9 = vcmp.eq.s32.totalorder %v13243_v49, 0 }
  0x9f   :  { %v8238_v37 = vld [vmem:[#allocation3 + $0x21c] sm:$0xf0]  ;;  %v278_v43 = vsel %vm11502_vm9, 0.0, %v259_v42  ;;  %375 = vst [vmem:[#allocation3 + $0x10c] sm:$0xf] %v367_v10 }
  0xa0   :  { %v8241_v54 = vor.u32 %v10365_v62, %v8238_v37  ;;  %v385_v8 = vpack.c.bf16 %v278_v43, %v278_v43  ;;  %401 = vst [vmem:[#allocation3 + $0xf4] sm:$0xf] %v367_v10  ;;  %v8072_v10 = vld [vmem:[#allocation3 + $0xa0] sm:$0xf] }
  0xa2   :  { %1704 = vmatmul.bf16.gmra.mxu1 %v8241_v54  ;;  %393 = vst [vmem:[#allocation3 + $0x114] sm:$0xf] %v385_v8  ;;  %v10326_v8 = vld [vmem:[#allocation3 + $0xc0] sm:$0xf0] }
  0xa3   :  { %v10854_v54 = vld [vmem:[#allocation5 + $0x840] sm:$0xff] }
  0xa4   :  { %v8246_v31 = vld [vmem:[#allocation3 + $0x224] sm:$0xf0] }
  0xa5   :  { %v8249_v20 = vor.u32 %v10366_v38, %v8246_v31  ;;  %v8036_v31 = vld [vmem:[#allocation3 + $0x58] sm:$0xf] }
  0xa7   :  { %1802 = vmatmul.bf16.gmra.mxu3 %v8249_v20  ;;  %v10317_v20 = vld [vmem:[#allocation3 + $0x78] sm:$0xf0] }
  0xa8   :  { %v8037_v39 = vor.u32 %v10317_v20, %v8036_v31 }
  0xa9   :  { %v1621_v24 = vpop.f32.mrf.mxu0 }
  0xaa   :  { %v1622_v34 = vadd.f32 %v11490_v16, %v1621_v24  ;;  %v10313_v24 = vld [vmem:[#allocation3 + $0x5c] sm:$0xf] }
  0xab   :  { %v1670_v59 = vpop.f32.mrf.mxu1 }
  0xac   :  { %v1671_v30 = vadd.f32 %v1670_v59, %v1622_v34  ;;  %1816 = vmatmul.bf16.vlgmr.msrb.gmra.mxu0 %v8001_v21  ;;  %v308_v21 = vsel %vm11517_vm4, 0.0, %v290_v40  ;;  %v8038_v34 = vld [vmem:[#allocation3 + $0x7c] sm:$0xf0]  ;;  %v8080_v40 = vld [vmem:[#allocation3 + $0xa8] sm:$0xf] }
  0xad   :  { %1914 = vmatmul.bf16.vlgmr.msrb.gmra.mxu2 %v8009_v47  ;;  %v376_v59 = vpack.c.bf16 %v308_v21, %v308_v21  ;;  %v8041_v45 = vor.u32 %v10313_v24, %v8038_v34  ;;  %v10327_v21 = vld [vmem:[#allocation3 + $0xc8] sm:$0xf0]  ;;  %v10322_v24 = vld [vmem:[#allocation3 + $0xa4] sm:$0xf]  ;;  %v8074_v34 = vld [vmem:[#allocation3 + $0xc4] sm:$0xf0] }
  0xaf   :  { %384 = vst [vmem:[#allocation3 + $0x110] sm:$0xf] %v376_v59 }
  0xb0   :  { %v1719_v52 = vpop.f32.mrf.mxu2  ;;  %410 = vst [vmem:[#allocation3 + $0xf8] sm:$0xf] %v376_v59 }
  0xb1   :  { %v1720_v58 = vadd.f32 %v1719_v52, %v1671_v30  ;;  %v1623_v61 = vpop.f32.mrf.mxu0  ;;  %v8045_v30 = vor.u32 %v10318_v50, %v8044_v3  ;;  %v10314_v52 = vld [vmem:[#allocation3 + $0x64] sm:$0xf] }
  0xb2   :  { %1865 = vmatmul.bf16.vlgmr.msrb.gmra.mxu1 %v8005_v26  ;;  %v1624_v41 = vadd.f32 %v11490_v16, %v1623_v61  ;;  %v11531_v61 = vld [vmem:[#allocation3 + $0x114] sm:$0xf0] }
  0xb3   :  { %v1768_v7 = vpop.f32.mrf.mxu3  ;;  %v1672_v37 = vpop.f32.mrf.mxu1  ;;  %2247 = vst [vmem:[#allocation3 + $0x118] sm:$0xf] %v13241_v1 }
  0xb4   :  { %v11498_v62 = vadd.f32 %v1768_v7, %v1720_v58  ;;  %v1673_v38 = vadd.f32 %v1672_v37, %v1624_v41  ;;  %v8046_v58 = vld [vmem:[#allocation3 + $0x84] sm:$0xf0]  ;;  %v10442_v7 = vld [vmem:[#allocation5 + $0x220] sm:$0xff] }
  0xb5   :  { %2007 = vmatpush.bf16.msra.mxu0 %v10442_v7  ;;  %v8049_v41 = vor.u32 %v10314_v52, %v8046_v58  ;;  %v10323_v52 = vld [vmem:[#allocation3 + $0xac] sm:$0xf]  ;;  %v8082_v58 = vld [vmem:[#allocation3 + $0xcc] sm:$0xf0] }
  0xb6   :  { %v8085_v7 = vor.u32 %v10323_v52, %v8082_v58 }
  0xb7   :  { %1963 = vmatmul.bf16.vlgmr.msrb.gmra.mxu3 %v8013_v6 }
  0xb8   :  { %v1721_v47 = vpop.f32.mrf.mxu2 }
  0xb9   :  { %v1722_v26 = vadd.f32 %v1721_v47, %v1673_v38  ;;  %v1626_v35 = vpop.f32.mrf.mxu0 }
  0xba   :  { %v1627_v51 = vadd.f32 %v11490_v16, %v1626_v35 }
  0xbb   :  { %v1770_v29 = vpop.f32.mrf.mxu3  ;;  %v1675_v60 = vpop.f32.mrf.mxu1 }
  0xbc   :  { %v11529_v36 = vadd.f32 %v1770_v29, %v1722_v26  ;;  %v1676_v6 = vadd.f32 %v1675_v60, %v1627_v51  ;;  %1821 = vmatmul.bf16.gmra.mxu0 %v8037_v39  ;;  %v8073_v26 = vor.u32 %v10326_v8, %v8072_v10  ;;  %v8081_v29 = vor.u32 %v10327_v21, %v8080_v40  ;;  %v8108_v8 = vld [vmem:[#allocation3 + $0xe8] sm:$0xf]  ;;  %v10335_v40 = vld [vmem:[#allocation3 + $0x108] sm:$0xf0]  ;;  %v8116_v21 = vld [vmem:[#allocation3 + $0xf0] sm:$0xf] }
  0xbd   :  { %1919 = vmatmul.bf16.gmra.mxu2 %v8045_v30 }
  0xc0   :  { %v1724_v37 = vpop.f32.mrf.mxu2 }
  0xc1   :  { %v1725_v42 = vadd.f32 %v1724_v37, %v1676_v6  ;;  %v1628_v38 = vpop.f32.mrf.mxu0  ;;  %v10441_v37 = vld [vmem:[#allocation5 + $0x218] sm:$0xff] }
  0xc2   :  { %1870 = vmatmul.bf16.gmra.mxu1 %v8041_v45  ;;  %v1629_v20 = vadd.f32 %v11490_v16, %v1628_v38  ;;  %v8077_v45 = vor.u32 %v10322_v24, %v8074_v34  ;;  %2008 = vmatpush.bf16.msra.mxu0 %v10441_v37  ;;  %v10331_v34 = vld [vmem:[#allocation3 + $0xec] sm:$0xf] }
  0xc3   :  { %v1677_v3 = vpop.f32.mrf.mxu1 }
  0xc4   :  { %v1678_v50 = vadd.f32 %v1677_v3, %v1629_v20 }
  0xc5   :  { %v1773_v31 = vpop.f32.mrf.mxu3 }
  0xc6   :  { %v11535_v43 = vadd.f32 %v1773_v31, %v1725_v42 }
  0xc7   :  { %1968 = vmatmul.bf16.gmra.mxu3 %v8049_v41 }
  0xc8   :  { %v1726_v47 = vpop.f32.mrf.mxu2 }
  0xc9   :  { %v1727_v59 = vadd.f32 %v1726_v47, %v1678_v50  ;;  %v1631_v39 = vpop.f32.mrf.mxu0  ;;  %v10336_v47 = vld [vmem:[#allocation3 + $0x110] sm:$0xf0] }
  0xca   :  { %v1632_v35 = vadd.f32 %v11490_v16, %v1631_v39  ;;  %v8117_v39 = vor.u32 %v10336_v47, %v8116_v21  ;;  %v10344_v21 = vld [vmem:[#allocation3 + $0x150] sm:$0xf0]  ;;  %v8152_v47 = vld [vmem:[#allocation3 + $0x138] sm:$0xf] }
  0xcc   :  { %v1680_v60 = vpop.f32.mrf.mxu1  ;;  %1826 = vmatmul.bf16.gmra.mxu0 %v8073_v26 }
  0xcd   :  { %v1775_v30 = vpop.f32.mrf.mxu3  ;;  %v1681_v6 = vadd.f32 %v1680_v60, %v1632_v35  ;;  %1924 = vmatmul.bf16.gmra.mxu2 %v8081_v29  ;;  %v8109_v29 = vor.u32 %v10335_v40, %v8108_v8  ;;  %v8144_v8 = vld [vmem:[#allocation3 + $0x130] sm:$0xf] }
  0xce   :  { %v11538_v51 = vadd.f32 %v1775_v30, %v1727_v59  ;;  %v8110_v59 = vld [vmem:[#allocation3 + $0x10c] sm:$0xf0] }
  0xd0   :  { %v1729_v41 = vpop.f32.mrf.mxu2 }
  0xd1   :  { %v1730_v42 = vadd.f32 %v1729_v41, %v1681_v6  ;;  %v1633_v38 = vpop.f32.mrf.mxu0 }
  0xd2   :  { %1875 = vmatmul.bf16.gmra.mxu1 %v8077_v45  ;;  %v1634_v31 = vadd.f32 %v11490_v16, %v1633_v38  ;;  %v8113_v45 = vor.u32 %v10331_v34, %v8110_v59 }
  0xd4   :  { %v1682_v20 = vpop.f32.mrf.mxu1 }
  0xd5   :  { %v1683_v10 = vadd.f32 %v1682_v20, %v1634_v31 }
  0xd7   :  { %1973 = vmatmul.bf16.gmra.mxu3 %v8085_v7  ;;  %v1778_v3 = vpop.f32.mrf.mxu3  ;;  %v10332_v7 = vld [vmem:[#allocation3 + $0xf4] sm:$0xf] }
  0xd8   :  { %v11541_v50 = vadd.f32 %v1778_v3, %v1730_v42  ;;  %v1731_v24 = vpop.f32.mrf.mxu2  ;;  %v8121_v41 = vor.u32 %v10332_v7, %v11531_v61  ;;  %v10440_v42 = vld [vmem:[#allocation5 + $0x210] sm:$0xff]  ;;  %v8146_v61 = vld [vmem:[#allocation3 + $0x154] sm:$0xf0]  ;;  %v10341_v7 = vld [vmem:[#allocation3 + $0x13c] sm:$0xf] }
  0xd9   :  { %v1732_v26 = vadd.f32 %v1731_v24, %v1683_v10  ;;  %v1636_v30 = vpop.f32.mrf.mxu0  ;;  %2009 = vmatpush.bf16.msra.mxu0 %v10440_v42  ;;  %v10345_v24 = vld [vmem:[#allocation3 + $0x158] sm:$0xf0] }
  0xda   :  { %v1637_v35 = vadd.f32 %v11490_v16, %v1636_v30  ;;  %v8153_v30 = vor.u32 %v10345_v24, %v8152_v47 }
  0xdc   :  { %1831 = vmatmul.bf16.gmra.mxu0 %v8109_v29 }
  0xdd   :  { %1929 = vmatmul.bf16.gmra.mxu2 %v8117_v39  ;;  %v8145_v39 = vor.u32 %v10344_v21, %v8144_v8  ;;  %v8180_v21 = vld [vmem:[#allocation3 + $0x178] sm:$0xf] }
  0xde   :  { %v1685_v60 = vpop.f32.mrf.mxu1 }
  0xdf   :  { %v1780_v6 = vpop.f32.mrf.mxu3  ;;  %v1686_v58 = vadd.f32 %v1685_v60, %v1637_v35 }
  0xe0   :  { %v11544_v52 = vadd.f32 %v1780_v6, %v1732_v26  ;;  %v1734_v37 = vpop.f32.mrf.mxu2  ;;  %v10340_v26 = vld [vmem:[#allocation3 + $0x134] sm:$0xf] }
  0xe1   :  { %v1735_v38 = vadd.f32 %v1734_v37, %v1686_v58  ;;  %v1638_v31 = vpop.f32.mrf.mxu0  ;;  %v8149_v6 = vor.u32 %v10340_v26, %v8146_v61  ;;  %v8188_v26 = vld [vmem:[#allocation3 + $0x180] sm:$0xf]  ;;  %v10354_v61 = vld [vmem:[#allocation3 + $0x1a0] sm:$0xf0] }
  0xe2   :  { %1880 = vmatmul.bf16.gmra.mxu1 %v8113_v45  ;;  %v1639_v20 = vadd.f32 %v11490_v16, %v1638_v31 }
  0xe6   :  { %v1687_v3 = vpop.f32.mrf.mxu1 }
  0xe7   :  { %1978 = vmatmul.bf16.gmra.mxu3 %v8121_v41  ;;  %v1688_v10 = vadd.f32 %v1687_v3, %v1639_v20  ;;  %v8154_v41 = vld [vmem:[#allocation3 + $0x15c] sm:$0xf0]  ;;  %v10439_v20 = vld [vmem:[#allocation5 + $0x208] sm:$0xff] }
  0xe8   :  { %v1736_v59 = vpop.f32.mrf.mxu2  ;;  %2010 = vmatpush.bf16.msra.mxu0 %v10439_v20  ;;  %v10350_v20 = vld [vmem:[#allocation3 + $0x184] sm:$0xf] }
  0xe9   :  { %v1783_v40 = vpop.f32.mrf.mxu3  ;;  %v1737_v29 = vadd.f32 %v1736_v59, %v1688_v10  ;;  %v1641_v35 = vpop.f32.mrf.mxu0  ;;  %v10353_v59 = vld [vmem:[#allocation3 + $0x198] sm:$0xf0] }
  0xea   :  { %v11548_v34 = vadd.f32 %v1783_v40, %v1735_v38  ;;  %v1642_v60 = vadd.f32 %v11490_v16, %v1641_v35  ;;  %v8157_v38 = vor.u32 %v10341_v7, %v8154_v41  ;;  %v432_v40 = vsel %vm13332_vm3, %v430_v46, %v11053_v4 }
  0xeb   :  { %v451_v47 = vsel %vm11502_vm9, 0.0, %v432_v40  ;;  %v8181_v7 = vor.u32 %v10353_v59, %v8180_v21  ;;  %v8189_v41 = vor.u32 %v10354_v61, %v8188_v26  ;;  %v8262_v26 = vld [vmem:[#allocation3 + $0x234] sm:$0xf0] }
  0xec   :  { %1836 = vmatmul.bf16.gmra.mxu0 %v8145_v39  ;;  %v557_v39 = vpack.c.bf16 %v451_v47, %v451_v47  ;;  %2419 = vst [vmem:[#allocation3 + $0x238] sm:$0xf] %v13241_v1 }
  0xed   :  { %1934 = vmatmul.bf16.gmra.mxu2 %v8153_v30  ;;  %v462_v30 = vsel %vm13333_vm0, %v460_v22, %v11071_v25 }
  0xee   :  { %v1690_v45 = vpop.f32.mrf.mxu1  ;;  %v480_v46 = vsel %vm11517_vm4, 0.0, %v462_v30  ;;  %565 = vst [vmem:[#allocation3 + $0x234] sm:$0xf] %v557_v39  ;;  %v8216_v39 = vld [vmem:[#allocation3 + $0x1c0] sm:$0xf] }
  0xef   :  { %v1691_v58 = vadd.f32 %v1690_v45, %v1642_v60  ;;  %v10349_v45 = vld [vmem:[#allocation3 + $0x17c] sm:$0xf] }
  0xf0   :  { %v1739_v31 = vpop.f32.mrf.mxu2 }
  0xf1   :  { %v1785_v37 = vpop.f32.mrf.mxu3  ;;  %v1740_v3 = vadd.f32 %v1739_v31, %v1691_v58  ;;  %v11553_v10 = vpop.f32.mrf.mxu0  ;;  %v548_v58 = vpack.c.bf16 %v480_v46, %v480_v46  ;;  %v10362_v46 = vld [vmem:[#allocation3 + $0x1e0] sm:$0xf0] }
  0xf2   :  { %v11551_v42 = vadd.f32 %v1785_v37, %v1737_v29  ;;  %1885 = vmatmul.bf16.gmra.mxu1 %v8149_v6  ;;  %v539_v29 = vpack.c.bf16 %v11451_v44, %v11451_v44  ;;  %v8182_v6 = vld [vmem:[#allocation3 + $0x19c] sm:$0xf0] }
  0xf3   :  { %v8185_v22 = vor.u32 %v10349_v45, %v8182_v6  ;;  %556 = vst [vmem:[#allocation3 + $0x230] sm:$0xf] %v548_v58  ;;  %v8224_v45 = vld [vmem:[#allocation3 + $0x1c8] sm:$0xf]  ;;  %v10363_v6 = vld [vmem:[#allocation3 + $0x1e8] sm:$0xf0] }
  0xf4   :  { %547 = vst [vmem:[#allocation3 + $0x22c] sm:$0xf] %v539_v29 }
  0xf5   :  { %573 = vst [vmem:[#allocation3 + $0x214] sm:$0xf] %v539_v29 }
  0xf6   :  { %v11555_v8 = vpop.f32.mrf.mxu1  ;;  %582 = vst [vmem:[#allocation3 + $0x218] sm:$0xf] %v548_v58 }
  0xf7   :  { %1983 = vmatmul.bf16.gmra.mxu3 %v8157_v38 }
  0xf8   :  { %v11575_v60 = vpop.f32.mrf.mxu2 }
  0xf9   :  { %v1788_v24 = vpop.f32.mrf.mxu3  ;;  %v1646_v37 = vpop.f32.mrf.mxu0 }
  0xfa   :  { %v11571_v35 = vadd.f32 %v1788_v24, %v1740_v3  ;;  %v1647_v44 = vadd.f32 %v11490_v16, %v1646_v37  ;;  %v8190_v3 = vld [vmem:[#allocation3 + $0x1a4] sm:$0xf0]  ;;  %v10438_v24 = vld [vmem:[#allocation5 + $0x200] sm:$0xff] }
  0xfb   :  { %v8193_v47 = vor.u32 %v10350_v20, %v8190_v3  ;;  %2011 = vmatpush.bf16.msra.mxu0 %v10438_v24  ;;  %v8218_v37 = vld [vmem:[#allocation3 + $0x1e4] sm:$0xf0]  ;;  %v8226_v24 = vld [vmem:[#allocation3 + $0x1ec] sm:$0xf0] }
  0xfc   :  { %1841 = vmatmul.bf16.gmra.mxu0 %v8181_v7 }
  0xfd   :  { %1939 = vmatmul.bf16.gmra.mxu2 %v8189_v41  ;;  %v10358_v41 = vld [vmem:[#allocation3 + $0x1c4] sm:$0xf] }
  0xfe   :  { %v1695_v38 = vpop.f32.mrf.mxu1  ;;  %v8221_v3 = vor.u32 %v10358_v41, %v8218_v37  ;;  %v8260_v41 = vld [vmem:[#allocation3 + $0x210] sm:$0xf]  ;;  %v10372_v37 = vld [vmem:[#allocation3 + $0x230] sm:$0xf0] }
  0xff   :  { %v1696_v31 = vadd.f32 %v1695_v38, %v1647_v44  ;;  %v8217_v44 = vor.u32 %v10362_v46, %v8216_v39  ;;  %v8225_v38 = vor.u32 %v10363_v6, %v8224_v45  ;;  %v8252_v46 = vld [vmem:[#allocation3 + $0x208] sm:$0xf]  ;;  %v10371_v6 = vld [vmem:[#allocation3 + $0x228] sm:$0xf0] }
 0x100   :  { %v1744_v21 = vpop.f32.mrf.mxu2 }
 0x101   :  { %v11578_v40 = vpop.f32.mrf.mxu3  ;;  %v1745_v59 = vadd.f32 %v1744_v21, %v1696_v31  ;;  %v11580_v61 = vpop.f32.mrf.mxu0 }
 0x102   :  { %1890 = vmatmul.bf16.gmra.mxu1 %v8185_v22 }
 0x106   :  { %v11583_v29 = vpop.f32.mrf.mxu1 }
 0x107   :  { %1988 = vmatmul.bf16.gmra.mxu3 %v8193_v47  ;;  %v10359_v47 = vld [vmem:[#allocation3 + $0x1cc] sm:$0xf] }
 0x108   :  { %v11587_v7 = vpop.f32.mrf.mxu2 }
 0x109   :  { %v1793_v30 = vpop.f32.mrf.mxu3  ;;  %v1651_v22 = vpop.f32.mrf.mxu0 }
 0x10a   :  { %v11585_v58 = vadd.f32 %v1793_v30, %v1745_v59  ;;  %v1652_v31 = vadd.f32 %v11490_v16, %v1651_v22  ;;  %v8229_v59 = vor.u32 %v10359_v47, %v8226_v24  ;;  %v10367_v22 = vld [vmem:[#allocation3 + $0x20c] sm:$0xf] }
 0x10c   :  { %1846 = vmatmul.bf16.gmra.mxu0 %v8217_v44 }
 0x10d   :  { %1944 = vmatmul.bf16.gmra.mxu2 %v8225_v38 }
 0x10e   :  { %v1700_v20 = vpop.f32.mrf.mxu1 }
 0x10f   :  { %v1701_v21 = vadd.f32 %v1700_v20, %v1652_v31  ;;  %v8254_v31 = vld [vmem:[#allocation3 + $0x22c] sm:$0xf0]  ;;  %v8253_v20 = vor.u32 %v10371_v6, %v8252_v46  ;;  %v8016_v46 = vld [vmem:[#allocation3 + $0x20] sm:$0xf]  ;;  %v10310_v6 = vld [vmem:[#allocation3 + $0x40] sm:$0xf0] }
 0x110   :  { %v1749_v30 = vpop.f32.mrf.mxu2  ;;  %v8257_v24 = vor.u32 %v10367_v22, %v8254_v31 }
 0x111   :  { %v11590_v0 = vpop.f32.mrf.mxu3  ;;  %v1750_v1 = vadd.f32 %v1749_v30, %v1701_v21  ;;  %v11592_v49 = vpop.f32.mrf.mxu0 }
 0x112   :  { %13334 = vst [vmem:[#allocation15_spill] sm:$0xff] %v11590_v0  ;;  %1895 = vmatmul.bf16.gmra.mxu1 %v8221_v3  ;;  %v8261_v3 = vor.u32 %v10372_v37, %v8260_v41  ;;  %v8017_v37 = vor.u32 %v10310_v6, %v8016_v46  ;;  %v10328_v46 = vld [vmem:[#allocation3 + $0xd0] sm:$0xf0] }
 0x113   :  { %13335 = vst [vmem:[#allocation16_spill] sm:$0xff] %v11592_v49  ;;  %v10525_v49 = vld [vmem:[#allocation5 + $0x278] sm:$0xff] }
 0x114   :  { %3459 = vmatpush.bf16.msra.mxu1 %v10525_v49  ;;  %v13340_v49 = vand.u32 7, %v11494_v53  ;;  %v10523_v53 = vld [vmem:[#allocation5 + $0x268] sm:$0xff] }
 0x116   :  { %v11594_v39 = vpop.f32.mrf.mxu1  ;;  %vm200_vm0 = vcmp.eq.s32.totalorder %v13340_v49, 7 }
 0x117   :  { %13336 = vst [vmem:[#allocation17_spill] sm:$0xff] %v11594_v39  ;;  %1993 = vmatmul.bf16.gmra.mxu3 %v8229_v59  ;;  %v10368_v59 = vld [vmem:[#allocation3 + $0x214] sm:$0xf] }
 0x118   :  { %v11598_v38 = vpop.f32.mrf.mxu2 }
 0x119   :  { %v1798_v45 = vpop.f32.mrf.mxu3  ;;  %13337 = vst [vmem:[#allocation18_spill] sm:$0xff] %v11598_v38  ;;  %v1656_v47 = vpop.f32.mrf.mxu0 }
 0x11a   :  { %v11596_v44 = vadd.f32 %v1798_v45, %v1750_v1  ;;  %v1657_v21 = vadd.f32 %v11490_v16, %v1656_v47  ;;  %v8265_v1 = vor.u32 %v10368_v59, %v8262_v26  ;;  %v8052_v47 = vld [vmem:[#allocation3 + $0x68] sm:$0xf] }
 0x11c   :  { %1851 = vmatmul.bf16.gmra.mxu0 %v8253_v20  ;;  %v10524_v20 = vld [vmem:[#allocation5 + $0x270] sm:$0xff] }
 0x11d   :  { %1949 = vmatmul.bf16.gmra.mxu2 %v8261_v3  ;;  %3460 = vmatpush.bf16.msra.mxu1 %v10524_v20  ;;  %v309_v3 = vsel %vm200_vm0, 0.0, %v11071_v25  ;;  %vm13351_vm0 = vcmp.lt.s32.totalorder %v11050_v2, 7 }
 0x11f   :  { %v1705_v30 = vpop.f32.mrf.mxu1 }
 0x120   :  { %v1706_v12 = vadd.f32 %v1705_v30, %v1657_v21  ;;  %v1754_v45 = vpop.f32.mrf.mxu2  ;;  %v11616_v21 = vpack.c.bf16 %v309_v3, %v309_v3 }
 0x121   :  { %v11601_v39 = vpop.f32.mrf.mxu3  ;;  %v11603_v0 = vpop.f32.mrf.mxu0  ;;  %3461 = vmatpush.bf16.msra.mxu1 %v10523_v53 }
 0x122   :  { %13338 = vst [vmem:[#allocation19_spill] sm:$0xff] %v11601_v39  ;;  %1900 = vmatmul.bf16.gmra.mxu1 %v8257_v24  ;;  %v1755_v38 = vadd.f32 %v1754_v45, %v1706_v12  ;;  %v8088_v45 = vld [vmem:[#allocation3 + $0xb0] sm:$0xf]  ;;  %v10538_v39 = vld [vmem:[#allocation5 + $0x2e0] sm:$0xff] }
 0x123   :  { %13339 = vst [vmem:[#allocation20_spill] sm:$0xff] %v11603_v0  ;;  %v8089_v6 = vor.u32 %v10328_v46, %v8088_v45  ;;  %v10355_v46 = vld [vmem:[#allocation3 + $0x1a8] sm:$0xf0] }
 0x124   :  { %13341 = vst [vmem:[#allocation21_spill] sm:$0xff] %v11616_v21 }
 0x125   :  { %411 = vst [vmem:[#allocation3 + $0x11c] sm:$0xf] %v11616_v21 }
 0x126   :  { %583 = vst [vmem:[#allocation3 + $0x23c] sm:$0xf] %v11616_v21 }
 0x127   :  { %1998 = vmatmul.bf16.gmra.mxu3 %v8265_v1 }
 0x129   :  { %v1817_v22 = vpop.f32.mrf.mxu0 }
 0x12a   :  { %v1803_v16 = vpop.f32.mrf.mxu3  ;;  %v11608_v31 = vadd.f32 %v1817_v22, %v11498_v62 }
 0x12b   :  { %v11605_v41 = vadd.f32 %v1803_v16, %v1755_v38  ;;  %v10319_v38 = vld [vmem:[#allocation3 + $0x88] sm:$0xf0] }
 0x12c   :  { %2012 = vmatmul.bf16.vlgmr.msra.gmra.mxu0 %v8017_v37  ;;  %v8053_v62 = vor.u32 %v10319_v38, %v8052_v47  ;;  %v10521_v47 = vld [vmem:[#allocation5 + $0x258] sm:$0xff] }
 0x131   :  { %v1819_v26 = vpop.f32.mrf.mxu0 }
 0x132   :  { %v11611_v12 = vadd.f32 %v1819_v26, %v11529_v36  ;;  %v10337_v36 = vld [vmem:[#allocation3 + $0x118] sm:$0xf0]  ;;  %v8124_v26 = vld [vmem:[#allocation3 + $0xf8] sm:$0xf] }
 0x133   :  { %2256 = vst [vmem:[#allocation3 + $0x11c] sm:$0xf] %v11616_v21  ;;  %v8125_v49 = vor.u32 %v10337_v36, %v8124_v26  ;;  %v10520_v36 = vld [vmem:[#allocation5 + $0x250] sm:$0xff]  ;;  %v11651_v26 = vpop.f32.mrf.mxu3 }
 0x134   :  { %13345 = vst [vmem:[#allocation25_spill] sm:$0xff] %v11651_v26 }
 0x139   :  { %v1822_v24 = vpop.f32.mrf.mxu0 }
 0x13a   :  { %v11621_v30 = vadd.f32 %v1822_v24, %v11535_v43  ;;  %v10522_v43 = vld [vmem:[#allocation5 + $0x260] sm:$0xff] }
 0x13b   :  { %3462 = vmatpush.bf16.msra.mxu1 %v10522_v43  ;;  %v10346_v24 = vld [vmem:[#allocation3 + $0x160] sm:$0xf0] }
 0x13c   :  { %2017 = vmatmul.bf16.gmra.mxu0 %v8053_v62  ;;  %v8160_v62 = vld [vmem:[#allocation3 + $0x140] sm:$0xf] }
 0x13d   :  { %v8161_v53 = vor.u32 %v10346_v24, %v8160_v62 }
 0x13f   :  { %3463 = vmatpush.bf16.msra.mxu1 %v10521_v47 }
 0x141   :  { %v1824_v59 = vpop.f32.mrf.mxu0 }
 0x142   :  { %v11625_v1 = vadd.f32 %v1824_v59, %v11538_v51 }
 0x143   :  { %3464 = vmatpush.bf16.msra.mxu1 %v10520_v36  ;;  %v10531_v36 = vld [vmem:[#allocation5 + $0x2a8] sm:$0xff] }
 0x149   :  { %v1827_v16 = vpop.f32.mrf.mxu0 }
 0x14a   :  { %v11628_v37 = vadd.f32 %v1827_v16, %v11541_v50  ;;  %v11646_v16 = vpop.f32.mrf.mxu2 }
 0x14b   :  { %13343 = vst [vmem:[#allocation23_spill] sm:$0xff] %v11646_v16  ;;  %v10540_v16 = vld [vmem:[#allocation5 + $0x2f0] sm:$0xff] }
 0x14c   :  { %2022 = vmatmul.bf16.gmra.mxu0 %v8089_v6  ;;  %v11644_v6 = vpop.f32.mrf.mxu1 }
 0x14d   :  { %13342 = vst [vmem:[#allocation22_spill] sm:$0xff] %v11644_v6  ;;  %v10548_v6 = vld [vmem:[#allocation5 + $0x330] sm:$0xff] }
 0x151   :  { %v1829_v22 = vpop.f32.mrf.mxu0 }
 0x152   :  { %v11631_v20 = vadd.f32 %v1829_v22, %v11544_v52  ;;  %v11658_v24 = vpop.f32.mrf.mxu2 }
 0x154   :  { %v11654_v47 = vpop.f32.mrf.mxu1 }
 0x159   :  { %v1832_v3 = vpop.f32.mrf.mxu0 }
 0x15a   :  { %v11634_v51 = vadd.f32 %v1832_v3, %v11548_v34  ;;  %v8196_v34 = vld [vmem:[#allocation3 + $0x188] sm:$0xf] }
 0x15b   :  { %v10519_v3 = vld [vmem:[#allocation5 + $0x248] sm:$0xff] }
 0x15c   :  { %2027 = vmatmul.bf16.gmra.mxu0 %v8125_v49  ;;  %v10373_v49 = vld [vmem:[#allocation3 + $0x238] sm:$0xf0]  ;;  %3465 = vmatpush.bf16.msra.mxu1 %v10519_v3  ;;  %v1868_v26 = vpop.f32.mrf.mxu1  ;;  %v11665_v3 = vpop.f32.mrf.mxu2 }
 0x15d   :  { %2428 = vst [vmem:[#allocation3 + $0x23c] sm:$0xf] %v11616_v21 }
 0x161   :  { %v1834_v38 = vpop.f32.mrf.mxu0 }
 0x162   :  { %v11637_v50 = vadd.f32 %v1834_v38, %v11551_v42  ;;  %v8197_v42 = vor.u32 %v10355_v46, %v8196_v34  ;;  %v10532_v38 = vld [vmem:[#allocation5 + $0x2b0] sm:$0xff]  ;;  %v10530_v46 = vld [vmem:[#allocation5 + $0x2a0] sm:$0xff] }
 0x169   :  { %v1837_v59 = vpop.f32.mrf.mxu0 }
 0x16a   :  { %v11640_v52 = vadd.f32 %v1837_v59, %v11571_v35  ;;  %v10533_v35 = vld [vmem:[#allocation5 + $0x2b8] sm:$0xff]  ;;  %v11660_v59 = vpop.f32.mrf.mxu3 }
 0x16b   :  { %3508 = vmatpush.bf16.msra.mxu2 %v10533_v35 }
 0x16c   :  { %2032 = vmatmul.bf16.gmra.mxu0 %v8161_v53  ;;  %v10364_v53 = vld [vmem:[#allocation3 + $0x1f0] sm:$0xf0] }
 0x16f   :  { %3509 = vmatpush.bf16.msra.mxu2 %v10532_v38  ;;  %v10529_v38 = vld [vmem:[#allocation5 + $0x298] sm:$0xff] }
 0x171   :  { %v11642_v45 = vpop.f32.mrf.mxu0 }
 0x172   :  { %v11667_v0 = vpop.f32.mrf.mxu3 }
 0x173   :  { %3510 = vmatpush.bf16.msra.mxu2 %v10531_v36  ;;  %v10539_v36 = vld [vmem:[#allocation5 + $0x2e8] sm:$0xff] }
 0x177   :  { %3511 = vmatpush.bf16.msra.mxu2 %v10530_v46  ;;  %v10518_v46 = vld [vmem:[#allocation5 + $0x240] sm:$0xff] }
 0x178   :  { %3466 = vmatpush.bf16.msra.mxu1 %v10518_v46 }
 0x179   :  { %v1842_v43 = vpop.f32.mrf.mxu0 }
 0x17a   :  { %v11649_v22 = vadd.f32 %v1842_v43, %v11585_v58  ;;  %v8232_v58 = vld [vmem:[#allocation3 + $0x1d0] sm:$0xf]  ;;  %v10549_v43 = vld [vmem:[#allocation5 + $0x338] sm:$0xff] }
 0x17b   :  { %v8233_v34 = vor.u32 %v10364_v53, %v8232_v58  ;;  %3606 = vmatpush.bf16.msrb.mxu0 %v10549_v43  ;;  %3512 = vmatpush.bf16.msra.mxu2 %v10529_v38  ;;  %v10528_v53 = vld [vmem:[#allocation5 + $0x290] sm:$0xff]  ;;  %v10527_v43 = vld [vmem:[#allocation5 + $0x288] sm:$0xff] }
 0x17c   :  { %13344 = vst [vmem:[#allocation24_spill] sm:$0xff] %v11649_v22  ;;  %2037 = vmatmul.bf16.gmra.mxu0 %v8197_v42  ;;  %v10541_v42 = vld [vmem:[#allocation5 + $0x2f8] sm:$0xff]  ;;  %v10536_v22 = vld [vmem:[#allocation5 + $0x2d0] sm:$0xff] }
 0x17d   :  { %3557 = vmatpush.bf16.msra.mxu3 %v10541_v42  ;;  %v8268_v42 = vld [vmem:[#allocation3 + $0x218] sm:$0xf] }
 0x17e   :  { %v8269_v38 = vor.u32 %v10373_v49, %v8268_v42  ;;  %v10544_v49 = vld [vmem:[#allocation5 + $0x310] sm:$0xff] }
 0x17f   :  { %3607 = vmatpush.bf16.msrb.mxu0 %v10548_v6  ;;  %3513 = vmatpush.bf16.msra.mxu2 %v10528_v53  ;;  %v11675_v6 = vpop.f32.mrf.mxu3  ;;  %v10526_v53 = vld [vmem:[#allocation5 + $0x280] sm:$0xff] }
 0x181   :  { %v11656_v62 = vpop.f32.mrf.mxu0  ;;  %3558 = vmatpush.bf16.msra.mxu3 %v10540_v16 }
 0x182   :  { %13346 = vst [vmem:[#allocation26_spill] sm:$0xff] %v11656_v62 }
 0x183   :  { %3514 = vmatpush.bf16.msra.mxu2 %v10527_v43 }
 0x185   :  { %3559 = vmatpush.bf16.msra.mxu3 %v10539_v36  ;;  %v10537_v36 = vld [vmem:[#allocation5 + $0x2d8] sm:$0xff] }
 0x187   :  { %3515 = vmatpush.bf16.msra.mxu2 %v10526_v53 }
 0x189   :  { %v1847_v21 = vpop.f32.mrf.mxu0  ;;  %3560 = vmatpush.bf16.msra.mxu3 %v10538_v39  ;;  %v1867_v39 = vadd.f32 %v11654_v47, %v11608_v31  ;;  %v10534_v31 = vld [vmem:[#allocation5 + $0x2c0] sm:$0xff] }
 0x18a   :  { %v11663_v35 = vadd.f32 %v1847_v21, %v11596_v44  ;;  %v10547_v44 = vld [vmem:[#allocation5 + $0x328] sm:$0xff]  ;;  %v11671_v21 = vpop.f32.mrf.mxu1  ;;  %v10542_v47 = vld [vmem:[#allocation5 + $0x300] sm:$0xff] }
 0x18b   :  { %3608 = vmatpush.bf16.msrb.mxu0 %v10547_v44  ;;  %v10545_v44 = vld [vmem:[#allocation5 + $0x318] sm:$0xff]  ;;  %v1916_v43 = vadd.f32 %v11658_v24, %v1867_v39 }
 0x18c   :  { %13347 = vst [vmem:[#allocation27_spill] sm:$0xff] %v11663_v35  ;;  %2042 = vmatmul.bf16.gmra.mxu0 %v8233_v34  ;;  %v11673_v34 = vpop.f32.mrf.mxu2  ;;  %v10546_v35 = vld [vmem:[#allocation5 + $0x320] sm:$0xff] }
 0x18d   :  { %3561 = vmatpush.bf16.msra.mxu3 %v10537_v36 }
 0x18f   :  { %3609 = vmatpush.bf16.msrb.mxu0 %v10546_v35  ;;  %v10543_v35 = vld [vmem:[#allocation5 + $0x308] sm:$0xff] }
 0x191   :  { %v11669_v58 = vpop.f32.mrf.mxu0  ;;  %3562 = vmatpush.bf16.msra.mxu3 %v10536_v22  ;;  %v1869_v22 = vadd.f32 %v1868_v26, %v11611_v12 }
 0x192   :  { %13348 = vst [vmem:[#allocation28_spill] sm:$0xff] %v11669_v58  ;;  %v1873_v62 = vpop.f32.mrf.mxu1 }
 0x193   :  { %3610 = vmatpush.bf16.msrb.mxu0 %v10545_v44  ;;  %v10557_v44 = vld [vmem:[#allocation5 + $0x378] sm:$0xff]  ;;  %v1918_v24 = vadd.f32 %v11665_v3, %v1869_v22 }
 0x194   :  { %v11680_v42 = vpop.f32.mrf.mxu2  ;;  %3655 = vmatpush.bf16.msrb.mxu1 %v10557_v44 }
 0x197   :  { %3611 = vmatpush.bf16.msrb.mxu0 %v10544_v49 }
 0x199   :  { %v1852_v16 = vpop.f32.mrf.mxu0 }
 0x19a   :  { %v11678_v58 = vadd.f32 %v1852_v16, %v11605_v41  ;;  %v10535_v41 = vld [vmem:[#allocation5 + $0x2c8] sm:$0xff]  ;;  %v1965_v16 = vadd.f32 %v11660_v59, %v1916_v43  ;;  %v11690_v53 = vpop.f32.mrf.mxu1 }
 0x19b   :  { %3563 = vmatpush.bf16.msra.mxu3 %v10535_v41  ;;  %3612 = vmatpush.bf16.msrb.mxu0 %v10543_v35 }
 0x19c   :  { %13349 = vst [vmem:[#allocation29_spill] sm:$0xff] %v11678_v58  ;;  %2047 = vmatmul.bf16.gmra.mxu0 %v8269_v38  ;;  %v11687_v38 = vpop.f32.mrf.mxu3  ;;  %v11693_v49 = vpop.f32.mrf.mxu2  ;;  %v1967_v58 = vadd.f32 %v11667_v0, %v1918_v24  ;;  %v1872_v0 = vadd.f32 %v11671_v21, %v11621_v30 }
 0x19f   :  { %3564 = vmatpush.bf16.msra.mxu3 %v10534_v31  ;;  %3613 = vmatpush.bf16.msrb.mxu0 %v10542_v47  ;;  %v1921_v47 = vadd.f32 %v11673_v34, %v1872_v0 }
 0x1a1   :  { %v11682_v46 = vpop.f32.mrf.mxu0  ;;  %v1970_v27 = vadd.f32 %v11675_v6, %v1921_v47 }
 0x1a2   :  { %13350 = vst [vmem:[#allocation30_spill] sm:$0xff] %v11682_v46 }
 0x1a4   :  { %v11696_v41 = vpop.f32.mrf.mxu3  ;;  %v11714_v24 = vpop.f32.mrf.mxu2 }
 0x1a9   :  { %v2013_v36 = vpop.f32.mrf.mxu0 }
 0x1aa   :  { %v2014_v46 = vadd.f32 %v2013_v36, %v1965_v16  ;;  %v11711_v36 = vpop.f32.mrf.mxu1 }
 0x1ac   :  { %v2053_v39 = vmax.f32 %v2014_v46, 0.0  ;;  %v11717_v30 = vpop.f32.mrf.mxu3 }
 0x1ae   :  { %v2096_v59 = vrot.slane %v2053_v39, 7  ;;  %v2126_v35 = vrot.slane %v2053_v39, 1  ;;  %v2172_v43 = vpack.c.bf16 %v2053_v39, %v2053_v39 }
 0x1b0   :  { %v2113_v12 = vsel %vm13332_vm3, %v11053_v4, %v2096_v59  ;;  %v2143_v26 = vsel %vm13351_vm0, %v11071_v25, %v2126_v35  ;;  %2180 = vst [vmem:[#allocation3 + $0x28] sm:$0xf] %v2172_v43 }
 0x1b1   :  { %v2116_v3 = vsel %vm11073_vm1, 0.0, %v2113_v12  ;;  %v2145_v46 = vsel %vm11077_vm2, 0.0, %v2143_v26  ;;  %2213 = vst [vmem:[#allocation3 + $0x10] sm:$0xf] %v2172_v43  ;;  %v2015_v16 = vpop.f32.mrf.mxu0 }
 0x1b2   :  { %v2156_v44 = vpack.c.bf16 %v2116_v3, %v2116_v3  ;;  %v2187_v22 = vpack.c.bf16 %v2145_v46, %v2145_v46  ;;  %v2016_v31 = vadd.f32 %v2015_v16, %v1967_v58  ;;  %v1874_v3 = vadd.f32 %v1873_v62, %v11625_v1  ;;  %v11733_v62 = vpop.f32.mrf.mxu2 }
 0x1b4   :  { %2164 = vst [vmem:[#allocation3 + $0x24] sm:$0xf] %v2156_v44  ;;  %v2054_v39 = vmax.f32 %v2016_v31, 0.0  ;;  %v1923_v31 = vadd.f32 %v11680_v42, %v1874_v3  ;;  %v1877_v3 = vadd.f32 %v11690_v53, %v11628_v37 }
 0x1b5   :  { %2195 = vst [vmem:[#allocation3 + $0x8] sm:$0xf] %v2187_v22 }
 0x1b6   :  { %2204 = vst [vmem:[#allocation3 + $0xc] sm:$0xf] %v2156_v44  ;;  %v2097_v12 = vrot.slane %v2054_v39, 7  ;;  %v2127_v26 = vrot.slane %v2054_v39, 1  ;;  %v2173_v43 = vpack.c.bf16 %v2054_v39, %v2054_v39 }
 0x1b7   :  { %v8562_v28 = vld [vmem:[#allocation3 + $0x24] sm:$0xf0] }
 0x1b8   :  { %v2112_v21 = vsel %vm13332_vm3, %v2096_v59, %v2097_v12  ;;  %v2142_v58 = vsel %vm13351_vm0, %v2126_v35, %v2127_v26  ;;  %2181 = vst [vmem:[#allocation3 + $0x4c] sm:$0xf] %v2173_v43  ;;  %v8565_v34 = vor.u32 %v11176_v23, %v8562_v28  ;;  %v10556_v35 = vld [vmem:[#allocation5 + $0x370] sm:$0xff]  ;;  %v11730_v28 = vpop.f32.mrf.mxu1 }
 0x1b9   :  { %v2117_v46 = vsel %vm11092_vm6, 0.0, %v2112_v21  ;;  %v2146_v16 = vsel %vm11086_vm5, 0.0, %v2142_v58  ;;  %2214 = vst [vmem:[#allocation3 + $0x34] sm:$0xf] %v2173_v43  ;;  %v2018_v6 = vpop.f32.mrf.mxu0  ;;  %3656 = vmatpush.bf16.msrb.mxu1 %v10556_v35 }
 0x1ba   :  { %v2157_v0 = vpack.c.bf16 %v2117_v46, %v2117_v46  ;;  %v2188_v44 = vpack.c.bf16 %v2146_v16, %v2146_v16  ;;  %2240 = vst [vmem:[#allocation3 + $0x1c] sm:$0xf] %v2173_v43  ;;  %v2019_v59 = vadd.f32 %v2018_v6, %v1970_v27  ;;  %3516 = vmatmul.bf16.vlgmr.msra.gmra.mxu2 %v8565_v34  ;;  %v11746_v46 = vpop.f32.mrf.mxu3 }
 0x1bb   :  { %v10450_v22 = vld [vmem:[#allocation3 + $0x20] sm:$0xf0]  ;;  %v1972_v27 = vadd.f32 %v11687_v38, %v1923_v31 }
 0x1bc   :  { %2165 = vst [vmem:[#allocation3 + $0x48] sm:$0xf] %v2157_v0  ;;  %v2055_v23 = vmax.f32 %v2019_v59, 0.0  ;;  %v8561_v1 = vor.u32 %v10450_v22, %v11153_v13  ;;  %v8568_v6 = vld [vmem:[#allocation3 + $0x8] sm:$0xf] }
 0x1bd   :  { %2196 = vst [vmem:[#allocation3 + $0x2c] sm:$0xf] %v2188_v44  ;;  %v10447_v22 = vld [vmem:[#allocation3 + $0xc] sm:$0xf] }
 0x1be   :  { %2205 = vst [vmem:[#allocation3 + $0x30] sm:$0xf] %v2157_v0  ;;  %v2098_v47 = vrot.slane %v2055_v23, 7  ;;  %v2128_v39 = vrot.slane %v2055_v23, 1  ;;  %v2174_v43 = vpack.c.bf16 %v2055_v23, %v2055_v23  ;;  %3467 = vmatmul.bf16.vlgmr.msra.gmra.mxu1 %v8561_v1 }
 0x1bf   :  { %2222 = vst [vmem:[#allocation3 + $0x14] sm:$0xf] %v2188_v44 }
 0x1c0   :  { %2231 = vst [vmem:[#allocation3 + $0x18] sm:$0xf] %v2157_v0  ;;  %v2111_v42 = vsel %vm13332_vm3, %v2097_v12, %v2098_v47  ;;  %v2141_v21 = vsel %vm13351_vm0, %v2127_v26, %v2128_v39  ;;  %v1926_v26 = vadd.f32 %v11693_v49, %v1877_v3  ;;  %v11749_v31 = vpop.f32.mrf.mxu1 }
 0x1c1   :  { %v2118_v13 = vsel %vm11144_vm7, 0.0, %v2111_v42  ;;  %v2147_v58 = vsel %vm11160_vm8, 0.0, %v2141_v21  ;;  %2182 = vst [vmem:[#allocation3 + $0x70] sm:$0xf] %v2174_v43  ;;  %v2020_v34 = vpop.f32.mrf.mxu0  ;;  %v10455_v21 = vld [vmem:[#allocation3 + $0x4c] sm:$0xf]  ;;  %vm13352_vm8 = vnez %v13290_v19 }
 0x1c2   :  { %v2158_v38 = vpack.c.bf16 %v2118_v13, %v2118_v13  ;;  %v2189_v16 = vpack.c.bf16 %v2147_v58, %v2147_v58  ;;  %2215 = vst [vmem:[#allocation3 + $0x58] sm:$0xf] %v2174_v43  ;;  %v2021_v12 = vadd.f32 %v2020_v34, %v1972_v27  ;;  %v11752_v27 = vpop.f32.mrf.mxu2 }
 0x1c3   :  { %2241 = vst [vmem:[#allocation3 + $0x40] sm:$0xf] %v2174_v43  ;;  %v1975_v43 = vadd.f32 %v11696_v41, %v1926_v26 }
 0x1c4   :  { %2166 = vst [vmem:[#allocation3 + $0x6c] sm:$0xf] %v2158_v38  ;;  %v2056_v0 = vmax.f32 %v2021_v12, 0.0  ;;  %v10451_v44 = vld [vmem:[#allocation3 + $0x28] sm:$0xf0] }
 0x1c5   :  { %2197 = vst [vmem:[#allocation3 + $0x50] sm:$0xf] %v2189_v16  ;;  %v8569_v59 = vor.u32 %v10451_v44, %v8568_v6  ;;  %v8570_v35 = vld [vmem:[#allocation3 + $0x2c] sm:$0xf0] }
 0x1c6   :  { %2206 = vst [vmem:[#allocation3 + $0x54] sm:$0xf] %v2158_v38  ;;  %v2099_v37 = vrot.slane %v2056_v0, 7  ;;  %v2129_v53 = vrot.slane %v2056_v0, 1  ;;  %v2175_v23 = vpack.c.bf16 %v2056_v0, %v2056_v0  ;;  %v8573_v1 = vor.u32 %v10447_v22, %v8570_v35  ;;  %v11765_v0 = vpop.f32.mrf.mxu3  ;;  %v10555_v22 = vld [vmem:[#allocation5 + $0x368] sm:$0xff] }
 0x1c7   :  { %2223 = vst [vmem:[#allocation3 + $0x38] sm:$0xf] %v2189_v16  ;;  %3565 = vmatmul.bf16.vlgmr.msra.gmra.mxu3 %v8569_v59  ;;  %3657 = vmatpush.bf16.msrb.mxu1 %v10555_v22 }
 0x1c8   :  { %2232 = vst [vmem:[#allocation3 + $0x3c] sm:$0xf] %v2158_v38  ;;  %v2110_v49 = vsel %vm13332_vm3, %v2098_v47, %v2099_v37  ;;  %v2140_v42 = vsel %vm13351_vm0, %v2128_v39, %v2129_v53  ;;  %3614 = vmatmul.bf16.vlgmr.msrb.gmra.mxu0 %v8573_v1  ;;  %v8598_v13 = vld [vmem:[#allocation3 + $0x6c] sm:$0xf0]  ;;  %v1879_v38 = vadd.f32 %v11711_v36, %v11631_v20  ;;  %v8596_v39 = vld [vmem:[#allocation3 + $0x48] sm:$0xf] }
 0x1c9   :  { %2249 = vst [vmem:[#allocation3 + $0x20] sm:$0xf] %v2189_v16  ;;  %v2119_v58 = vsel %vm11192_vm10, 0.0, %v2110_v49  ;;  %v2148_v34 = vsel %vm13352_vm8, 0.0, %v2140_v42  ;;  %v2023_v41 = vpop.f32.mrf.mxu0  ;;  %v8601_v3 = vor.u32 %v10455_v21, %v8598_v13 }
 0x1ca   :  { %v2159_v12 = vpack.c.bf16 %v2119_v58, %v2119_v58  ;;  %2183 = vst [vmem:[#allocation3 + $0x94] sm:$0xf] %v2175_v23  ;;  %v2190_v47 = vpack.c.bf16 %v2148_v34, %v2148_v34  ;;  %v2024_v6 = vadd.f32 %v2023_v41, %v1975_v43  ;;  %v1928_v16 = vadd.f32 %v11714_v24, %v1879_v38  ;;  %v11768_v43 = vpop.f32.mrf.mxu1  ;;  %v11780_v58 = vpop.f32.mrf.mxu2 }
 0x1cb   :  { %2216 = vst [vmem:[#allocation3 + $0x7c] sm:$0xf] %v2175_v23  ;;  %3521 = vmatmul.bf16.gmra.mxu2 %v8601_v3  ;;  %v10459_v26 = vld [vmem:[#allocation3 + $0x68] sm:$0xf0] }
 0x1cc   :  { %2167 = vst [vmem:[#allocation3 + $0x90] sm:$0xf] %v2159_v12  ;;  %v2057_v44 = vmax.f32 %v2024_v6, 0.0  ;;  %v8597_v59 = vor.u32 %v10459_v26, %v8596_v39  ;;  %v1977_v1 = vadd.f32 %v11717_v30, %v1928_v16  ;;  %v1882_v30 = vadd.f32 %v11730_v28, %v11634_v51  ;;  %v8604_v3 = vld [vmem:[#allocation3 + $0x50] sm:$0xf] }
 0x1cd   :  { %2198 = vst [vmem:[#allocation3 + $0x74] sm:$0xf] %v2190_v47  ;;  %v10456_v6 = vld [vmem:[#allocation3 + $0x54] sm:$0xf] }
 0x1ce   :  { %2207 = vst [vmem:[#allocation3 + $0x78] sm:$0xf] %v2159_v12  ;;  %v2100_v35 = vrot.slane %v2057_v44, 7  ;;  %v2130_v20 = vrot.slane %v2057_v44, 1  ;;  %3472 = vmatmul.bf16.gmra.mxu1 %v8597_v59  ;;  %v2176_v36 = vpack.c.bf16 %v2057_v44, %v2057_v44  ;;  %v11783_v26 = vpop.f32.mrf.mxu3  ;;  %v11790_v59 = vld [vmem:[#allocation7] ss:$0 sm:$0xff] }
 0x1cf   :  { %2224 = vst [vmem:[#allocation3 + $0x5c] sm:$0xf] %v2190_v47  ;;  %v1644_v22 = vadd.f32 %v11790_v59, %v11553_v10 }
 0x1d0   :  { %2233 = vst [vmem:[#allocation3 + $0x60] sm:$0xf] %v2159_v12  ;;  %v2109_v24 = vsel %vm13332_vm3, %v2099_v37, %v2100_v35  ;;  %v2139_v49 = vsel %vm13351_vm0, %v2129_v53, %v2130_v20  ;;  %v1931_v53 = vadd.f32 %v11733_v62, %v1882_v30 }
 0x1d1   :  { %2242 = vst [vmem:[#allocation3 + $0x64] sm:$0xf] %v2175_v23  ;;  %v2120_v42 = vsel %vm11213_vm11, 0.0, %v2109_v24  ;;  %v2149_v21 = vsel %vm11221_vm12, 0.0, %v2139_v49  ;;  %v2025_v13 = vpop.f32.mrf.mxu0  ;;  %v10464_v30 = vld [vmem:[#allocation3 + $0x94] sm:$0xf] }
 0x1d2   :  { %2250 = vst [vmem:[#allocation3 + $0x44] sm:$0xf] %v2190_v47  ;;  %v2160_v34 = vpack.c.bf16 %v2120_v42, %v2120_v42  ;;  %v2191_v41 = vpack.c.bf16 %v2149_v21, %v2149_v21  ;;  %v2026_v37 = vadd.f32 %v2025_v13, %v1977_v1  ;;  %v1980_v16 = vadd.f32 %v11746_v46, %v1931_v53  ;;  %v11800_v42 = vpop.f32.mrf.mxu1 }
 0x1d3   :  { %2184 = vst [vmem:[#allocation3 + $0xb8] sm:$0xf] %v2176_v36 }
 0x1d4   :  { %2168 = vst [vmem:[#allocation3 + $0xb4] sm:$0xf] %v2160_v34  ;;  %v2058_v23 = vmax.f32 %v2026_v37, 0.0  ;;  %v10460_v38 = vld [vmem:[#allocation3 + $0x70] sm:$0xf0] }
 0x1d5   :  { %2199 = vst [vmem:[#allocation3 + $0x98] sm:$0xf] %v2191_v41  ;;  %v8605_v12 = vor.u32 %v10460_v38, %v8604_v3  ;;  %v8606_v39 = vld [vmem:[#allocation3 + $0x74] sm:$0xf0]  ;;  %v8632_v37 = vld [vmem:[#allocation3 + $0x90] sm:$0xf]  ;;  %v11803_v38 = vpop.f32.mrf.mxu2 }
 0x1d6   :  { %2208 = vst [vmem:[#allocation3 + $0x9c] sm:$0xf] %v2160_v34  ;;  %v2101_v51 = vrot.slane %v2058_v23, 7  ;;  %v2131_v28 = vrot.slane %v2058_v23, 1  ;;  %v8609_v47 = vor.u32 %v10456_v6, %v8606_v39  ;;  %v2177_v24 = vpack.c.bf16 %v2058_v23, %v2058_v23  ;;  %v11808_v39 = vpop.f32.mrf.mxu3 }
 0x1d7   :  { %2217 = vst [vmem:[#allocation3 + $0xa0] sm:$0xf] %v2176_v36  ;;  %3570 = vmatmul.bf16.gmra.mxu3 %v8605_v12 }
 0x1d8   :  { %2225 = vst [vmem:[#allocation3 + $0x80] sm:$0xf] %v2191_v41  ;;  %v2108_v62 = vsel %vm13332_vm3, %v2100_v35, %v2101_v51  ;;  %v2138_v44 = vsel %vm13351_vm0, %v2130_v20, %v2131_v28  ;;  %3619 = vmatmul.bf16.gmra.mxu0 %v8609_v47  ;;  %v1884_v35 = vadd.f32 %v11749_v31, %v11637_v50  ;;  %v10554_v50 = vld [vmem:[#allocation5 + $0x360] sm:$0xff] }
 0x1d9   :  { %2234 = vst [vmem:[#allocation3 + $0x84] sm:$0xf] %v2160_v34  ;;  %v2121_v1 = vsel %vm11256_vm14, 0.0, %v2108_v62  ;;  %v2150_v46 = vsel %vm11228_vm13, 0.0, %v2138_v44  ;;  %v2028_v49 = vpop.f32.mrf.mxu0  ;;  %v1693_v31 = vadd.f32 %v11555_v8, %v1644_v22  ;;  %3658 = vmatpush.bf16.msrb.mxu1 %v10554_v50  ;;  %vm13353_vm13 = vnez %v13304_v48 }
 0x1da   :  { %2243 = vst [vmem:[#allocation3 + $0x88] sm:$0xf] %v2176_v36  ;;  %v2161_v20 = vpack.c.bf16 %v2121_v1, %v2121_v1  ;;  %v2192_v21 = vpack.c.bf16 %v2150_v46, %v2150_v46  ;;  %v2029_v13 = vadd.f32 %v2028_v49, %v1980_v16  ;;  %v8634_v10 = vld [vmem:[#allocation3 + $0xb4] sm:$0xf0]  ;;  %v1933_v53 = vadd.f32 %v11752_v27, %v1884_v35 }
 0x1db   :  { %2251 = vst [vmem:[#allocation3 + $0x68] sm:$0xf] %v2191_v41  ;;  %v8637_v34 = vor.u32 %v10464_v30, %v8634_v10  ;;  %v10468_v3 = vld [vmem:[#allocation3 + $0xb0] sm:$0xf0]  ;;  %v1742_v41 = vadd.f32 %v11575_v60, %v1693_v31  ;;  %v1887_v1 = vadd.f32 %v11768_v43, %v11640_v52  ;;  %vm13356_vm14 = vnez %v13306_v14 }
 0x1dc   :  { %2169 = vst [vmem:[#allocation3 + $0xd8] sm:$0xf] %v2161_v20  ;;  %v2059_v23 = vmax.f32 %v2029_v13, 0.0  ;;  %v8633_v12 = vor.u32 %v10468_v3, %v8632_v37  ;;  %v1982_v27 = vadd.f32 %v11765_v0, %v1933_v53  ;;  %v8640_v35 = vld [vmem:[#allocation3 + $0x98] sm:$0xf]  ;;  %v1649_v3 = vadd.f32 %v11790_v59, %v11580_v61 }
 0x1dd   :  { %2185 = vst [vmem:[#allocation3 + $0xdc] sm:$0xf] %v2177_v24  ;;  %3526 = vmatmul.bf16.gmra.mxu2 %v8637_v34  ;;  %v1791_v46 = vadd.f32 %v11578_v40, %v1742_v41  ;;  %v1936_v13 = vadd.f32 %v11780_v58, %v1887_v1  ;;  %v11825_v34 = vpop.f32.mrf.mxu2 }
 0x1de   :  { %2200 = vst [vmem:[#allocation3 + $0xbc] sm:$0xf] %v2192_v21  ;;  %v2102_v36 = vrot.slane %v2059_v23, 7  ;;  %v2132_v6 = vrot.slane %v2059_v23, 1  ;;  %3477 = vmatmul.bf16.gmra.mxu1 %v8633_v12  ;;  %v2178_v0 = vpack.c.bf16 %v2059_v23, %v2059_v23 }
 0x1df   :  { %2209 = vst [vmem:[#allocation3 + $0xc0] sm:$0xf] %v2161_v20  ;;  %v1840_v10 = vadd.f32 %v11642_v45, %v1791_v46  ;;  %v1985_v53 = vadd.f32 %v11783_v26, %v1936_v13 }
 0x1e0   :  { %2218 = vst [vmem:[#allocation3 + $0xc4] sm:$0xf] %v2177_v24  ;;  %v2107_v47 = vsel %vm13332_vm3, %v2101_v51, %v2102_v36  ;;  %v2137_v16 = vsel %vm13351_vm0, %v2131_v28, %v2132_v6  ;;  %v11821_v28 = vpop.f32.mrf.mxu1 }
 0x1e1   :  { %2226 = vst [vmem:[#allocation3 + $0xa4] sm:$0xf] %v2192_v21  ;;  %v2122_v8 = vsel %vm11274_vm15, 0.0, %v2107_v47  ;;  %v2151_v62 = vsel %vm13353_vm13, 0.0, %v2137_v16  ;;  %v2030_v44 = vpop.f32.mrf.mxu0  ;;  %vm13354_vm13 = vmmov %vm13351_vm0  ;;  %vm13355_vm15 = vnez %v13308_v55  ;;  %v1889_v31 = vadd.f32 %v11800_v42, %v1840_v10  ;;  %v10553_v10 = vld [vmem:[#allocation5 + $0x358] sm:$0xff] }
 0x1e2   :  { %2235 = vst [vmem:[#allocation3 + $0xa8] sm:$0xf] %v2161_v20  ;;  %v2162_v60 = vpack.c.bf16 %v2122_v8, %v2122_v8  ;;  %v2031_v22 = vadd.f32 %v2030_v44, %v1982_v27  ;;  %v2193_v51 = vpack.c.bf16 %v2151_v62, %v2151_v62  ;;  %v10465_v20 = vld [vmem:[#allocation3 + $0x9c] sm:$0xf]  ;;  %v1698_v44 = vadd.f32 %v11583_v29, %v1649_v3 }
 0x1e3   :  { %2244 = vst [vmem:[#allocation3 + $0xac] sm:$0xf] %v2177_v24  ;;  %v8668_v47 = vld [vmem:[#allocation3 + $0xd8] sm:$0xf]  ;;  %v1938_v16 = vadd.f32 %v11803_v38, %v1889_v31  ;;  %3659 = vmatpush.bf16.msrb.mxu1 %v10553_v10 }
 0x1e4   :  { %2252 = vst [vmem:[#allocation3 + $0x8c] sm:$0xf] %v2192_v21  ;;  %v2060_v49 = vmax.f32 %v2031_v22, 0.0  ;;  %v10473_v42 = vld [vmem:[#allocation3 + $0xdc] sm:$0xf] }
 0x1e5   :  { %2170 = vst [vmem:[#allocation3 + $0xfc] sm:$0xf] %v2162_v60  ;;  %v10469_v30 = vld [vmem:[#allocation3 + $0xb8] sm:$0xf0]  ;;  %v1942_v29 = vpop.f32.mrf.mxu2 }
 0x1e6   :  { %2186 = vst [vmem:[#allocation3 + $0x100] sm:$0xf] %v2178_v0  ;;  %v2103_v52 = vrot.slane %v2060_v49, 7  ;;  %v2133_v43 = vrot.slane %v2060_v49, 1  ;;  %v8641_v24 = vor.u32 %v10469_v30, %v8640_v35  ;;  %v8642_v37 = vld [vmem:[#allocation3 + $0xbc] sm:$0xf0]  ;;  %v2212_v8 = vpack.c.bf16 %v2060_v49, %v2060_v49 }
 0x1e7   :  { %2201 = vst [vmem:[#allocation3 + $0xe0] sm:$0xf] %v2193_v51  ;;  %v8645_v40 = vor.u32 %v10465_v20, %v8642_v37  ;;  %v1747_v20 = vadd.f32 %v11587_v7, %v1698_v44  ;;  %v1987_v49 = vadd.f32 %v11808_v39, %v1938_v16 }
 0x1e8   :  { %2210 = vst [vmem:[#allocation3 + $0xe4] sm:$0xf] %v2162_v60  ;;  %v2106_v21 = vsel %vm13332_vm3, %v2102_v36, %v2103_v52  ;;  %v2135_v58 = vsel %vm13351_vm0, %v2133_v43, %v11071_v25  ;;  %v2136_v45 = vsel %vm13354_vm13, %v2132_v6, %v2133_v43  ;;  %3575 = vmatmul.bf16.gmra.mxu3 %v8641_v24  ;;  %v11842_v36 = vpop.f32.mrf.mxu3  ;;  %vm13357_vm13 = vmmov %vm13332_vm3  ;;  %v1893_v35 = vpop.f32.mrf.mxu1  ;;  %v13358_v24 = vld [vmem:[#allocation24_spill] sm:$0xff] }
 0x1e9   :  { %2219 = vst [vmem:[#allocation3 + $0xe8] sm:$0xf] %v2178_v0  ;;  %v2123_v23 = vsel %vm13355_vm15, 0.0, %v2106_v21  ;;  %v2152_v12 = vsel %vm13356_vm14, 0.0, %v2136_v45  ;;  %3624 = vmatmul.bf16.gmra.mxu0 %v8645_v40  ;;  %v2033_v50 = vpop.f32.mrf.mxu0  ;;  %v2105_v61 = vsel %vm13357_vm13, %v2103_v52, %v11053_v4  ;;  %v2153_v6 = vsel %vm11517_vm4, 0.0, %v2135_v58  ;;  %v13360_v58 = vld [vmem:[#allocation15_spill] sm:$0xff]  ;;  %vm13363_vm13 = vmmov %vm13332_vm3 }
 0x1ea   :  { %2227 = vst [vmem:[#allocation3 + $0xc8] sm:$0xf] %v2193_v51  ;;  %v2194_v26 = vpack.c.bf16 %v2152_v12, %v2152_v12  ;;  %v2203_v41 = vpack.c.bf16 %v2123_v23, %v2123_v23  ;;  %v2034_v27 = vadd.f32 %v2033_v50, %v1985_v53  ;;  %v2124_v22 = vsel %vm11502_vm9, 0.0, %v2105_v61 }
 0x1eb   :  { %2236 = vst [vmem:[#allocation3 + $0xcc] sm:$0xf] %v2162_v60  ;;  %v2221_v13 = vpack.c.bf16 %v2153_v6, %v2153_v6  ;;  %v1892_v37 = vadd.f32 %v11821_v28, %v13358_v24  ;;  %v1796_v45 = vadd.f32 %v13360_v58, %v1747_v20  ;;  %v13362_v28 = vld [vmem:[#allocation26_spill] sm:$0xff]  ;;  %v13366_v24 = vld [vmem:[#allocation17_spill] sm:$0xff] }
 0x1ec   :  { %2245 = vst [vmem:[#allocation3 + $0xd0] sm:$0xf] %v2178_v0  ;;  %v10477_v62 = vld [vmem:[#allocation3 + $0xf8] sm:$0xf0]  ;;  %v2061_v1 = vmax.f32 %v2034_v27, 0.0 }
 0x1ed   :  { %2253 = vst [vmem:[#allocation3 + $0xb0] sm:$0xf] %v2193_v51  ;;  %v8670_v60 = vld [vmem:[#allocation3 + $0xfc] sm:$0xf0]  ;;  %v8669_v46 = vor.u32 %v10477_v62, %v8668_v47  ;;  %v2230_v51 = vpack.c.bf16 %v2124_v22, %v2124_v22  ;;  %v1941_v23 = vadd.f32 %v11825_v34, %v1892_v37  ;;  %v1845_v6 = vadd.f32 %v13362_v28, %v1796_v45 }
 0x1ee   :  { %2202 = vst [vmem:[#allocation3 + $0x104] sm:$0xf] %v2194_v26  ;;  %v8673_v30 = vor.u32 %v10473_v42, %v8670_v60  ;;  %v2268_v38 = vrot.slane %v2061_v1, 7  ;;  %v2298_v0 = vrot.slane %v2061_v1, 1  ;;  %v8676_v61 = vld [vmem:[#allocation3 + $0xe0] sm:$0xf]  ;;  %v2344_v27 = vpack.c.bf16 %v2061_v1, %v2061_v1 }
 0x1ef   :  { %2211 = vst [vmem:[#allocation3 + $0x108] sm:$0xf] %v2203_v41  ;;  %3482 = vmatmul.bf16.gmra.mxu1 %v8669_v46  ;;  %v10474_v16 = vld [vmem:[#allocation3 + $0xe4] sm:$0xf]  ;;  %v1990_v34 = vadd.f32 %v11842_v36, %v1941_v23  ;;  %v13365_v1 = vld [vmem:[#allocation16_spill] sm:$0xff] }
 0x1f0   :  { %2220 = vst [vmem:[#allocation3 + $0x10c] sm:$0xf] %v2212_v8  ;;  %3531 = vmatmul.bf16.gmra.mxu2 %v8673_v30  ;;  %v2285_v52 = vsel %vm13332_vm3, %v11053_v4, %v2268_v38  ;;  %v2315_v7 = vsel %vm13351_vm0, %v11071_v25, %v2298_v0  ;;  %v1991_v12 = vpop.f32.mrf.mxu3  ;;  %v1896_v46 = vpop.f32.mrf.mxu1  ;;  %vm13364_vm3 = vmmov %vm13351_vm0 }
 0x1f1   :  { %2228 = vst [vmem:[#allocation3 + $0xec] sm:$0xf] %v2194_v26  ;;  %v2035_v43 = vpop.f32.mrf.mxu0  ;;  %v2288_v40 = vsel %vm11073_vm1, 0.0, %v2285_v52  ;;  %v2317_v53 = vsel %vm11077_vm2, 0.0, %v2315_v7  ;;  %vm13368_vm0 = vmmov %vm13363_vm13 }
 0x1f2   :  { %2229 = vst [vmem:[#allocation3 + $0x110] sm:$0xf] %v2221_v13  ;;  %v2036_v21 = vadd.f32 %v2035_v43, %v1987_v49  ;;  %v2328_v50 = vpack.c.bf16 %v2288_v40, %v2288_v40  ;;  %v2359_v42 = vpack.c.bf16 %v2317_v53, %v2317_v53  ;;  %v1894_v49 = vadd.f32 %v1893_v35, %v1845_v6  ;;  %v8704_v40 = vld [vmem:[#allocation3 + $0x120] sm:$0xf]  ;;  %v10482_v53 = vld [vmem:[#allocation3 + $0x124] sm:$0xf] }
 0x1f3   :  { %2237 = vst [vmem:[#allocation3 + $0xf0] sm:$0xf] %v2203_v41  ;;  %v13367_v35 = vld [vmem:[#allocation18_spill] sm:$0xff] }
 0x1f4   :  { %2238 = vst [vmem:[#allocation3 + $0x114] sm:$0xf] %v2230_v51  ;;  %v2062_v31 = vmax.f32 %v2036_v21, 0.0  ;;  %v1945_v51 = vpop.f32.mrf.mxu2  ;;  %v1943_v7 = vadd.f32 %v1942_v29, %v1894_v49 }
 0x1f5   :  { %2246 = vst [vmem:[#allocation3 + $0xf4] sm:$0xf] %v2212_v8  ;;  %v10478_v47 = vld [vmem:[#allocation3 + $0x100] sm:$0xf0] }
 0x1f6   :  { %2254 = vst [vmem:[#allocation3 + $0xd4] sm:$0xf] %v2194_v26  ;;  %v2269_v62 = vrot.slane %v2062_v31, 7  ;;  %v2299_v41 = vrot.slane %v2062_v31, 1  ;;  %v8677_v44 = vor.u32 %v10478_v47, %v8676_v61  ;;  %v8678_v22 = vld [vmem:[#allocation3 + $0x104] sm:$0xf0]  ;;  %v1654_v26 = vadd.f32 %v11790_v59, %v13365_v1 }
 0x1f7   :  { %2255 = vst [vmem:[#allocation3 + $0xf8] sm:$0xf] %v2221_v13  ;;  %v8681_v60 = vor.u32 %v10474_v16, %v8678_v22  ;;  %v2345_v10 = vpack.c.bf16 %v2062_v31, %v2062_v31  ;;  %v1992_v31 = vadd.f32 %v1991_v12, %v1943_v7 }
 0x1f8   :  { %2336 = vst [vmem:[#allocation3 + $0x144] sm:$0xf] %v2328_v50  ;;  %v2284_v30 = vsel %vm13363_vm13, %v2268_v38, %v2269_v62  ;;  %v2314_v8 = vsel %vm13364_vm3, %v2298_v0, %v2299_v41  ;;  %3580 = vmatmul.bf16.gmra.mxu3 %v8677_v44  ;;  %v1703_v37 = vadd.f32 %v13366_v24, %v1654_v26  ;;  %v1994_v21 = vpop.f32.mrf.mxu3  ;;  %vm13369_vm13 = vmmov %vm13364_vm3  ;;  %v1898_v22 = vpop.f32.mrf.mxu1 }
 0x1f9   :  { %2352 = vst [vmem:[#allocation3 + $0x148] sm:$0xf] %v2344_v27  ;;  %v2289_v20 = vsel %vm11092_vm6, 0.0, %v2284_v30  ;;  %v2318_v13 = vsel %vm11086_vm5, 0.0, %v2314_v8  ;;  %3629 = vmatmul.bf16.gmra.mxu0 %v8681_v60  ;;  %v2038_v36 = vpop.f32.mrf.mxu0  ;;  %vm13371_vm3 = vnez %v13288_v17 }
 0x1fa   :  { %2367 = vst [vmem:[#allocation3 + $0x128] sm:$0xf] %v2359_v42  ;;  %v2329_v38 = vpack.c.bf16 %v2289_v20, %v2289_v20  ;;  %v2039_v52 = vadd.f32 %v2038_v36, %v1990_v34  ;;  %v2360_v0 = vpack.c.bf16 %v2318_v13, %v2318_v13  ;;  %v1752_v23 = vadd.f32 %v13367_v35, %v1703_v37  ;;  %v13373_v36 = vld [vmem:[#allocation28_spill] sm:$0xff] }
 0x1fb   :  { %2376 = vst [vmem:[#allocation3 + $0x12c] sm:$0xf] %v2328_v50  ;;  %v13374_v35 = vld [vmem:[#allocation20_spill] sm:$0xff] }
 0x1fc   :  { %2385 = vst [vmem:[#allocation3 + $0x130] sm:$0xf] %v2344_v27  ;;  %v2063_v43 = vmax.f32 %v2039_v52, 0.0  ;;  %v13370_v27 = vld [vmem:[#allocation27_spill] sm:$0xff]  ;;  %v1947_v26 = vpop.f32.mrf.mxu2 }
 0x1fd   :  { %2337 = vst [vmem:[#allocation3 + $0x168] sm:$0xf] %v2329_v38  ;;  %v1897_v47 = vadd.f32 %v1896_v46, %v13370_v27  ;;  %v13372_v46 = vld [vmem:[#allocation19_spill] sm:$0xff] }
 0x1fe   :  { %2353 = vst [vmem:[#allocation3 + $0x16c] sm:$0xf] %v2345_v10  ;;  %v2270_v58 = vrot.slane %v2063_v43, 7  ;;  %v2300_v45 = vrot.slane %v2063_v43, 1  ;;  %v1801_v8 = vadd.f32 %v13372_v46, %v1752_v23  ;;  %v1659_v23 = vadd.f32 %v11790_v59, %v13374_v35 }
 0x1ff   :  { %2368 = vst [vmem:[#allocation3 + $0x14c] sm:$0xf] %v2360_v0  ;;  %v10486_v61 = vld [vmem:[#allocation3 + $0x140] sm:$0xf0]  ;;  %v1946_v1 = vadd.f32 %v1945_v51, %v1897_v47  ;;  %v13375_v47 = vld [vmem:[#allocation22_spill] sm:$0xff] }
 0x200   :  { %2377 = vst [vmem:[#allocation3 + $0x150] sm:$0xf] %v2329_v38  ;;  %v2283_v29 = vsel %vm13368_vm0, %v2269_v62, %v2270_v58  ;;  %v2313_v50 = vsel %vm13369_vm13, %v2299_v41, %v2300_v45  ;;  %v8706_v28 = vld [vmem:[#allocation3 + $0x144] sm:$0xf0]  ;;  %v8705_v6 = vor.u32 %v10486_v61, %v8704_v40  ;;  %v2346_v62 = vpack.c.bf16 %v2063_v43, %v2063_v43  ;;  %v10552_v41 = vld [vmem:[#allocation5 + $0x350] sm:$0xff]  ;;  %v1996_v40 = vpop.f32.mrf.mxu3 }
 0x201   :  { %2386 = vst [vmem:[#allocation3 + $0x154] sm:$0xf] %v2345_v10  ;;  %v2290_v16 = vsel %vm11144_vm7, 0.0, %v2283_v29  ;;  %v2319_v42 = vsel %vm13371_vm3, 0.0, %v2313_v50  ;;  %v8709_v44 = vor.u32 %v10482_v53, %v8706_v28  ;;  %v2040_v12 = vpop.f32.mrf.mxu0  ;;  %3660 = vmatpush.bf16.msrb.mxu1 %v10552_v41  ;;  %v8712_v13 = vld [vmem:[#allocation3 + $0x128] sm:$0xf]  ;;  %v1850_v49 = vadd.f32 %v13373_v36, %v1801_v8  ;;  %v1901_v28 = vpop.f32.mrf.mxu1 }
 0x202   :  { %2394 = vst [vmem:[#allocation3 + $0x134] sm:$0xf] %v2360_v0  ;;  %v2330_v60 = vpack.c.bf16 %v2290_v16, %v2290_v16  ;;  %3487 = vmatmul.bf16.gmra.mxu1 %v8705_v6  ;;  %v2041_v34 = vadd.f32 %v2040_v12, %v1992_v31  ;;  %v2361_v30 = vpack.c.bf16 %v2319_v42, %v2319_v42  ;;  %v10565_v50 = vld [vmem:[#allocation5 + $0x3b8] sm:$0xff] }
 0x203   :  { %2403 = vst [vmem:[#allocation3 + $0x138] sm:$0xf] %v2329_v38  ;;  %3536 = vmatmul.bf16.gmra.mxu2 %v8709_v44  ;;  %v10483_v38 = vld [vmem:[#allocation3 + $0x12c] sm:$0xf]  ;;  %v1995_v37 = vadd.f32 %v1994_v21, %v1946_v1  ;;  %v1899_v29 = vadd.f32 %v1898_v22, %v1850_v49  ;;  %v1708_v16 = vadd.f32 %v13375_v47, %v1659_v23  ;;  %v10564_v49 = vld [vmem:[#allocation5 + $0x3b0] sm:$0xff] }
 0x204   :  { %2412 = vst [vmem:[#allocation3 + $0x13c] sm:$0xf] %v2345_v10  ;;  %v2064_v20 = vmax.f32 %v2041_v34, 0.0  ;;  %v8740_v12 = vld [vmem:[#allocation3 + $0x168] sm:$0xf]  ;;  %3704 = vmatpush.bf16.msrb.mxu2 %v10565_v50  ;;  %v1950_v22 = vpop.f32.mrf.mxu2  ;;  %v13376_v34 = vmov 0.0|0.0  }
 0x205   :  { %2338 = vst [vmem:[#allocation3 + $0x18c] sm:$0xf] %v2330_v60  ;;  %v10491_v8 = vld [vmem:[#allocation3 + $0x16c] sm:$0xf] }
 0x206   :  { %2354 = vst [vmem:[#allocation3 + $0x190] sm:$0xf] %v2346_v62  ;;  %v2271_v52 = vrot.slane %v2064_v20, 7  ;;  %v2301_v0 = vrot.slane %v2064_v20, 1  ;;  %v10487_v7 = vld [vmem:[#allocation3 + $0x148] sm:$0xf0]  ;;  %v2347_v42 = vpack.c.bf16 %v2064_v20, %v2064_v20 }
 0x207   :  { %2369 = vst [vmem:[#allocation3 + $0x170] sm:$0xf] %v2361_v30  ;;  %v8713_v43 = vor.u32 %v10487_v7, %v8712_v13  ;;  %v8714_v24 = vld [vmem:[#allocation3 + $0x14c] sm:$0xf0]  ;;  %v13378_v13 = vld [vmem:[#allocation11_spill] sm:$0xff] }
 0x208   :  { %2378 = vst [vmem:[#allocation3 + $0x174] sm:$0xf] %v2330_v60  ;;  %v2282_v51 = vsel %vm13368_vm0, %v2270_v58, %v2271_v52  ;;  %v2312_v10 = vsel %vm13369_vm13, %v2300_v45, %v2301_v0  ;;  %v8717_v53 = vor.u32 %v10483_v38, %v8714_v24  ;;  %v1948_v45 = vadd.f32 %v1947_v26, %v1899_v29  ;;  %v13377_v26 = vld [vmem:[#allocation23_spill] sm:$0xff]  ;;  %v13379_v38 = vld [vmem:[#allocation29_spill] sm:$0xff] }
 0x209   :  { %2387 = vst [vmem:[#allocation3 + $0x178] sm:$0xf] %v2346_v62  ;;  %v2291_v61 = vsel %vm11192_vm10, 0.0, %v2282_v51  ;;  %3585 = vmatmul.bf16.gmra.mxu3 %v8713_v43  ;;  %v2043_v31 = vpop.f32.mrf.mxu0  ;;  %v2320_v58 = vsel %vm13352_vm8, 0.0, %v2312_v10  ;;  %3705 = vmatpush.bf16.msrb.mxu2 %v10564_v49  ;;  %v1902_v24 = vadd.f32 %v1901_v28, %v13379_v38  ;;  %v10572_v38 = vld [vmem:[#allocation5 + $0x3f0] sm:$0xff] }
 0x20a   :  { %2395 = vst [vmem:[#allocation3 + $0x158] sm:$0xf] %v2361_v30  ;;  %3634 = vmatmul.bf16.gmra.mxu0 %v8717_v53  ;;  %v2044_v21 = vadd.f32 %v2043_v31, %v1995_v37  ;;  %v2331_v6 = vpack.c.bf16 %v2291_v61, %v2291_v61  ;;  %v1997_v7 = vadd.f32 %v1996_v40, %v1948_v45  ;;  %v1999_v37 = vpop.f32.mrf.mxu3  ;;  %v13380_v40 = vld [vmem:[#allocation25_spill] sm:$0xff]  ;;  %v10563_v61 = vld [vmem:[#allocation5 + $0x3a8] sm:$0xff]  ;;  %v13381_v31 = vld [vmem:[#allocation30_spill] sm:$0xff] }
 0x20b   :  { %2404 = vst [vmem:[#allocation3 + $0x15c] sm:$0xf] %v2330_v60  ;;  %v2362_v60 = vpack.c.bf16 %v2320_v58, %v2320_v58  ;;  %v1951_v35 = vadd.f32 %v1950_v22, %v1902_v24  ;;  %v1903_v58 = vpop.f32.mrf.mxu1  ;;  %v10580_v24 = vld [vmem:[#allocation5 + $0x430] sm:$0xff] }
 0x20c   :  { %2413 = vst [vmem:[#allocation3 + $0x160] sm:$0xf] %v2346_v62  ;;  %v2065_v59 = vmax.f32 %v2044_v21, 0.0  ;;  %v10495_v27 = vld [vmem:[#allocation3 + $0x188] sm:$0xf0]  ;;  %v1757_v62 = vadd.f32 %v13377_v26, %v1708_v16  ;;  %v1952_v16 = vpop.f32.mrf.mxu2 }
 0x20d   :  { %2421 = vst [vmem:[#allocation3 + $0x140] sm:$0xf] %v2361_v30  ;;  %v8742_v44 = vld [vmem:[#allocation3 + $0x18c] sm:$0xf0]  ;;  %v8741_v1 = vor.u32 %v10495_v27, %v8740_v12  ;;  %3706 = vmatpush.bf16.msrb.mxu2 %v10563_v61  ;;  %v2000_v47 = vadd.f32 %v1999_v37, %v1951_v35 }
 0x20e   :  { %4198 = vst [vmem:[#allocation3 + $0x124] sm:$0xf] %v13376_v34  ;;  %v2272_v41 = vrot.slane %v2065_v59, 7  ;;  %v2302_v46 = vrot.slane %v2065_v59, 1  ;;  %v8745_v36 = vor.u32 %v10491_v8, %v8742_v44  ;;  %v1806_v53 = vadd.f32 %v13380_v40, %v1757_v62  ;;  %v8748_v22 = vld [vmem:[#allocation3 + $0x170] sm:$0xf] }
 0x20f   :  { %4182 = vst [vmem:[#allocation3 + $0x120] sm:$0xf] %v13378_v13  ;;  %v2348_v50 = vpack.c.bf16 %v2065_v59, %v2065_v59  ;;  %v10562_v8 = vld [vmem:[#allocation5 + $0x3a0] sm:$0xff]  ;;  %v10492_v26 = vld [vmem:[#allocation3 + $0x174] sm:$0xf] }
 0x210   :  { %2339 = vst [vmem:[#allocation3 + $0x1b0] sm:$0xf] %v2331_v6  ;;  %v2281_v30 = vsel %vm13368_vm0, %v2271_v52, %v2272_v41  ;;  %v2311_v20 = vsel %vm13369_vm13, %v2301_v0, %v2302_v46  ;;  %v10551_v52 = vld [vmem:[#allocation5 + $0x348] sm:$0xff]  ;;  %v1855_v29 = vadd.f32 %v13381_v31, %v1806_v53  ;;  %v10560_v31 = vld [vmem:[#allocation5 + $0x390] sm:$0xff] }
 0x211   :  { %2355 = vst [vmem:[#allocation3 + $0x1b4] sm:$0xf] %v2347_v42  ;;  %v2045_v43 = vpop.f32.mrf.mxu0  ;;  %v2292_v51 = vsel %vm11213_vm11, 0.0, %v2281_v30  ;;  %v2321_v0 = vsel %vm11221_vm12, 0.0, %v2311_v20  ;;  %3661 = vmatpush.bf16.msrb.mxu1 %v10551_v52  ;;  %3707 = vmatpush.bf16.msrb.mxu2 %v10562_v8  ;;  %vm13389_vm12 = vcmp.lt.s32.totalorder %v11050_v2, 7 }
 0x212   :  { %2370 = vst [vmem:[#allocation3 + $0x194] sm:$0xf] %v2362_v60  ;;  %3492 = vmatmul.bf16.gmra.mxu1 %v8741_v1  ;;  %v2046_v10 = vadd.f32 %v2045_v43, %v1997_v7  ;;  %v2332_v21 = vpack.c.bf16 %v2292_v51, %v2292_v51  ;;  %v2363_v27 = vpack.c.bf16 %v2321_v0, %v2321_v0  ;;  %v10581_v7 = vld [vmem:[#allocation5 + $0x438] sm:$0xff]  ;;  %v10550_v51 = vld [vmem:[#allocation5 + $0x340] sm:$0xff] }
 0x213   :  { %2379 = vst [vmem:[#allocation3 + $0x198] sm:$0xf] %v2331_v6  ;;  %3541 = vmatmul.bf16.gmra.mxu2 %v8745_v36  ;;  %v1904_v59 = vadd.f32 %v1903_v58, %v1855_v29  ;;  %3802 = vmatpush.bf16.msra.mxu0 %v10581_v7  ;;  %v10561_v43 = vld [vmem:[#allocation5 + $0x398] sm:$0xff] }
 0x214   :  { %2388 = vst [vmem:[#allocation3 + $0x19c] sm:$0xf] %v2347_v42  ;;  %v11918_v23 = vmax.f32 %v2046_v10, 0.0 }
 0x215   :  { %2396 = vst [vmem:[#allocation3 + $0x17c] sm:$0xf] %v2362_v60  ;;  %3708 = vmatpush.bf16.msrb.mxu2 %v10561_v43  ;;  %3662 = vmatpush.bf16.msrb.mxu1 %v10550_v51  ;;  %v10577_v43 = vld [vmem:[#allocation5 + $0x418] sm:$0xff] }
 0x216   :  { %2405 = vst [vmem:[#allocation3 + $0x180] sm:$0xf] %v2331_v6  ;;  %v2273_v45 = vrot.slane %v11918_v23, 7  ;;  %v2303_v28 = vrot.slane %v11918_v23, 1  ;;  %v10573_v6 = vld [vmem:[#allocation5 + $0x3f8] sm:$0xff]  ;;  %v2349_v0 = vpack.c.bf16 %v11918_v23, %v11918_v23 }
 0x217   :  { %2414 = vst [vmem:[#allocation3 + $0x184] sm:$0xf] %v2347_v42  ;;  %3753 = vmatpush.bf16.msrb.mxu3 %v10573_v6  ;;  %v8776_v52 = vld [vmem:[#allocation3 + $0x1b0] sm:$0xf]  ;;  %3803 = vmatpush.bf16.msra.mxu0 %v10580_v24 }
 0x218   :  { %2422 = vst [vmem:[#allocation3 + $0x164] sm:$0xf] %v2362_v60  ;;  %v2280_v44 = vsel %vm13368_vm0, %v2272_v41, %v2273_v45  ;;  %v2310_v12 = vsel %vm13369_vm13, %v2302_v46, %v2303_v28  ;;  %v1953_v60 = vadd.f32 %v1952_v16, %v1904_v59  ;;  %vm13382_vm0 = vnez %v13300_v57  ;;  %v2001_v46 = vpop.f32.mrf.mxu3  ;;  %v10500_v61 = vld [vmem:[#allocation3 + $0x1b4] sm:$0xf]  ;;  %v10578_v59 = vld [vmem:[#allocation5 + $0x420] sm:$0xff] }
 0x219   :  { %2340 = vst [vmem:[#allocation3 + $0x1d4] sm:$0xf] %v2332_v21  ;;  %v10496_v1 = vld [vmem:[#allocation3 + $0x190] sm:$0xf0]  ;;  %v2048_v62 = vpop.f32.mrf.mxu0  ;;  %v2293_v41 = vsel %vm13382_vm0, 0.0, %v2280_v44  ;;  %vm13383_vm13 = vnez %v13298_v18  ;;  %vm13385_vm0 = vcmp.lt.s32.totalorder %v11050_v2, 7  ;;  %3709 = vmatpush.bf16.msrb.mxu2 %v10560_v31 }
 0x21a   :  { %2356 = vst [vmem:[#allocation3 + $0x1d8] sm:$0xf] %v2348_v50  ;;  %v8749_v42 = vor.u32 %v10496_v1, %v8748_v22  ;;  %v8750_v36 = vld [vmem:[#allocation3 + $0x194] sm:$0xf0]  ;;  %v2049_v49 = vadd.f32 %v2048_v62, %v2000_v47  ;;  %v2322_v37 = vsel %vm13383_vm13, 0.0, %v2310_v12  ;;  %v2333_v10 = vpack.c.bf16 %v2293_v41, %v2293_v41  ;;  %v10571_v44 = vld [vmem:[#allocation5 + $0x3e8] sm:$0xff] }
 0x21b   :  { %2371 = vst [vmem:[#allocation3 + $0x1b8] sm:$0xf] %v2363_v27  ;;  %v8753_v30 = vor.u32 %v10492_v26, %v8750_v36  ;;  %v2002_v35 = vadd.f32 %v2001_v46, %v1953_v60  ;;  %3754 = vmatpush.bf16.msrb.mxu3 %v10572_v38  ;;  %v2364_v29 = vpack.c.bf16 %v2322_v37, %v2322_v37  ;;  %vm13384_vm13 = vcmp.lt.s32.totalorder %v11050_v2, 1  ;;  %v10579_v22 = vld [vmem:[#allocation5 + $0x428] sm:$0xff]  ;;  %v10558_v36 = vld [vmem:[#allocation5 + $0x380] sm:$0xff]  ;;  %v10569_v46 = vld [vmem:[#allocation5 + $0x3d8] sm:$0xff] }
 0x21c   :  { %2380 = vst [vmem:[#allocation3 + $0x1bc] sm:$0xf] %v2332_v21  ;;  %3590 = vmatmul.bf16.gmra.mxu3 %v8749_v42  ;;  %v11929_v20 = vmax.f32 %v2049_v49, 0.0  ;;  %3804 = vmatpush.bf16.msra.mxu0 %v10579_v22  ;;  %v10589_v49 = vld [vmem:[#allocation5 + $0x478] sm:$0xff] }
 0x21d   :  { %2389 = vst [vmem:[#allocation3 + $0x1c0] sm:$0xf] %v2348_v50  ;;  %3639 = vmatmul.bf16.gmra.mxu0 %v8753_v30  ;;  %3851 = vmatpush.bf16.msra.mxu1 %v10589_v49 }
 0x21e   :  { %2397 = vst [vmem:[#allocation3 + $0x1a0] sm:$0xf] %v2363_v27  ;;  %v2274_v40 = vrot.slane %v11929_v20, 7  ;;  %v2304_v53 = vrot.slane %v11929_v20, 1  ;;  %v2350_v7 = vpack.c.bf16 %v11929_v20, %v11929_v20 }
 0x21f   :  { %2406 = vst [vmem:[#allocation3 + $0x1a4] sm:$0xf] %v2332_v21  ;;  %3755 = vmatpush.bf16.msrb.mxu3 %v10571_v44  ;;  %v10575_v44 = vld [vmem:[#allocation5 + $0x408] sm:$0xff] }
 0x220   :  { %2415 = vst [vmem:[#allocation3 + $0x1a8] sm:$0xf] %v2348_v50  ;;  %v2279_v58 = vsel %vm13384_vm13, %v2273_v45, %v2274_v40  ;;  %v2309_v47 = vsel %vm13385_vm0, %v2303_v28, %v2304_v53  ;;  %v10504_v16 = vld [vmem:[#allocation3 + $0x1d0] sm:$0xf0]  ;;  %v10559_v50 = vld [vmem:[#allocation5 + $0x388] sm:$0xff]  ;;  %vm13386_vm13 = vnez %v13302_v63  ;;  %vm13387_vm0 = vnez %v13304_v48  ;;  %3805 = vmatpush.bf16.msra.mxu0 %v10578_v59 }
 0x221   :  { %2423 = vst [vmem:[#allocation3 + $0x188] sm:$0xf] %v2363_v27  ;;  %v8778_v21 = vld [vmem:[#allocation3 + $0x1d4] sm:$0xf0]  ;;  %v8777_v12 = vor.u32 %v10504_v16, %v8776_v52  ;;  %v2050_v23 = vpop.f32.mrf.mxu0  ;;  %v2294_v45 = vsel %vm13386_vm13, 0.0, %v2279_v58  ;;  %v10570_v27 = vld [vmem:[#allocation5 + $0x3e0] sm:$0xff]  ;;  %3710 = vmatpush.bf16.msrb.mxu2 %v10559_v50 }
 0x222   :  { %2341 = vst [vmem:[#allocation3 + $0x1f8] sm:$0xf] %v2333_v10  ;;  %v8781_v8 = vor.u32 %v10500_v61, %v8778_v21  ;;  %v2051_v6 = vadd.f32 %v2050_v23, %v2002_v35  ;;  %v2323_v1 = vsel %vm13387_vm0, 0.0, %v2309_v47  ;;  %v2334_v42 = vpack.c.bf16 %v2294_v45, %v2294_v45  ;;  %v8784_v38 = vld [vmem:[#allocation3 + $0x1b8] sm:$0xf]  ;;  %v10576_v52 = vld [vmem:[#allocation5 + $0x410] sm:$0xff] }
 0x223   :  { %2357 = vst [vmem:[#allocation3 + $0x1fc] sm:$0xf] %v2349_v0  ;;  %3497 = vmatmul.bf16.gmra.mxu1 %v8777_v12  ;;  %vm13388_vm13 = vcmp.lt.s32.totalorder %v11050_v2, 1  ;;  %v2365_v30 = vpack.c.bf16 %v2323_v1, %v2323_v1  ;;  %3756 = vmatpush.bf16.msrb.mxu3 %v10570_v27  ;;  %v10501_v37 = vld [vmem:[#allocation3 + $0x1bc] sm:$0xf]  ;;  %v10567_v16 = vld [vmem:[#allocation5 + $0x3c8] sm:$0xff] }
 0x224   :  { %2372 = vst [vmem:[#allocation3 + $0x1dc] sm:$0xf] %v2364_v29  ;;  %3546 = vmatmul.bf16.gmra.mxu2 %v8781_v8  ;;  %v2068_v28 = vmax.f32 %v2051_v6, 0.0  ;;  %3806 = vmatpush.bf16.msra.mxu0 %v10577_v43  ;;  %v10566_v27 = vld [vmem:[#allocation5 + $0x3c0] sm:$0xff]  ;;  %v11968_v43 = vld [vmem:[#allocation3 + $0x114] sm:$0xf0] }
 0x225   :  { %2381 = vst [vmem:[#allocation3 + $0x1e0] sm:$0xf] %v2333_v10  ;;  %3711 = vmatpush.bf16.msrb.mxu2 %v10558_v36  ;;  %v10574_v1 = vld [vmem:[#allocation5 + $0x400] sm:$0xff] }
 0x226   :  { %2390 = vst [vmem:[#allocation3 + $0x1e4] sm:$0xf] %v2349_v0  ;;  %v2275_v26 = vrot.slane %v2068_v28, 7  ;;  %v2305_v62 = vrot.slane %v2068_v28, 1  ;;  %v2384_v21 = vpack.c.bf16 %v2068_v28, %v2068_v28  ;;  %v11965_v28 = vld [vmem:[#allocation7 + $0x1] ss:$0 sm:$0xff] }
 0x227   :  { %2398 = vst [vmem:[#allocation3 + $0x1c4] sm:$0xf] %v2364_v29  ;;  %3757 = vmatpush.bf16.msrb.mxu3 %v10569_v46 }
 0x228   :  { %2407 = vst [vmem:[#allocation3 + $0x1c8] sm:$0xf] %v2333_v10  ;;  %v2278_v60 = vsel %vm13388_vm13, %v2274_v40, %v2275_v26  ;;  %v2308_v41 = vsel %vm13389_vm12, %v2304_v53, %v2305_v62  ;;  %v10568_v53 = vld [vmem:[#allocation5 + $0x3d0] sm:$0xff]  ;;  %vm13390_vm12 = vmmov %vm13388_vm13  ;;  %vm13391_vm13 = vcmp.lt.s32.totalorder %v11050_v2, 7  ;;  %3807 = vmatpush.bf16.msra.mxu0 %v10576_v52 }
 0x229   :  { %2416 = vst [vmem:[#allocation3 + $0x1cc] sm:$0xf] %v2349_v0  ;;  %v2324_v10 = vsel %vm13356_vm14, 0.0, %v2308_v41  ;;  %v2277_v35 = vsel %vm13390_vm12, %v2275_v26, %v11053_v4  ;;  %v2295_v0 = vsel %vm13355_vm15, 0.0, %v2278_v60  ;;  %v2307_v61 = vsel %vm13391_vm13, %v2305_v62, %v11071_v25  ;;  %v8812_v12 = vld [vmem:[#allocation3 + $0x1f8] sm:$0xf] }
 0x22a   :  { %2424 = vst [vmem:[#allocation3 + $0x1ac] sm:$0xf] %v2364_v29  ;;  %v2366_v31 = vpack.c.bf16 %v2324_v10, %v2324_v10  ;;  %v2296_v29 = vsel %vm11502_vm9, 0.0, %v2277_v35  ;;  %v2325_v58 = vsel %vm11517_vm4, 0.0, %v2307_v61  ;;  %v2375_v47 = vpack.c.bf16 %v2295_v0, %v2295_v0  ;;  %v10509_v22 = vld [vmem:[#allocation3 + $0x1fc] sm:$0xf] }
 0x22b   :  { %2342 = vst [vmem:[#allocation3 + $0x21c] sm:$0xf] %v2334_v42  ;;  %v10505_v24 = vld [vmem:[#allocation3 + $0x1d8] sm:$0xf0]  ;;  %3758 = vmatpush.bf16.msrb.mxu3 %v10568_v53  ;;  %v2393_v50 = vpack.c.bf16 %v2325_v58, %v2325_v58  ;;  %v2402_v59 = vpack.c.bf16 %v2296_v29, %v2296_v29  ;;  %v10588_v26 = vld [vmem:[#allocation5 + $0x470] sm:$0xff]  ;;  %v10587_v58 = vld [vmem:[#allocation5 + $0x468] sm:$0xff] }
 0x22c   :  { %2358 = vst [vmem:[#allocation3 + $0x220] sm:$0xf] %v2350_v7  ;;  %v8785_v20 = vor.u32 %v10505_v24, %v8784_v38  ;;  %v8786_v51 = vld [vmem:[#allocation3 + $0x1dc] sm:$0xf0]  ;;  %3808 = vmatpush.bf16.msra.mxu0 %v10575_v44  ;;  %3852 = vmatpush.bf16.msra.mxu1 %v10588_v26  ;;  %v11971_v24 = vld [vmem:[#allocation3 + $0x234] sm:$0xf0] }
 0x22d   :  { %2373 = vst [vmem:[#allocation3 + $0x200] sm:$0xf] %v2365_v30  ;;  %v8789_v40 = vor.u32 %v10501_v37, %v8786_v51  ;;  %v10452_v37 = vld [vmem:[#allocation3 + $0x30] sm:$0xf0]  ;;  %v11977_v10 = vld [vmem:[#allocation3 + $0x238] sm:$0xf0] }
 0x22e   :  { %2382 = vst [vmem:[#allocation3 + $0x204] sm:$0xf] %v2334_v42  ;;  %3595 = vmatmul.bf16.gmra.mxu3 %v8785_v20  ;;  %v11974_v20 = vld [vmem:[#allocation3 + $0x118] sm:$0xf0]  ;;  %v13392_v51 = vld [vmem:[#allocation21_spill] sm:$0xff] }
 0x22f   :  { %2391 = vst [vmem:[#allocation3 + $0x208] sm:$0xf] %v2350_v7  ;;  %3644 = vmatmul.bf16.gmra.mxu0 %v8789_v40  ;;  %3759 = vmatpush.bf16.msrb.mxu3 %v10567_v16  ;;  %v8578_v40 = vld [vmem:[#allocation3 + $0x34] sm:$0xf0]  ;;  %v8576_v53 = vld [vmem:[#allocation3 + $0x10] sm:$0xf] }
 0x230   :  { %2399 = vst [vmem:[#allocation3 + $0x1e8] sm:$0xf] %v2365_v30  ;;  %3809 = vmatpush.bf16.msra.mxu0 %v10574_v1  ;;  %v10448_v52 = vld [vmem:[#allocation3 + $0x14] sm:$0xf]  ;;  %v8577_v35 = vor.u32 %v10452_v37, %v8576_v53  ;;  %3853 = vmatpush.bf16.msra.mxu1 %v10587_v58  ;;  %v8586_v16 = vld [vmem:[#allocation3 + $0x3c] sm:$0xf0] }
 0x231   :  { %2408 = vst [vmem:[#allocation3 + $0x1ec] sm:$0xf] %v2334_v42  ;;  %v8581_v61 = vor.u32 %v10448_v52, %v8578_v40  ;;  %v10586_v52 = vld [vmem:[#allocation5 + $0x460] sm:$0xff] }
 0x232   :  { %2417 = vst [vmem:[#allocation3 + $0x1f0] sm:$0xf] %v2350_v7  ;;  %v10513_v23 = vld [vmem:[#allocation3 + $0x218] sm:$0xf0] }
 0x233   :  { %2425 = vst [vmem:[#allocation3 + $0x1d0] sm:$0xf] %v2365_v30  ;;  %v8814_v8 = vld [vmem:[#allocation3 + $0x21c] sm:$0xf0]  ;;  %v8813_v6 = vor.u32 %v10513_v23, %v8812_v12  ;;  %3760 = vmatpush.bf16.msrb.mxu3 %v10566_v27 }
 0x234   :  { %2374 = vst [vmem:[#allocation3 + $0x224] sm:$0xf] %v2366_v31  ;;  %v8817_v45 = vor.u32 %v10509_v22, %v8814_v8  ;;  %v8820_v62 = vld [vmem:[#allocation3 + $0x200] sm:$0xf]  ;;  %v10449_v8 = vld [vmem:[#allocation3 + $0x1c] sm:$0xf]  ;;  %3854 = vmatpush.bf16.msra.mxu1 %v10586_v52 }
 0x235   :  { %2383 = vst [vmem:[#allocation3 + $0x228] sm:$0xf] %v2375_v47  ;;  %3502 = vmatmul.bf16.gmra.mxu1 %v8813_v6  ;;  %v10510_v7 = vld [vmem:[#allocation3 + $0x204] sm:$0xf] }
 0x236   :  { %2392 = vst [vmem:[#allocation3 + $0x22c] sm:$0xf] %v2384_v21  ;;  %3551 = vmatmul.bf16.gmra.mxu2 %v8817_v45  ;;  %v8589_v45 = vor.u32 %v10449_v8, %v8586_v16  ;;  %v10458_v16 = vld [vmem:[#allocation3 + $0x64] sm:$0xf] }
 0x237   :  { %2400 = vst [vmem:[#allocation3 + $0x20c] sm:$0xf] %v2366_v31 }
 0x238   :  { %2401 = vst [vmem:[#allocation3 + $0x230] sm:$0xf] %v2393_v50 }
 0x239   :  { %2409 = vst [vmem:[#allocation3 + $0x210] sm:$0xf] %v2375_v47  ;;  %v10453_v47 = vld [vmem:[#allocation3 + $0x38] sm:$0xf0] }
 0x23a   :  { %2410 = vst [vmem:[#allocation3 + $0x234] sm:$0xf] %v2402_v59 }
 0x23b   :  { %2418 = vst [vmem:[#allocation3 + $0x214] sm:$0xf] %v2384_v21  ;;  %v10514_v42 = vld [vmem:[#allocation3 + $0x220] sm:$0xf0]  ;;  %v3468_v36 = vpop.f32.mrf.mxu1  ;;  %v8584_v21 = vld [vmem:[#allocation3 + $0x18] sm:$0xf] }
 0x23c   :  { %2426 = vst [vmem:[#allocation3 + $0x1f4] sm:$0xf] %v2366_v31  ;;  %v8821_v49 = vor.u32 %v10514_v42, %v8820_v62  ;;  %v8822_v60 = vld [vmem:[#allocation3 + $0x224] sm:$0xf0]  ;;  %v3469_v41 = vadd.f32 %v11965_v28, %v3468_v36  ;;  %v8585_v22 = vor.u32 %v10453_v47, %v8584_v21  ;;  %v10461_v62 = vld [vmem:[#allocation3 + $0x78] sm:$0xf0] }
 0x23d   :  { %2427 = vst [vmem:[#allocation3 + $0x218] sm:$0xf] %v2393_v50  ;;  %v8825_v30 = vor.u32 %v10510_v7, %v8822_v60  ;;  %v3517_v46 = vpop.f32.mrf.mxu2  ;;  %v8614_v36 = vld [vmem:[#allocation3 + $0x7c] sm:$0xf0]  ;;  %v10457_v60 = vld [vmem:[#allocation3 + $0x5c] sm:$0xf] }
 0x23e   :  { %3600 = vmatmul.bf16.gmra.mxu3 %v8821_v49  ;;  %v3518_v38 = vadd.f32 %v3517_v46, %v3469_v41  ;;  %4094 = vst [vmem:[#allocation3 + $0x118] sm:$0xf] %v13376_v34  ;;  %v8612_v49 = vld [vmem:[#allocation3 + $0x58] sm:$0xf] }
 0x23f   :  { %3649 = vmatmul.bf16.gmra.mxu0 %v8825_v30  ;;  %4266 = vst [vmem:[#allocation3 + $0x238] sm:$0xf] %v13376_v34  ;;  %v8613_v41 = vor.u32 %v10461_v62, %v8612_v49  ;;  %v10466_v62 = vld [vmem:[#allocation3 + $0xa4] sm:$0xf] }
 0x240   :  { %4103 = vst [vmem:[#allocation3 + $0x11c] sm:$0xf] %v13392_v51 }
 0x241   :  { %4275 = vst [vmem:[#allocation3 + $0x23c] sm:$0xf] %v13392_v51 }
 0x243   :  { %v3470_v0 = vpop.f32.mrf.mxu1 }
 0x244   :  { %v3471_v50 = vadd.f32 %v11965_v28, %v3470_v0  ;;  %v8622_v0 = vld [vmem:[#allocation3 + $0x84] sm:$0xf0] }
 0x245   :  { %3663 = vmatmul.bf16.vlgmr.msrb.gmra.mxu1 %v8577_v35  ;;  %v3615_v31 = vpop.f32.mrf.mxu0  ;;  %v3519_v29 = vpop.f32.mrf.mxu2  ;;  %v10462_v35 = vld [vmem:[#allocation3 + $0x80] sm:$0xf0]  ;;  %v8625_v21 = vor.u32 %v10458_v16, %v8622_v0 }
 0x246   :  { %3712 = vmatmul.bf16.vlgmr.msrb.gmra.mxu2 %v8581_v61  ;;  %v3520_v42 = vadd.f32 %v3519_v29, %v3471_v50 }
 0x24a   :  { %v3566_v44 = vpop.f32.mrf.mxu3 }
 0x24b   :  { %v3567_v12 = vadd.f32 %v3566_v44, %v3518_v38  ;;  %v3473_v23 = vpop.f32.mrf.mxu1  ;;  %v8617_v38 = vor.u32 %v10457_v60, %v8614_v36 }
 0x24c   :  { %v3474_v6 = vadd.f32 %v11965_v28, %v3473_v23 }
 0x24d   :  { %v3617_v27 = vpop.f32.mrf.mxu0  ;;  %v11982_v59 = vadd.f32 %v3615_v31, %v3567_v12  ;;  %v8620_v31 = vld [vmem:[#allocation3 + $0x60] sm:$0xf] }
 0x24e   :  { %3761 = vmatmul.bf16.vlgmr.msrb.gmra.mxu3 %v8585_v22  ;;  %v3522_v1 = vpop.f32.mrf.mxu2  ;;  %v8621_v47 = vor.u32 %v10462_v35, %v8620_v31  ;;  %v10467_v35 = vld [vmem:[#allocation3 + $0xac] sm:$0xf] }
 0x24f   :  { %3810 = vmatmul.bf16.vlgmr.msra.gmra.mxu0 %v8589_v45  ;;  %v3523_v26 = vadd.f32 %v3522_v1, %v3474_v6  ;;  %v10470_v6 = vld [vmem:[#allocation3 + $0xc0] sm:$0xf0]  ;;  %v8650_v45 = vld [vmem:[#allocation3 + $0xc4] sm:$0xf0]  ;;  %v8648_v1 = vld [vmem:[#allocation3 + $0xa0] sm:$0xf] }
 0x252   :  { %v3568_v7 = vpop.f32.mrf.mxu3 }
 0x253   :  { %v3569_v30 = vadd.f32 %v3568_v7, %v3520_v42  ;;  %v3475_v46 = vpop.f32.mrf.mxu1  ;;  %v8649_v42 = vor.u32 %v10470_v6, %v8648_v1  ;;  %v8653_v7 = vor.u32 %v10466_v62, %v8650_v45 }
 0x254   :  { %v3476_v44 = vadd.f32 %v11965_v28, %v3475_v46 }
 0x255   :  { %3668 = vmatmul.bf16.gmra.mxu1 %v8613_v41  ;;  %v3620_v37 = vpop.f32.mrf.mxu0  ;;  %v11984_v40 = vadd.f32 %v3617_v27, %v3569_v30  ;;  %v10585_v30 = vld [vmem:[#allocation5 + $0x458] sm:$0xff] }
 0x256   :  { %3717 = vmatmul.bf16.gmra.mxu2 %v8617_v38  ;;  %v3524_v53 = vpop.f32.mrf.mxu2  ;;  %v10471_v38 = vld [vmem:[#allocation3 + $0xc8] sm:$0xf0]  ;;  %3855 = vmatpush.bf16.msra.mxu1 %v10585_v30  ;;  %v8692_v30 = vld [vmem:[#allocation3 + $0xf0] sm:$0xf] }
 0x257   :  { %v3525_v50 = vadd.f32 %v3524_v53, %v3476_v44  ;;  %v8656_v53 = vld [vmem:[#allocation3 + $0xa8] sm:$0xf] }
 0x258   :  { %v8657_v52 = vor.u32 %v10471_v38, %v8656_v53  ;;  %v10480_v38 = vld [vmem:[#allocation3 + $0x110] sm:$0xf0] }
 0x25a   :  { %v3571_v61 = vpop.f32.mrf.mxu3 }
 0x25b   :  { %v3572_v29 = vadd.f32 %v3571_v61, %v3523_v26  ;;  %v3478_v58 = vpop.f32.mrf.mxu1 }
 0x25c   :  { %v3479_v12 = vadd.f32 %v11965_v28, %v3478_v58 }
 0x25d   :  { %v3622_v23 = vpop.f32.mrf.mxu0  ;;  %v11988_v22 = vadd.f32 %v3620_v37, %v3572_v29  ;;  %v8658_v37 = vld [vmem:[#allocation3 + $0xcc] sm:$0xf0] }
 0x25e   :  { %3766 = vmatmul.bf16.gmra.mxu3 %v8621_v47  ;;  %v8661_v31 = vor.u32 %v10467_v35, %v8658_v37  ;;  %v10476_v37 = vld [vmem:[#allocation3 + $0xf4] sm:$0xf] }
 0x25f   :  { %3815 = vmatmul.bf16.gmra.mxu0 %v8625_v21  ;;  %v10479_v21 = vld [vmem:[#allocation3 + $0x108] sm:$0xf0] }
 0x260   :  { %v3527_v8 = vpop.f32.mrf.mxu2 }
 0x261   :  { %v3528_v27 = vadd.f32 %v3527_v8, %v3479_v12  ;;  %v10475_v12 = vld [vmem:[#allocation3 + $0xec] sm:$0xf]  ;;  %v8684_v8 = vld [vmem:[#allocation3 + $0xe8] sm:$0xf] }
 0x262   :  { %v3573_v26 = vpop.f32.mrf.mxu3  ;;  %v8685_v45 = vor.u32 %v10479_v21, %v8684_v8  ;;  %v8720_v21 = vld [vmem:[#allocation3 + $0x130] sm:$0xf] }
 0x263   :  { %v3574_v36 = vadd.f32 %v3573_v26, %v3525_v50  ;;  %v3480_v49 = vpop.f32.mrf.mxu1 }
 0x264   :  { %v3481_v47 = vadd.f32 %v11965_v28, %v3480_v49  ;;  %v10584_v49 = vld [vmem:[#allocation5 + $0x450] sm:$0xff] }
 0x265   :  { %3673 = vmatmul.bf16.gmra.mxu1 %v8649_v42  ;;  %v11990_v60 = vadd.f32 %v3622_v23, %v3574_v36  ;;  %v8686_v23 = vld [vmem:[#allocation3 + $0x10c] sm:$0xf0] }
 0x266   :  { %3722 = vmatmul.bf16.gmra.mxu2 %v8653_v7  ;;  %v3625_v41 = vpop.f32.mrf.mxu0  ;;  %v8689_v1 = vor.u32 %v10475_v12, %v8686_v23  ;;  %3856 = vmatpush.bf16.msra.mxu1 %v10584_v49  ;;  %v10484_v12 = vld [vmem:[#allocation3 + $0x134] sm:$0xf]  ;;  %v8730_v49 = vld [vmem:[#allocation3 + $0x15c] sm:$0xf0] }
 0x268   :  { %v3529_v46 = vpop.f32.mrf.mxu2 }
 0x269   :  { %v3530_v6 = vadd.f32 %v3529_v46, %v3481_v47 }
 0x26b   :  { %v3576_v0 = vpop.f32.mrf.mxu3 }
 0x26c   :  { %v3483_v61 = vpop.f32.mrf.mxu1  ;;  %v3577_v29 = vadd.f32 %v3576_v0, %v3528_v27  ;;  %v8697_v0 = vor.u32 %v10476_v37, %v11968_v43 }
 0x26d   :  { %v3484_v44 = vadd.f32 %v11965_v28, %v3483_v61 }
 0x26e   :  { %3771 = vmatmul.bf16.gmra.mxu3 %v8657_v52  ;;  %v3627_v58 = vpop.f32.mrf.mxu0  ;;  %v11993_v16 = vadd.f32 %v3625_v41, %v3577_v29  ;;  %v8693_v52 = vor.u32 %v10480_v38, %v8692_v30  ;;  %v10485_v38 = vld [vmem:[#allocation3 + $0x13c] sm:$0xf] }
 0x26f   :  { %3820 = vmatmul.bf16.gmra.mxu0 %v8661_v31 }
 0x273   :  { %v3532_v50 = vpop.f32.mrf.mxu2  ;;  %v3578_v62 = vpop.f32.mrf.mxu3 }
 0x274   :  { %v3533_v26 = vadd.f32 %v3532_v50, %v3484_v44  ;;  %v3579_v27 = vadd.f32 %v3578_v62, %v3530_v6  ;;  %v3485_v42 = vpop.f32.mrf.mxu1  ;;  %v8722_v44 = vld [vmem:[#allocation3 + $0x154] sm:$0xf0] }
 0x275   :  { %3678 = vmatmul.bf16.gmra.mxu1 %v8685_v45  ;;  %v3486_v41 = vadd.f32 %v11965_v28, %v3485_v42  ;;  %v8725_v6 = vor.u32 %v10484_v12, %v8722_v44  ;;  %v10583_v42 = vld [vmem:[#allocation5 + $0x448] sm:$0xff]  ;;  %v10493_v44 = vld [vmem:[#allocation3 + $0x17c] sm:$0xf] }
 0x276   :  { %3727 = vmatmul.bf16.gmra.mxu2 %v8689_v1  ;;  %v3630_v36 = vpop.f32.mrf.mxu0  ;;  %v11996_v7 = vadd.f32 %v3627_v58, %v3579_v27  ;;  %v10488_v58 = vld [vmem:[#allocation3 + $0x150] sm:$0xf0]  ;;  %3857 = vmatpush.bf16.msra.mxu1 %v10583_v42  ;;  %v10582_v42 = vld [vmem:[#allocation5 + $0x440] sm:$0xff] }
 0x277   :  { %v8721_v8 = vor.u32 %v10488_v58, %v8720_v21  ;;  %v8756_v58 = vld [vmem:[#allocation3 + $0x178] sm:$0xf] }
 0x27a   :  { %3858 = vmatpush.bf16.msra.mxu1 %v10582_v42 }
 0x27b   :  { %v3534_v46 = vpop.f32.mrf.mxu2  ;;  %v3581_v35 = vpop.f32.mrf.mxu3 }
 0x27c   :  { %v3535_v53 = vadd.f32 %v3534_v46, %v3486_v41  ;;  %v3582_v61 = vadd.f32 %v3581_v35, %v3533_v26  ;;  %v8728_v41 = vld [vmem:[#allocation3 + $0x138] sm:$0xf]  ;;  %v8733_v46 = vor.u32 %v10485_v38, %v8730_v49 }
 0x27e   :  { %3776 = vmatmul.bf16.gmra.mxu3 %v8693_v52  ;;  %v3632_v31 = vpop.f32.mrf.mxu0  ;;  %v12000_v47 = vadd.f32 %v3630_v36, %v3582_v61  ;;  %v10489_v36 = vld [vmem:[#allocation3 + $0x158] sm:$0xf0] }
 0x27f   :  { %3825 = vmatmul.bf16.gmra.mxu0 %v8697_v0  ;;  %v3488_v29 = vpop.f32.mrf.mxu1  ;;  %v8729_v30 = vor.u32 %v10489_v36, %v8728_v41  ;;  %v8764_v36 = vld [vmem:[#allocation3 + $0x180] sm:$0xf]  ;;  %v10494_v41 = vld [vmem:[#allocation3 + $0x184] sm:$0xf] }
 0x280   :  { %v3489_v23 = vadd.f32 %v11965_v28, %v3488_v29  ;;  %v8758_v29 = vld [vmem:[#allocation3 + $0x19c] sm:$0xf0] }
 0x283   :  { %v3583_v50 = vpop.f32.mrf.mxu3 }
 0x284   :  { %v3584_v45 = vadd.f32 %v3583_v50, %v3535_v53 }
 0x285   :  { %3683 = vmatmul.bf16.gmra.mxu1 %v8721_v8 }
 0x286   :  { %3732 = vmatmul.bf16.gmra.mxu2 %v8725_v6  ;;  %v3537_v43 = vpop.f32.mrf.mxu2  ;;  %v12005_v27 = vadd.f32 %v3632_v31, %v3584_v45  ;;  %v10497_v31 = vld [vmem:[#allocation3 + $0x198] sm:$0xf0] }
 0x287   :  { %v3538_v1 = vadd.f32 %v3537_v43, %v3489_v23  ;;  %v12003_v26 = vpop.f32.mrf.mxu1  ;;  %v3635_v62 = vpop.f32.mrf.mxu0  ;;  %v8757_v12 = vor.u32 %v10497_v31, %v8756_v58  ;;  %v8761_v23 = vor.u32 %v10493_v44, %v8758_v29  ;;  %v10498_v43 = vld [vmem:[#allocation3 + $0x1a0] sm:$0xf0]  ;;  %v8794_v31 = vld [vmem:[#allocation3 + $0x1e4] sm:$0xf0]  ;;  %v8792_v29 = vld [vmem:[#allocation3 + $0x1c0] sm:$0xf] }
 0x288   :  { %v8765_v49 = vor.u32 %v10498_v43, %v8764_v36  ;;  %v10502_v44 = vld [vmem:[#allocation3 + $0x1c4] sm:$0xf]  ;;  %v10507_v36 = vld [vmem:[#allocation3 + $0x1e8] sm:$0xf0] }
 0x28c   :  { %v3586_v37 = vpop.f32.mrf.mxu3 }
 0x28d   :  { %v3587_v52 = vadd.f32 %v3586_v37, %v3538_v1 }
 0x28e   :  { %v12007_v35 = vpop.f32.mrf.mxu2  ;;  %3781 = vmatmul.bf16.gmra.mxu3 %v8729_v30 }
 0x28f   :  { %3830 = vmatmul.bf16.gmra.mxu0 %v8733_v46  ;;  %v3493_v53 = vpop.f32.mrf.mxu1  ;;  %v12009_v0 = vadd.f32 %v3635_v62, %v3587_v52  ;;  %v12011_v61 = vpop.f32.mrf.mxu0  ;;  %v8766_v62 = vld [vmem:[#allocation3 + $0x1a4] sm:$0xf0] }
 0x290   :  { %v3494_v21 = vadd.f32 %v11965_v28, %v3493_v53  ;;  %v8769_v30 = vor.u32 %v10494_v41, %v8766_v62  ;;  %v10506_v53 = vld [vmem:[#allocation3 + $0x1e0] sm:$0xf0]  ;;  %v8800_v41 = vld [vmem:[#allocation3 + $0x1c8] sm:$0xf] }
 0x294   :  { %v12014_v8 = vpop.f32.mrf.mxu3 }
 0x295   :  { %3688 = vmatmul.bf16.gmra.mxu1 %v8757_v12  ;;  %v8797_v12 = vor.u32 %v10502_v44, %v8794_v31  ;;  %v8830_v44 = vld [vmem:[#allocation3 + $0x22c] sm:$0xf0] }
 0x296   :  { %3737 = vmatmul.bf16.gmra.mxu2 %v8761_v23  ;;  %v3542_v6 = vpop.f32.mrf.mxu2 }
 0x297   :  { %v3543_v50 = vadd.f32 %v3542_v6, %v3494_v21  ;;  %v12016_v45 = vpop.f32.mrf.mxu1  ;;  %v8793_v21 = vor.u32 %v10506_v53, %v8792_v29  ;;  %v10511_v29 = vld [vmem:[#allocation3 + $0x20c] sm:$0xf] }
 0x298   :  { %v8833_v51 = vor.u32 %v10511_v29, %v8830_v44 }
 0x29a   :  { %v3640_v1 = vpop.f32.mrf.mxu0 }
 0x29e   :  { %v12018_v38 = vpop.f32.mrf.mxu2  ;;  %3786 = vmatmul.bf16.gmra.mxu3 %v8765_v49  ;;  %v8802_v49 = vld [vmem:[#allocation3 + $0x1ec] sm:$0xf0] }
 0x29f   :  { %3835 = vmatmul.bf16.gmra.mxu0 %v8769_v30  ;;  %v3591_v37 = vpop.f32.mrf.mxu3  ;;  %v10503_v30 = vld [vmem:[#allocation3 + $0x1cc] sm:$0xf] }
 0x2a0   :  { %v3592_v46 = vadd.f32 %v3591_v37, %v3543_v50  ;;  %v3498_v52 = vpop.f32.mrf.mxu1  ;;  %v8805_v37 = vor.u32 %v10503_v30, %v8802_v49  ;;  %v8836_v30 = vld [vmem:[#allocation3 + $0x210] sm:$0xf] }
 0x2a1   :  { %v3499_v23 = vadd.f32 %v11965_v28, %v3498_v52  ;;  %v10515_v52 = vld [vmem:[#allocation3 + $0x228] sm:$0xf0] }
 0x2a2   :  { %v12020_v58 = vadd.f32 %v3640_v1, %v3592_v46  ;;  %v12023_v6 = vpop.f32.mrf.mxu0  ;;  %v8801_v1 = vor.u32 %v10507_v36, %v8800_v41 }
 0x2a3   :  { %13393 = vst [vmem:[#allocation24_spill] sm:$0xff] %v12023_v6 }
 0x2a5   :  { %3693 = vmatmul.bf16.gmra.mxu1 %v8793_v21 }
 0x2a6   :  { %3742 = vmatmul.bf16.gmra.mxu2 %v8797_v12 }
 0x2a7   :  { %v3547_v43 = vpop.f32.mrf.mxu2  ;;  %v12025_v62 = vpop.f32.mrf.mxu3 }
 0x2a8   :  { %13394 = vst [vmem:[#allocation12_spill] sm:$0xff] %v12025_v62  ;;  %v3548_v42 = vadd.f32 %v3547_v43, %v3499_v23  ;;  %v12027_v50 = vpop.f32.mrf.mxu1  ;;  %v8828_v23 = vld [vmem:[#allocation3 + $0x208] sm:$0xf]  ;;  %v12114_v62 = vld [vmem:[#allocation3 + $0x4] sm:$0xf] }
 0x2a9   :  { %13395 = vst [vmem:[#allocation15_spill] sm:$0xff] %v12027_v50  ;;  %v8829_v43 = vor.u32 %v10515_v52, %v8828_v23 }
 0x2aa   :  { %5873 = vst [vmem:[#allocation3 + $0x4] sm:$0xf] %v13376_v34  ;;  %v10686_v34 = vld [vmem:[#allocation5 + $0x540] sm:$0xff] }
 0x2ac   :  { %v3645_v46 = vpop.f32.mrf.mxu0 }
 0x2ae   :  { %3791 = vmatmul.bf16.gmra.mxu3 %v8801_v1 }
 0x2af   :  { %v12029_v53 = vpop.f32.mrf.mxu2  ;;  %3840 = vmatmul.bf16.gmra.mxu0 %v8805_v37  ;;  %v10516_v37 = vld [vmem:[#allocation3 + $0x230] sm:$0xf0] }
 0x2b0   :  { %13396 = vst [vmem:[#allocation13_spill] sm:$0xff] %v12029_v53  ;;  %v8837_v52 = vor.u32 %v10516_v37, %v8836_v30  ;;  %v10668_v30 = vld [vmem:[#allocation5 + $0x4b0] sm:$0xff] }
 0x2b1   :  { %v3596_v31 = vpop.f32.mrf.mxu3 }
 0x2b2   :  { %v3597_v21 = vadd.f32 %v3596_v31, %v3548_v42  ;;  %v3503_v12 = vpop.f32.mrf.mxu1  ;;  %v10512_v42 = vld [vmem:[#allocation3 + $0x214] sm:$0xf]  ;;  %v10669_v31 = vld [vmem:[#allocation5 + $0x4b8] sm:$0xff] }
 0x2b3   :  { %v3504_v36 = vadd.f32 %v11965_v28, %v3503_v12  ;;  %5306 = vmatpush.bf16.msra.mxu2 %v10669_v31  ;;  %v8628_v31 = vld [vmem:[#allocation3 + $0x68] sm:$0xf] }
 0x2b4   :  { %v12031_v50 = vadd.f32 %v3645_v46, %v3597_v21  ;;  %v12034_v49 = vpop.f32.mrf.mxu0  ;;  %v8841_v46 = vor.u32 %v10512_v42, %v11971_v24  ;;  %v8592_v21 = vld [vmem:[#allocation3 + $0x20] sm:$0xf]  ;;  %v10463_v24 = vld [vmem:[#allocation3 + $0x88] sm:$0xf0] }
 0x2b5   :  { %3698 = vmatmul.bf16.gmra.mxu1 %v8829_v43  ;;  %13397 = vst [vmem:[#allocation26_spill] sm:$0xff] %v12034_v49 }
 0x2b6   :  { %3747 = vmatmul.bf16.gmra.mxu2 %v8833_v51  ;;  %v10454_v51 = vld [vmem:[#allocation3 + $0x40] sm:$0xf0] }
 0x2b7   :  { %v8593_v43 = vor.u32 %v10454_v51, %v8592_v21  ;;  %5307 = vmatpush.bf16.msra.mxu2 %v10668_v30 }
 0x2b9   :  { %v3552_v41 = vpop.f32.mrf.mxu2  ;;  %v12036_v1 = vpop.f32.mrf.mxu3 }
 0x2ba   :  { %13398 = vst [vmem:[#allocation16_spill] sm:$0xff] %v12036_v1  ;;  %v3553_v53 = vadd.f32 %v3552_v41, %v3504_v36  ;;  %v12038_v6 = vpop.f32.mrf.mxu1 }
 0x2bb   :  { %13399 = vst [vmem:[#allocation17_spill] sm:$0xff] %v12038_v6 }
 0x2bc   :  { %v3650_v12 = vpop.f32.mrf.mxu0 }
 0x2be   :  { %3796 = vmatmul.bf16.gmra.mxu3 %v8837_v52  ;;  %v8629_v52 = vor.u32 %v10463_v24, %v8628_v31  ;;  %v10665_v31 = vld [vmem:[#allocation5 + $0x498] sm:$0xff] }
 0x2bf   :  { %3845 = vmatmul.bf16.gmra.mxu0 %v8841_v46  ;;  %v10667_v46 = vld [vmem:[#allocation5 + $0x4a8] sm:$0xff] }
 0x2c0   :  { %5308 = vmatpush.bf16.msra.mxu2 %v10667_v46  ;;  %v8736_v46 = vld [vmem:[#allocation3 + $0x140] sm:$0xf] }
 0x2c1   :  { %v3601_v28 = vpop.f32.mrf.mxu3 }
 0x2c2   :  { %v3602_v29 = vadd.f32 %v3601_v28, %v3553_v53  ;;  %v3664_v44 = vpop.f32.mrf.mxu1  ;;  %v10472_v28 = vld [vmem:[#allocation3 + $0xd0] sm:$0xf0] }
 0x2c3   :  { %v12042_v23 = vadd.f32 %v3664_v44, %v11982_v59  ;;  %v8664_v44 = vld [vmem:[#allocation3 + $0xb0] sm:$0xf] }
 0x2c4   :  { %v12044_v36 = vadd.f32 %v3650_v12, %v3602_v29  ;;  %v8665_v21 = vor.u32 %v10472_v28, %v8664_v44  ;;  %v10499_v44 = vld [vmem:[#allocation3 + $0x1a8] sm:$0xf0] }
 0x2c5   :  { %3859 = vmatmul.bf16.vlgmr.msra.gmra.mxu1 %v8593_v43  ;;  %v10666_v43 = vld [vmem:[#allocation5 + $0x4a0] sm:$0xff] }
 0x2c6   :  { %5309 = vmatpush.bf16.msra.mxu2 %v10666_v43 }
 0x2ca   :  { %v3666_v41 = vpop.f32.mrf.mxu1  ;;  %5310 = vmatpush.bf16.msra.mxu2 %v10665_v31  ;;  %v10663_v31 = vld [vmem:[#allocation5 + $0x488] sm:$0xff] }
 0x2cb   :  { %v12047_v37 = vadd.f32 %v3666_v41, %v11984_v40  ;;  %v8700_v41 = vld [vmem:[#allocation3 + $0xf8] sm:$0xf] }
 0x2cc   :  { %v8701_v24 = vor.u32 %v11974_v20, %v8700_v41  ;;  %v12073_v20 = vpop.f32.mrf.mxu2 }
 0x2cd   :  { %13400 = vst [vmem:[#allocation18_spill] sm:$0xff] %v12073_v20  ;;  %v10674_v20 = vld [vmem:[#allocation5 + $0x4e0] sm:$0xff] }
 0x2d2   :  { %v3669_v42 = vpop.f32.mrf.mxu1 }
 0x2d3   :  { %v12050_v53 = vadd.f32 %v3669_v42, %v11988_v22 }
 0x2d5   :  { %3864 = vmatmul.bf16.gmra.mxu1 %v8629_v52  ;;  %v10490_v52 = vld [vmem:[#allocation3 + $0x160] sm:$0xf0] }
 0x2d6   :  { %v8737_v28 = vor.u32 %v10490_v52, %v8736_v46  ;;  %v10508_v46 = vld [vmem:[#allocation3 + $0x1f0] sm:$0xf0] }
 0x2da   :  { %v3671_v59 = vpop.f32.mrf.mxu1 }
 0x2db   :  { %v12053_v51 = vadd.f32 %v3671_v59, %v11990_v60 }
 0x2e2   :  { %v3674_v29 = vpop.f32.mrf.mxu1 }
 0x2e3   :  { %v12056_v40 = vadd.f32 %v3674_v29, %v11993_v16 }
 0x2e5   :  { %3869 = vmatmul.bf16.gmra.mxu1 %v8665_v21  ;;  %v12075_v21 = vpop.f32.mrf.mxu3 }
 0x2e6   :  { %13401 = vst [vmem:[#allocation27_spill] sm:$0xff] %v12075_v21  ;;  %v8808_v21 = vld [vmem:[#allocation3 + $0x1d0] sm:$0xf] }
 0x2ea   :  { %v3676_v12 = vpop.f32.mrf.mxu1 }
 0x2eb   :  { %v12059_v22 = vadd.f32 %v3676_v12, %v11996_v7  ;;  %v8772_v12 = vld [vmem:[#allocation3 + $0x188] sm:$0xf] }
 0x2ec   :  { %v8773_v41 = vor.u32 %v10499_v44, %v8772_v12 }
 0x2ed   :  { %v3762_v52 = vpop.f32.mrf.mxu3 }
 0x2f2   :  { %v3679_v30 = vpop.f32.mrf.mxu1 }
 0x2f3   :  { %v12062_v60 = vadd.f32 %v3679_v30, %v12000_v47  ;;  %v10664_v47 = vld [vmem:[#allocation5 + $0x490] sm:$0xff]  ;;  %v3713_v30 = vpop.f32.mrf.mxu2 }
 0x2f4   :  { %5311 = vmatpush.bf16.msra.mxu2 %v10664_v47 }
 0x2f5   :  { %3874 = vmatmul.bf16.gmra.mxu1 %v8701_v24  ;;  %v12087_v6 = vpop.f32.mrf.mxu3 }
 0x2f8   :  { %5312 = vmatpush.bf16.msra.mxu2 %v10663_v31 }
 0x2fa   :  { %v3681_v42 = vpop.f32.mrf.mxu1 }
 0x2fb   :  { %v12066_v16 = vadd.f32 %v3681_v42, %v12005_v27  ;;  %v10677_v42 = vld [vmem:[#allocation5 + $0x4f8] sm:$0xff]  ;;  %v3715_v44 = vpop.f32.mrf.mxu2 }
 0x2fc   :  { %5355 = vmatpush.bf16.msra.mxu3 %v10677_v42 }
 0x2fd   :  { %v12095_v49 = vpop.f32.mrf.mxu3 }
 0x302   :  { %v3684_v59 = vpop.f32.mrf.mxu1 }
 0x303   :  { %v12069_v7 = vadd.f32 %v3684_v59, %v12009_v0  ;;  %v12080_v0 = vpop.f32.mrf.mxu0  ;;  %v10676_v59 = vld [vmem:[#allocation5 + $0x4f0] sm:$0xff] }
 0x304   :  { %13403 = vst [vmem:[#allocation28_spill] sm:$0xff] %v12080_v0  ;;  %5356 = vmatpush.bf16.msra.mxu3 %v10676_v59  ;;  %v10693_v0 = vld [vmem:[#allocation5 + $0x578] sm:$0xff]  ;;  %v12093_v59 = vpop.f32.mrf.mxu2 }
 0x305   :  { %3879 = vmatmul.bf16.gmra.mxu1 %v8737_v28 }
 0x306   :  { %5453 = vmatpush.bf16.msrb.mxu1 %v10693_v0  ;;  %v10691_v0 = vld [vmem:[#allocation5 + $0x568] sm:$0xff] }
 0x30a   :  { %v12071_v29 = vpop.f32.mrf.mxu1 }
 0x30b   :  { %v3811_v28 = vpop.f32.mrf.mxu0 }
 0x312   :  { %v3689_v27 = vpop.f32.mrf.mxu1 }
 0x313   :  { %v12078_v43 = vadd.f32 %v3689_v27, %v12020_v58  ;;  %v10675_v58 = vld [vmem:[#allocation5 + $0x4e8] sm:$0xff]  ;;  %v10685_v27 = vld [vmem:[#allocation5 + $0x538] sm:$0xff]  ;;  %v12091_v31 = vpop.f32.mrf.mxu0 }
 0x314   :  { %5357 = vmatpush.bf16.msra.mxu3 %v10675_v58  ;;  %5404 = vmatpush.bf16.msrb.mxu0 %v10685_v27  ;;  %v10662_v58 = vld [vmem:[#allocation5 + $0x480] sm:$0xff]  ;;  %v10672_v27 = vld [vmem:[#allocation5 + $0x4d0] sm:$0xff] }
 0x315   :  { %13402 = vst [vmem:[#allocation19_spill] sm:$0xff] %v12078_v43  ;;  %3884 = vmatmul.bf16.gmra.mxu1 %v8773_v41  ;;  %v8809_v41 = vor.u32 %v10508_v46, %v8808_v21  ;;  %v10692_v21 = vld [vmem:[#allocation5 + $0x570] sm:$0xff]  ;;  %v8844_v46 = vld [vmem:[#allocation3 + $0x218] sm:$0xf]  ;;  %5313 = vmatpush.bf16.msra.mxu2 %v10662_v58  ;;  %v10690_v58 = vld [vmem:[#allocation5 + $0x560] sm:$0xff] }
 0x316   :  { %5454 = vmatpush.bf16.msrb.mxu1 %v10692_v21  ;;  %v10682_v21 = vld [vmem:[#allocation5 + $0x520] sm:$0xff] }
 0x318   :  { %5358 = vmatpush.bf16.msra.mxu3 %v10674_v20  ;;  %v10683_v20 = vld [vmem:[#allocation5 + $0x528] sm:$0xff] }
 0x31a   :  { %v12082_v24 = vpop.f32.mrf.mxu1  ;;  %5455 = vmatpush.bf16.msrb.mxu1 %v10691_v0 }
 0x31b   :  { %13404 = vst [vmem:[#allocation20_spill] sm:$0xff] %v12082_v24  ;;  %v12101_v1 = vpop.f32.mrf.mxu0  ;;  %v12103_v24 = vpop.f32.mrf.mxu2 }
 0x31e   :  { %5456 = vmatpush.bf16.msrb.mxu1 %v10690_v58  ;;  %v10701_v58 = vld [vmem:[#allocation5 + $0x5b8] sm:$0xff] }
 0x31f   :  { %5502 = vmatpush.bf16.msrb.mxu2 %v10701_v58 }
 0x322   :  { %v3694_v47 = vpop.f32.mrf.mxu1 }
 0x323   :  { %v12085_v12 = vadd.f32 %v3694_v47, %v12031_v50  ;;  %v10673_v50 = vld [vmem:[#allocation5 + $0x4d8] sm:$0xff]  ;;  %v10684_v47 = vld [vmem:[#allocation5 + $0x530] sm:$0xff] }
 0x324   :  { %5359 = vmatpush.bf16.msra.mxu3 %v10673_v50  ;;  %5405 = vmatpush.bf16.msrb.mxu0 %v10684_v47  ;;  %v12105_v50 = vpop.f32.mrf.mxu3  ;;  %v10671_v47 = vld [vmem:[#allocation5 + $0x4c8] sm:$0xff] }
 0x325   :  { %13405 = vst [vmem:[#allocation22_spill] sm:$0xff] %v12085_v12  ;;  %3889 = vmatmul.bf16.gmra.mxu1 %v8809_v41 }
 0x328   :  { %5360 = vmatpush.bf16.msra.mxu3 %v10672_v27  ;;  %5406 = vmatpush.bf16.msrb.mxu0 %v10683_v20  ;;  %v12110_v27 = vpop.f32.mrf.mxu0  ;;  %v12112_v20 = vpop.f32.mrf.mxu2 }
 0x32a   :  { %v12089_v42 = vpop.f32.mrf.mxu1 }
 0x32b   :  { %13406 = vst [vmem:[#allocation23_spill] sm:$0xff] %v12089_v42  ;;  %v8845_v42 = vor.u32 %v11977_v10, %v8844_v46  ;;  %v10670_v10 = vld [vmem:[#allocation5 + $0x4c0] sm:$0xff] }
 0x32c   :  { %5361 = vmatpush.bf16.msra.mxu3 %v10671_v47  ;;  %5407 = vmatpush.bf16.msrb.mxu0 %v10682_v21  ;;  %v12117_v47 = vpop.f32.mrf.mxu3 }
 0x330   :  { %5362 = vmatpush.bf16.msra.mxu3 %v10670_v10  ;;  %v12139_v58 = vpop.f32.mrf.mxu2 }
 0x332   :  { %v3699_v12 = vpop.f32.mrf.mxu1 }
 0x333   :  { %v12098_v41 = vadd.f32 %v3699_v12, %v12044_v36  ;;  %v3714_v36 = vadd.f32 %v3713_v30, %v12042_v23  ;;  %v10681_v12 = vld [vmem:[#allocation5 + $0x518] sm:$0xff]  ;;  %v10688_v23 = vld [vmem:[#allocation5 + $0x550] sm:$0xff]  ;;  %v3716_v30 = vadd.f32 %v3715_v44, %v12047_v37 }
 0x334   :  { %5408 = vmatpush.bf16.msrb.mxu0 %v10681_v12 }
 0x335   :  { %13407 = vst [vmem:[#allocation29_spill] sm:$0xff] %v12098_v41  ;;  %3894 = vmatmul.bf16.gmra.mxu1 %v8845_v42  ;;  %v10689_v42 = vld [vmem:[#allocation5 + $0x558] sm:$0xff]  ;;  %v3763_v46 = vadd.f32 %v3762_v52, %v3714_v36  ;;  %v12120_v52 = vld [vmem:[#allocation3] sm:$0xf]  ;;  %v10687_v36 = vld [vmem:[#allocation5 + $0x548] sm:$0xff]  ;;  %v3765_v10 = vadd.f32 %v12087_v6, %v3716_v30 }
 0x336   :  { %5457 = vmatpush.bf16.msrb.mxu1 %v10689_v42  ;;  %5857 = vst [vmem:[#allocation3] sm:$0xf] %v13378_v13  ;;  %v10678_v13 = vld [vmem:[#allocation5 + $0x500] sm:$0xff] }
 0x337   :  { %v3812_v0 = vadd.f32 %v3811_v28, %v3763_v46  ;;  %v10679_v28 = vld [vmem:[#allocation5 + $0x508] sm:$0xff]  ;;  %v3814_v6 = vadd.f32 %v12091_v31, %v3765_v10  ;;  %v12142_v10 = vpop.f32.mrf.mxu3 }
 0x33a   :  { %v12107_v43 = vpop.f32.mrf.mxu1  ;;  %5458 = vmatpush.bf16.msrb.mxu1 %v10688_v23 }
 0x33b   :  { %13408 = vst [vmem:[#allocation25_spill] sm:$0xff] %v12107_v43  ;;  %v10680_v43 = vld [vmem:[#allocation5 + $0x510] sm:$0xff] }
 0x33c   :  { %5409 = vmatpush.bf16.msrb.mxu0 %v10680_v43 }
 0x33e   :  { %5459 = vmatpush.bf16.msrb.mxu1 %v10687_v36 }
 0x340   :  { %5410 = vmatpush.bf16.msrb.mxu0 %v10679_v28 }
 0x342   :  { %v3860_v41 = vpop.f32.mrf.mxu1  ;;  %5460 = vmatpush.bf16.msrb.mxu1 %v10686_v34  ;;  %v3721_v34 = vadd.f32 %v12103_v24, %v12053_v51  ;;  %v12159_v51 = vpop.f32.mrf.mxu2 }
 0x343   :  { %v3861_v21 = vadd.f32 %v3860_v41, %v3812_v0  ;;  %v12124_v41 = vpop.f32.mrf.mxu0 }
 0x344   :  { %5411 = vmatpush.bf16.msrb.mxu0 %v10678_v13 }
 0x345   :  { %v3900_v12 = vmax.f32 %v3861_v21, 0.0  ;;  %v3719_v21 = vadd.f32 %v12093_v59, %v12050_v53 }
 0x347   :  { %v3943_v42 = vrot.slane %v3900_v12, 7  ;;  %v3973_v37 = vrot.slane %v3900_v12, 1  ;;  %v4019_v44 = vpack.c.bf16 %v3900_v12, %v3900_v12  ;;  %v3768_v31 = vadd.f32 %v12095_v49, %v3719_v21 }
 0x349   :  { %v3960_v43 = vsel %vm13390_vm12, %v11053_v4, %v3943_v42  ;;  %v3990_v46 = vsel %vm13391_vm13, %v11071_v25, %v3973_v37  ;;  %4027 = vst [vmem:[#allocation3 + $0x28] sm:$0xf] %v4019_v44  ;;  %v3817_v49 = vadd.f32 %v12101_v1, %v3768_v31 }
 0x34a   :  { %v3963_v0 = vsel %vm11073_vm1, 0.0, %v3960_v43  ;;  %v3992_v23 = vsel %vm11077_vm2, 0.0, %v3990_v46  ;;  %4060 = vst [vmem:[#allocation3 + $0x10] sm:$0xf] %v4019_v44  ;;  %v3862_v30 = vpop.f32.mrf.mxu1 }
 0x34b   :  { %v4003_v28 = vpack.c.bf16 %v3963_v0, %v3963_v0  ;;  %v4034_v36 = vpack.c.bf16 %v3992_v23, %v3992_v23  ;;  %v3863_v12 = vadd.f32 %v3862_v30, %v3814_v6 }
 0x34d   :  { %4011 = vst [vmem:[#allocation3 + $0x24] sm:$0xf] %v4003_v28  ;;  %v3901_v43 = vmax.f32 %v3863_v12, 0.0  ;;  %v3770_v12 = vadd.f32 %v12105_v50, %v3721_v34 }
 0x34e   :  { %4042 = vst [vmem:[#allocation3 + $0x8] sm:$0xf] %v4034_v36 }
 0x34f   :  { %4051 = vst [vmem:[#allocation3 + $0xc] sm:$0xf] %v4003_v28  ;;  %v3944_v44 = vrot.slane %v3901_v43, 7  ;;  %v3974_v46 = vrot.slane %v3901_v43, 1  ;;  %v4020_v53 = vpack.c.bf16 %v3901_v43, %v3901_v43  ;;  %v12162_v43 = vpop.f32.mrf.mxu3 }
 0x350   :  { %v9138_v59 = vld [vmem:[#allocation3 + $0x24] sm:$0xf0] }
 0x351   :  { %v3959_v0 = vsel %vm13390_vm12, %v3943_v42, %v3944_v44  ;;  %v3989_v6 = vsel %vm13391_vm13, %v3973_v37, %v3974_v46  ;;  %4028 = vst [vmem:[#allocation3 + $0x4c] sm:$0xf] %v4020_v53  ;;  %v9141_v23 = vor.u32 %v12114_v62, %v9138_v59  ;;  %v12156_v42 = vpop.f32.mrf.mxu0  ;;  %v10700_v62 = vld [vmem:[#allocation5 + $0x5b0] sm:$0xff] }
 0x352   :  { %v3964_v13 = vsel %vm11092_vm6, 0.0, %v3959_v0  ;;  %v3993_v30 = vsel %vm11086_vm5, 0.0, %v3989_v6  ;;  %4061 = vst [vmem:[#allocation3 + $0x34] sm:$0xf] %v4020_v53  ;;  %v3865_v21 = vpop.f32.mrf.mxu1  ;;  %5503 = vmatpush.bf16.msrb.mxu2 %v10700_v62 }
 0x353   :  { %v4004_v28 = vpack.c.bf16 %v3964_v13, %v3964_v13  ;;  %v4035_v37 = vpack.c.bf16 %v3993_v30, %v3993_v30  ;;  %4087 = vst [vmem:[#allocation3 + $0x1c] sm:$0xf] %v4020_v53  ;;  %v3866_v36 = vadd.f32 %v3865_v21, %v3817_v49  ;;  %5363 = vmatmul.bf16.vlgmr.msra.gmra.mxu3 %v9141_v23 }
 0x354   :  { %v10594_v1 = vld [vmem:[#allocation3 + $0x20] sm:$0xf0]  ;;  %v3819_v49 = vadd.f32 %v12110_v27, %v3770_v12  ;;  %v3724_v13 = vadd.f32 %v12112_v20, %v12056_v40 }
 0x355   :  { %4012 = vst [vmem:[#allocation3 + $0x48] sm:$0xf] %v4004_v28  ;;  %v3902_v24 = vmax.f32 %v3866_v36, 0.0  ;;  %v9137_v31 = vor.u32 %v10594_v1, %v12120_v52 }
 0x356   :  { %4043 = vst [vmem:[#allocation3 + $0x2c] sm:$0xf] %v4035_v37  ;;  %v10591_v62 = vld [vmem:[#allocation3 + $0xc] sm:$0xf] }
 0x357   :  { %4052 = vst [vmem:[#allocation3 + $0x30] sm:$0xf] %v4004_v28  ;;  %v3945_v59 = vrot.slane %v3902_v24, 7  ;;  %v3975_v0 = vrot.slane %v3902_v24, 1  ;;  %v4021_v53 = vpack.c.bf16 %v3902_v24, %v3902_v24  ;;  %5314 = vmatmul.bf16.vlgmr.msra.gmra.mxu2 %v9137_v31  ;;  %v12178_v24 = vpop.f32.mrf.mxu2 }
 0x358   :  { %4069 = vst [vmem:[#allocation3 + $0x14] sm:$0xf] %v4035_v37 }
 0x359   :  { %4078 = vst [vmem:[#allocation3 + $0x18] sm:$0xf] %v4004_v28  ;;  %v3958_v50 = vsel %vm13390_vm12, %v3944_v44, %v3945_v59  ;;  %v3988_v6 = vsel %vm13391_vm13, %v3974_v46, %v3975_v0  ;;  %v9144_v28 = vld [vmem:[#allocation3 + $0x8] sm:$0xf]  ;;  %v3773_v46 = vadd.f32 %v12117_v47, %v3724_v13  ;;  %v12176_v27 = vpop.f32.mrf.mxu0 }
 0x35a   :  { %v3965_v52 = vsel %vm11144_vm7, 0.0, %v3958_v50  ;;  %v3994_v23 = vsel %vm13371_vm3, 0.0, %v3988_v6  ;;  %4029 = vst [vmem:[#allocation3 + $0x70] sm:$0xf] %v4021_v53  ;;  %v3867_v34 = vpop.f32.mrf.mxu1 }
 0x35b   :  { %v4005_v30 = vpack.c.bf16 %v3965_v52, %v3965_v52  ;;  %v4036_v21 = vpack.c.bf16 %v3994_v23, %v3994_v23  ;;  %4062 = vst [vmem:[#allocation3 + $0x58] sm:$0xf] %v4021_v53  ;;  %v3868_v44 = vadd.f32 %v3867_v34, %v3819_v49  ;;  %v3822_v49 = vadd.f32 %v12124_v41, %v3773_v46  ;;  %v10599_v52 = vld [vmem:[#allocation3 + $0x4c] sm:$0xf] }
 0x35c   :  { %4088 = vst [vmem:[#allocation3 + $0x40] sm:$0xf] %v4021_v53  ;;  %v12180_v53 = vpop.f32.mrf.mxu3  ;;  %v9172_v41 = vld [vmem:[#allocation3 + $0x48] sm:$0xf] }
 0x35d   :  { %4013 = vst [vmem:[#allocation3 + $0x6c] sm:$0xf] %v4005_v30  ;;  %v3903_v37 = vmax.f32 %v3868_v44, 0.0  ;;  %v10595_v36 = vld [vmem:[#allocation3 + $0x28] sm:$0xf0] }
 0x35e   :  { %4044 = vst [vmem:[#allocation3 + $0x50] sm:$0xf] %v4036_v21  ;;  %v9145_v1 = vor.u32 %v10595_v36, %v9144_v28  ;;  %v9146_v12 = vld [vmem:[#allocation3 + $0x2c] sm:$0xf0] }
 0x35f   :  { %4053 = vst [vmem:[#allocation3 + $0x54] sm:$0xf] %v4005_v30  ;;  %v3946_v40 = vrot.slane %v3903_v37, 7  ;;  %v3976_v20 = vrot.slane %v3903_v37, 1  ;;  %v4022_v31 = vpack.c.bf16 %v3903_v37, %v3903_v37  ;;  %v9149_v50 = vor.u32 %v10591_v62, %v9146_v12  ;;  %v10699_v62 = vld [vmem:[#allocation5 + $0x5a8] sm:$0xff] }
 0x360   :  { %4070 = vst [vmem:[#allocation3 + $0x38] sm:$0xf] %v4036_v21  ;;  %5412 = vmatmul.bf16.vlgmr.msrb.gmra.mxu0 %v9145_v1  ;;  %5504 = vmatpush.bf16.msrb.mxu2 %v10699_v62  ;;  %v12219_v62 = vld [vmem:[#allocation7 + $0x1] ss:$0 sm:$0xff] }
 0x361   :  { %4079 = vst [vmem:[#allocation3 + $0x3c] sm:$0xf] %v4005_v30  ;;  %v3957_v47 = vsel %vm13390_vm12, %v3945_v59, %v3946_v40  ;;  %v3987_v6 = vsel %vm13391_vm13, %v3975_v0, %v3976_v20  ;;  %5461 = vmatmul.bf16.vlgmr.msrb.gmra.mxu1 %v9149_v50  ;;  %v9174_v23 = vld [vmem:[#allocation3 + $0x6c] sm:$0xf0]  ;;  %v3726_v59 = vadd.f32 %v12139_v58, %v12059_v22  ;;  %v12194_v12 = vpop.f32.mrf.mxu0 }
 0x362   :  { %4096 = vst [vmem:[#allocation3 + $0x20] sm:$0xf] %v4036_v21  ;;  %v3966_v34 = vsel %vm11192_vm10, 0.0, %v3957_v47  ;;  %v3995_v13 = vsel %vm13352_vm8, 0.0, %v3987_v6  ;;  %v3870_v44 = vpop.f32.mrf.mxu1  ;;  %v9177_v30 = vor.u32 %v10599_v52, %v9174_v23  ;;  %v12196_v47 = vpop.f32.mrf.mxu2  ;;  %vm13409_vm8 = vnez %v13296_v11 }
 0x363   :  { %v4006_v28 = vpack.c.bf16 %v3966_v34, %v3966_v34  ;;  %4030 = vst [vmem:[#allocation3 + $0x94] sm:$0xf] %v4022_v31  ;;  %v4037_v0 = vpack.c.bf16 %v3995_v13, %v3995_v13  ;;  %v3871_v37 = vadd.f32 %v3870_v44, %v3822_v49  ;;  %v3775_v21 = vadd.f32 %v12142_v10, %v3726_v59 }
 0x364   :  { %4063 = vst [vmem:[#allocation3 + $0x7c] sm:$0xf] %v4022_v31  ;;  %5368 = vmatmul.bf16.gmra.mxu3 %v9177_v30  ;;  %v10603_v46 = vld [vmem:[#allocation3 + $0x68] sm:$0xf0]  ;;  %v3729_v13 = vadd.f32 %v12159_v51, %v12062_v60  ;;  %v12209_v44 = vpop.f32.mrf.mxu3 }
 0x365   :  { %4014 = vst [vmem:[#allocation3 + $0x90] sm:$0xf] %v4006_v28  ;;  %v3904_v36 = vmax.f32 %v3871_v37, 0.0  ;;  %v9173_v1 = vor.u32 %v10603_v46, %v9172_v41  ;;  %v3824_v49 = vadd.f32 %v12156_v42, %v3775_v21 }
 0x366   :  { %4045 = vst [vmem:[#allocation3 + $0x74] sm:$0xf] %v4037_v0  ;;  %v3778_v42 = vadd.f32 %v12162_v43, %v3729_v13  ;;  %v10600_v41 = vld [vmem:[#allocation3 + $0x54] sm:$0xf] }
 0x367   :  { %4054 = vst [vmem:[#allocation3 + $0x78] sm:$0xf] %v4006_v28  ;;  %v3947_v50 = vrot.slane %v3904_v36, 7  ;;  %v3977_v22 = vrot.slane %v3904_v36, 1  ;;  %5319 = vmatmul.bf16.gmra.mxu2 %v9173_v1  ;;  %v4023_v58 = vpack.c.bf16 %v3904_v36, %v3904_v36 }
 0x368   :  { %4071 = vst [vmem:[#allocation3 + $0x5c] sm:$0xf] %v4037_v0  ;;  %v3827_v1 = vadd.f32 %v12176_v27, %v3778_v42 }
 0x369   :  { %4080 = vst [vmem:[#allocation3 + $0x60] sm:$0xf] %v4006_v28  ;;  %v3956_v10 = vsel %vm13390_vm12, %v3946_v40, %v3947_v50  ;;  %v3986_v6 = vsel %vm13391_vm13, %v3976_v20, %v3977_v22  ;;  %v9180_v20 = vld [vmem:[#allocation3 + $0x50] sm:$0xf] }
 0x36a   :  { %4089 = vst [vmem:[#allocation3 + $0x64] sm:$0xf] %v4022_v31  ;;  %v3967_v52 = vsel %vm11213_vm11, 0.0, %v3956_v10  ;;  %v3996_v23 = vsel %vm13409_vm8, 0.0, %v3986_v6  ;;  %v3872_v34 = vpop.f32.mrf.mxu1  ;;  %v3491_v10 = vadd.f32 %v12219_v62, %v12003_v26  ;;  %vm13410_vm8 = vnez %v13300_v57 }
 0x36b   :  { %4097 = vst [vmem:[#allocation3 + $0x44] sm:$0xf] %v4037_v0  ;;  %v4007_v40 = vpack.c.bf16 %v3967_v52, %v3967_v52  ;;  %v4038_v30 = vpack.c.bf16 %v3996_v23, %v3996_v23  ;;  %v3873_v59 = vadd.f32 %v3872_v34, %v3824_v49  ;;  %v12212_v0 = vpop.f32.mrf.mxu0  ;;  %vm13411_vm11 = vnez %v13298_v18  ;;  %v12229_v23 = vpop.f32.mrf.mxu2 }
 0x36c   :  { %4031 = vst [vmem:[#allocation3 + $0xb8] sm:$0xf] %v4023_v58 }
 0x36d   :  { %4015 = vst [vmem:[#allocation3 + $0xb4] sm:$0xf] %v4007_v40  ;;  %v3905_v31 = vmax.f32 %v3873_v59, 0.0  ;;  %v10604_v28 = vld [vmem:[#allocation3 + $0x70] sm:$0xf0] }
 0x36e   :  { %4046 = vst [vmem:[#allocation3 + $0x98] sm:$0xf] %v4038_v30  ;;  %v9181_v37 = vor.u32 %v10604_v28, %v9180_v20  ;;  %v9182_v46 = vld [vmem:[#allocation3 + $0x74] sm:$0xf0]  ;;  %v10608_v59 = vld [vmem:[#allocation3 + $0x94] sm:$0xf] }
 0x36f   :  { %4055 = vst [vmem:[#allocation3 + $0x9c] sm:$0xf] %v4007_v40  ;;  %v3948_v21 = vrot.slane %v3905_v31, 7  ;;  %v3978_v60 = vrot.slane %v3905_v31, 1  ;;  %v9185_v51 = vor.u32 %v10600_v41, %v9182_v46  ;;  %v4024_v52 = vpack.c.bf16 %v3905_v31, %v3905_v31  ;;  %v9208_v20 = vld [vmem:[#allocation3 + $0x90] sm:$0xf] }
 0x370   :  { %4064 = vst [vmem:[#allocation3 + $0xa0] sm:$0xf] %v4023_v58  ;;  %5417 = vmatmul.bf16.gmra.mxu0 %v9181_v37  ;;  %v12232_v37 = vpop.f32.mrf.mxu3 }
 0x371   :  { %4072 = vst [vmem:[#allocation3 + $0x80] sm:$0xf] %v4038_v30  ;;  %v3955_v36 = vsel %vm13390_vm12, %v3947_v50, %v3948_v21  ;;  %v3985_v43 = vsel %vm13391_vm13, %v3977_v22, %v3978_v60  ;;  %5466 = vmatmul.bf16.gmra.mxu1 %v9185_v51  ;;  %v3731_v22 = vadd.f32 %v12178_v24, %v12066_v16  ;;  %v10698_v16 = vld [vmem:[#allocation5 + $0x5a0] sm:$0xff] }
 0x372   :  { %4081 = vst [vmem:[#allocation3 + $0x84] sm:$0xf] %v4007_v40  ;;  %v3968_v6 = vsel %vm13410_vm8, 0.0, %v3955_v36  ;;  %v3997_v49 = vsel %vm13411_vm11, 0.0, %v3985_v43  ;;  %v3875_v50 = vpop.f32.mrf.mxu1  ;;  %v3540_v24 = vadd.f32 %v12007_v35, %v3491_v10  ;;  %5505 = vmatpush.bf16.msrb.mxu2 %v10698_v16  ;;  %vm13412_vm11 = vnez %v13302_v63 }
 0x373   :  { %4090 = vst [vmem:[#allocation3 + $0x88] sm:$0xf] %v4023_v58  ;;  %v4008_v27 = vpack.c.bf16 %v3968_v6, %v3968_v6  ;;  %v4039_v34 = vpack.c.bf16 %v3997_v49, %v3997_v49  ;;  %v3876_v13 = vadd.f32 %v3875_v50, %v3827_v1  ;;  %v9210_v26 = vld [vmem:[#allocation3 + $0xb4] sm:$0xf0]  ;;  %v3780_v28 = vadd.f32 %v12180_v53, %v3731_v22  ;;  %v12245_v10 = vpop.f32.mrf.mxu0  ;;  %v12250_v50 = vpop.f32.mrf.mxu2 }
 0x374   :  { %4098 = vst [vmem:[#allocation3 + $0x68] sm:$0xf] %v4038_v30  ;;  %v9213_v40 = vor.u32 %v10608_v59, %v9210_v26  ;;  %v10612_v42 = vld [vmem:[#allocation3 + $0xb0] sm:$0xf0]  ;;  %v3589_v30 = vadd.f32 %v12014_v8, %v3540_v24 }
 0x375   :  { %4016 = vst [vmem:[#allocation3 + $0xd8] sm:$0xf] %v4008_v27  ;;  %v3906_v31 = vmax.f32 %v3876_v13, 0.0  ;;  %v9209_v41 = vor.u32 %v10612_v42, %v9208_v20  ;;  %v3829_v36 = vadd.f32 %v12194_v12, %v3780_v28  ;;  %v9216_v13 = vld [vmem:[#allocation3 + $0x98] sm:$0xf]  ;;  %v3496_v28 = vadd.f32 %v12219_v62, %v12016_v45 }
 0x376   :  { %4032 = vst [vmem:[#allocation3 + $0xdc] sm:$0xf] %v4024_v52  ;;  %5373 = vmatmul.bf16.gmra.mxu3 %v9213_v40  ;;  %v3638_v12 = vadd.f32 %v12011_v61, %v3589_v30 }
 0x377   :  { %4047 = vst [vmem:[#allocation3 + $0xbc] sm:$0xf] %v4039_v34  ;;  %v3949_v58 = vrot.slane %v3906_v31, 7  ;;  %v3979_v46 = vrot.slane %v3906_v31, 1  ;;  %5324 = vmatmul.bf16.gmra.mxu2 %v9209_v41  ;;  %v4025_v6 = vpack.c.bf16 %v3906_v31, %v3906_v31 }
 0x378   :  { %4056 = vst [vmem:[#allocation3 + $0xc0] sm:$0xf] %v4008_v27  ;;  %v3687_v40 = vadd.f32 %v12071_v29, %v3638_v12  ;;  %v12254_v20 = vpop.f32.mrf.mxu3 }
 0x379   :  { %4065 = vst [vmem:[#allocation3 + $0xc4] sm:$0xf] %v4024_v52  ;;  %v3954_v53 = vsel %vm13390_vm12, %v3948_v21, %v3949_v58  ;;  %v3984_v51 = vsel %vm13391_vm13, %v3978_v60, %v3979_v46  ;;  %v3734_v21 = vadd.f32 %v12196_v47, %v12069_v7 }
 0x37a   :  { %4073 = vst [vmem:[#allocation3 + $0xa4] sm:$0xf] %v4039_v34  ;;  %v3969_v35 = vsel %vm13412_vm11, 0.0, %v3954_v53  ;;  %v3998_v43 = vsel %vm13387_vm0, 0.0, %v3984_v51  ;;  %v3877_v1 = vpop.f32.mrf.mxu1  ;;  %vm13413_vm0 = vmmov %vm13391_vm13 }
 0x37b   :  { %4082 = vst [vmem:[#allocation3 + $0xa8] sm:$0xf] %v4008_v27  ;;  %v4009_v8 = vpack.c.bf16 %v3969_v35, %v3969_v35  ;;  %v3878_v49 = vadd.f32 %v3877_v1, %v3829_v36  ;;  %v4040_v60 = vpack.c.bf16 %v3998_v43, %v3998_v43  ;;  %v3783_v59 = vadd.f32 %v12209_v44, %v3734_v21  ;;  %v10609_v27 = vld [vmem:[#allocation3 + $0x9c] sm:$0xf]  ;;  %v3836_v43 = vpop.f32.mrf.mxu0 }
 0x37c   :  { %4091 = vst [vmem:[#allocation3 + $0xac] sm:$0xf] %v4024_v52  ;;  %v9244_v36 = vld [vmem:[#allocation3 + $0xd8] sm:$0xf] }
 0x37d   :  { %4099 = vst [vmem:[#allocation3 + $0x8c] sm:$0xf] %v4039_v34  ;;  %v3907_v22 = vmax.f32 %v3878_v49, 0.0  ;;  %v3832_v16 = vadd.f32 %v12212_v0, %v3783_v59  ;;  %v10617_v1 = vld [vmem:[#allocation3 + $0xdc] sm:$0xf]  ;;  %v3545_v49 = vadd.f32 %v12018_v38, %v3496_v28  ;;  %v3740_v59 = vpop.f32.mrf.mxu2 }
 0x37e   :  { %4017 = vst [vmem:[#allocation3 + $0xfc] sm:$0xf] %v4009_v8  ;;  %v10613_v26 = vld [vmem:[#allocation3 + $0xb8] sm:$0xf0] }
 0x37f   :  { %4033 = vst [vmem:[#allocation3 + $0x100] sm:$0xf] %v4025_v6  ;;  %v3950_v7 = vrot.slane %v3907_v22, 7  ;;  %v3980_v47 = vrot.slane %v3907_v22, 1  ;;  %v9217_v52 = vor.u32 %v10613_v26, %v9216_v13  ;;  %v9218_v42 = vld [vmem:[#allocation3 + $0xbc] sm:$0xf0]  ;;  %v4059_v0 = vpack.c.bf16 %v3907_v22, %v3907_v22 }
 0x380   :  { %4048 = vst [vmem:[#allocation3 + $0xe0] sm:$0xf] %v4040_v60  ;;  %v9221_v61 = vor.u32 %v10609_v27, %v9218_v42 }
 0x381   :  { %4057 = vst [vmem:[#allocation3 + $0xe4] sm:$0xf] %v4009_v8  ;;  %v3953_v34 = vsel %vm13390_vm12, %v3949_v58, %v3950_v7  ;;  %v3982_v44 = vsel %vm13391_vm13, %v3980_v47, %v11071_v25  ;;  %v3983_v29 = vsel %vm13413_vm0, %v3979_v46, %v3980_v47  ;;  %5422 = vmatmul.bf16.gmra.mxu0 %v9217_v52  ;;  %vm13414_vm0 = vmmov %vm13390_vm12  ;;  %v10697_v47 = vld [vmem:[#allocation5 + $0x598] sm:$0xff] }
 0x382   :  { %4066 = vst [vmem:[#allocation3 + $0xe8] sm:$0xf] %v4025_v6  ;;  %v3970_v31 = vsel %vm13355_vm15, 0.0, %v3953_v34  ;;  %v3999_v41 = vsel %vm13356_vm14, 0.0, %v3983_v29  ;;  %5471 = vmatmul.bf16.gmra.mxu1 %v9221_v61  ;;  %v3880_v24 = vpop.f32.mrf.mxu1  ;;  %v3736_v58 = vadd.f32 %v12229_v23, %v3687_v40  ;;  %v3952_v46 = vsel %vm13414_vm0, %v3950_v7, %v11053_v4  ;;  %v13415_v40 = vld [vmem:[#allocation12_spill] sm:$0xff]  ;;  %v3789_v7 = vpop.f32.mrf.mxu3  ;;  %vm13416_vm12 = vmmov %vm13414_vm0  ;;  %v13417_v34 = vld [vmem:[#allocation19_spill] sm:$0xff]  ;;  %5506 = vmatpush.bf16.msrb.mxu2 %v10697_v47 }
 0x383   :  { %4074 = vst [vmem:[#allocation3 + $0xc8] sm:$0xf] %v4040_v60  ;;  %v4041_v45 = vpack.c.bf16 %v3999_v41, %v3999_v41  ;;  %v4000_v30 = vsel %vm11517_vm4, 0.0, %v3982_v44  ;;  %v4050_v53 = vpack.c.bf16 %v3970_v31, %v3970_v31  ;;  %v3881_v51 = vadd.f32 %v3880_v24, %v3832_v16 }
 0x384   :  { %4083 = vst [vmem:[#allocation3 + $0xcc] sm:$0xf] %v4009_v8  ;;  %v3785_v35 = vadd.f32 %v12232_v37, %v3736_v58  ;;  %v3971_v21 = vsel %vm11502_vm9, 0.0, %v3952_v46  ;;  %v4068_v26 = vpack.c.bf16 %v4000_v30, %v4000_v30  ;;  %v3594_v37 = vadd.f32 %v13415_v40, %v3545_v49  ;;  %v13419_v30 = vld [vmem:[#allocation20_spill] sm:$0xff]  ;;  %v13421_v40 = vld [vmem:[#allocation15_spill] sm:$0xff] }
 0x385   :  { %4092 = vst [vmem:[#allocation3 + $0xd0] sm:$0xf] %v4025_v6  ;;  %v10621_v23 = vld [vmem:[#allocation3 + $0xf8] sm:$0xf0]  ;;  %v3908_v8 = vmax.f32 %v3881_v51, 0.0  ;;  %v4077_v38 = vpack.c.bf16 %v3971_v21, %v3971_v21  ;;  %v3739_v44 = vadd.f32 %v12250_v50, %v13417_v34  ;;  %v13422_v34 = vld [vmem:[#allocation13_spill] sm:$0xff] }
 0x386   :  { %4100 = vst [vmem:[#allocation3 + $0xb0] sm:$0xf] %v4040_v60  ;;  %v9246_v12 = vld [vmem:[#allocation3 + $0xfc] sm:$0xf0]  ;;  %v9245_v13 = vor.u32 %v10621_v23, %v9244_v36  ;;  %v3834_v60 = vadd.f32 %v12245_v10, %v3785_v35  ;;  %v13418_v10 = vld [vmem:[#allocation24_spill] sm:$0xff] }
 0x387   :  { %4049 = vst [vmem:[#allocation3 + $0x104] sm:$0xf] %v4041_v45  ;;  %v9249_v27 = vor.u32 %v10617_v1, %v9246_v12  ;;  %v4115_v6 = vrot.slane %v3908_v8, 7  ;;  %v4145_v22 = vrot.slane %v3908_v8, 1  ;;  %v3643_v31 = vadd.f32 %v13418_v10, %v3594_v37  ;;  %v9252_v46 = vld [vmem:[#allocation3 + $0xe0] sm:$0xf]  ;;  %v3838_v1 = vpop.f32.mrf.mxu0 }
 0x388   :  { %4058 = vst [vmem:[#allocation3 + $0x108] sm:$0xf] %v4050_v53  ;;  %5329 = vmatmul.bf16.gmra.mxu2 %v9245_v13  ;;  %v3788_v16 = vadd.f32 %v12254_v20, %v3739_v44  ;;  %v4191_v51 = vpack.c.bf16 %v3908_v8, %v3908_v8  ;;  %v10618_v35 = vld [vmem:[#allocation3 + $0xe4] sm:$0xf]  ;;  %v3743_v20 = vpop.f32.mrf.mxu2  ;;  %v3501_v37 = vadd.f32 %v12219_v62, %v13421_v40 }
 0x389   :  { %4067 = vst [vmem:[#allocation3 + $0x10c] sm:$0xf] %v4059_v0  ;;  %5378 = vmatmul.bf16.gmra.mxu3 %v9249_v27  ;;  %v4132_v52 = vsel %vm13416_vm12, %v11053_v4, %v4115_v6  ;;  %v4162_v42 = vsel %vm13391_vm13, %v11071_v25, %v4145_v22  ;;  %v3692_v50 = vadd.f32 %v13419_v30, %v3643_v31  ;;  %vm13420_vm12 = vmmov %vm13391_vm13  ;;  %v10626_v31 = vld [vmem:[#allocation3 + $0x124] sm:$0xf] }
 0x38a   :  { %4075 = vst [vmem:[#allocation3 + $0xec] sm:$0xf] %v4041_v45  ;;  %v3882_v61 = vpop.f32.mrf.mxu1  ;;  %v4135_v29 = vsel %vm11073_vm1, 0.0, %v4132_v52  ;;  %v4164_v41 = vsel %vm11077_vm2, 0.0, %v4162_v42  ;;  %v3837_v8 = vadd.f32 %v3836_v43, %v3788_v16  ;;  %v3792_v47 = vpop.f32.mrf.mxu3  ;;  %v3550_v44 = vadd.f32 %v13422_v34, %v3501_v37  ;;  %vm13424_vm13 = vmmov %vm13414_vm0 }
 0x38b   :  { %4076 = vst [vmem:[#allocation3 + $0x110] sm:$0xf] %v4068_v26  ;;  %v3883_v28 = vadd.f32 %v3882_v61, %v3834_v60  ;;  %v4175_v24 = vpack.c.bf16 %v4135_v29, %v4135_v29  ;;  %v4206_v23 = vpack.c.bf16 %v4164_v41, %v4164_v41  ;;  %v3741_v60 = vadd.f32 %v3740_v59, %v3692_v50  ;;  %v9280_v29 = vld [vmem:[#allocation3 + $0x120] sm:$0xf]  ;;  %v13423_v41 = vld [vmem:[#allocation16_spill] sm:$0xff] }
 0x38c   :  { %4084 = vst [vmem:[#allocation3 + $0xf0] sm:$0xf] %v4050_v53  ;;  %v3599_v59 = vadd.f32 %v13423_v41, %v3550_v44 }
 0x38d   :  { %4085 = vst [vmem:[#allocation3 + $0x114] sm:$0xf] %v4077_v38  ;;  %v3909_v58 = vmax.f32 %v3883_v28, 0.0  ;;  %v3790_v42 = vadd.f32 %v3789_v7, %v3741_v60 }
 0x38e   :  { %4093 = vst [vmem:[#allocation3 + $0xf4] sm:$0xf] %v4059_v0  ;;  %v10622_v36 = vld [vmem:[#allocation3 + $0x100] sm:$0xf0] }
 0x38f   :  { %4101 = vst [vmem:[#allocation3 + $0xd4] sm:$0xf] %v4041_v45  ;;  %v4116_v49 = vrot.slane %v3909_v58, 7  ;;  %v4146_v53 = vrot.slane %v3909_v58, 1  ;;  %v9253_v21 = vor.u32 %v10622_v36, %v9252_v46  ;;  %v9254_v12 = vld [vmem:[#allocation3 + $0x104] sm:$0xf0]  ;;  %v4192_v52 = vpack.c.bf16 %v3909_v58, %v3909_v58  ;;  %v3841_v46 = vpop.f32.mrf.mxu0 }
 0x390   :  { %4102 = vst [vmem:[#allocation3 + $0xf8] sm:$0xf] %v4068_v26  ;;  %v9257_v13 = vor.u32 %v10618_v35, %v9254_v12  ;;  %v3839_v50 = vadd.f32 %v3838_v1, %v3790_v42 }
 0x391   :  { %4183 = vst [vmem:[#allocation3 + $0x144] sm:$0xf] %v4175_v24  ;;  %v4131_v27 = vsel %vm13414_vm0, %v4115_v6, %v4116_v49  ;;  %v4161_v0 = vsel %vm13420_vm12, %v4145_v22, %v4146_v53  ;;  %5427 = vmatmul.bf16.gmra.mxu0 %v9253_v21  ;;  %vm13425_vm0 = vmmov %vm13420_vm12 }
 0x392   :  { %4199 = vst [vmem:[#allocation3 + $0x148] sm:$0xf] %v4191_v51  ;;  %v4136_v45 = vsel %vm11092_vm6, 0.0, %v4131_v27  ;;  %v4165_v26 = vsel %vm11086_vm5, 0.0, %v4161_v0  ;;  %5476 = vmatmul.bf16.gmra.mxu1 %v9257_v13  ;;  %v3885_v38 = vpop.f32.mrf.mxu1  ;;  %v3745_v13 = vpop.f32.mrf.mxu2  ;;  %v10696_v0 = vld [vmem:[#allocation5 + $0x590] sm:$0xff]  ;;  %vm13429_vm12 = vmmov %vm13424_vm13 }
 0x393   :  { %4214 = vst [vmem:[#allocation3 + $0x128] sm:$0xf] %v4206_v23  ;;  %v4176_v6 = vpack.c.bf16 %v4136_v45, %v4136_v45  ;;  %v3886_v22 = vadd.f32 %v3885_v38, %v3837_v8  ;;  %v4207_v43 = vpack.c.bf16 %v4165_v26, %v4165_v26  ;;  %v3794_v37 = vpop.f32.mrf.mxu3  ;;  %5507 = vmatpush.bf16.msrb.mxu2 %v10696_v0  ;;  %v13428_v38 = vld [vmem:[#allocation23_spill] sm:$0xff] }
 0x394   :  { %4223 = vst [vmem:[#allocation3 + $0x12c] sm:$0xf] %v4175_v24 }
 0x395   :  { %4232 = vst [vmem:[#allocation3 + $0x130] sm:$0xf] %v4191_v51  ;;  %v3910_v61 = vmax.f32 %v3886_v22, 0.0  ;;  %v13426_v51 = vld [vmem:[#allocation22_spill] sm:$0xff] }
 0x396   :  { %4184 = vst [vmem:[#allocation3 + $0x168] sm:$0xf] %v4176_v6  ;;  %v3744_v36 = vadd.f32 %v3743_v20, %v13426_v51  ;;  %v13427_v20 = vld [vmem:[#allocation26_spill] sm:$0xff] }
 0x397   :  { %4200 = vst [vmem:[#allocation3 + $0x16c] sm:$0xf] %v4192_v52  ;;  %v4117_v28 = vrot.slane %v3910_v61, 7  ;;  %v4147_v10 = vrot.slane %v3910_v61, 1  ;;  %v4193_v27 = vpack.c.bf16 %v3910_v61, %v3910_v61  ;;  %v3648_v8 = vadd.f32 %v13427_v20, %v3599_v59  ;;  %v13433_v51 = vld [vmem:[#allocation18_spill] sm:$0xff] }
 0x398   :  { %4215 = vst [vmem:[#allocation3 + $0x14c] sm:$0xf] %v4207_v43  ;;  %v10630_v16 = vld [vmem:[#allocation3 + $0x140] sm:$0xf0]  ;;  %v3793_v40 = vadd.f32 %v3792_v47, %v3744_v36 }
 0x399   :  { %4224 = vst [vmem:[#allocation3 + $0x150] sm:$0xf] %v4176_v6  ;;  %v4130_v24 = vsel %vm13424_vm13, %v4116_v49, %v4117_v28  ;;  %v4160_v7 = vsel %vm13425_vm0, %v4146_v53, %v4147_v10  ;;  %v9282_v58 = vld [vmem:[#allocation3 + $0x144] sm:$0xf0]  ;;  %v9281_v30 = vor.u32 %v10630_v16, %v9280_v29  ;;  %v3697_v60 = vadd.f32 %v13428_v38, %v3648_v8  ;;  %vm13430_vm13 = vmmov %vm13425_vm0  ;;  %v10709_v38 = vld [vmem:[#allocation5 + $0x5f8] sm:$0xff] }
 0x39a   :  { %4233 = vst [vmem:[#allocation3 + $0x154] sm:$0xf] %v4192_v52  ;;  %v4137_v35 = vsel %vm11144_vm7, 0.0, %v4130_v24  ;;  %v4166_v23 = vsel %vm13371_vm3, 0.0, %v4160_v7  ;;  %v9285_v21 = vor.u32 %v10626_v31, %v9282_v58  ;;  %v3887_v12 = vpop.f32.mrf.mxu1  ;;  %v9288_v26 = vld [vmem:[#allocation3 + $0x128] sm:$0xf]  ;;  %v3842_v29 = vadd.f32 %v3841_v46, %v3793_v40  ;;  %v3843_v7 = vpop.f32.mrf.mxu0  ;;  %5551 = vmatpush.bf16.msrb.mxu3 %v10709_v38 }
 0x39b   :  { %4241 = vst [vmem:[#allocation3 + $0x134] sm:$0xf] %v4207_v43  ;;  %v4177_v49 = vpack.c.bf16 %v4137_v35, %v4137_v35  ;;  %5334 = vmatmul.bf16.gmra.mxu2 %v9281_v30  ;;  %v3888_v53 = vadd.f32 %v3887_v12, %v3839_v50  ;;  %v4208_v1 = vpack.c.bf16 %v4166_v23, %v4166_v23  ;;  %v13431_v31 = vld [vmem:[#allocation17_spill] sm:$0xff]  ;;  %v3797_v12 = vpop.f32.mrf.mxu3  ;;  %v13435_v40 = vld [vmem:[#allocation27_spill] sm:$0xff] }
 0x39c   :  { %4250 = vst [vmem:[#allocation3 + $0x138] sm:$0xf] %v4176_v6  ;;  %5383 = vmatmul.bf16.gmra.mxu3 %v9285_v21  ;;  %v10627_v6 = vld [vmem:[#allocation3 + $0x12c] sm:$0xf]  ;;  %v3506_v41 = vadd.f32 %v12219_v62, %v13431_v31  ;;  %v3746_v24 = vadd.f32 %v3745_v13, %v3697_v60  ;;  %vm13432_vm0 = vnez %v13290_v19  ;;  %v13434_v13 = vmov 0.0|0.0  }
 0x39d   :  { %4259 = vst [vmem:[#allocation3 + $0x13c] sm:$0xf] %v4192_v52  ;;  %v3911_v45 = vmax.f32 %v3888_v53, 0.0  ;;  %v9316_v21 = vld [vmem:[#allocation3 + $0x168] sm:$0xf] }
 0x39e   :  { %4185 = vst [vmem:[#allocation3 + $0x18c] sm:$0xf] %v4177_v49  ;;  %v3795_v46 = vadd.f32 %v3794_v37, %v3746_v24  ;;  %v3555_v36 = vadd.f32 %v13433_v51, %v3506_v41  ;;  %v10635_v20 = vld [vmem:[#allocation3 + $0x16c] sm:$0xf] }
 0x39f   :  { %4201 = vst [vmem:[#allocation3 + $0x190] sm:$0xf] %v4193_v27  ;;  %v4118_v22 = vrot.slane %v3911_v45, 7  ;;  %v4148_v43 = vrot.slane %v3911_v45, 1  ;;  %v10631_v42 = vld [vmem:[#allocation3 + $0x148] sm:$0xf0]  ;;  %v4194_v35 = vpack.c.bf16 %v3911_v45, %v3911_v45 }
 0x3a0   :  { %4216 = vst [vmem:[#allocation3 + $0x170] sm:$0xf] %v4208_v1  ;;  %v9289_v61 = vor.u32 %v10631_v42, %v9288_v26  ;;  %v9290_v34 = vld [vmem:[#allocation3 + $0x14c] sm:$0xf0]  ;;  %v3604_v37 = vadd.f32 %v13435_v40, %v3555_v36  ;;  %v3844_v60 = vadd.f32 %v3843_v7, %v3795_v46 }
 0x3a1   :  { %4225 = vst [vmem:[#allocation3 + $0x174] sm:$0xf] %v4177_v49  ;;  %v4129_v47 = vsel %vm13429_vm12, %v4117_v28, %v4118_v22  ;;  %v4159_v52 = vsel %vm13430_vm13, %v4147_v10, %v4148_v43  ;;  %v9293_v44 = vor.u32 %v10627_v6, %v9290_v34  ;;  %v3748_v10 = vpop.f32.mrf.mxu2 }
 0x3a2   :  { %4234 = vst [vmem:[#allocation3 + $0x178] sm:$0xf] %v4193_v27  ;;  %v4138_v59 = vsel %vm11192_vm10, 0.0, %v4129_v47  ;;  %5432 = vmatmul.bf16.gmra.mxu0 %v9289_v61  ;;  %v3890_v16 = vpop.f32.mrf.mxu1  ;;  %v4167_v28 = vsel %vm13432_vm0, 0.0, %v4159_v52  ;;  %v13437_v61 = vld [vmem:[#allocation29_spill] sm:$0xff]  ;;  %vm13438_vm0 = vnez %v13294_v9  ;;  %v3846_v31 = vpop.f32.mrf.mxu0 }
 0x3a3   :  { %4242 = vst [vmem:[#allocation3 + $0x158] sm:$0xf] %v4208_v1  ;;  %5481 = vmatmul.bf16.gmra.mxu1 %v9293_v44  ;;  %v3891_v58 = vadd.f32 %v3890_v16, %v3842_v29  ;;  %v4178_v30 = vpack.c.bf16 %v4138_v59, %v4138_v59  ;;  %v4209_v53 = vpack.c.bf16 %v4167_v28, %v4167_v28  ;;  %v10708_v52 = vld [vmem:[#allocation5 + $0x5f0] sm:$0xff]  ;;  %v3799_v36 = vpop.f32.mrf.mxu3 }
 0x3a4   :  { %4251 = vst [vmem:[#allocation3 + $0x15c] sm:$0xf] %v4177_v49  ;;  %v3749_v6 = vadd.f32 %v3748_v10, %v13437_v61  ;;  %v13439_v44 = vld [vmem:[#allocation28_spill] sm:$0xff]  ;;  %v13441_v16 = vld [vmem:[#allocation25_spill] sm:$0xff]  ;;  %5552 = vmatpush.bf16.msrb.mxu3 %v10708_v52 }
 0x3a5   :  { %4260 = vst [vmem:[#allocation3 + $0x160] sm:$0xf] %v4193_v27  ;;  %v3912_v62 = vmax.f32 %v3891_v58, 0.0  ;;  %v10639_v50 = vld [vmem:[#allocation3 + $0x188] sm:$0xf0]  ;;  %v13436_v27 = vld [vmem:[#allocation11_spill] sm:$0xff]  ;;  %v3653_v29 = vadd.f32 %v13439_v44, %v3604_v37 }
 0x3a6   :  { %4268 = vst [vmem:[#allocation3 + $0x140] sm:$0xf] %v4208_v1  ;;  %v9318_v23 = vld [vmem:[#allocation3 + $0x18c] sm:$0xf0]  ;;  %v9317_v8 = vor.u32 %v10639_v50, %v9316_v21  ;;  %v10707_v50 = vld [vmem:[#allocation5 + $0x5e8] sm:$0xff]  ;;  %v10694_v44 = vld [vmem:[#allocation5 + $0x580] sm:$0xff] }
 0x3a7   :  { %6045 = vst [vmem:[#allocation3 + $0x124] sm:$0xf] %v13434_v13  ;;  %v4119_v49 = vrot.slane %v3912_v62, 7  ;;  %v4149_v0 = vrot.slane %v3912_v62, 1  ;;  %v9321_v26 = vor.u32 %v10635_v20, %v9318_v23  ;;  %v3702_v24 = vadd.f32 %v13441_v16, %v3653_v29 }
 0x3a8   :  { %6029 = vst [vmem:[#allocation3 + $0x120] sm:$0xf] %v13436_v27  ;;  %v4195_v28 = vpack.c.bf16 %v3912_v62, %v3912_v62  ;;  %v10636_v62 = vld [vmem:[#allocation3 + $0x174] sm:$0xf]  ;;  %5553 = vmatpush.bf16.msrb.mxu3 %v10707_v50 }
 0x3a9   :  { %4186 = vst [vmem:[#allocation3 + $0x1b0] sm:$0xf] %v4178_v30  ;;  %v4128_v1 = vsel %vm13429_vm12, %v4118_v22, %v4119_v49  ;;  %v4158_v45 = vsel %vm13430_vm13, %v4148_v43, %v4149_v0  ;;  %v10695_v22 = vld [vmem:[#allocation5 + $0x588] sm:$0xff]  ;;  %v3798_v43 = vadd.f32 %v3797_v12, %v3749_v6  ;;  %vm13440_vm12 = vnez %v13296_v11  ;;  %v3750_v58 = vpop.f32.mrf.mxu2  ;;  %v9324_v12 = vld [vmem:[#allocation3 + $0x170] sm:$0xf] }
 0x3aa   :  { %4202 = vst [vmem:[#allocation3 + $0x1b4] sm:$0xf] %v4194_v35  ;;  %v3892_v42 = vpop.f32.mrf.mxu1  ;;  %v4139_v34 = vsel %vm13438_vm0, 0.0, %v4128_v1  ;;  %v4168_v41 = vsel %vm13440_vm12, 0.0, %v4158_v45  ;;  %5508 = vmatpush.bf16.msrb.mxu2 %v10695_v22  ;;  %vm13442_vm13 = vcmp.lt.s32.totalorder %v11050_v2, 1  ;;  %vm13443_vm12 = vcmp.lt.s32.totalorder %v11050_v2, 7  ;;  %v3848_v61 = vpop.f32.mrf.mxu0 }
 0x3ab   :  { %4217 = vst [vmem:[#allocation3 + $0x194] sm:$0xf] %v4209_v53  ;;  %5339 = vmatmul.bf16.gmra.mxu2 %v9317_v8  ;;  %v3893_v47 = vadd.f32 %v3892_v42, %v3844_v60  ;;  %v4179_v7 = vpack.c.bf16 %v4139_v34, %v4139_v34  ;;  %v4210_v51 = vpack.c.bf16 %v4168_v41, %v4168_v41  ;;  %v10725_v1 = vld [vmem:[#allocation5 + $0x678] sm:$0xff]  ;;  %v10724_v50 = vld [vmem:[#allocation5 + $0x670] sm:$0xff] }
 0x3ac   :  { %4226 = vst [vmem:[#allocation3 + $0x198] sm:$0xf] %v4178_v30  ;;  %5388 = vmatmul.bf16.gmra.mxu3 %v9321_v26  ;;  %v3847_v20 = vadd.f32 %v3846_v31, %v3798_v43  ;;  %v3751_v8 = vadd.f32 %v3750_v58, %v3702_v24  ;;  %v10706_v26 = vld [vmem:[#allocation5 + $0x5e0] sm:$0xff]  ;;  %v10705_v42 = vld [vmem:[#allocation5 + $0x5d8] sm:$0xff]  ;;  %5649 = vmatpush.bf16.msra.mxu1 %v10725_v1  ;;  %v10716_v43 = vld [vmem:[#allocation5 + $0x630] sm:$0xff] }
 0x3ad   :  { %4235 = vst [vmem:[#allocation3 + $0x19c] sm:$0xf] %v4194_v35  ;;  %v12344_v59 = vmax.f32 %v3893_v47, 0.0  ;;  %5554 = vmatpush.bf16.msrb.mxu3 %v10706_v26 }
 0x3ae   :  { %4243 = vst [vmem:[#allocation3 + $0x17c] sm:$0xf] %v4209_v53  ;;  %v3800_v38 = vadd.f32 %v3799_v36, %v3751_v8  ;;  %5509 = vmatpush.bf16.msrb.mxu2 %v10694_v44 }
 0x3af   :  { %4252 = vst [vmem:[#allocation3 + $0x180] sm:$0xf] %v4178_v30  ;;  %v4120_v10 = vrot.slane %v12344_v59, 7  ;;  %v4150_v46 = vrot.slane %v12344_v59, 1  ;;  %v4196_v29 = vpack.c.bf16 %v12344_v59, %v12344_v59  ;;  %v10704_v59 = vld [vmem:[#allocation5 + $0x5d0] sm:$0xff] }
 0x3b0   :  { %4261 = vst [vmem:[#allocation3 + $0x184] sm:$0xf] %v4194_v35  ;;  %v9352_v52 = vld [vmem:[#allocation3 + $0x1b0] sm:$0xf]  ;;  %v3849_v31 = vadd.f32 %v3848_v61, %v3800_v38  ;;  %5650 = vmatpush.bf16.msra.mxu1 %v10724_v50  ;;  %v10711_v50 = vld [vmem:[#allocation5 + $0x608] sm:$0xff] }
 0x3b1   :  { %4269 = vst [vmem:[#allocation3 + $0x164] sm:$0xf] %v4209_v53  ;;  %v4127_v23 = vsel %vm13442_vm13, %v4119_v49, %v4120_v10  ;;  %v4157_v21 = vsel %vm13443_vm12, %v4149_v0, %v4150_v46  ;;  %v10717_v53 = vld [vmem:[#allocation5 + $0x638] sm:$0xff]  ;;  %vm13444_vm12 = vnez %v13298_v18  ;;  %v10644_v22 = vld [vmem:[#allocation3 + $0x1b4] sm:$0xf]  ;;  %5555 = vmatpush.bf16.msrb.mxu3 %v10705_v42 }
 0x3b2   :  { %4187 = vst [vmem:[#allocation3 + $0x1d4] sm:$0xf] %v4179_v7  ;;  %v10640_v30 = vld [vmem:[#allocation3 + $0x190] sm:$0xf0]  ;;  %v3895_v40 = vpop.f32.mrf.mxu1  ;;  %v4140_v49 = vsel %vm13410_vm8, 0.0, %v4127_v23  ;;  %v4169_v60 = vsel %vm13444_vm12, 0.0, %v4157_v21  ;;  %5600 = vmatpush.bf16.msra.mxu0 %v10717_v53 }
 0x3b3   :  { %4203 = vst [vmem:[#allocation3 + $0x1d8] sm:$0xf] %v4195_v28  ;;  %v9325_v37 = vor.u32 %v10640_v30, %v9324_v12  ;;  %v9326_v35 = vld [vmem:[#allocation3 + $0x194] sm:$0xf0]  ;;  %v3896_v27 = vadd.f32 %v3895_v40, %v3847_v20  ;;  %v4180_v6 = vpack.c.bf16 %v4140_v49, %v4140_v49  ;;  %v4211_v41 = vpack.c.bf16 %v4169_v60, %v4169_v60  ;;  %v10703_v20 = vld [vmem:[#allocation5 + $0x5c8] sm:$0xff]  ;;  %v10722_v49 = vld [vmem:[#allocation5 + $0x660] sm:$0xff] }
 0x3b4   :  { %4218 = vst [vmem:[#allocation3 + $0x1b8] sm:$0xf] %v4210_v51  ;;  %v9329_v0 = vor.u32 %v10636_v62, %v9326_v35  ;;  %vm13445_vm12 = vcmp.lt.s32.totalorder %v11050_v2, 7  ;;  %v10733_v35 = vld [vmem:[#allocation5 + $0x6b8] sm:$0xff]  ;;  %v9856_v33 = vld [vmem:[#allocation3 + $0x120] sm:$0xf] }
 0x3b5   :  { %4227 = vst [vmem:[#allocation3 + $0x1bc] sm:$0xf] %v4179_v7  ;;  %5437 = vmatmul.bf16.gmra.mxu0 %v9325_v37  ;;  %v12355_v45 = vmax.f32 %v3896_v27, 0.0  ;;  %5556 = vmatpush.bf16.msrb.mxu3 %v10704_v59  ;;  %v10714_v37 = vld [vmem:[#allocation5 + $0x620] sm:$0xff]  ;;  %v10713_v42 = vld [vmem:[#allocation5 + $0x618] sm:$0xff] }
 0x3b6   :  { %4236 = vst [vmem:[#allocation3 + $0x1c0] sm:$0xf] %v4195_v28  ;;  %5486 = vmatmul.bf16.gmra.mxu1 %v9329_v0  ;;  %5601 = vmatpush.bf16.msra.mxu0 %v10716_v43  ;;  %v10702_v0 = vld [vmem:[#allocation5 + $0x5c0] sm:$0xff] }
 0x3b7   :  { %4244 = vst [vmem:[#allocation3 + $0x1a0] sm:$0xf] %v4210_v51  ;;  %v4121_v34 = vrot.slane %v12355_v45, 7  ;;  %v4151_v47 = vrot.slane %v12355_v45, 1  ;;  %v4197_v27 = vpack.c.bf16 %v12355_v45, %v12355_v45  ;;  %5698 = vmatpush.bf16.msra.mxu2 %v10733_v35 }
 0x3b8   :  { %4253 = vst [vmem:[#allocation3 + $0x1a4] sm:$0xf] %v4179_v7 }
 0x3b9   :  { %4262 = vst [vmem:[#allocation3 + $0x1a8] sm:$0xf] %v4195_v28  ;;  %v4126_v16 = vsel %vm13442_vm13, %v4120_v10, %v4121_v34  ;;  %v4156_v24 = vsel %vm13445_vm12, %v4150_v46, %v4151_v47  ;;  %v10648_v58 = vld [vmem:[#allocation3 + $0x1d0] sm:$0xf0]  ;;  %v10715_v28 = vld [vmem:[#allocation5 + $0x628] sm:$0xff]  ;;  %vm13446_vm12 = vnez %v13304_v48  ;;  %5557 = vmatpush.bf16.msrb.mxu3 %v10703_v20 }
 0x3ba   :  { %4270 = vst [vmem:[#allocation3 + $0x188] sm:$0xf] %v4210_v51  ;;  %v9354_v36 = vld [vmem:[#allocation3 + $0x1d4] sm:$0xf0]  ;;  %v9353_v7 = vor.u32 %v10648_v58, %v9352_v52  ;;  %v3897_v23 = vpop.f32.mrf.mxu1  ;;  %v4141_v10 = vsel %vm13412_vm11, 0.0, %v4126_v16  ;;  %v10723_v51 = vld [vmem:[#allocation5 + $0x668] sm:$0xff]  ;;  %5602 = vmatpush.bf16.msra.mxu0 %v10715_v28 }
 0x3bb   :  { %4188 = vst [vmem:[#allocation3 + $0x1f8] sm:$0xf] %v4180_v6  ;;  %v9357_v21 = vor.u32 %v10644_v22, %v9354_v36  ;;  %v3898_v12 = vadd.f32 %v3897_v23, %v3849_v31  ;;  %v4170_v8 = vsel %vm13446_vm12, 0.0, %v4156_v24  ;;  %v4181_v40 = vpack.c.bf16 %v4141_v10, %v4141_v10  ;;  %5651 = vmatpush.bf16.msra.mxu1 %v10723_v51  ;;  %v9360_v1 = vld [vmem:[#allocation3 + $0x1b8] sm:$0xf]  ;;  %v10712_v31 = vld [vmem:[#allocation5 + $0x610] sm:$0xff] }
 0x3bc   :  { %4204 = vst [vmem:[#allocation3 + $0x1fc] sm:$0xf] %v4196_v29  ;;  %5344 = vmatmul.bf16.gmra.mxu2 %v9353_v7  ;;  %vm13447_vm11 = vcmp.lt.s32.totalorder %v11050_v2, 7  ;;  %v4212_v38 = vpack.c.bf16 %v4170_v8, %v4170_v8  ;;  %v10645_v61 = vld [vmem:[#allocation3 + $0x1bc] sm:$0xf]  ;;  %v10720_v58 = vld [vmem:[#allocation5 + $0x650] sm:$0xff] }
 0x3bd   :  { %4219 = vst [vmem:[#allocation3 + $0x1dc] sm:$0xf] %v4211_v41  ;;  %5393 = vmatmul.bf16.gmra.mxu3 %v9357_v21  ;;  %v3915_v46 = vmax.f32 %v3898_v12, 0.0  ;;  %v10721_v52 = vld [vmem:[#allocation5 + $0x658] sm:$0xff]  ;;  %v10719_v51 = vld [vmem:[#allocation5 + $0x648] sm:$0xff]  ;;  %v10732_v8 = vld [vmem:[#allocation5 + $0x6b0] sm:$0xff] }
 0x3be   :  { %4228 = vst [vmem:[#allocation3 + $0x1e0] sm:$0xf] %v4180_v6  ;;  %5603 = vmatpush.bf16.msra.mxu0 %v10714_v37  ;;  %5558 = vmatpush.bf16.msrb.mxu3 %v10702_v0  ;;  %v12396_v0 = vld [vmem:[#allocation3 + $0x234] sm:$0xf0] }
 0x3bf   :  { %4237 = vst [vmem:[#allocation3 + $0x1e4] sm:$0xf] %v4196_v29  ;;  %v4122_v30 = vrot.slane %v3915_v46, 7  ;;  %v4152_v62 = vrot.slane %v3915_v46, 1  ;;  %5652 = vmatpush.bf16.msra.mxu1 %v10722_v49  ;;  %v4231_v36 = vpack.c.bf16 %v3915_v46, %v3915_v46  ;;  %v10710_v46 = vld [vmem:[#allocation5 + $0x600] sm:$0xff]  ;;  %5699 = vmatpush.bf16.msra.mxu2 %v10732_v8 }
 0x3c0   :  { %4245 = vst [vmem:[#allocation3 + $0x1c4] sm:$0xf] %v4211_v41  ;;  %v12393_v49 = vld [vmem:[#allocation7 + $0x2] ss:$0 sm:$0xff] }
 0x3c1   :  { %4254 = vst [vmem:[#allocation3 + $0x1c8] sm:$0xf] %v4180_v6  ;;  %v4125_v26 = vsel %vm13442_vm13, %v4121_v34, %v4122_v30  ;;  %v4155_v53 = vsel %vm13447_vm11, %v4151_v47, %v4152_v62  ;;  %vm13448_vm11 = vmmov %vm13442_vm13  ;;  %vm13449_vm13 = vcmp.lt.s32.totalorder %v11050_v2, 7 }
 0x3c2   :  { %4263 = vst [vmem:[#allocation3 + $0x1cc] sm:$0xf] %v4196_v29  ;;  %v4171_v34 = vsel %vm13356_vm14, 0.0, %v4155_v53  ;;  %v4124_v44 = vsel %vm13448_vm11, %v4122_v30, %v11053_v4  ;;  %v4142_v29 = vsel %vm13355_vm15, 0.0, %v4125_v26  ;;  %v4154_v22 = vsel %vm13449_vm13, %v4152_v62, %v11071_v25  ;;  %5604 = vmatpush.bf16.msra.mxu0 %v10713_v42  ;;  %v9388_v7 = vld [vmem:[#allocation3 + $0x1f8] sm:$0xf] }
 0x3c3   :  { %4271 = vst [vmem:[#allocation3 + $0x1ac] sm:$0xf] %v4211_v41  ;;  %v4213_v43 = vpack.c.bf16 %v4171_v34, %v4171_v34  ;;  %v4143_v41 = vsel %vm11502_vm9, 0.0, %v4124_v44  ;;  %v4172_v16 = vsel %vm11517_vm4, 0.0, %v4154_v22  ;;  %v4222_v24 = vpack.c.bf16 %v4142_v29, %v4142_v29  ;;  %5653 = vmatpush.bf16.msra.mxu1 %v10721_v52  ;;  %v10653_v59 = vld [vmem:[#allocation3 + $0x1fc] sm:$0xf] }
 0x3c4   :  { %4189 = vst [vmem:[#allocation3 + $0x21c] sm:$0xf] %v4181_v40  ;;  %v10649_v60 = vld [vmem:[#allocation3 + $0x1d8] sm:$0xf0]  ;;  %v4240_v28 = vpack.c.bf16 %v4172_v16, %v4172_v16  ;;  %v4249_v20 = vpack.c.bf16 %v4143_v41, %v4143_v41  ;;  %v10718_v30 = vld [vmem:[#allocation5 + $0x640] sm:$0xff]  ;;  %v13450_v42 = vld [vmem:[#allocation21_spill] sm:$0xff] }
 0x3c5   :  { %4205 = vst [vmem:[#allocation3 + $0x220] sm:$0xf] %v4197_v27  ;;  %v9361_v45 = vor.u32 %v10649_v60, %v9360_v1  ;;  %v9362_v6 = vld [vmem:[#allocation3 + $0x1dc] sm:$0xf0]  ;;  %v12399_v1 = vld [vmem:[#allocation3 + $0x118] sm:$0xf0] }
 0x3c6   :  { %4220 = vst [vmem:[#allocation3 + $0x200] sm:$0xf] %v4212_v38  ;;  %v9365_v47 = vor.u32 %v10645_v61, %v9362_v6  ;;  %5605 = vmatpush.bf16.msra.mxu0 %v10712_v31  ;;  %v10596_v60 = vld [vmem:[#allocation3 + $0x30] sm:$0xf0]  ;;  %v9154_v61 = vld [vmem:[#allocation3 + $0x34] sm:$0xf0] }
 0x3c7   :  { %4229 = vst [vmem:[#allocation3 + $0x204] sm:$0xf] %v4181_v40  ;;  %5442 = vmatmul.bf16.gmra.mxu0 %v9361_v45  ;;  %5654 = vmatpush.bf16.msra.mxu1 %v10720_v58  ;;  %v12402_v45 = vld [vmem:[#allocation3 + $0x238] sm:$0xf0]  ;;  %v9152_v34 = vld [vmem:[#allocation3 + $0x10] sm:$0xf] }
 0x3c8   :  { %4238 = vst [vmem:[#allocation3 + $0x208] sm:$0xf] %v4197_v27  ;;  %5491 = vmatmul.bf16.gmra.mxu1 %v9365_v47  ;;  %v10592_v52 = vld [vmem:[#allocation3 + $0x14] sm:$0xf]  ;;  %v9153_v44 = vor.u32 %v10596_v60, %v9152_v34  ;;  %v10731_v16 = vld [vmem:[#allocation5 + $0x6a8] sm:$0xff] }
 0x3c9   :  { %4246 = vst [vmem:[#allocation3 + $0x1e8] sm:$0xf] %v4212_v38  ;;  %v9157_v29 = vor.u32 %v10592_v52, %v9154_v61  ;;  %5700 = vmatpush.bf16.msra.mxu2 %v10731_v16  ;;  %v10597_v58 = vld [vmem:[#allocation3 + $0x38] sm:$0xf0] }
 0x3ca   :  { %4255 = vst [vmem:[#allocation3 + $0x1ec] sm:$0xf] %v4181_v40  ;;  %5606 = vmatpush.bf16.msra.mxu0 %v10711_v50 }
 0x3cb   :  { %4264 = vst [vmem:[#allocation3 + $0x1f0] sm:$0xf] %v4197_v27  ;;  %v10657_v23 = vld [vmem:[#allocation3 + $0x218] sm:$0xf0]  ;;  %5655 = vmatpush.bf16.msra.mxu1 %v10719_v51 }
 0x3cc   :  { %4272 = vst [vmem:[#allocation3 + $0x1d0] sm:$0xf] %v4212_v38  ;;  %v9390_v21 = vld [vmem:[#allocation3 + $0x21c] sm:$0xf0]  ;;  %v9389_v12 = vor.u32 %v10657_v23, %v9388_v7  ;;  %v12391_v38 = vld [vmem:[#allocation3 + $0x114] sm:$0xf0] }
 0x3cd   :  { %4221 = vst [vmem:[#allocation3 + $0x224] sm:$0xf] %v4213_v43  ;;  %v9393_v10 = vor.u32 %v10653_v59, %v9390_v21  ;;  %v9396_v62 = vld [vmem:[#allocation3 + $0x200] sm:$0xf]  ;;  %v9160_v23 = vld [vmem:[#allocation3 + $0x18] sm:$0xf] }
 0x3ce   :  { %4230 = vst [vmem:[#allocation3 + $0x228] sm:$0xf] %v4222_v24  ;;  %5349 = vmatmul.bf16.gmra.mxu2 %v9389_v12  ;;  %5607 = vmatpush.bf16.msra.mxu0 %v10710_v46  ;;  %v10654_v35 = vld [vmem:[#allocation3 + $0x204] sm:$0xf]  ;;  %v9161_v59 = vor.u32 %v10597_v58, %v9160_v23  ;;  %v10593_v21 = vld [vmem:[#allocation3 + $0x1c] sm:$0xf] }
 0x3cf   :  { %4239 = vst [vmem:[#allocation3 + $0x22c] sm:$0xf] %v4231_v36  ;;  %5398 = vmatmul.bf16.gmra.mxu3 %v9393_v10  ;;  %5656 = vmatpush.bf16.msra.mxu1 %v10718_v30  ;;  %v10605_v30 = vld [vmem:[#allocation3 + $0x78] sm:$0xf0] }
 0x3d0   :  { %4247 = vst [vmem:[#allocation3 + $0x20c] sm:$0xf] %v4213_v43 }
 0x3d1   :  { %4248 = vst [vmem:[#allocation3 + $0x230] sm:$0xf] %v4240_v28 }
 0x3d2   :  { %4256 = vst [vmem:[#allocation3 + $0x210] sm:$0xf] %v4222_v24 }
 0x3d3   :  { %4257 = vst [vmem:[#allocation3 + $0x234] sm:$0xf] %v4249_v20 }
 0x3d4   :  { %4265 = vst [vmem:[#allocation3 + $0x214] sm:$0xf] %v4231_v36  ;;  %v10658_v40 = vld [vmem:[#allocation3 + $0x220] sm:$0xf0]  ;;  %v9162_v36 = vld [vmem:[#allocation3 + $0x3c] sm:$0xf0] }
 0x3d5   :  { %4273 = vst [vmem:[#allocation3 + $0x1f4] sm:$0xf] %v4213_v43  ;;  %v9397_v37 = vor.u32 %v10658_v40, %v9396_v62  ;;  %v9398_v27 = vld [vmem:[#allocation3 + $0x224] sm:$0xf0]  ;;  %v9165_v10 = vor.u32 %v10593_v21, %v9162_v36  ;;  %v9190_v62 = vld [vmem:[#allocation3 + $0x7c] sm:$0xf0] }
 0x3d6   :  { %4274 = vst [vmem:[#allocation3 + $0x218] sm:$0xf] %v4240_v28  ;;  %v9401_v26 = vor.u32 %v10654_v35, %v9398_v27  ;;  %v5364_v53 = vpop.f32.mrf.mxu3  ;;  %v10601_v27 = vld [vmem:[#allocation3 + $0x5c] sm:$0xf]  ;;  %v10614_v21 = vld [vmem:[#allocation3 + $0xc0] sm:$0xf0] }
 0x3d7   :  { %5447 = vmatmul.bf16.gmra.mxu0 %v9397_v37  ;;  %5941 = vst [vmem:[#allocation3 + $0x118] sm:$0xf] %v13434_v13  ;;  %v9188_v37 = vld [vmem:[#allocation3 + $0x58] sm:$0xf] }
 0x3d8   :  { %5496 = vmatmul.bf16.gmra.mxu1 %v9401_v26  ;;  %6113 = vst [vmem:[#allocation3 + $0x238] sm:$0xf] %v13434_v13  ;;  %v9189_v26 = vor.u32 %v10605_v30, %v9188_v37 }
 0x3d9   :  { %5950 = vst [vmem:[#allocation3 + $0x11c] sm:$0xf] %v13450_v42 }
 0x3da   :  { %v5315_v6 = vpop.f32.mrf.mxu2  ;;  %6122 = vst [vmem:[#allocation3 + $0x23c] sm:$0xf] %v13450_v42 }
 0x3db   :  { %v5316_v47 = vadd.f32 %v12393_v49, %v5315_v6 }
 0x3dd   :  { %v5365_v22 = vadd.f32 %v5364_v53, %v5316_v47  ;;  %v5413_v31 = vpop.f32.mrf.mxu0  ;;  %v9193_v53 = vor.u32 %v10601_v27, %v9190_v62  ;;  %v10730_v47 = vld [vmem:[#allocation5 + $0x6a0] sm:$0xff] }
 0x3de   :  { %5510 = vmatmul.bf16.vlgmr.msrb.gmra.mxu2 %v9153_v44  ;;  %v5462_v13 = vpop.f32.mrf.mxu1  ;;  %v5366_v43 = vpop.f32.mrf.mxu3  ;;  %v10606_v44 = vld [vmem:[#allocation3 + $0x80] sm:$0xf0] }
 0x3df   :  { %5559 = vmatmul.bf16.vlgmr.msrb.gmra.mxu3 %v9157_v29  ;;  %v5414_v41 = vadd.f32 %v5413_v31, %v5365_v22  ;;  %5701 = vmatpush.bf16.msra.mxu2 %v10730_v47  ;;  %v9198_v22 = vld [vmem:[#allocation3 + $0x84] sm:$0xf0] }
 0x3e1   :  { %v12406_v24 = vadd.f32 %v5462_v13, %v5414_v41  ;;  %v9196_v13 = vld [vmem:[#allocation3 + $0x60] sm:$0xf]  ;;  %v10602_v41 = vld [vmem:[#allocation3 + $0x64] sm:$0xf] }
 0x3e2   :  { %v5317_v50 = vpop.f32.mrf.mxu2 }
 0x3e3   :  { %v5318_v7 = vadd.f32 %v12393_v49, %v5317_v50  ;;  %v9201_v50 = vor.u32 %v10602_v41, %v9198_v22  ;;  %v10623_v41 = vld [vmem:[#allocation3 + $0x108] sm:$0xf0] }
 0x3e5   :  { %v5367_v12 = vadd.f32 %v5366_v43, %v5318_v7  ;;  %v5415_v28 = vpop.f32.mrf.mxu0  ;;  %v9197_v43 = vor.u32 %v10606_v44, %v9196_v13  ;;  %v10611_v44 = vld [vmem:[#allocation3 + $0xac] sm:$0xf] }
 0x3e6   :  { %v5464_v51 = vpop.f32.mrf.mxu1 }
 0x3e7   :  { %5608 = vmatmul.bf16.vlgmr.msra.gmra.mxu0 %v9161_v59  ;;  %v5416_v20 = vadd.f32 %v5415_v28, %v5367_v12  ;;  %v5369_v8 = vpop.f32.mrf.mxu3  ;;  %v9226_v12 = vld [vmem:[#allocation3 + $0xc4] sm:$0xf0] }
 0x3e8   :  { %5657 = vmatmul.bf16.vlgmr.msra.gmra.mxu1 %v9165_v10  ;;  %v9224_v10 = vld [vmem:[#allocation3 + $0xa0] sm:$0xf] }
 0x3e9   :  { %v12409_v46 = vadd.f32 %v5464_v51, %v5416_v20  ;;  %v10610_v20 = vld [vmem:[#allocation3 + $0xa4] sm:$0xf] }
 0x3ea   :  { %v5320_v40 = vpop.f32.mrf.mxu2  ;;  %v9229_v30 = vor.u32 %v10610_v20, %v9226_v12 }
 0x3eb   :  { %v5321_v35 = vadd.f32 %v12393_v49, %v5320_v40 }
 0x3ed   :  { %v5370_v60 = vadd.f32 %v5369_v8, %v5321_v35  ;;  %v5418_v42 = vpop.f32.mrf.mxu0  ;;  %v9225_v8 = vor.u32 %v10614_v21, %v9224_v10  ;;  %v10729_v35 = vld [vmem:[#allocation5 + $0x698] sm:$0xff] }
 0x3ee   :  { %5515 = vmatmul.bf16.gmra.mxu2 %v9189_v26  ;;  %v5467_v61 = vpop.f32.mrf.mxu1 }
 0x3ef   :  { %5564 = vmatmul.bf16.gmra.mxu3 %v9193_v53  ;;  %v5419_v6 = vadd.f32 %v5418_v42, %v5370_v60  ;;  %v5371_v34 = vpop.f32.mrf.mxu3  ;;  %5702 = vmatpush.bf16.msra.mxu2 %v10729_v35  ;;  %v10615_v60 = vld [vmem:[#allocation3 + $0xc8] sm:$0xf0]  ;;  %v10620_v35 = vld [vmem:[#allocation3 + $0xf4] sm:$0xf] }
 0x3f1   :  { %v12412_v52 = vadd.f32 %v5467_v61, %v5419_v6  ;;  %v9234_v61 = vld [vmem:[#allocation3 + $0xcc] sm:$0xf0] }
 0x3f2   :  { %v5322_v29 = vpop.f32.mrf.mxu2  ;;  %v9237_v22 = vor.u32 %v10611_v44, %v9234_v61  ;;  %v9273_v61 = vor.u32 %v10620_v35, %v12391_v38 }
 0x3f3   :  { %v5323_v31 = vadd.f32 %v12393_v49, %v5322_v29 }
 0x3f5   :  { %v5372_v16 = vadd.f32 %v5371_v34, %v5323_v31  ;;  %v5420_v58 = vpop.f32.mrf.mxu0  ;;  %v9232_v34 = vld [vmem:[#allocation3 + $0xa8] sm:$0xf] }
 0x3f6   :  { %v5469_v36 = vpop.f32.mrf.mxu1  ;;  %v9233_v47 = vor.u32 %v10615_v60, %v9232_v34 }
 0x3f7   :  { %5613 = vmatmul.bf16.gmra.mxu0 %v9197_v43  ;;  %v5421_v7 = vadd.f32 %v5420_v58, %v5372_v16  ;;  %v10619_v16 = vld [vmem:[#allocation3 + $0xec] sm:$0xf]  ;;  %v9262_v58 = vld [vmem:[#allocation3 + $0x10c] sm:$0xf0] }
 0x3f8   :  { %5662 = vmatmul.bf16.gmra.mxu1 %v9201_v50 }
 0x3f9   :  { %v12415_v23 = vadd.f32 %v5469_v36, %v5421_v7  ;;  %v5374_v59 = vpop.f32.mrf.mxu3  ;;  %v9260_v36 = vld [vmem:[#allocation3 + $0xe8] sm:$0xf] }
 0x3fa   :  { %v5325_v28 = vpop.f32.mrf.mxu2  ;;  %v9261_v21 = vor.u32 %v10623_v41, %v9260_v36 }
 0x3fb   :  { %v5326_v51 = vadd.f32 %v12393_v49, %v5325_v28  ;;  %v9265_v28 = vor.u32 %v10619_v16, %v9262_v58 }
 0x3fd   :  { %v5375_v62 = vadd.f32 %v5374_v59, %v5326_v51 }
 0x3fe   :  { %5520 = vmatmul.bf16.gmra.mxu2 %v9225_v8  ;;  %v5423_v40 = vpop.f32.mrf.mxu0  ;;  %v10728_v8 = vld [vmem:[#allocation5 + $0x690] sm:$0xff] }
 0x3ff   :  { %5569 = vmatmul.bf16.gmra.mxu3 %v9229_v30  ;;  %v5472_v37 = vpop.f32.mrf.mxu1  ;;  %v5424_v27 = vadd.f32 %v5423_v40, %v5375_v62  ;;  %5703 = vmatpush.bf16.msra.mxu2 %v10728_v8  ;;  %v9268_v40 = vld [vmem:[#allocation3 + $0xf0] sm:$0xf] }
 0x401   :  { %v12418_v26 = vadd.f32 %v5472_v37, %v5424_v27  ;;  %v5376_v53 = vpop.f32.mrf.mxu3  ;;  %v10624_v37 = vld [vmem:[#allocation3 + $0x110] sm:$0xf0] }
 0x402   :  { %v5327_v42 = vpop.f32.mrf.mxu2 }
 0x403   :  { %v5328_v6 = vadd.f32 %v12393_v49, %v5327_v42  ;;  %v9269_v42 = vor.u32 %v10624_v37, %v9268_v40  ;;  %v10629_v40 = vld [vmem:[#allocation3 + $0x13c] sm:$0xf] }
 0x405   :  { %v5377_v29 = vadd.f32 %v5376_v53, %v5328_v6 }
 0x406   :  { %v5425_v31 = vpop.f32.mrf.mxu0 }
 0x407   :  { %5618 = vmatmul.bf16.gmra.mxu0 %v9233_v47  ;;  %v5474_v13 = vpop.f32.mrf.mxu1  ;;  %v5426_v43 = vadd.f32 %v5425_v31, %v5377_v29  ;;  %v10632_v29 = vld [vmem:[#allocation3 + $0x150] sm:$0xf0] }
 0x408   :  { %5667 = vmatmul.bf16.gmra.mxu1 %v9237_v22  ;;  %v9298_v22 = vld [vmem:[#allocation3 + $0x154] sm:$0xf0] }
 0x409   :  { %v12421_v50 = vadd.f32 %v5474_v13, %v5426_v43  ;;  %v9296_v13 = vld [vmem:[#allocation3 + $0x130] sm:$0xf]  ;;  %v10628_v43 = vld [vmem:[#allocation3 + $0x134] sm:$0xf] }
 0x40a   :  { %v9297_v41 = vor.u32 %v10632_v29, %v9296_v13  ;;  %v9301_v16 = vor.u32 %v10628_v43, %v9298_v22 }
 0x40b   :  { %v5330_v7 = vpop.f32.mrf.mxu2 }
 0x40c   :  { %v5379_v59 = vpop.f32.mrf.mxu3  ;;  %v5331_v12 = vadd.f32 %v12393_v49, %v5330_v7 }
 0x40e   :  { %5525 = vmatmul.bf16.gmra.mxu2 %v9261_v21  ;;  %v5380_v10 = vadd.f32 %v5379_v59, %v5331_v12  ;;  %v5428_v51 = vpop.f32.mrf.mxu0  ;;  %v10727_v21 = vld [vmem:[#allocation5 + $0x688] sm:$0xff] }
 0x40f   :  { %5574 = vmatmul.bf16.gmra.mxu3 %v9265_v28  ;;  %v5477_v20 = vpop.f32.mrf.mxu1  ;;  %v10633_v28 = vld [vmem:[#allocation3 + $0x158] sm:$0xf0]  ;;  %5704 = vmatpush.bf16.msra.mxu2 %v10727_v21 }
 0x410   :  { %v5429_v30 = vadd.f32 %v5428_v51, %v5380_v10  ;;  %v9306_v51 = vld [vmem:[#allocation3 + $0x15c] sm:$0xf0] }
 0x411   :  { %v9309_v37 = vor.u32 %v10629_v40, %v9306_v51  ;;  %v9370_v40 = vld [vmem:[#allocation3 + $0x1e4] sm:$0xf0] }
 0x412   :  { %v12424_v62 = vadd.f32 %v5477_v20, %v5429_v30  ;;  %v9304_v20 = vld [vmem:[#allocation3 + $0x138] sm:$0xf] }
 0x413   :  { %v5332_v27 = vpop.f32.mrf.mxu2  ;;  %v9305_v30 = vor.u32 %v10633_v28, %v9304_v20  ;;  %v10638_v28 = vld [vmem:[#allocation3 + $0x184] sm:$0xf] }
 0x414   :  { %v5333_v53 = vadd.f32 %v12393_v49, %v5332_v27  ;;  %v5381_v60 = vpop.f32.mrf.mxu3 }
 0x416   :  { %v5382_v6 = vadd.f32 %v5381_v60, %v5333_v53  ;;  %v5430_v34 = vpop.f32.mrf.mxu0 }
 0x417   :  { %5623 = vmatmul.bf16.gmra.mxu0 %v9269_v42  ;;  %v5479_v47 = vpop.f32.mrf.mxu1  ;;  %v10641_v42 = vld [vmem:[#allocation3 + $0x198] sm:$0xf0] }
 0x418   :  { %5672 = vmatmul.bf16.gmra.mxu1 %v9273_v61  ;;  %v5431_v44 = vadd.f32 %v5430_v34, %v5382_v6  ;;  %v9334_v61 = vld [vmem:[#allocation3 + $0x19c] sm:$0xf0]  ;;  %v9332_v6 = vld [vmem:[#allocation3 + $0x178] sm:$0xf]  ;;  %v10637_v34 = vld [vmem:[#allocation3 + $0x17c] sm:$0xf] }
 0x41a   :  { %v12428_v31 = vadd.f32 %v5479_v47, %v5431_v44  ;;  %v9333_v47 = vor.u32 %v10641_v42, %v9332_v6  ;;  %v9337_v44 = vor.u32 %v10637_v34, %v9334_v61  ;;  %v9368_v61 = vld [vmem:[#allocation3 + $0x1c0] sm:$0xf]  ;;  %v10646_v6 = vld [vmem:[#allocation3 + $0x1c4] sm:$0xf] }
 0x41e   :  { %5530 = vmatmul.bf16.gmra.mxu2 %v9297_v41  ;;  %v5335_v58 = vpop.f32.mrf.mxu2 }
 0x41f   :  { %5579 = vmatmul.bf16.gmra.mxu3 %v9301_v16  ;;  %v5384_v36 = vpop.f32.mrf.mxu3  ;;  %v5336_v38 = vadd.f32 %v12393_v49, %v5335_v58  ;;  %v5433_v7 = vpop.f32.mrf.mxu0  ;;  %v10642_v16 = vld [vmem:[#allocation3 + $0x1a0] sm:$0xf0] }
 0x420   :  { %v5482_v59 = vpop.f32.mrf.mxu1  ;;  %v10726_v58 = vld [vmem:[#allocation5 + $0x680] sm:$0xff] }
 0x421   :  { %v5385_v12 = vadd.f32 %v5384_v36, %v5336_v38  ;;  %5705 = vmatpush.bf16.msra.mxu2 %v10726_v58  ;;  %v9376_v58 = vld [vmem:[#allocation3 + $0x1c8] sm:$0xf] }
 0x423   :  { %v5434_v10 = vadd.f32 %v5433_v7, %v5385_v12  ;;  %v9342_v7 = vld [vmem:[#allocation3 + $0x1a4] sm:$0xf0] }
 0x425   :  { %v12431_v8 = vadd.f32 %v5482_v59, %v5434_v10  ;;  %v9340_v59 = vld [vmem:[#allocation3 + $0x180] sm:$0xf]  ;;  %v9345_v10 = vor.u32 %v10638_v28, %v9342_v7 }
 0x426   :  { %v12433_v35 = vpop.f32.mrf.mxu2  ;;  %v9341_v12 = vor.u32 %v10642_v16, %v9340_v59  ;;  %v10647_v59 = vld [vmem:[#allocation3 + $0x1cc] sm:$0xf] }
 0x427   :  { %v12435_v27 = vpop.f32.mrf.mxu3  ;;  %5628 = vmatmul.bf16.gmra.mxu0 %v9305_v30  ;;  %v12437_v53 = vpop.f32.mrf.mxu0  ;;  %v10650_v30 = vld [vmem:[#allocation3 + $0x1e0] sm:$0xf0] }
 0x428   :  { %5677 = vmatmul.bf16.gmra.mxu1 %v9309_v37  ;;  %v12439_v60 = vpop.f32.mrf.mxu1  ;;  %v9369_v34 = vor.u32 %v10650_v30, %v9368_v61  ;;  %v10655_v61 = vld [vmem:[#allocation3 + $0x20c] sm:$0xf] }
 0x42e   :  { %5535 = vmatmul.bf16.gmra.mxu2 %v9333_v47  ;;  %v5340_v29 = vpop.f32.mrf.mxu2  ;;  %v9373_v47 = vor.u32 %v10646_v6, %v9370_v40  ;;  %v10659_v40 = vld [vmem:[#allocation3 + $0x228] sm:$0xf0]  ;;  %v9406_v6 = vld [vmem:[#allocation3 + $0x22c] sm:$0xf0] }
 0x42f   :  { %5584 = vmatmul.bf16.gmra.mxu3 %v9337_v44  ;;  %v5389_v22 = vpop.f32.mrf.mxu3  ;;  %v5341_v13 = vadd.f32 %v12393_v49, %v5340_v29 }
 0x431   :  { %v5390_v43 = vadd.f32 %v5389_v22, %v5341_v13 }
 0x432   :  { %v5438_v41 = vpop.f32.mrf.mxu0 }
 0x433   :  { %v5439_v36 = vadd.f32 %v5438_v41, %v5390_v43  ;;  %v5487_v38 = vpop.f32.mrf.mxu1  ;;  %v10651_v43 = vld [vmem:[#allocation3 + $0x1e8] sm:$0xf0]  ;;  %v9378_v41 = vld [vmem:[#allocation3 + $0x1ec] sm:$0xf0] }
 0x434   :  { %v9377_v7 = vor.u32 %v10651_v43, %v9376_v58 }
 0x435   :  { %v12442_v21 = vadd.f32 %v5487_v38, %v5439_v36 }
 0x436   :  { %v12444_v51 = vpop.f32.mrf.mxu2 }
 0x437   :  { %v12446_v20 = vpop.f32.mrf.mxu3  ;;  %5633 = vmatmul.bf16.gmra.mxu0 %v9341_v12  ;;  %v9381_v12 = vor.u32 %v10647_v59, %v9378_v41  ;;  %v9412_v41 = vld [vmem:[#allocation3 + $0x210] sm:$0xf] }
 0x438   :  { %5682 = vmatmul.bf16.gmra.mxu1 %v9345_v10 }
 0x43a   :  { %v12448_v37 = vpop.f32.mrf.mxu0 }
 0x43b   :  { %v12450_v42 = vpop.f32.mrf.mxu1 }
 0x43c   :  { %13451 = vst [vmem:[#allocation30_spill] sm:$0xff] %v12450_v42  ;;  %v10831_v42 = vld [vmem:[#allocation5 + $0x788] sm:$0xff] }
 0x43e   :  { %5540 = vmatmul.bf16.gmra.mxu2 %v9369_v34  ;;  %v9404_v34 = vld [vmem:[#allocation3 + $0x208] sm:$0xf] }
 0x43f   :  { %5589 = vmatmul.bf16.gmra.mxu3 %v9373_v47  ;;  %v5345_v44 = vpop.f32.mrf.mxu2 }
 0x440   :  { %v5394_v29 = vpop.f32.mrf.mxu3  ;;  %v5346_v22 = vadd.f32 %v12393_v49, %v5345_v44  ;;  %v9405_v44 = vor.u32 %v10659_v40, %v9404_v34  ;;  %v10813_v34 = vld [vmem:[#allocation5 + $0x6f8] sm:$0xff] }
 0x441   :  { %7153 = vmatpush.bf16.msra.mxu3 %v10813_v34 }
 0x442   :  { %v5395_v13 = vadd.f32 %v5394_v29, %v5346_v22  ;;  %v9409_v29 = vor.u32 %v10655_v61, %v9406_v6  ;;  %v10598_v6 = vld [vmem:[#allocation3 + $0x40] sm:$0xf0] }
 0x444   :  { %v5443_v16 = vpop.f32.mrf.mxu0 }
 0x445   :  { %v5444_v36 = vadd.f32 %v5443_v16, %v5395_v13  ;;  %v5492_v38 = vpop.f32.mrf.mxu1  ;;  %v10660_v16 = vld [vmem:[#allocation3 + $0x230] sm:$0xf0] }
 0x446   :  { %v9413_v59 = vor.u32 %v10660_v16, %v9412_v41  ;;  %v10607_v41 = vld [vmem:[#allocation3 + $0x88] sm:$0xf0]  ;;  %v9204_v16 = vld [vmem:[#allocation3 + $0x68] sm:$0xf] }
 0x447   :  { %v12453_v28 = vadd.f32 %v5492_v38, %v5444_v36  ;;  %5638 = vmatmul.bf16.gmra.mxu0 %v9377_v7  ;;  %v12455_v10 = vpop.f32.mrf.mxu2  ;;  %v10656_v36 = vld [vmem:[#allocation3 + $0x214] sm:$0xf] }
 0x448   :  { %13452 = vst [vmem:[#allocation12_spill] sm:$0xff] %v12455_v10  ;;  %5687 = vmatmul.bf16.gmra.mxu1 %v9381_v12  ;;  %v12457_v30 = vpop.f32.mrf.mxu3  ;;  %v10806_v10 = vld [vmem:[#allocation5 + $0x6c0] sm:$0xff] }
 0x449   :  { %13453 = vst [vmem:[#allocation19_spill] sm:$0xff] %v12457_v30  ;;  %v9417_v30 = vor.u32 %v10656_v36, %v12396_v0 }
 0x44c   :  { %v12459_v47 = vpop.f32.mrf.mxu0 }
 0x44d   :  { %13454 = vst [vmem:[#allocation24_spill] sm:$0xff] %v12459_v47  ;;  %v12461_v22 = vpop.f32.mrf.mxu1 }
 0x44e   :  { %13455 = vst [vmem:[#allocation20_spill] sm:$0xff] %v12461_v22  ;;  %5545 = vmatmul.bf16.gmra.mxu2 %v9405_v44  ;;  %v10836_v22 = vld [vmem:[#allocation5 + $0x7b0] sm:$0xff] }
 0x44f   :  { %5594 = vmatmul.bf16.gmra.mxu3 %v9409_v29 }
 0x451   :  { %v5350_v13 = vpop.f32.mrf.mxu2 }
 0x452   :  { %v5351_v43 = vadd.f32 %v12393_v49, %v5350_v13  ;;  %v5399_v58 = vpop.f32.mrf.mxu3  ;;  %v9168_v49 = vld [vmem:[#allocation3 + $0x20] sm:$0xf] }
 0x453   :  { %v9169_v44 = vor.u32 %v10598_v6, %v9168_v49 }
 0x454   :  { %v5400_v38 = vadd.f32 %v5399_v58, %v5351_v43  ;;  %v5448_v7 = vpop.f32.mrf.mxu0 }
 0x455   :  { %v5497_v47 = vpop.f32.mrf.mxu1 }
 0x456   :  { %v5449_v12 = vadd.f32 %v5448_v7, %v5400_v38  ;;  %v10616_v7 = vld [vmem:[#allocation3 + $0xd0] sm:$0xf0] }
 0x457   :  { %5643 = vmatmul.bf16.gmra.mxu0 %v9413_v59 }
 0x458   :  { %v12465_v40 = vadd.f32 %v5497_v47, %v5449_v12  ;;  %5692 = vmatmul.bf16.gmra.mxu1 %v9417_v30  ;;  %v10812_v47 = vld [vmem:[#allocation5 + $0x6f0] sm:$0xff]  ;;  %v9205_v30 = vor.u32 %v10607_v41, %v9204_v16  ;;  %v10634_v16 = vld [vmem:[#allocation3 + $0x160] sm:$0xf0] }
 0x459   :  { %v12467_v61 = vpop.f32.mrf.mxu2  ;;  %7154 = vmatpush.bf16.msra.mxu3 %v10812_v47  ;;  %v9240_v12 = vld [vmem:[#allocation3 + $0xb0] sm:$0xf] }
 0x45a   :  { %13456 = vst [vmem:[#allocation15_spill] sm:$0xff] %v12467_v61  ;;  %v9241_v6 = vor.u32 %v10616_v7, %v9240_v12  ;;  %v10808_v12 = vld [vmem:[#allocation5 + $0x6d0] sm:$0xff] }
 0x45b   :  { %v10828_v61 = vld [vmem:[#allocation5 + $0x770] sm:$0xff] }
 0x45e   :  { %5706 = vmatmul.bf16.vlgmr.msra.gmra.mxu2 %v9169_v44  ;;  %v9276_v44 = vld [vmem:[#allocation3 + $0xf8] sm:$0xf] }
 0x461   :  { %v5511_v29 = vpop.f32.mrf.mxu2 }
 0x462   :  { %v12470_v13 = vadd.f32 %v5511_v29, %v12406_v24  ;;  %v10811_v24 = vld [vmem:[#allocation5 + $0x6e8] sm:$0xff] }
 0x463   :  { %7155 = vmatpush.bf16.msra.mxu3 %v10811_v24  ;;  %v10643_v24 = vld [vmem:[#allocation3 + $0x1a8] sm:$0xf0] }
 0x469   :  { %v5513_v43 = vpop.f32.mrf.mxu2 }
 0x46a   :  { %v12473_v0 = vadd.f32 %v5513_v43, %v12409_v46  ;;  %v9277_v43 = vor.u32 %v12399_v1, %v9276_v44 }
 0x46e   :  { %5711 = vmatmul.bf16.gmra.mxu2 %v9205_v30 }
 0x471   :  { %v5516_v58 = vpop.f32.mrf.mxu2 }
 0x472   :  { %v12476_v36 = vadd.f32 %v5516_v58, %v12412_v52  ;;  %v10810_v52 = vld [vmem:[#allocation5 + $0x6e0] sm:$0xff] }
 0x473   :  { %7156 = vmatpush.bf16.msra.mxu3 %v10810_v52  ;;  %v9312_v58 = vld [vmem:[#allocation3 + $0x140] sm:$0xf]  ;;  %v12506_v52 = vpop.f32.mrf.mxu1 }
 0x474   :  { %13459 = vst [vmem:[#allocation22_spill] sm:$0xff] %v12506_v52 }
 0x479   :  { %v5518_v38 = vpop.f32.mrf.mxu2 }
 0x47a   :  { %v12479_v59 = vadd.f32 %v5518_v38, %v12415_v23  ;;  %v9313_v38 = vor.u32 %v10634_v16, %v9312_v58  ;;  %v10807_v16 = vld [vmem:[#allocation5 + $0x6c8] sm:$0xff]  ;;  %v9384_v58 = vld [vmem:[#allocation3 + $0x1d0] sm:$0xf] }
 0x47e   :  { %5716 = vmatmul.bf16.gmra.mxu2 %v9241_v6 }
 0x481   :  { %v5521_v46 = vpop.f32.mrf.mxu2 }
 0x482   :  { %v12482_v34 = vadd.f32 %v5521_v46, %v12418_v26  ;;  %v10809_v26 = vld [vmem:[#allocation5 + $0x6d8] sm:$0xff]  ;;  %v12499_v46 = vpop.f32.mrf.mxu3 }
 0x483   :  { %7157 = vmatpush.bf16.msra.mxu3 %v10809_v26  ;;  %13457 = vst [vmem:[#allocation13_spill] sm:$0xff] %v12499_v46  ;;  %v10820_v26 = vld [vmem:[#allocation5 + $0x730] sm:$0xff] }
 0x487   :  { %7158 = vmatpush.bf16.msra.mxu3 %v10808_v12  ;;  %v10819_v12 = vld [vmem:[#allocation5 + $0x728] sm:$0xff] }
 0x489   :  { %v5523_v49 = vpop.f32.mrf.mxu2 }
 0x48a   :  { %v12485_v29 = vadd.f32 %v5523_v49, %v12421_v50  ;;  %v12501_v49 = vpop.f32.mrf.mxu0 }
 0x48b   :  { %13458 = vst [vmem:[#allocation16_spill] sm:$0xff] %v12501_v49  ;;  %7159 = vmatpush.bf16.msra.mxu3 %v10807_v16  ;;  %v10818_v49 = vld [vmem:[#allocation5 + $0x720] sm:$0xff] }
 0x48e   :  { %5721 = vmatmul.bf16.gmra.mxu2 %v9277_v43  ;;  %v10821_v43 = vld [vmem:[#allocation5 + $0x738] sm:$0xff] }
 0x48f   :  { %7202 = vmatpush.bf16.msrb.mxu0 %v10821_v43  ;;  %7160 = vmatpush.bf16.msra.mxu3 %v10806_v10  ;;  %v10814_v10 = vld [vmem:[#allocation5 + $0x700] sm:$0xff] }
 0x491   :  { %v5526_v23 = vpop.f32.mrf.mxu2 }
 0x492   :  { %v12489_v41 = vadd.f32 %v5526_v23, %v12424_v62  ;;  %v9348_v62 = vld [vmem:[#allocation3 + $0x188] sm:$0xf]  ;;  %v13490_v56 = vld [vmem:[#allocation16_spill] sm:$0xff] }
 0x493   :  { %v9349_v6 = vor.u32 %v10643_v24, %v9348_v62  ;;  %7203 = vmatpush.bf16.msrb.mxu0 %v10820_v26  ;;  %v5658_v24 = vpop.f32.mrf.mxu1 }
 0x497   :  { %7204 = vmatpush.bf16.msrb.mxu0 %v10819_v12  ;;  %v10816_v12 = vld [vmem:[#allocation5 + $0x710] sm:$0xff] }
 0x499   :  { %v5528_v47 = vpop.f32.mrf.mxu2 }
 0x49a   :  { %v12492_v30 = vadd.f32 %v5528_v47, %v12428_v31  ;;  %v10652_v47 = vld [vmem:[#allocation3 + $0x1f0] sm:$0xf0] }
 0x49b   :  { %7205 = vmatpush.bf16.msrb.mxu0 %v10818_v49  ;;  %v5660_v16 = vpop.f32.mrf.mxu1  ;;  %v10835_v49 = vld [vmem:[#allocation5 + $0x7a8] sm:$0xff] }
 0x49e   :  { %5726 = vmatmul.bf16.gmra.mxu2 %v9313_v38  ;;  %v5609_v38 = vpop.f32.mrf.mxu0 }
 0x4a1   :  { %v5531_v50 = vpop.f32.mrf.mxu2 }
 0x4a2   :  { %v12495_v7 = vadd.f32 %v5531_v50, %v12431_v8  ;;  %v5560_v8 = vpop.f32.mrf.mxu3  ;;  %v9385_v50 = vor.u32 %v10652_v47, %v9384_v58  ;;  %v9420_v47 = vld [vmem:[#allocation3 + $0x218] sm:$0xf] }
 0x4a3   :  { %v9421_v58 = vor.u32 %v12402_v45, %v9420_v47  ;;  %v5561_v47 = vadd.f32 %v5560_v8, %v12470_v13 }
 0x4a6   :  { %v5611_v43 = vpop.f32.mrf.mxu0 }
 0x4a9   :  { %v12497_v1 = vpop.f32.mrf.mxu2 }
 0x4ae   :  { %5731 = vmatmul.bf16.gmra.mxu2 %v9349_v6  ;;  %v10837_v6 = vld [vmem:[#allocation5 + $0x7b8] sm:$0xff] }
 0x4af   :  { %7300 = vmatpush.bf16.msrb.mxu2 %v10837_v6 }
 0x4b1   :  { %v5536_v31 = vpop.f32.mrf.mxu2 }
 0x4b2   :  { %v12504_v44 = vadd.f32 %v5536_v31, %v12442_v21  ;;  %v10829_v21 = vld [vmem:[#allocation5 + $0x778] sm:$0xff]  ;;  %v5562_v31 = vpop.f32.mrf.mxu3 }
 0x4b3   :  { %7251 = vmatpush.bf16.msrb.mxu1 %v10829_v21  ;;  %v10827_v21 = vld [vmem:[#allocation5 + $0x768] sm:$0xff]  ;;  %7301 = vmatpush.bf16.msrb.mxu2 %v10836_v22  ;;  %v5563_v8 = vadd.f32 %v5562_v31, %v12473_v0 }
 0x4b7   :  { %7252 = vmatpush.bf16.msrb.mxu1 %v10828_v61  ;;  %7302 = vmatpush.bf16.msrb.mxu2 %v10835_v49  ;;  %v10826_v61 = vld [vmem:[#allocation5 + $0x760] sm:$0xff] }
 0x4b9   :  { %v12508_v23 = vpop.f32.mrf.mxu2 }
 0x4ba   :  { %13460 = vst [vmem:[#allocation26_spill] sm:$0xff] %v12508_v23  ;;  %v5565_v26 = vpop.f32.mrf.mxu3  ;;  %v10832_v23 = vld [vmem:[#allocation5 + $0x790] sm:$0xff] }
 0x4bb   :  { %7253 = vmatpush.bf16.msrb.mxu1 %v10827_v21  ;;  %v5566_v0 = vadd.f32 %v5565_v26, %v12476_v36 }
 0x4be   :  { %5736 = vmatmul.bf16.gmra.mxu2 %v9385_v50  ;;  %v10817_v50 = vld [vmem:[#allocation5 + $0x718] sm:$0xff] }
 0x4bf   :  { %7206 = vmatpush.bf16.msrb.mxu0 %v10817_v50  ;;  %v10834_v50 = vld [vmem:[#allocation5 + $0x7a0] sm:$0xff]  ;;  %7254 = vmatpush.bf16.msrb.mxu1 %v10826_v61  ;;  %v10845_v61 = vld [vmem:[#allocation5 + $0x7f8] sm:$0xff] }
 0x4c0   :  { %7303 = vmatpush.bf16.msrb.mxu2 %v10834_v50  ;;  %v10823_v50 = vld [vmem:[#allocation5 + $0x748] sm:$0xff]  ;;  %7349 = vmatpush.bf16.msrb.mxu3 %v10845_v61 }
 0x4c1   :  { %v5541_v62 = vpop.f32.mrf.mxu2 }
 0x4c2   :  { %v12511_v52 = vadd.f32 %v5541_v62, %v12453_v28  ;;  %v12516_v28 = vpop.f32.mrf.mxu0  ;;  %v12523_v45 = vpop.f32.mrf.mxu3 }
 0x4c3   :  { %7207 = vmatpush.bf16.msrb.mxu0 %v10816_v12  ;;  %v5610_v12 = vadd.f32 %v5609_v38, %v5561_v47  ;;  %v5612_v38 = vadd.f32 %v5611_v43, %v5563_v8  ;;  %v10822_v8 = vld [vmem:[#allocation5 + $0x740] sm:$0xff]  ;;  %v5615_v61 = vadd.f32 %v12516_v28, %v5566_v0 }
 0x4c4   :  { %13461 = vst [vmem:[#allocation23_spill] sm:$0xff] %v12511_v52 }
 0x4c5   :  { %v5659_v13 = vadd.f32 %v5658_v24, %v5610_v12  ;;  %v5661_v31 = vadd.f32 %v5660_v16, %v5612_v38  ;;  %v10734_v38 = vld [vmem:[#allocation3 + $0x4] sm:$0xf] }
 0x4c9   :  { %v12513_v46 = vpop.f32.mrf.mxu2 }
 0x4ca   :  { %13462 = vst [vmem:[#allocation17_spill] sm:$0xff] %v12513_v46  ;;  %v12521_v46 = vpop.f32.mrf.mxu1  ;;  %v12528_v22 = vpop.f32.mrf.mxu0 }
 0x4cb   :  { %v12533_v49 = vpop.f32.mrf.mxu3 }
 0x4ce   :  { %5741 = vmatmul.bf16.gmra.mxu2 %v9421_v58  ;;  %v10815_v58 = vld [vmem:[#allocation5 + $0x708] sm:$0xff] }
 0x4cf   :  { %7208 = vmatpush.bf16.msrb.mxu0 %v10815_v58 }
 0x4d1   :  { %v5546_v62 = vpop.f32.mrf.mxu2 }
 0x4d2   :  { %v12519_v6 = vadd.f32 %v5546_v62, %v12465_v40  ;;  %v10825_v40 = vld [vmem:[#allocation5 + $0x758] sm:$0xff]  ;;  %v12530_v21 = vpop.f32.mrf.mxu1  ;;  %v12535_v47 = vpop.f32.mrf.mxu0 }
 0x4d3   :  { %v10833_v62 = vld [vmem:[#allocation5 + $0x798] sm:$0xff]  ;;  %7209 = vmatpush.bf16.msrb.mxu0 %v10814_v10  ;;  %7255 = vmatpush.bf16.msrb.mxu1 %v10825_v40  ;;  %v12550_v16 = vpop.f32.mrf.mxu3 }
 0x4d4   :  { %13463 = vst [vmem:[#allocation18_spill] sm:$0xff] %v12519_v6  ;;  %7304 = vmatpush.bf16.msrb.mxu2 %v10833_v62  ;;  %v10824_v6 = vld [vmem:[#allocation5 + $0x750] sm:$0xff] }
 0x4d7   :  { %7256 = vmatpush.bf16.msrb.mxu1 %v10824_v6 }
 0x4d8   :  { %7305 = vmatpush.bf16.msrb.mxu2 %v10832_v23 }
 0x4d9   :  { %v12526_v52 = vpop.f32.mrf.mxu2 }
 0x4da   :  { %13464 = vst [vmem:[#allocation27_spill] sm:$0xff] %v12526_v52  ;;  %v12538_v12 = vpop.f32.mrf.mxu1 }
 0x4db   :  { %7257 = vmatpush.bf16.msrb.mxu1 %v10823_v50 }
 0x4dc   :  { %7306 = vmatpush.bf16.msrb.mxu2 %v10831_v42 }
 0x4df   :  { %7258 = vmatpush.bf16.msrb.mxu1 %v10822_v8 }
 0x4e1   :  { %v5707_v52 = vpop.f32.mrf.mxu2 }
 0x4e2   :  { %v5708_v58 = vadd.f32 %v5707_v52, %v5659_v13  ;;  %v12566_v8 = vpop.f32.mrf.mxu1 }
 0x4e4   :  { %v5747_v10 = vmax.f32 %v5708_v58, 0.0  ;;  %v10830_v58 = vld [vmem:[#allocation5 + $0x780] sm:$0xff] }
 0x4e5   :  { %7307 = vmatpush.bf16.msrb.mxu2 %v10830_v58 }
 0x4e6   :  { %v5790_v40 = vrot.slane %v5747_v10, 7  ;;  %v5820_v24 = vrot.slane %v5747_v10, 1  ;;  %v5866_v62 = vpack.c.bf16 %v5747_v10, %v5747_v10  ;;  %v12553_v10 = vpop.f32.mrf.mxu0 }
 0x4e8   :  { %v5807_v52 = vsel %vm13448_vm11, %v11053_v4, %v5790_v40  ;;  %v5837_v23 = vsel %vm13449_vm13, %v11071_v25, %v5820_v24  ;;  %5874 = vst [vmem:[#allocation3 + $0x28] sm:$0xf] %v5866_v62 }
 0x4e9   :  { %v5810_v43 = vsel %vm11073_vm1, 0.0, %v5807_v52  ;;  %v5839_v36 = vsel %vm11077_vm2, 0.0, %v5837_v23  ;;  %5907 = vst [vmem:[#allocation3 + $0x10] sm:$0xf] %v5866_v62  ;;  %v5709_v42 = vpop.f32.mrf.mxu2 }
 0x4ea   :  { %v5850_v26 = vpack.c.bf16 %v5810_v43, %v5810_v43  ;;  %v5881_v6 = vpack.c.bf16 %v5839_v36, %v5839_v36  ;;  %v5710_v13 = vadd.f32 %v5709_v42, %v5661_v31  ;;  %v5664_v43 = vadd.f32 %v12521_v46, %v5615_v61 }
 0x4eb   :  { %v5568_v31 = vadd.f32 %v12523_v45, %v12479_v59 }
 0x4ec   :  { %5858 = vst [vmem:[#allocation3 + $0x24] sm:$0xf] %v5850_v26  ;;  %v5748_v50 = vmax.f32 %v5710_v13, 0.0  ;;  %v9712_v13 = vld [vmem:[#allocation3] sm:$0xf] }
 0x4ed   :  { %5889 = vst [vmem:[#allocation3 + $0x8] sm:$0xf] %v5881_v6  ;;  %v5617_v61 = vadd.f32 %v12528_v22, %v5568_v31 }
 0x4ee   :  { %5898 = vst [vmem:[#allocation3 + $0xc] sm:$0xf] %v5850_v26  ;;  %v5791_v62 = vrot.slane %v5748_v50, 7  ;;  %v5821_v52 = vrot.slane %v5748_v50, 1  ;;  %v5867_v23 = vpack.c.bf16 %v5748_v50, %v5748_v50  ;;  %v12569_v50 = vpop.f32.mrf.mxu3 }
 0x4ef   :  { %v9714_v36 = vld [vmem:[#allocation3 + $0x24] sm:$0xf0] }
 0x4f0   :  { %v5806_v28 = vsel %vm13448_vm11, %v5790_v40, %v5791_v62  ;;  %v5836_v0 = vsel %vm13449_vm13, %v5820_v24, %v5821_v52  ;;  %5875 = vst [vmem:[#allocation3 + $0x4c] sm:$0xf] %v5867_v23  ;;  %v9717_v42 = vor.u32 %v10734_v38, %v9714_v36  ;;  %v10844_v24 = vld [vmem:[#allocation5 + $0x7f0] sm:$0xff] }
 0x4f1   :  { %v5811_v26 = vsel %vm11092_vm6, 0.0, %v5806_v28  ;;  %v5840_v6 = vsel %vm11086_vm5, 0.0, %v5836_v0  ;;  %5908 = vst [vmem:[#allocation3 + $0x34] sm:$0xf] %v5867_v23  ;;  %v5712_v46 = vpop.f32.mrf.mxu2  ;;  %7350 = vmatpush.bf16.msrb.mxu3 %v10844_v24 }
 0x4f2   :  { %v5851_v59 = vpack.c.bf16 %v5811_v26, %v5811_v26  ;;  %v5882_v45 = vpack.c.bf16 %v5840_v6, %v5840_v6  ;;  %5934 = vst [vmem:[#allocation3 + $0x1c] sm:$0xf] %v5867_v23  ;;  %v5713_v40 = vadd.f32 %v5712_v46, %v5664_v43  ;;  %7210 = vmatmul.bf16.vlgmr.msrb.gmra.mxu0 %v9717_v42  ;;  %v12574_v42 = vpop.f32.mrf.mxu0 }
 0x4f3   :  { %v10738_v58 = vld [vmem:[#allocation3 + $0x20] sm:$0xf0]  ;;  %v5571_v23 = vadd.f32 %v12533_v49, %v12482_v34  ;;  %v5666_v43 = vadd.f32 %v12530_v21, %v5617_v61 }
 0x4f4   :  { %5859 = vst [vmem:[#allocation3 + $0x48] sm:$0xf] %v5851_v59  ;;  %v5749_v38 = vmax.f32 %v5713_v40, 0.0  ;;  %v9713_v36 = vor.u32 %v10738_v58, %v9712_v13 }
 0x4f5   :  { %5890 = vst [vmem:[#allocation3 + $0x2c] sm:$0xf] %v5882_v45  ;;  %v5620_v13 = vadd.f32 %v12535_v47, %v5571_v23  ;;  %v10735_v58 = vld [vmem:[#allocation3 + $0xc] sm:$0xf] }
 0x4f6   :  { %5899 = vst [vmem:[#allocation3 + $0x30] sm:$0xf] %v5851_v59  ;;  %v5792_v28 = vrot.slane %v5749_v38, 7  ;;  %v5822_v0 = vrot.slane %v5749_v38, 1  ;;  %v5868_v32 = vpack.c.bf16 %v5749_v38, %v5749_v38  ;;  %7161 = vmatmul.bf16.vlgmr.msra.gmra.mxu3 %v9713_v36  ;;  %v12587_v61 = vpop.f32.mrf.mxu3 }
 0x4f7   :  { %5916 = vst [vmem:[#allocation3 + $0x14] sm:$0xf] %v5882_v45  ;;  %v5669_v47 = vadd.f32 %v12538_v12, %v5620_v13 }
 0x4f8   :  { %5925 = vst [vmem:[#allocation3 + $0x18] sm:$0xf] %v5851_v59  ;;  %v5805_v22 = vsel %vm13448_vm11, %v5791_v62, %v5792_v28  ;;  %v5835_v31 = vsel %vm13449_vm13, %v5821_v52, %v5822_v0  ;;  %v9720_v59 = vld [vmem:[#allocation3 + $0x8] sm:$0xf]  ;;  %v12585_v62 = vpop.f32.mrf.mxu1 }
 0x4f9   :  { %v5812_v26 = vsel %vm11144_vm7, 0.0, %v5805_v22  ;;  %v5841_v6 = vsel %vm13371_vm3, 0.0, %v5835_v31  ;;  %5876 = vst [vmem:[#allocation3 + $0x70] sm:$0xf] %v5868_v32  ;;  %v5714_v34 = vpop.f32.mrf.mxu2  ;;  %vm13465_vm3 = vnez %v13290_v19 }
 0x4fa   :  { %v5852_v49 = vpack.c.bf16 %v5812_v26, %v5812_v26  ;;  %v5883_v46 = vpack.c.bf16 %v5841_v6, %v5841_v6  ;;  %5909 = vst [vmem:[#allocation3 + $0x58] sm:$0xf] %v5868_v32  ;;  %v5715_v21 = vadd.f32 %v5714_v34, %v5666_v43  ;;  %v10743_v26 = vld [vmem:[#allocation3 + $0x4c] sm:$0xf] }
 0x4fb   :  { %5935 = vst [vmem:[#allocation3 + $0x40] sm:$0xf] %v5868_v32  ;;  %v5573_v32 = vadd.f32 %v12550_v16, %v12485_v29  ;;  %v12600_v29 = vpop.f32.mrf.mxu0 }
 0x4fc   :  { %5860 = vst [vmem:[#allocation3 + $0x6c] sm:$0xf] %v5852_v49  ;;  %v5750_v52 = vmax.f32 %v5715_v21, 0.0  ;;  %v10739_v45 = vld [vmem:[#allocation3 + $0x28] sm:$0xf0] }
 0x4fd   :  { %5891 = vst [vmem:[#allocation3 + $0x50] sm:$0xf] %v5883_v46  ;;  %v9721_v40 = vor.u32 %v10739_v45, %v9720_v59  ;;  %v9722_v24 = vld [vmem:[#allocation3 + $0x2c] sm:$0xf0] }
 0x4fe   :  { %5900 = vst [vmem:[#allocation3 + $0x54] sm:$0xf] %v5852_v49  ;;  %v5793_v38 = vrot.slane %v5750_v52, 7  ;;  %v5823_v36 = vrot.slane %v5750_v52, 1  ;;  %v5869_v22 = vpack.c.bf16 %v5750_v52, %v5750_v52  ;;  %v9725_v43 = vor.u32 %v10735_v58, %v9722_v24 }
 0x4ff   :  { %5917 = vst [vmem:[#allocation3 + $0x38] sm:$0xf] %v5883_v46  ;;  %7259 = vmatmul.bf16.vlgmr.msrb.gmra.mxu1 %v9721_v40  ;;  %v10843_v40 = vld [vmem:[#allocation5 + $0x7e8] sm:$0xff] }
 0x500   :  { %5926 = vst [vmem:[#allocation3 + $0x3c] sm:$0xf] %v5852_v49  ;;  %v5804_v23 = vsel %vm13448_vm11, %v5792_v28, %v5793_v38  ;;  %v5834_v31 = vsel %vm13449_vm13, %v5822_v0, %v5823_v36  ;;  %7308 = vmatmul.bf16.vlgmr.msrb.gmra.mxu2 %v9725_v43  ;;  %v9750_v6 = vld [vmem:[#allocation3 + $0x6c] sm:$0xf0]  ;;  %v9748_v0 = vld [vmem:[#allocation3 + $0x48] sm:$0xf]  ;;  %v12603_v58 = vpop.f32.mrf.mxu1  ;;  %7351 = vmatpush.bf16.msrb.mxu3 %v10843_v40 }
 0x501   :  { %5943 = vst [vmem:[#allocation3 + $0x20] sm:$0xf] %v5883_v46  ;;  %v5813_v34 = vsel %vm11192_vm10, 0.0, %v5804_v23  ;;  %v5842_v12 = vsel %vm13465_vm3, 0.0, %v5834_v31  ;;  %v5717_v21 = vpop.f32.mrf.mxu2  ;;  %v9753_v13 = vor.u32 %v10743_v26, %v9750_v6  ;;  %v5622_v46 = vadd.f32 %v12553_v10, %v5573_v32  ;;  %v12608_v10 = vpop.f32.mrf.mxu3 }
 0x502   :  { %v5853_v16 = vpack.c.bf16 %v5813_v34, %v5813_v34  ;;  %5877 = vst [vmem:[#allocation3 + $0x94] sm:$0xf] %v5869_v22  ;;  %v5884_v28 = vpack.c.bf16 %v5842_v12, %v5842_v12  ;;  %v5718_v49 = vadd.f32 %v5717_v21, %v5669_v47  ;;  %v5576_v47 = vadd.f32 %v12569_v50, %v12489_v41 }
 0x503   :  { %5910 = vst [vmem:[#allocation3 + $0x7c] sm:$0xf] %v5869_v22  ;;  %7215 = vmatmul.bf16.gmra.mxu0 %v9753_v13  ;;  %v10747_v59 = vld [vmem:[#allocation3 + $0x68] sm:$0xf0]  ;;  %v5671_v31 = vadd.f32 %v12566_v8, %v5622_v46  ;;  %vm13466_vm3 = vnez %v13296_v11  ;;  %v5578_v40 = vadd.f32 %v12587_v61, %v12492_v30 }
 0x504   :  { %5861 = vst [vmem:[#allocation3 + $0x90] sm:$0xf] %v5853_v16  ;;  %v5751_v52 = vmax.f32 %v5718_v49, 0.0  ;;  %v9749_v45 = vor.u32 %v10747_v59, %v9748_v0  ;;  %v5625_v21 = vadd.f32 %v12574_v42, %v5576_v47  ;;  %v9756_v13 = vld [vmem:[#allocation3 + $0x50] sm:$0xf] }
 0x505   :  { %5892 = vst [vmem:[#allocation3 + $0x74] sm:$0xf] %v5884_v28  ;;  %v10744_v49 = vld [vmem:[#allocation3 + $0x54] sm:$0xf]  ;;  %v12621_v59 = vld [vmem:[#allocation7 + $0x2] ss:$0 sm:$0xff] }
 0x506   :  { %5901 = vst [vmem:[#allocation3 + $0x78] sm:$0xf] %v5853_v16  ;;  %v5794_v24 = vrot.slane %v5751_v52, 7  ;;  %v5824_v43 = vrot.slane %v5751_v52, 1  ;;  %7166 = vmatmul.bf16.gmra.mxu3 %v9749_v45  ;;  %v5870_v23 = vpack.c.bf16 %v5751_v52, %v5751_v52  ;;  %v5674_v45 = vadd.f32 %v12585_v62, %v5625_v21 }
 0x507   :  { %5918 = vst [vmem:[#allocation3 + $0x5c] sm:$0xf] %v5884_v28 }
 0x508   :  { %5927 = vst [vmem:[#allocation3 + $0x60] sm:$0xf] %v5853_v16  ;;  %v5803_v32 = vsel %vm13448_vm11, %v5793_v38, %v5794_v24  ;;  %v5833_v26 = vsel %vm13449_vm13, %v5823_v36, %v5824_v43  ;;  %v12619_v38 = vpop.f32.mrf.mxu0  ;;  %v12628_v47 = vpop.f32.mrf.mxu1 }
 0x509   :  { %5936 = vst [vmem:[#allocation3 + $0x64] sm:$0xf] %v5869_v22  ;;  %v5814_v6 = vsel %vm13438_vm0, 0.0, %v5803_v32  ;;  %v5843_v41 = vsel %vm13466_vm3, 0.0, %v5833_v26  ;;  %v5719_v50 = vpop.f32.mrf.mxu2  ;;  %vm13467_vm3 = vnez %v13298_v18  ;;  %v5582_v61 = vpop.f32.mrf.mxu3 }
 0x50a   :  { %5944 = vst [vmem:[#allocation3 + $0x44] sm:$0xf] %v5884_v28  ;;  %v5854_v34 = vpack.c.bf16 %v5814_v6, %v5814_v6  ;;  %v5885_v8 = vpack.c.bf16 %v5843_v41, %v5843_v41  ;;  %v5720_v12 = vadd.f32 %v5719_v50, %v5671_v31  ;;  %v5338_v28 = vadd.f32 %v12621_v59, %v12433_v35 }
 0x50b   :  { %5878 = vst [vmem:[#allocation3 + $0xb8] sm:$0xf] %v5870_v23 }
 0x50c   :  { %5862 = vst [vmem:[#allocation3 + $0xb4] sm:$0xf] %v5854_v34  ;;  %v5752_v36 = vmax.f32 %v5720_v12, 0.0  ;;  %v10748_v22 = vld [vmem:[#allocation3 + $0x70] sm:$0xf0]  ;;  %v5387_v30 = vadd.f32 %v12435_v27, %v5338_v28 }
 0x50d   :  { %5893 = vst [vmem:[#allocation3 + $0x98] sm:$0xf] %v5885_v8  ;;  %v9757_v16 = vor.u32 %v10748_v22, %v9756_v13  ;;  %v9758_v0 = vld [vmem:[#allocation3 + $0x74] sm:$0xf0]  ;;  %v10752_v12 = vld [vmem:[#allocation3 + $0x94] sm:$0xf]  ;;  %v5627_v22 = vadd.f32 %v12600_v29, %v5578_v40 }
 0x50e   :  { %5902 = vst [vmem:[#allocation3 + $0x9c] sm:$0xf] %v5854_v34  ;;  %v5795_v46 = vrot.slane %v5752_v36, 7  ;;  %v5825_v52 = vrot.slane %v5752_v36, 1  ;;  %v9761_v42 = vor.u32 %v10744_v49, %v9758_v0  ;;  %v5871_v26 = vpack.c.bf16 %v5752_v36, %v5752_v36  ;;  %v10842_v36 = vld [vmem:[#allocation5 + $0x7e0] sm:$0xff] }
 0x50f   :  { %5911 = vst [vmem:[#allocation3 + $0xa0] sm:$0xf] %v5870_v23  ;;  %7264 = vmatmul.bf16.gmra.mxu1 %v9757_v16  ;;  %v5436_v27 = vadd.f32 %v12437_v53, %v5387_v30  ;;  %7352 = vmatpush.bf16.msrb.mxu3 %v10842_v36  ;;  %v5581_v53 = vadd.f32 %v12608_v10, %v12495_v7 }
 0x510   :  { %5919 = vst [vmem:[#allocation3 + $0x80] sm:$0xf] %v5885_v8  ;;  %v5802_v31 = vsel %vm13448_vm11, %v5794_v24, %v5795_v46  ;;  %v5832_v35 = vsel %vm13449_vm13, %v5824_v43, %v5825_v52  ;;  %7313 = vmatmul.bf16.gmra.mxu2 %v9761_v42 }
 0x511   :  { %5928 = vst [vmem:[#allocation3 + $0x84] sm:$0xf] %v5854_v34  ;;  %v5815_v32 = vsel %vm13410_vm8, 0.0, %v5802_v31  ;;  %v5844_v62 = vsel %vm13467_vm3, 0.0, %v5832_v35  ;;  %v5722_v6 = vpop.f32.mrf.mxu2  ;;  %v9784_v34 = vld [vmem:[#allocation3 + $0x90] sm:$0xf]  ;;  %vm13468_vm3 = vnez %v13302_v63  ;;  %v12655_v35 = vpop.f32.mrf.mxu1 }
 0x512   :  { %5937 = vst [vmem:[#allocation3 + $0x88] sm:$0xf] %v5870_v23  ;;  %v5855_v41 = vpack.c.bf16 %v5815_v32, %v5815_v32  ;;  %v5886_v50 = vpack.c.bf16 %v5844_v62, %v5844_v62  ;;  %v5723_v24 = vadd.f32 %v5722_v6, %v5674_v45  ;;  %v9786_v21 = vld [vmem:[#allocation3 + $0xb4] sm:$0xf0]  ;;  %v12641_v23 = vpop.f32.mrf.mxu0  ;;  %v5585_v10 = vpop.f32.mrf.mxu3 }
 0x513   :  { %5945 = vst [vmem:[#allocation3 + $0x68] sm:$0xf] %v5885_v8  ;;  %v9789_v43 = vor.u32 %v10752_v12, %v9786_v21  ;;  %v10756_v13 = vld [vmem:[#allocation3 + $0xb0] sm:$0xf0]  ;;  %v5676_v8 = vadd.f32 %v12603_v58, %v5627_v22  ;;  %v5485_v58 = vadd.f32 %v12439_v60, %v5436_v27  ;;  %v5343_v60 = vadd.f32 %v12621_v59, %v12444_v51 }
 0x514   :  { %5863 = vst [vmem:[#allocation3 + $0xd8] sm:$0xf] %v5855_v41  ;;  %v5753_v16 = vmax.f32 %v5723_v24, 0.0  ;;  %v9785_v49 = vor.u32 %v10756_v13, %v9784_v34  ;;  %v9792_v30 = vld [vmem:[#allocation3 + $0x98] sm:$0xf]  ;;  %v5630_v24 = vadd.f32 %v12619_v38, %v5581_v53 }
 0x515   :  { %5879 = vst [vmem:[#allocation3 + $0xdc] sm:$0xf] %v5871_v26  ;;  %7220 = vmatmul.bf16.gmra.mxu0 %v9789_v43  ;;  %v5534_v7 = vadd.f32 %v12497_v1, %v5485_v58  ;;  %v10753_v21 = vld [vmem:[#allocation3 + $0x9c] sm:$0xf] }
 0x516   :  { %5894 = vst [vmem:[#allocation3 + $0xbc] sm:$0xf] %v5886_v50  ;;  %v5796_v0 = vrot.slane %v5753_v16, 7  ;;  %v5826_v28 = vrot.slane %v5753_v16, 1  ;;  %7171 = vmatmul.bf16.gmra.mxu3 %v9785_v49  ;;  %v5872_v32 = vpack.c.bf16 %v5753_v16, %v5753_v16  ;;  %v5679_v16 = vadd.f32 %v12628_v47, %v5630_v24 }
 0x517   :  { %5903 = vst [vmem:[#allocation3 + $0xc0] sm:$0xf] %v5855_v41  ;;  %v5583_v1 = vadd.f32 %v5582_v61, %v5534_v7 }
 0x518   :  { %5912 = vst [vmem:[#allocation3 + $0xc4] sm:$0xf] %v5871_v26  ;;  %v5801_v29 = vsel %vm13448_vm11, %v5795_v46, %v5796_v0  ;;  %v5831_v42 = vsel %vm13449_vm13, %v5825_v52, %v5826_v28 }
 0x519   :  { %5920 = vst [vmem:[#allocation3 + $0xa4] sm:$0xf] %v5886_v50  ;;  %v5816_v45 = vsel %vm13468_vm3, 0.0, %v5801_v29  ;;  %v5845_v40 = vsel %vm13446_vm12, 0.0, %v5831_v42  ;;  %v5724_v31 = vpop.f32.mrf.mxu2  ;;  %vm13469_vm12 = vmmov %vm13449_vm13 }
 0x51a   :  { %5929 = vst [vmem:[#allocation3 + $0xa8] sm:$0xf] %v5855_v41  ;;  %v5856_v46 = vpack.c.bf16 %v5816_v45, %v5816_v45  ;;  %v5725_v62 = vadd.f32 %v5724_v31, %v5676_v8  ;;  %v5887_v52 = vpack.c.bf16 %v5845_v40, %v5845_v40  ;;  %v5634_v22 = vpop.f32.mrf.mxu0  ;;  %vm13470_vm3 = vmmov %vm13448_vm11  ;;  %v5632_v45 = vadd.f32 %v12641_v23, %v5583_v1  ;;  %v5683_v40 = vpop.f32.mrf.mxu1 }
 0x51b   :  { %5938 = vst [vmem:[#allocation3 + $0xac] sm:$0xf] %v5871_v26  ;;  %v9820_v8 = vld [vmem:[#allocation3 + $0xd8] sm:$0xf] }
 0x51c   :  { %5946 = vst [vmem:[#allocation3 + $0x8c] sm:$0xf] %v5886_v50  ;;  %v5754_v6 = vmax.f32 %v5725_v62, 0.0  ;;  %v10761_v53 = vld [vmem:[#allocation3 + $0xdc] sm:$0xf] }
 0x51d   :  { %5864 = vst [vmem:[#allocation3 + $0xfc] sm:$0xf] %v5856_v46  ;;  %v10757_v12 = vld [vmem:[#allocation3 + $0xb8] sm:$0xf0] }
 0x51e   :  { %5880 = vst [vmem:[#allocation3 + $0x100] sm:$0xf] %v5872_v32  ;;  %v5797_v41 = vrot.slane %v5754_v6, 7  ;;  %v5827_v43 = vrot.slane %v5754_v6, 1  ;;  %v9793_v34 = vor.u32 %v10757_v12, %v9792_v30  ;;  %v9794_v26 = vld [vmem:[#allocation3 + $0xbc] sm:$0xf0]  ;;  %v5906_v58 = vpack.c.bf16 %v5754_v6, %v5754_v6  ;;  %v5587_v12 = vpop.f32.mrf.mxu3 }
 0x51f   :  { %5895 = vst [vmem:[#allocation3 + $0xe0] sm:$0xf] %v5887_v52  ;;  %v9797_v13 = vor.u32 %v10753_v21, %v9794_v26  ;;  %v5586_v6 = vadd.f32 %v5585_v10, %v12504_v44  ;;  %v13471_v26 = vld [vmem:[#allocation30_spill] sm:$0xff] }
 0x520   :  { %5904 = vst [vmem:[#allocation3 + $0xe4] sm:$0xf] %v5856_v46  ;;  %v5800_v50 = vsel %vm13448_vm11, %v5796_v0, %v5797_v41  ;;  %v5829_v38 = vsel %vm13449_vm13, %v5827_v43, %v11071_v25  ;;  %v5830_v51 = vsel %vm13469_vm12, %v5826_v28, %v5827_v43  ;;  %v5799_v49 = vsel %vm13470_vm3, %v5797_v41, %v11053_v4 }
 0x521   :  { %5913 = vst [vmem:[#allocation3 + $0xe8] sm:$0xf] %v5872_v32  ;;  %v5817_v61 = vsel %vm13355_vm15, 0.0, %v5800_v50  ;;  %v5846_v36 = vsel %vm13356_vm14, 0.0, %v5830_v51  ;;  %7269 = vmatmul.bf16.gmra.mxu1 %v9793_v34  ;;  %7318 = vmatmul.bf16.gmra.mxu2 %v9797_v13  ;;  %v5727_v27 = vpop.f32.mrf.mxu2  ;;  %v5392_v0 = vadd.f32 %v12446_v20, %v5343_v60  ;;  %v5847_v47 = vsel %vm11517_vm4, 0.0, %v5829_v38  ;;  %v13472_v38 = vld [vmem:[#allocation26_spill] sm:$0xff] }
 0x522   :  { %5921 = vst [vmem:[#allocation3 + $0xc8] sm:$0xf] %v5887_v52  ;;  %v5888_v28 = vpack.c.bf16 %v5846_v36, %v5846_v36  ;;  %v5897_v29 = vpack.c.bf16 %v5817_v61, %v5817_v61  ;;  %v5728_v42 = vadd.f32 %v5727_v27, %v5679_v16  ;;  %v5818_v31 = vsel %vm11502_vm9, 0.0, %v5799_v49  ;;  %v5636_v1 = vpop.f32.mrf.mxu0  ;;  %v13473_v36 = vld [vmem:[#allocation12_spill] sm:$0xff] }
 0x523   :  { %5930 = vst [vmem:[#allocation3 + $0xcc] sm:$0xf] %v5856_v46  ;;  %v10841_v46 = vld [vmem:[#allocation5 + $0x7d8] sm:$0xff]  ;;  %v5441_v24 = vadd.f32 %v12448_v37, %v5392_v0  ;;  %v5915_v21 = vpack.c.bf16 %v5847_v47, %v5847_v47  ;;  %v5635_v50 = vadd.f32 %v5634_v22, %v5586_v6  ;;  %v5348_v27 = vadd.f32 %v12621_v59, %v13473_v36  ;;  %v5685_v47 = vpop.f32.mrf.mxu1  ;;  %v13482_v36 = vld [vmem:[#allocation20_spill] sm:$0xff] }
 0x524   :  { %5939 = vst [vmem:[#allocation3 + $0xd0] sm:$0xf] %v5872_v32  ;;  %v10765_v62 = vld [vmem:[#allocation3 + $0xf8] sm:$0xf0]  ;;  %v5755_v20 = vmax.f32 %v5728_v42, 0.0  ;;  %v5681_v32 = vadd.f32 %v12655_v35, %v5632_v45  ;;  %7353 = vmatpush.bf16.msrb.mxu3 %v10841_v46  ;;  %vm13483_vm11 = vnez %v13288_v17 }
 0x525   :  { %5947 = vst [vmem:[#allocation3 + $0xb0] sm:$0xf] %v5887_v52  ;;  %v9822_v7 = vld [vmem:[#allocation3 + $0xfc] sm:$0xf0]  ;;  %v9821_v30 = vor.u32 %v10765_v62, %v9820_v8  ;;  %v5924_v52 = vpack.c.bf16 %v5818_v31, %v5818_v31  ;;  %v5490_v13 = vadd.f32 %v13471_v26, %v5441_v24  ;;  %v5684_v31 = vadd.f32 %v5683_v40, %v5635_v50  ;;  %v10840_v50 = vld [vmem:[#allocation5 + $0x7d0] sm:$0xff] }
 0x526   :  { %5896 = vst [vmem:[#allocation3 + $0x104] sm:$0xf] %v5888_v28  ;;  %v9825_v60 = vor.u32 %v10761_v53, %v9822_v7  ;;  %v5962_v23 = vrot.slane %v5755_v20, 7  ;;  %v5992_v41 = vrot.slane %v5755_v20, 1  ;;  %v9828_v61 = vld [vmem:[#allocation3 + $0xe0] sm:$0xf]  ;;  %v6038_v0 = vpack.c.bf16 %v5755_v20, %v5755_v20  ;;  %v5590_v7 = vpop.f32.mrf.mxu3 }
 0x527   :  { %5905 = vst [vmem:[#allocation3 + $0x108] sm:$0xf] %v5897_v29  ;;  %7176 = vmatmul.bf16.gmra.mxu3 %v9821_v30  ;;  %v5539_v51 = vadd.f32 %v13472_v38, %v5490_v13  ;;  %v10762_v39 = vld [vmem:[#allocation3 + $0xe4] sm:$0xf] }
 0x528   :  { %5914 = vst [vmem:[#allocation3 + $0x10c] sm:$0xf] %v5906_v58  ;;  %7225 = vmatmul.bf16.gmra.mxu0 %v9825_v60  ;;  %v5979_v37 = vsel %vm13470_vm3, %v11053_v4, %v5962_v23  ;;  %v6009_v43 = vsel %vm13469_vm12, %v11071_v25, %v5992_v41  ;;  %v13476_v20 = vld [vmem:[#allocation19_spill] sm:$0xff]  ;;  %7354 = vmatpush.bf16.msrb.mxu3 %v10840_v50 }
 0x529   :  { %5922 = vst [vmem:[#allocation3 + $0xec] sm:$0xf] %v5888_v28  ;;  %v5729_v34 = vpop.f32.mrf.mxu2  ;;  %v5982_v44 = vsel %vm11073_vm1, 0.0, %v5979_v37  ;;  %v6011_v10 = vsel %vm11077_vm2, 0.0, %v6009_v43  ;;  %v5588_v62 = vadd.f32 %v5587_v12, %v5539_v51  ;;  %vm13474_vm1 = vmmov %vm13470_vm3  ;;  %v5397_v46 = vadd.f32 %v13476_v20, %v5348_v27  ;;  %v13478_v37 = vld [vmem:[#allocation24_spill] sm:$0xff] }
 0x52a   :  { %5923 = vst [vmem:[#allocation3 + $0x110] sm:$0xf] %v5915_v21  ;;  %v5730_v35 = vadd.f32 %v5729_v34, %v5681_v32  ;;  %v6022_v16 = vpack.c.bf16 %v5982_v44, %v5982_v44  ;;  %vm13475_vm2 = vmmov %vm13469_vm12  ;;  %v10770_v13 = vld [vmem:[#allocation3 + $0x124] sm:$0xf]  ;;  %vm13489_vm3 = vnez %v13290_v19 }
 0x52b   :  { %5931 = vst [vmem:[#allocation3 + $0xf0] sm:$0xf] %v5897_v29  ;;  %v6053_v29 = vpack.c.bf16 %v6011_v10, %v6011_v10  ;;  %v5637_v6 = vadd.f32 %v5636_v1, %v5588_v62  ;;  %v5446_v43 = vadd.f32 %v13478_v37, %v5397_v46  ;;  %v13479_v44 = vld [vmem:[#allocation23_spill] sm:$0xff]  ;;  %v5688_v51 = vpop.f32.mrf.mxu1  ;;  %vm13487_vm13 = vmmov %vm13475_vm2 }
 0x52c   :  { %5932 = vst [vmem:[#allocation3 + $0x114] sm:$0xf] %v5924_v52  ;;  %v5756_v49 = vmax.f32 %v5730_v35, 0.0  ;;  %v5591_v35 = vadd.f32 %v5590_v7, %v13479_v44  ;;  %v13485_v7 = vld [vmem:[#allocation15_spill] sm:$0xff]  ;;  %vm13493_vm12 = vmmov %vm13475_vm2 }
 0x52d   :  { %5940 = vst [vmem:[#allocation3 + $0xf4] sm:$0xf] %v5906_v58  ;;  %v10766_v8 = vld [vmem:[#allocation3 + $0x100] sm:$0xf0]  ;;  %v5686_v38 = vadd.f32 %v5685_v47, %v5637_v6  ;;  %v5495_v27 = vadd.f32 %v13482_v36, %v5446_v43  ;;  %v5353_v17 = vadd.f32 %v12621_v59, %v13485_v7  ;;  %v13488_v6 = vld [vmem:[#allocation13_spill] sm:$0xff] }
 0x52e   :  { %5948 = vst [vmem:[#allocation3 + $0xd4] sm:$0xf] %v5888_v28  ;;  %v5963_v42 = vrot.slane %v5756_v49, 7  ;;  %v5993_v3 = vrot.slane %v5756_v49, 1  ;;  %v9829_v53 = vor.u32 %v10766_v8, %v9828_v61  ;;  %v9830_v22 = vld [vmem:[#allocation3 + $0x104] sm:$0xf0]  ;;  %v6039_v60 = vpack.c.bf16 %v5756_v49, %v5756_v49 }
 0x52f   :  { %5949 = vst [vmem:[#allocation3 + $0xf8] sm:$0xf] %v5915_v21  ;;  %v9833_v45 = vor.u32 %v10762_v39, %v9830_v22 }
 0x530   :  { %6030 = vst [vmem:[#allocation3 + $0x144] sm:$0xf] %v6022_v16  ;;  %v5978_v30 = vsel %vm13474_vm1, %v5962_v23, %v5963_v42  ;;  %v6008_v58 = vsel %vm13475_vm2, %v5992_v41, %v5993_v3  ;;  %v5639_v41 = vpop.f32.mrf.mxu0 }
 0x531   :  { %6046 = vst [vmem:[#allocation3 + $0x148] sm:$0xf] %v6038_v0  ;;  %v5983_v28 = vsel %vm11092_vm6, 0.0, %v5978_v30  ;;  %v6012_v21 = vsel %vm11086_vm5, 0.0, %v6008_v58  ;;  %7274 = vmatmul.bf16.gmra.mxu1 %v9829_v53  ;;  %7323 = vmatmul.bf16.gmra.mxu2 %v9833_v45  ;;  %v5732_v40 = vpop.f32.mrf.mxu2  ;;  %vm13480_vm5 = vmmov %vm13474_vm1  ;;  %v5640_v22 = vadd.f32 %v5639_v41, %v5591_v35  ;;  %v5402_v41 = vadd.f32 %v13488_v6, %v5353_v17 }
 0x532   :  { %6061 = vst [vmem:[#allocation3 + $0x128] sm:$0xf] %v6053_v29  ;;  %v6023_v12 = vpack.c.bf16 %v5983_v28, %v5983_v28  ;;  %v5733_v32 = vadd.f32 %v5732_v40, %v5684_v31  ;;  %v6054_v23 = vpack.c.bf16 %v6012_v21, %v6012_v21  ;;  %vm13481_vm6 = vmmov %vm13475_vm2  ;;  %v5592_v29 = vpop.f32.mrf.mxu3  ;;  %v13484_v31 = vld [vmem:[#allocation17_spill] sm:$0xff] }
 0x533   :  { %6070 = vst [vmem:[#allocation3 + $0x12c] sm:$0xf] %v6022_v16  ;;  %v5544_v62 = vadd.f32 %v13484_v31, %v5495_v27  ;;  %v5689_v24 = vadd.f32 %v5688_v51, %v5640_v22  ;;  %v5451_v51 = vadd.f32 %v13490_v56, %v5402_v41 }
 0x534   :  { %6079 = vst [vmem:[#allocation3 + $0x130] sm:$0xf] %v6038_v0  ;;  %v5757_v52 = vmax.f32 %v5733_v32, 0.0 }
 0x535   :  { %6031 = vst [vmem:[#allocation3 + $0x168] sm:$0xf] %v6023_v12  ;;  %v5593_v32 = vadd.f32 %v5592_v29, %v5544_v62  ;;  %v10839_v62 = vld [vmem:[#allocation5 + $0x7c8] sm:$0xff] }
 0x536   :  { %6047 = vst [vmem:[#allocation3 + $0x16c] sm:$0xf] %v6039_v60  ;;  %v5964_v34 = vrot.slane %v5757_v52, 7  ;;  %v5994_v26 = vrot.slane %v5757_v52, 1  ;;  %v6040_v53 = vpack.c.bf16 %v5757_v52, %v5757_v52  ;;  %7355 = vmatpush.bf16.msrb.mxu3 %v10839_v62  ;;  %v10859_v62 = vld [vmem:[#allocation5 + $0x868] sm:$0xff] }
 0x537   :  { %6062 = vst [vmem:[#allocation3 + $0x14c] sm:$0xf] %v6054_v23  ;;  %v10774_v10 = vld [vmem:[#allocation3 + $0x140] sm:$0xf0] }
 0x538   :  { %6071 = vst [vmem:[#allocation3 + $0x150] sm:$0xf] %v6023_v12  ;;  %v5977_v1 = vsel %vm13480_vm5, %v5963_v42, %v5964_v34  ;;  %v6007_v16 = vsel %vm13481_vm6, %v5993_v3, %v5994_v26  ;;  %v9858_v49 = vld [vmem:[#allocation3 + $0x144] sm:$0xf0]  ;;  %v9857_v61 = vor.u32 %v10774_v10, %v9856_v33  ;;  %v5641_v58 = vpop.f32.mrf.mxu0  ;;  %v5690_v33 = vpop.f32.mrf.mxu1  ;;  %vm13500_vm6 = vmmov %vm13475_vm2 }
 0x539   :  { %6080 = vst [vmem:[#allocation3 + $0x154] sm:$0xf] %v6039_v60  ;;  %v5984_v0 = vsel %vm11144_vm7, 0.0, %v5977_v1  ;;  %v6013_v8 = vsel %vm13483_vm11, 0.0, %v6007_v16  ;;  %v9861_v39 = vor.u32 %v10770_v13, %v9858_v49  ;;  %v5734_v47 = vpop.f32.mrf.mxu2  ;;  %v9864_v30 = vld [vmem:[#allocation3 + $0x128] sm:$0xf]  ;;  %vm13486_vm7 = vmmov %vm13474_vm1  ;;  %vm13501_vm11 = vnez %v13302_v63 }
 0x53a   :  { %6088 = vst [vmem:[#allocation3 + $0x134] sm:$0xf] %v6054_v23  ;;  %v6024_v42 = vpack.c.bf16 %v5984_v0, %v5984_v0  ;;  %7181 = vmatmul.bf16.gmra.mxu3 %v9857_v61  ;;  %v5735_v3 = vadd.f32 %v5734_v47, %v5686_v38  ;;  %v6055_v45 = vpack.c.bf16 %v6013_v8, %v6013_v8  ;;  %v10771_v40 = vld [vmem:[#allocation3 + $0x12c] sm:$0xf]  ;;  %v5595_v35 = vpop.f32.mrf.mxu3  ;;  %v10853_v0 = vld [vmem:[#allocation5 + $0x838] sm:$0xff] }
 0x53b   :  { %6097 = vst [vmem:[#allocation3 + $0x138] sm:$0xf] %v6023_v12  ;;  %7230 = vmatmul.bf16.gmra.mxu0 %v9861_v39  ;;  %v13491_v39 = vld [vmem:[#allocation18_spill] sm:$0xff] }
 0x53c   :  { %6106 = vst [vmem:[#allocation3 + $0x13c] sm:$0xf] %v6039_v60  ;;  %v5758_v5 = vmax.f32 %v5735_v3, 0.0  ;;  %v9892_v1 = vld [vmem:[#allocation3 + $0x168] sm:$0xf]  ;;  %v5596_v47 = vadd.f32 %v5595_v35, %v13491_v39  ;;  %v13494_v3 = vld [vmem:[#allocation22_spill] sm:$0xff]  ;;  %7398 = vmatpush.bf16.msra.mxu0 %v10853_v0 }
 0x53d   :  { %6032 = vst [vmem:[#allocation3 + $0x18c] sm:$0xf] %v6024_v42  ;;  %v10779_v61 = vld [vmem:[#allocation3 + $0x16c] sm:$0xf]  ;;  %v5500_v22 = vadd.f32 %v13494_v3, %v5451_v51 }
 0x53e   :  { %6048 = vst [vmem:[#allocation3 + $0x190] sm:$0xf] %v6040_v53  ;;  %v5965_v20 = vrot.slane %v5758_v5, 7  ;;  %v5995_v46 = vrot.slane %v5758_v5, 1  ;;  %v10775_v28 = vld [vmem:[#allocation3 + $0x148] sm:$0xf0]  ;;  %v6041_v44 = vpack.c.bf16 %v5758_v5, %v5758_v5 }
 0x53f   :  { %6063 = vst [vmem:[#allocation3 + $0x170] sm:$0xf] %v6055_v45  ;;  %v9865_v21 = vor.u32 %v10775_v28, %v9864_v30  ;;  %v9866_v12 = vld [vmem:[#allocation3 + $0x14c] sm:$0xf0]  ;;  %v13496_v30 = vld [vmem:[#allocation27_spill] sm:$0xff] }
 0x540   :  { %6072 = vst [vmem:[#allocation3 + $0x174] sm:$0xf] %v6024_v42  ;;  %v5976_v60 = vsel %vm13486_vm7, %v5964_v34, %v5965_v20  ;;  %v6006_v59 = vsel %vm13487_vm13, %v5994_v26, %v5995_v46  ;;  %v9869_v23 = vor.u32 %v10771_v40, %v9866_v12  ;;  %v5642_v26 = vadd.f32 %v5641_v58, %v5593_v32  ;;  %v5644_v29 = vpop.f32.mrf.mxu0  ;;  %v10852_v5 = vld [vmem:[#allocation5 + $0x830] sm:$0xff]  ;;  %v5693_v28 = vpop.f32.mrf.mxu1 }
 0x541   :  { %6081 = vst [vmem:[#allocation3 + $0x178] sm:$0xf] %v6040_v53  ;;  %v5985_v52 = vsel %vm11192_vm10, 0.0, %v5976_v60  ;;  %v6014_v37 = vsel %vm13489_vm3, 0.0, %v6006_v59  ;;  %7279 = vmatmul.bf16.gmra.mxu1 %v9865_v21  ;;  %v5737_v43 = vpop.f32.mrf.mxu2  ;;  %vm13492_vm10 = vmmov %vm13474_vm1  ;;  %vm13495_vm1 = vnez %v13296_v11  ;;  %v5549_v58 = vadd.f32 %v13496_v30, %v5500_v22  ;;  %7399 = vmatpush.bf16.msra.mxu0 %v10852_v5  ;;  %v10867_v5 = vld [vmem:[#allocation5 + $0x8a8] sm:$0xff] }
 0x542   :  { %6089 = vst [vmem:[#allocation3 + $0x158] sm:$0xf] %v6055_v45  ;;  %v6025_v13 = vpack.c.bf16 %v5985_v52, %v5985_v52  ;;  %7328 = vmatmul.bf16.gmra.mxu2 %v9869_v23  ;;  %v5738_v34 = vadd.f32 %v5737_v43, %v5689_v24  ;;  %v6056_v10 = vpack.c.bf16 %v6014_v37, %v6014_v37  ;;  %v5597_v40 = vpop.f32.mrf.mxu3  ;;  %v10851_v23 = vld [vmem:[#allocation5 + $0x828] sm:$0xff]  ;;  %vm13504_vm3 = vmmov %vm13475_vm2 }
 0x543   :  { %6098 = vst [vmem:[#allocation3 + $0x15c] sm:$0xf] %v6024_v42  ;;  %v5691_v8 = vadd.f32 %v5690_v33, %v5642_v26  ;;  %v5598_v60 = vadd.f32 %v5597_v40, %v5549_v58  ;;  %vm13502_vm7 = vnez %v13304_v48  ;;  %v10866_v48 = vld [vmem:[#allocation5 + $0x8a0] sm:$0xff] }
 0x544   :  { %6107 = vst [vmem:[#allocation3 + $0x160] sm:$0xf] %v6040_v53  ;;  %v5759_v50 = vmax.f32 %v5738_v34, 0.0  ;;  %v10783_v38 = vld [vmem:[#allocation3 + $0x188] sm:$0xf0] }
 0x545   :  { %6115 = vst [vmem:[#allocation3 + $0x140] sm:$0xf] %v6055_v45  ;;  %v9894_v19 = vld [vmem:[#allocation3 + $0x18c] sm:$0xf0]  ;;  %v9893_v36 = vor.u32 %v10783_v38, %v9892_v1  ;;  %7400 = vmatpush.bf16.msra.mxu0 %v10851_v23  ;;  %v10869_v38 = vld [vmem:[#allocation5 + $0x8b8] sm:$0xff] }
 0x546   :  { %6033 = vst [vmem:[#allocation3 + $0x1b0] sm:$0xf] %v6025_v13  ;;  %v5966_v16 = vrot.slane %v5759_v50, 7  ;;  %v5996_v49 = vrot.slane %v5759_v50, 1  ;;  %v9897_v27 = vor.u32 %v10779_v61, %v9894_v19  ;;  %v6042_v9 = vpack.c.bf16 %v5759_v50, %v5759_v50  ;;  %v9900_v32 = vld [vmem:[#allocation3 + $0x170] sm:$0xf]  ;;  %7496 = vmatpush.bf16.msra.mxu2 %v10869_v38 }
 0x547   :  { %6049 = vst [vmem:[#allocation3 + $0x1b4] sm:$0xf] %v6041_v44  ;;  %v10780_v43 = vld [vmem:[#allocation3 + $0x174] sm:$0xf]  ;;  %v10861_v50 = vld [vmem:[#allocation5 + $0x878] sm:$0xff] }
 0x548   :  { %6064 = vst [vmem:[#allocation3 + $0x194] sm:$0xf] %v6056_v10  ;;  %v5975_v42 = vsel %vm13492_vm10, %v5965_v20, %v5966_v16  ;;  %v6005_v53 = vsel %vm13493_vm12, %v5995_v46, %v5996_v49  ;;  %v5645_v46 = vadd.f32 %v5644_v29, %v5596_v47  ;;  %v5646_v26 = vpop.f32.mrf.mxu0  ;;  %7447 = vmatpush.bf16.msra.mxu1 %v10861_v50  ;;  %v10860_v1 = vld [vmem:[#allocation5 + $0x870] sm:$0xff]  ;;  %v5695_v0 = vpop.f32.mrf.mxu1  ;;  %vm13505_vm10 = vmmov %vm13475_vm2 }
 0x549   :  { %6073 = vst [vmem:[#allocation3 + $0x198] sm:$0xf] %v6025_v13  ;;  %v5986_v45 = vsel %vm13438_vm0, 0.0, %v5975_v42  ;;  %v5739_v31 = vpop.f32.mrf.mxu2  ;;  %v6015_v7 = vsel %vm13495_vm1, 0.0, %v6005_v53  ;;  %vm13497_vm0 = vmmov %vm13480_vm5  ;;  %v5647_v56 = vadd.f32 %v5646_v26, %v5598_v60  ;;  %vm13498_vm5 = vnez %v13298_v18 }
 0x54a   :  { %6082 = vst [vmem:[#allocation3 + $0x19c] sm:$0xf] %v6041_v44  ;;  %7186 = vmatmul.bf16.gmra.mxu3 %v9893_v36  ;;  %v5740_v17 = vadd.f32 %v5739_v31, %v5691_v8  ;;  %v6026_v20 = vpack.c.bf16 %v5986_v45, %v5986_v45  ;;  %v6057_v21 = vpack.c.bf16 %v6015_v7, %v6015_v7  ;;  %vm13503_vm13 = vmmov %vm13497_vm0 }
 0x54b   :  { %6090 = vst [vmem:[#allocation3 + $0x17c] sm:$0xf] %v6056_v10  ;;  %7235 = vmatmul.bf16.gmra.mxu0 %v9897_v27  ;;  %v5694_v6 = vadd.f32 %v5693_v28, %v5645_v46  ;;  %v10849_v27 = vld [vmem:[#allocation5 + $0x818] sm:$0xff]  ;;  %v5696_v29 = vadd.f32 %v5695_v0, %v5647_v56  ;;  %vm13506_vm12 = vmmov %vm13497_vm0  ;;  %v10862_v0 = vld [vmem:[#allocation5 + $0x880] sm:$0xff] }
 0x54c   :  { %6099 = vst [vmem:[#allocation3 + $0x180] sm:$0xf] %v6025_v13  ;;  %v12743_v24 = vmax.f32 %v5740_v17, 0.0  ;;  %7448 = vmatpush.bf16.msra.mxu1 %v10860_v1  ;;  %v10848_v17 = vld [vmem:[#allocation5 + $0x810] sm:$0xff]  ;;  %v10877_v28 = vld [vmem:[#allocation5 + $0x8f8] sm:$0xff] }
 0x54d   :  { %6108 = vst [vmem:[#allocation3 + $0x184] sm:$0xf] %v6041_v44  ;;  %v9928_v36 = vld [vmem:[#allocation3 + $0x1b0] sm:$0xf] }
 0x54e   :  { %6116 = vst [vmem:[#allocation3 + $0x164] sm:$0xf] %v6056_v10  ;;  %v5967_v11 = vrot.slane %v12743_v24, 7  ;;  %v5997_v12 = vrot.slane %v12743_v24, 1  ;;  %v10850_v10 = vld [vmem:[#allocation5 + $0x820] sm:$0xff]  ;;  %v6043_v61 = vpack.c.bf16 %v12743_v24, %v12743_v24  ;;  %v10847_v24 = vld [vmem:[#allocation5 + $0x808] sm:$0xff] }
 0x54f   :  { %6034 = vst [vmem:[#allocation3 + $0x1d4] sm:$0xf] %v6026_v20  ;;  %v10784_v59 = vld [vmem:[#allocation3 + $0x190] sm:$0xf0]  ;;  %7401 = vmatpush.bf16.msra.mxu0 %v10850_v10 }
 0x550   :  { %6050 = vst [vmem:[#allocation3 + $0x1d8] sm:$0xf] %v6042_v9  ;;  %v5974_v41 = vsel %vm13497_vm0, %v5966_v16, %v5967_v11  ;;  %v6004_v52 = vsel %vm13475_vm2, %v5996_v49, %v5997_v12  ;;  %v9901_v37 = vor.u32 %v10784_v59, %v9900_v32  ;;  %v9902_v33 = vld [vmem:[#allocation3 + $0x194] sm:$0xf0]  ;;  %v10868_v16 = vld [vmem:[#allocation5 + $0x8b0] sm:$0xff]  ;;  %v10838_v49 = vld [vmem:[#allocation5 + $0x7c0] sm:$0xff]  ;;  %7449 = vmatpush.bf16.msra.mxu1 %v10859_v62 }
 0x551   :  { %6065 = vst [vmem:[#allocation3 + $0x1b8] sm:$0xf] %v6057_v21  ;;  %v5987_v13 = vsel %vm13410_vm8, 0.0, %v5974_v41  ;;  %v9905_v34 = vor.u32 %v10780_v43, %v9902_v33  ;;  %v5742_v44 = vpop.f32.mrf.mxu2  ;;  %v6016_v51 = vsel %vm13498_vm5, 0.0, %v6004_v52  ;;  %7356 = vmatpush.bf16.msrb.mxu3 %v10838_v49  ;;  %v10788_v42 = vld [vmem:[#allocation3 + $0x1b4] sm:$0xf]  ;;  %vm13499_vm8 = vmmov %vm13497_vm0  ;;  %7497 = vmatpush.bf16.msra.mxu2 %v10868_v16 }
 0x552   :  { %6074 = vst [vmem:[#allocation3 + $0x1bc] sm:$0xf] %v6026_v20  ;;  %7284 = vmatmul.bf16.gmra.mxu1 %v9901_v37  ;;  %v5743_v35 = vadd.f32 %v5742_v44, %v5694_v6  ;;  %v6027_v19 = vpack.c.bf16 %v5987_v13, %v5987_v13  ;;  %v6058_v18 = vpack.c.bf16 %v6016_v51, %v6016_v51  ;;  %v10846_v6 = vld [vmem:[#allocation5 + $0x800] sm:$0xff]  ;;  %v10857_v41 = vld [vmem:[#allocation5 + $0x858] sm:$0xff]  ;;  %v10856_v10 = vld [vmem:[#allocation5 + $0x850] sm:$0xff] }
 0x553   :  { %6083 = vst [vmem:[#allocation3 + $0x1c0] sm:$0xf] %v6042_v9  ;;  %7333 = vmatmul.bf16.gmra.mxu2 %v9905_v34  ;;  %7402 = vmatpush.bf16.msra.mxu0 %v10849_v27  ;;  %v10865_v34 = vld [vmem:[#allocation5 + $0x898] sm:$0xff]  ;;  %v10863_v49 = vld [vmem:[#allocation5 + $0x888] sm:$0xff]  ;;  %v10736_v62 = vld [vmem:[#allocation3 + $0x14] sm:$0xf] }
 0x554   :  { %6091 = vst [vmem:[#allocation3 + $0x1a0] sm:$0xf] %v6057_v21  ;;  %v12755_v57 = vmax.f32 %v5743_v35, 0.0 }
 0x555   :  { %6100 = vst [vmem:[#allocation3 + $0x1a4] sm:$0xf] %v6026_v20  ;;  %7498 = vmatpush.bf16.msra.mxu2 %v10867_v5  ;;  %7545 = vmatpush.bf16.msra.mxu3 %v10877_v28 }
 0x556   :  { %6109 = vst [vmem:[#allocation3 + $0x1a8] sm:$0xf] %v6042_v9  ;;  %v5968_v8 = vrot.slane %v12755_v57, 7  ;;  %v5998_v39 = vrot.slane %v12755_v57, 1  ;;  %v10792_v47 = vld [vmem:[#allocation3 + $0x1d0] sm:$0xf0]  ;;  %v6044_v63 = vpack.c.bf16 %v12755_v57, %v12755_v57 }
 0x557   :  { %6117 = vst [vmem:[#allocation3 + $0x188] sm:$0xf] %v6057_v21  ;;  %v9930_v53 = vld [vmem:[#allocation3 + $0x1d4] sm:$0xf0]  ;;  %v9929_v3 = vor.u32 %v10792_v47, %v9928_v36  ;;  %7403 = vmatpush.bf16.msra.mxu0 %v10848_v17  ;;  %v10858_v21 = vld [vmem:[#allocation5 + $0x860] sm:$0xff]  ;;  %v10876_v36 = vld [vmem:[#allocation5 + $0x8f0] sm:$0xff] }
 0x558   :  { %6035 = vst [vmem:[#allocation3 + $0x1f8] sm:$0xf] %v6027_v19  ;;  %v5973_v22 = vsel %vm13499_vm8, %v5967_v11, %v5968_v8  ;;  %v6003_v45 = vsel %vm13500_vm6, %v5997_v12, %v5998_v39  ;;  %v9933_v31 = vor.u32 %v10788_v42, %v9930_v53  ;;  %v9936_v59 = vld [vmem:[#allocation3 + $0x1b8] sm:$0xf]  ;;  %7450 = vmatpush.bf16.msra.mxu1 %v10858_v21  ;;  %v10740_v53 = vld [vmem:[#allocation3 + $0x30] sm:$0xf0] }
 0x559   :  { %6051 = vst [vmem:[#allocation3 + $0x1fc] sm:$0xf] %v6043_v61  ;;  %v5744_v7 = vpop.f32.mrf.mxu2  ;;  %v5988_v30 = vsel %vm13501_vm11, 0.0, %v5973_v22  ;;  %v6017_v20 = vsel %vm13502_vm7, 0.0, %v6003_v45  ;;  %v10789_v23 = vld [vmem:[#allocation3 + $0x1bc] sm:$0xf]  ;;  %7499 = vmatpush.bf16.msra.mxu2 %v10866_v48  ;;  %7546 = vmatpush.bf16.msra.mxu3 %v10876_v36 }
 0x55a   :  { %6066 = vst [vmem:[#allocation3 + $0x1dc] sm:$0xf] %v6058_v18  ;;  %7191 = vmatmul.bf16.gmra.mxu3 %v9929_v3  ;;  %v5745_v58 = vadd.f32 %v5744_v7, %v5696_v29  ;;  %v6028_v9 = vpack.c.bf16 %v5988_v30, %v5988_v30  ;;  %v6059_v12 = vpack.c.bf16 %v6017_v20, %v6017_v20  ;;  %v12789_v3 = vld [vmem:[#allocation7 + $0x3] ss:$0 sm:$0xff]  ;;  %v9730_v22 = vld [vmem:[#allocation3 + $0x34] sm:$0xf0] }
 0x55b   :  { %6075 = vst [vmem:[#allocation3 + $0x1e0] sm:$0xf] %v6027_v19  ;;  %7240 = vmatmul.bf16.gmra.mxu0 %v9933_v31  ;;  %v9728_v31 = vld [vmem:[#allocation3 + $0x10] sm:$0xf]  ;;  %v9733_v17 = vor.u32 %v10736_v62, %v9730_v22 }
 0x55c   :  { %6084 = vst [vmem:[#allocation3 + $0x1e4] sm:$0xf] %v6043_v61  ;;  %v5762_v46 = vmax.f32 %v5745_v58, 0.0  ;;  %7404 = vmatpush.bf16.msra.mxu0 %v10847_v24  ;;  %7451 = vmatpush.bf16.msra.mxu1 %v10857_v41  ;;  %v9729_v5 = vor.u32 %v10740_v53, %v9728_v31  ;;  %v9738_v24 = vld [vmem:[#allocation3 + $0x3c] sm:$0xf0] }
 0x55d   :  { %6092 = vst [vmem:[#allocation3 + $0x1c4] sm:$0xf] %v6058_v18  ;;  %7500 = vmatpush.bf16.msra.mxu2 %v10865_v34 }
 0x55e   :  { %6101 = vst [vmem:[#allocation3 + $0x1c8] sm:$0xf] %v6027_v19  ;;  %v5969_v40 = vrot.slane %v5762_v46, 7  ;;  %v5999_v11 = vrot.slane %v5762_v46, 1  ;;  %v6078_v56 = vpack.c.bf16 %v5762_v46, %v5762_v46  ;;  %v10875_v46 = vld [vmem:[#allocation5 + $0x8e8] sm:$0xff] }
 0x55f   :  { %6110 = vst [vmem:[#allocation3 + $0x1cc] sm:$0xf] %v6043_v61  ;;  %v9964_v38 = vld [vmem:[#allocation3 + $0x1f8] sm:$0xf]  ;;  %7547 = vmatpush.bf16.msra.mxu3 %v10875_v46  ;;  %v9808_v46 = vld [vmem:[#allocation3 + $0xa8] sm:$0xf] }
 0x560   :  { %6118 = vst [vmem:[#allocation3 + $0x1ac] sm:$0xf] %v6058_v18  ;;  %v5972_v32 = vsel %vm13503_vm13, %v5968_v8, %v5969_v40  ;;  %v6002_v60 = vsel %vm13504_vm3, %v5998_v39, %v5999_v11  ;;  %v6001_v26 = vsel %vm13505_vm10, %v5999_v11, %v11071_v25  ;;  %v5971_v14 = vsel %vm13506_vm12, %v5969_v40, %v11053_v4  ;;  %v10864_v25 = vld [vmem:[#allocation5 + $0x890] sm:$0xff]  ;;  %v10797_v51 = vld [vmem:[#allocation3 + $0x1fc] sm:$0xf] }
 0x561   :  { %6036 = vst [vmem:[#allocation3 + $0x21c] sm:$0xf] %v6028_v9  ;;  %v10793_v52 = vld [vmem:[#allocation3 + $0x1d8] sm:$0xf0]  ;;  %v6018_v43 = vsel %vm13356_vm14, 0.0, %v6002_v60  ;;  %v5989_v44 = vsel %vm13355_vm15, 0.0, %v5972_v32  ;;  %7405 = vmatpush.bf16.msra.mxu0 %v10846_v6  ;;  %7452 = vmatpush.bf16.msra.mxu1 %v10856_v10 }
 0x562   :  { %6052 = vst [vmem:[#allocation3 + $0x220] sm:$0xf] %v6044_v63  ;;  %v9938_v37 = vld [vmem:[#allocation3 + $0x1dc] sm:$0xf0]  ;;  %v9937_v33 = vor.u32 %v10793_v52, %v9936_v59  ;;  %v6060_v35 = vpack.c.bf16 %v6018_v43, %v6018_v43  ;;  %v6019_v55 = vsel %vm11517_vm4, 0.0, %v6001_v26  ;;  %v6069_v50 = vpack.c.bf16 %v5989_v44, %v5989_v44  ;;  %7501 = vmatpush.bf16.msra.mxu2 %v10864_v25 }
 0x563   :  { %6067 = vst [vmem:[#allocation3 + $0x200] sm:$0xf] %v6059_v12  ;;  %v9941_v13 = vor.u32 %v10789_v23, %v9938_v37  ;;  %v5990_v2 = vsel %vm11502_vm9, 0.0, %v5971_v14  ;;  %v6087_v1 = vpack.c.bf16 %v6019_v55, %v6019_v55  ;;  %v9736_v40 = vld [vmem:[#allocation3 + $0x18] sm:$0xf] }
 0x564   :  { %6076 = vst [vmem:[#allocation3 + $0x204] sm:$0xf] %v6028_v9  ;;  %7289 = vmatmul.bf16.gmra.mxu1 %v9937_v33  ;;  %v6096_v61 = vpack.c.bf16 %v5990_v2, %v5990_v2  ;;  %v10737_v11 = vld [vmem:[#allocation3 + $0x1c] sm:$0xf]  ;;  %v9766_v37 = vld [vmem:[#allocation3 + $0x7c] sm:$0xf0] }
 0x565   :  { %6085 = vst [vmem:[#allocation3 + $0x208] sm:$0xf] %v6044_v63  ;;  %7338 = vmatmul.bf16.gmra.mxu2 %v9941_v13  ;;  %7453 = vmatpush.bf16.msra.mxu1 %v10855_v15  ;;  %v9741_v32 = vor.u32 %v10737_v11, %v9738_v24  ;;  %v10749_v52 = vld [vmem:[#allocation3 + $0x78] sm:$0xf0]  ;;  %v9764_v43 = vld [vmem:[#allocation3 + $0x58] sm:$0xf] }
 0x566   :  { %6093 = vst [vmem:[#allocation3 + $0x1e8] sm:$0xf] %v6059_v12  ;;  %7502 = vmatpush.bf16.msra.mxu2 %v10863_v49  ;;  %v10745_v13 = vld [vmem:[#allocation3 + $0x5c] sm:$0xf]  ;;  %v9765_v34 = vor.u32 %v10749_v52, %v9764_v43  ;;  %v9772_v2 = vld [vmem:[#allocation3 + $0x60] sm:$0xf] }
 0x567   :  { %6102 = vst [vmem:[#allocation3 + $0x1ec] sm:$0xf] %v6028_v9  ;;  %v10741_v9 = vld [vmem:[#allocation3 + $0x38] sm:$0xf0]  ;;  %v9769_v26 = vor.u32 %v10745_v13, %v9766_v37 }
 0x568   :  { %6111 = vst [vmem:[#allocation3 + $0x1f0] sm:$0xf] %v6044_v63  ;;  %v10801_v19 = vld [vmem:[#allocation3 + $0x218] sm:$0xf0]  ;;  %v9737_v48 = vor.u32 %v10741_v9, %v9736_v40 }
 0x569   :  { %6119 = vst [vmem:[#allocation3 + $0x1d0] sm:$0xf] %v6059_v12  ;;  %v9966_v4 = vld [vmem:[#allocation3 + $0x21c] sm:$0xf0]  ;;  %v9965_v57 = vor.u32 %v10801_v19, %v9964_v38  ;;  %7454 = vmatpush.bf16.msra.mxu1 %v10854_v54 }
 0x56a   :  { %6068 = vst [vmem:[#allocation3 + $0x224] sm:$0xf] %v6060_v35  ;;  %v9969_v16 = vor.u32 %v10797_v51, %v9966_v4  ;;  %v9972_v18 = vld [vmem:[#allocation3 + $0x200] sm:$0xf]  ;;  %7503 = vmatpush.bf16.msra.mxu2 %v10862_v0  ;;  %v9774_v51 = vld [vmem:[#allocation3 + $0x84] sm:$0xf0] }
 0x56b   :  { %6077 = vst [vmem:[#allocation3 + $0x228] sm:$0xf] %v6069_v50  ;;  %7196 = vmatmul.bf16.gmra.mxu3 %v9965_v57  ;;  %v10798_v47 = vld [vmem:[#allocation3 + $0x204] sm:$0xf] }
 0x56c   :  { %6086 = vst [vmem:[#allocation3 + $0x22c] sm:$0xf] %v6078_v56  ;;  %7245 = vmatmul.bf16.gmra.mxu0 %v9969_v16  ;;  %v10874_v38 = vld [vmem:[#allocation5 + $0x8e0] sm:$0xff] }
 0x56d   :  { %6094 = vst [vmem:[#allocation3 + $0x20c] sm:$0xf] %v6060_v35  ;;  %7548 = vmatpush.bf16.msra.mxu3 %v10874_v38  ;;  %v10746_v4 = vld [vmem:[#allocation3 + $0x64] sm:$0xf]  ;;  %v9844_v38 = vld [vmem:[#allocation3 + $0xf0] sm:$0xf] }
 0x56e   :  { %6095 = vst [vmem:[#allocation3 + $0x230] sm:$0xf] %v6087_v1  ;;  %v9777_v15 = vor.u32 %v10746_v4, %v9774_v51  ;;  %v10758_v0 = vld [vmem:[#allocation3 + $0xc0] sm:$0xf0] }
 0x56f   :  { %6103 = vst [vmem:[#allocation3 + $0x210] sm:$0xf] %v6069_v50  ;;  %v7211_v27 = vpop.f32.mrf.mxu0 }
 0x570   :  { %6104 = vst [vmem:[#allocation3 + $0x234] sm:$0xf] %v6096_v61 }
 0x571   :  { %6112 = vst [vmem:[#allocation3 + $0x214] sm:$0xf] %v6078_v56  ;;  %v10802_v8 = vld [vmem:[#allocation3 + $0x220] sm:$0xf0] }
 0x572   :  { %6120 = vst [vmem:[#allocation3 + $0x1f4] sm:$0xf] %v6060_v35  ;;  %v9973_v39 = vor.u32 %v10802_v8, %v9972_v18  ;;  %v9974_v29 = vld [vmem:[#allocation3 + $0x224] sm:$0xf0]  ;;  %v10750_v56 = vld [vmem:[#allocation3 + $0x80] sm:$0xf0] }
 0x573   :  { %6121 = vst [vmem:[#allocation3 + $0x218] sm:$0xf] %v6087_v1  ;;  %v9977_v42 = vor.u32 %v10798_v47, %v9974_v29  ;;  %v9773_v16 = vor.u32 %v10750_v56, %v9772_v2  ;;  %v9802_v18 = vld [vmem:[#allocation3 + $0xc4] sm:$0xf0]  ;;  %v9800_v8 = vld [vmem:[#allocation3 + $0xa0] sm:$0xf] }
 0x574   :  { %7294 = vmatmul.bf16.gmra.mxu1 %v9973_v39  ;;  %v10754_v39 = vld [vmem:[#allocation3 + $0xa4] sm:$0xf]  ;;  %v9801_v47 = vor.u32 %v10758_v0, %v9800_v8  ;;  %v10764_v56 = vld [vmem:[#allocation3 + $0xf4] sm:$0xf]  ;;  %v9872_v0 = vld [vmem:[#allocation3 + $0x130] sm:$0xf] }
 0x575   :  { %7343 = vmatmul.bf16.gmra.mxu2 %v9977_v42  ;;  %v9805_v42 = vor.u32 %v10754_v39, %v9802_v18  ;;  %v10772_v18 = vld [vmem:[#allocation3 + $0x134] sm:$0xf] }
 0x577   :  { %v7213_v45 = vpop.f32.mrf.mxu0 }
 0x579   :  { %v7162_v7 = vpop.f32.mrf.mxu3 }
 0x57a   :  { %v7163_v30 = vadd.f32 %v12789_v3, %v7162_v7 }
 0x57b   :  { %7357 = vmatmul.bf16.vlgmr.msrb.gmra.mxu3 %v9729_v5  ;;  %v10873_v5 = vld [vmem:[#allocation5 + $0x8d8] sm:$0xff] }
 0x57c   :  { %7406 = vmatmul.bf16.vlgmr.msra.gmra.mxu0 %v9733_v17  ;;  %v7212_v58 = vadd.f32 %v7211_v27, %v7163_v30  ;;  %v7260_v20 = vpop.f32.mrf.mxu1  ;;  %7549 = vmatpush.bf16.msra.mxu3 %v10873_v5  ;;  %v10759_v30 = vld [vmem:[#allocation3 + $0xc8] sm:$0xf0] }
 0x57d   :  { %v9809_v24 = vor.u32 %v10759_v30, %v9808_v46 }
 0x57e   :  { %v7261_v28 = vadd.f32 %v7260_v20, %v7212_v58  ;;  %v9810_v58 = vld [vmem:[#allocation3 + $0xcc] sm:$0xf0] }
 0x580   :  { %v7216_v21 = vpop.f32.mrf.mxu0 }
 0x581   :  { %v7164_v63 = vpop.f32.mrf.mxu3 }
 0x582   :  { %v7165_v12 = vadd.f32 %v12789_v3, %v7164_v63 }
 0x583   :  { %v7309_v60 = vpop.f32.mrf.mxu2 }
 0x584   :  { %v12793_v59 = vadd.f32 %v7309_v60, %v7261_v28  ;;  %v7214_v23 = vadd.f32 %v7213_v45, %v7165_v12  ;;  %v7262_v6 = vpop.f32.mrf.mxu1  ;;  %7455 = vmatmul.bf16.vlgmr.msra.gmra.mxu1 %v9737_v48  ;;  %v10755_v28 = vld [vmem:[#allocation3 + $0xac] sm:$0xf] }
 0x585   :  { %7504 = vmatmul.bf16.vlgmr.msra.gmra.mxu2 %v9741_v32  ;;  %v10767_v32 = vld [vmem:[#allocation3 + $0x108] sm:$0xf0] }
 0x586   :  { %v7263_v41 = vadd.f32 %v7262_v6, %v7214_v23  ;;  %v10763_v60 = vld [vmem:[#allocation3 + $0xec] sm:$0xf]  ;;  %v9838_v23 = vld [vmem:[#allocation3 + $0x10c] sm:$0xf0] }
 0x587   :  { %v9841_v37 = vor.u32 %v10763_v60, %v9838_v23  ;;  %v9908_v23 = vld [vmem:[#allocation3 + $0x178] sm:$0xf] }
 0x588   :  { %v7218_v33 = vpop.f32.mrf.mxu0 }
 0x589   :  { %v7167_v44 = vpop.f32.mrf.mxu3 }
 0x58a   :  { %v7168_v14 = vadd.f32 %v12789_v3, %v7167_v44 }
 0x58b   :  { %7362 = vmatmul.bf16.gmra.mxu3 %v9765_v34  ;;  %v7311_v35 = vpop.f32.mrf.mxu2  ;;  %v10872_v34 = vld [vmem:[#allocation5 + $0x8d0] sm:$0xff] }
 0x58c   :  { %7411 = vmatmul.bf16.gmra.mxu0 %v9769_v26  ;;  %v12796_v10 = vadd.f32 %v7311_v35, %v7263_v41  ;;  %v7217_v55 = vadd.f32 %v7216_v21, %v7168_v14  ;;  %v7265_v50 = vpop.f32.mrf.mxu1  ;;  %v9813_v21 = vor.u32 %v10755_v28, %v9810_v58  ;;  %v9836_v41 = vld [vmem:[#allocation3 + $0xe8] sm:$0xf]  ;;  %7550 = vmatpush.bf16.msra.mxu3 %v10872_v34  ;;  %v9880_v58 = vld [vmem:[#allocation3 + $0x138] sm:$0xf] }
 0x58d   :  { %v9837_v52 = vor.u32 %v10767_v32, %v9836_v41 }
 0x58e   :  { %v7266_v25 = vadd.f32 %v7265_v50, %v7217_v55  ;;  %v9846_v50 = vld [vmem:[#allocation3 + $0x114] sm:$0xf0] }
 0x58f   :  { %v9849_v2 = vor.u32 %v10764_v56, %v9846_v50  ;;  %v10786_v50 = vld [vmem:[#allocation3 + $0x1a0] sm:$0xf0]  ;;  %v9916_v56 = vld [vmem:[#allocation3 + $0x180] sm:$0xf] }
 0x591   :  { %v7169_v19 = vpop.f32.mrf.mxu3 }
 0x592   :  { %v7221_v57 = vpop.f32.mrf.mxu0  ;;  %v7170_v1 = vadd.f32 %v12789_v3, %v7169_v19 }
 0x593   :  { %v7314_v49 = vpop.f32.mrf.mxu2 }
 0x594   :  { %v12799_v61 = vadd.f32 %v7314_v49, %v7266_v25  ;;  %v7219_v36 = vadd.f32 %v7218_v33, %v7170_v1  ;;  %v7267_v54 = vpop.f32.mrf.mxu1  ;;  %7460 = vmatmul.bf16.gmra.mxu1 %v9773_v16  ;;  %v10768_v25 = vld [vmem:[#allocation3 + $0x110] sm:$0xf0] }
 0x595   :  { %7509 = vmatmul.bf16.gmra.mxu2 %v9777_v15  ;;  %v9845_v19 = vor.u32 %v10768_v25, %v9844_v38  ;;  %v10776_v49 = vld [vmem:[#allocation3 + $0x150] sm:$0xf0]  ;;  %v9918_v38 = vld [vmem:[#allocation3 + $0x1a4] sm:$0xf0] }
 0x596   :  { %v7268_v27 = vadd.f32 %v7267_v54, %v7219_v36  ;;  %v9874_v36 = vld [vmem:[#allocation3 + $0x154] sm:$0xf0]  ;;  %v9873_v8 = vor.u32 %v10776_v49, %v9872_v0  ;;  %v9944_v0 = vld [vmem:[#allocation3 + $0x1c0] sm:$0xf] }
 0x597   :  { %v9877_v39 = vor.u32 %v10772_v18, %v9874_v36  ;;  %v9946_v36 = vld [vmem:[#allocation3 + $0x1e4] sm:$0xf0]  ;;  %v10790_v18 = vld [vmem:[#allocation3 + $0x1c4] sm:$0xf] }
 0x599   :  { %v7172_v29 = vpop.f32.mrf.mxu3 }
 0x59a   :  { %v7173_v53 = vadd.f32 %v12789_v3, %v7172_v29  ;;  %v7223_v22 = vpop.f32.mrf.mxu0  ;;  %v10871_v29 = vld [vmem:[#allocation5 + $0x8c8] sm:$0xff] }
 0x59b   :  { %7367 = vmatmul.bf16.gmra.mxu3 %v9801_v47  ;;  %v7316_v45 = vpop.f32.mrf.mxu2 }
 0x59c   :  { %7416 = vmatmul.bf16.gmra.mxu0 %v9805_v42  ;;  %v12802_v31 = vadd.f32 %v7316_v45, %v7268_v27  ;;  %v7222_v62 = vadd.f32 %v7221_v57, %v7173_v53  ;;  %7551 = vmatpush.bf16.msra.mxu3 %v10871_v29 }
 0x59e   :  { %v7270_v7 = vpop.f32.mrf.mxu1 }
 0x59f   :  { %v7271_v17 = vadd.f32 %v7270_v7, %v7222_v62  ;;  %v10777_v7 = vld [vmem:[#allocation3 + $0x158] sm:$0xf0] }
 0x5a0   :  { %v9881_v46 = vor.u32 %v10777_v7, %v9880_v58  ;;  %v10795_v7 = vld [vmem:[#allocation3 + $0x1e8] sm:$0xf0]  ;;  %v9952_v58 = vld [vmem:[#allocation3 + $0x1c8] sm:$0xf] }
 0x5a1   :  { %v7174_v20 = vpop.f32.mrf.mxu3 }
 0x5a2   :  { %v7175_v9 = vadd.f32 %v12789_v3, %v7174_v20  ;;  %v10773_v20 = vld [vmem:[#allocation3 + $0x13c] sm:$0xf] }
 0x5a4   :  { %v7319_v63 = vpop.f32.mrf.mxu2  ;;  %v7224_v40 = vadd.f32 %v7223_v22, %v7175_v9  ;;  %7465 = vmatmul.bf16.gmra.mxu1 %v9809_v24 }
 0x5a5   :  { %7514 = vmatmul.bf16.gmra.mxu2 %v9813_v21  ;;  %v7226_v11 = vpop.f32.mrf.mxu0  ;;  %v12805_v12 = vadd.f32 %v7319_v63, %v7271_v17  ;;  %v9882_v17 = vld [vmem:[#allocation3 + $0x15c] sm:$0xf0] }
 0x5a6   :  { %v7272_v48 = vpop.f32.mrf.mxu1  ;;  %v9885_v28 = vor.u32 %v10773_v20, %v9882_v17  ;;  %v9954_v17 = vld [vmem:[#allocation3 + $0x1ec] sm:$0xf0]  ;;  %v10791_v20 = vld [vmem:[#allocation3 + $0x1cc] sm:$0xf] }
 0x5a7   :  { %v7273_v6 = vadd.f32 %v7272_v48, %v7224_v40  ;;  %v9910_v48 = vld [vmem:[#allocation3 + $0x19c] sm:$0xf0] }
 0x5aa   :  { %v7177_v43 = vpop.f32.mrf.mxu3 }
 0x5ab   :  { %7372 = vmatmul.bf16.gmra.mxu3 %v9837_v52  ;;  %v7178_v33 = vadd.f32 %v12789_v3, %v7177_v43  ;;  %v10870_v43 = vld [vmem:[#allocation5 + $0x8c0] sm:$0xff] }
 0x5ac   :  { %7421 = vmatmul.bf16.gmra.mxu0 %v9841_v37  ;;  %v7321_v13 = vpop.f32.mrf.mxu2  ;;  %7552 = vmatpush.bf16.msra.mxu3 %v10870_v43 }
 0x5ad   :  { %v12808_v44 = vadd.f32 %v7321_v13, %v7273_v6  ;;  %v7227_v26 = vadd.f32 %v7226_v11, %v7178_v33  ;;  %v7228_v14 = vpop.f32.mrf.mxu0  ;;  %v10785_v11 = vld [vmem:[#allocation3 + $0x198] sm:$0xf0] }
 0x5ae   :  { %v7275_v35 = vpop.f32.mrf.mxu1  ;;  %v10781_v6 = vld [vmem:[#allocation3 + $0x17c] sm:$0xf]  ;;  %v9909_v41 = vor.u32 %v10785_v11, %v9908_v23  ;;  %v10803_v11 = vld [vmem:[#allocation3 + $0x228] sm:$0xf0] }
 0x5af   :  { %v7276_v55 = vadd.f32 %v7275_v35, %v7227_v26  ;;  %v9913_v52 = vor.u32 %v10781_v6, %v9910_v48  ;;  %v10799_v48 = vld [vmem:[#allocation3 + $0x20c] sm:$0xf]  ;;  %v9980_v6 = vld [vmem:[#allocation3 + $0x208] sm:$0xf] }
 0x5b2   :  { %v7179_v51 = vpop.f32.mrf.mxu3 }
 0x5b3   :  { %v7180_v4 = vadd.f32 %v12789_v3, %v7179_v51  ;;  %v10782_v51 = vld [vmem:[#allocation3 + $0x184] sm:$0xf] }
 0x5b4   :  { %v7324_v57 = vpop.f32.mrf.mxu2  ;;  %7470 = vmatmul.bf16.gmra.mxu1 %v9845_v19  ;;  %v9917_v19 = vor.u32 %v10786_v50, %v9916_v56  ;;  %v9988_v50 = vld [vmem:[#allocation3 + $0x210] sm:$0xf] }
 0x5b5   :  { %7519 = vmatmul.bf16.gmra.mxu2 %v9849_v2  ;;  %v12811_v1 = vadd.f32 %v7324_v57, %v7276_v55  ;;  %v7229_v16 = vadd.f32 %v7228_v14, %v7180_v4  ;;  %v9921_v2 = vor.u32 %v10782_v51, %v9918_v38  ;;  %v10804_v38 = vld [vmem:[#allocation3 + $0x230] sm:$0xf0] }
 0x5b6   :  { %v7277_v15 = vpop.f32.mrf.mxu1 }
 0x5b7   :  { %v7278_v54 = vadd.f32 %v7277_v15, %v7229_v16  ;;  %v10794_v15 = vld [vmem:[#allocation3 + $0x1e0] sm:$0xf0] }
 0x5b8   :  { %v7231_v27 = vpop.f32.mrf.mxu0 }
 0x5bb   :  { %7377 = vmatmul.bf16.gmra.mxu3 %v9873_v8  ;;  %v9945_v8 = vor.u32 %v10794_v15, %v9944_v0  ;;  %v10742_v15 = vld [vmem:[#allocation3 + $0x40] sm:$0xf0]  ;;  %v9744_v0 = vld [vmem:[#allocation3 + $0x20] sm:$0xf] }
 0x5bc   :  { %7426 = vmatmul.bf16.gmra.mxu0 %v9877_v39  ;;  %v7326_v47 = vpop.f32.mrf.mxu2 }
 0x5bd   :  { %v7182_v42 = vpop.f32.mrf.mxu3  ;;  %v12813_v53 = vadd.f32 %v7326_v47, %v7278_v54  ;;  %v9949_v47 = vor.u32 %v10790_v18, %v9946_v36 }
 0x5be   :  { %v7183_v22 = vadd.f32 %v12789_v3, %v7182_v42  ;;  %v7280_v45 = vpop.f32.mrf.mxu1 }
 0x5c0   :  { %v7233_v62 = vpop.f32.mrf.mxu0  ;;  %v7232_v5 = vadd.f32 %v7231_v27, %v7183_v22 }
 0x5c2   :  { %v7281_v30 = vadd.f32 %v7280_v45, %v7232_v5 }
 0x5c4   :  { %7475 = vmatmul.bf16.gmra.mxu1 %v9881_v46 }
 0x5c5   :  { %7524 = vmatmul.bf16.gmra.mxu2 %v9885_v28  ;;  %v7184_v9 = vpop.f32.mrf.mxu3  ;;  %v7329_v24 = vpop.f32.mrf.mxu2  ;;  %v9953_v28 = vor.u32 %v10795_v7, %v9952_v58 }
 0x5c6   :  { %v7185_v21 = vadd.f32 %v12789_v3, %v7184_v9  ;;  %v12817_v63 = vadd.f32 %v7329_v24, %v7281_v30  ;;  %v7282_v40 = vpop.f32.mrf.mxu1  ;;  %v9957_v9 = vor.u32 %v10791_v20, %v9954_v17  ;;  %v10751_v17 = vld [vmem:[#allocation3 + $0x88] sm:$0xf0] }
 0x5c8   :  { %v7236_v32 = vpop.f32.mrf.mxu0  ;;  %v7234_v60 = vadd.f32 %v7233_v62, %v7185_v21 }
 0x5ca   :  { %v7283_v37 = vadd.f32 %v7282_v40, %v7234_v60 }
 0x5cb   :  { %7382 = vmatmul.bf16.gmra.mxu3 %v9909_v41 }
 0x5cc   :  { %7431 = vmatmul.bf16.gmra.mxu0 %v9913_v52  ;;  %v9981_v52 = vor.u32 %v10803_v11, %v9980_v6 }
 0x5cd   :  { %v7187_v33 = vpop.f32.mrf.mxu3  ;;  %v7331_v13 = vpop.f32.mrf.mxu2 }
 0x5ce   :  { %v7188_v34 = vadd.f32 %v12789_v3, %v7187_v33  ;;  %v12820_v26 = vadd.f32 %v7331_v13, %v7283_v37 }
 0x5cf   :  { %v7285_v14 = vpop.f32.mrf.mxu1 }
 0x5d0   :  { %v7238_v35 = vpop.f32.mrf.mxu0  ;;  %v7237_v55 = vadd.f32 %v7236_v32, %v7188_v34  ;;  %v9982_v32 = vld [vmem:[#allocation3 + $0x22c] sm:$0xf0] }
 0x5d1   :  { %v9985_v37 = vor.u32 %v10799_v48, %v9982_v32  ;;  %v9852_v48 = vld [vmem:[#allocation3 + $0xf8] sm:$0xf]  ;;  %v10769_v32 = vld [vmem:[#allocation3 + $0x118] sm:$0xf0] }
 0x5d2   :  { %v7286_v25 = vadd.f32 %v7285_v14, %v7237_v55 }
 0x5d4   :  { %7480 = vmatmul.bf16.gmra.mxu1 %v9917_v19 }
 0x5d5   :  { %7529 = vmatmul.bf16.gmra.mxu2 %v9921_v2  ;;  %v7189_v4 = vpop.f32.mrf.mxu3 }
 0x5d6   :  { %v7190_v57 = vadd.f32 %v12789_v3, %v7189_v4  ;;  %v7334_v16 = vpop.f32.mrf.mxu2  ;;  %v9989_v4 = vor.u32 %v10804_v38, %v9988_v50  ;;  %v10796_v38 = vld [vmem:[#allocation3 + $0x1f0] sm:$0xf0] }
 0x5d7   :  { %v12823_v49 = vadd.f32 %v7334_v16, %v7286_v25  ;;  %v7287_v27 = vpop.f32.mrf.mxu1  ;;  %v10800_v25 = vld [vmem:[#allocation3 + $0x214] sm:$0xf] }
 0x5d8   :  { %v7239_v54 = vadd.f32 %v7238_v35, %v7190_v57  ;;  %v7241_v39 = vpop.f32.mrf.mxu0  ;;  %v9990_v35 = vld [vmem:[#allocation3 + $0x234] sm:$0xf0] }
 0x5d9   :  { %v9993_v57 = vor.u32 %v10800_v25, %v9990_v35  ;;  %v9924_v35 = vld [vmem:[#allocation3 + $0x188] sm:$0xf] }
 0x5da   :  { %v7288_v29 = vadd.f32 %v7287_v27, %v7239_v54 }
 0x5db   :  { %7387 = vmatmul.bf16.gmra.mxu3 %v9945_v8 }
 0x5dc   :  { %7436 = vmatmul.bf16.gmra.mxu0 %v9949_v47 }
 0x5dd   :  { %v7192_v42 = vpop.f32.mrf.mxu3 }
 0x5de   :  { %v7193_v22 = vadd.f32 %v12789_v3, %v7192_v42  ;;  %v7336_v45 = vpop.f32.mrf.mxu2 }
 0x5df   :  { %v12826_v62 = vadd.f32 %v7336_v45, %v7288_v29 }
 0x5e0   :  { %v7242_v5 = vadd.f32 %v7241_v39, %v7193_v22  ;;  %v7243_v24 = vpop.f32.mrf.mxu0  ;;  %v9745_v39 = vor.u32 %v10742_v15, %v9744_v0 }
 0x5e1   :  { %v7290_v30 = vpop.f32.mrf.mxu1 }
 0x5e2   :  { %v7291_v46 = vadd.f32 %v7290_v30, %v7242_v5  ;;  %v9780_v30 = vld [vmem:[#allocation3 + $0x68] sm:$0xf] }
 0x5e3   :  { %v9781_v58 = vor.u32 %v10751_v17, %v9780_v30 }
 0x5e4   :  { %7485 = vmatmul.bf16.gmra.mxu1 %v9953_v28 }
 0x5e5   :  { %7534 = vmatmul.bf16.gmra.mxu2 %v9957_v9  ;;  %v7194_v21 = vpop.f32.mrf.mxu3  ;;  %v10760_v9 = vld [vmem:[#allocation3 + $0xd0] sm:$0xf0] }
 0x5e6   :  { %v7195_v40 = vadd.f32 %v12789_v3, %v7194_v21 }
 0x5e8   :  { %v7339_v60 = vpop.f32.mrf.mxu2  ;;  %v7244_v23 = vadd.f32 %v7243_v24, %v7195_v40  ;;  %v9816_v24 = vld [vmem:[#allocation3 + $0xb0] sm:$0xf] }
 0x5e9   :  { %v12829_v41 = vadd.f32 %v7339_v60, %v7291_v46  ;;  %v7292_v43 = vpop.f32.mrf.mxu1  ;;  %v7246_v13 = vpop.f32.mrf.mxu0  ;;  %v9817_v21 = vor.u32 %v10760_v9, %v9816_v24 }
 0x5ea   :  { %v7293_v33 = vadd.f32 %v7292_v43, %v7244_v23  ;;  %v9888_v43 = vld [vmem:[#allocation3 + $0x140] sm:$0xf] }
 0x5eb   :  { %7392 = vmatmul.bf16.gmra.mxu3 %v9981_v52  ;;  %v10778_v52 = vld [vmem:[#allocation3 + $0x160] sm:$0xf0] }
 0x5ec   :  { %7441 = vmatmul.bf16.gmra.mxu0 %v9985_v37 }
 0x5ee   :  { %v7197_v34 = vpop.f32.mrf.mxu3 }
 0x5ef   :  { %v7198_v14 = vadd.f32 %v12789_v3, %v7197_v34  ;;  %v10787_v34 = vld [vmem:[#allocation3 + $0x1a8] sm:$0xf0] }
 0x5f0   :  { %v7341_v55 = vpop.f32.mrf.mxu2 }
 0x5f1   :  { %v12832_v56 = vadd.f32 %v7341_v55, %v7293_v33  ;;  %v7247_v51 = vadd.f32 %v7246_v13, %v7198_v14  ;;  %v7295_v19 = vpop.f32.mrf.mxu1  ;;  %v7248_v54 = vpop.f32.mrf.mxu0 }
 0x5f3   :  { %v7296_v2 = vadd.f32 %v7295_v19, %v7247_v51 }
 0x5f4   :  { %7490 = vmatmul.bf16.gmra.mxu1 %v9989_v4 }
 0x5f5   :  { %7539 = vmatmul.bf16.gmra.mxu2 %v9993_v57 }
 0x5f6   :  { %v7199_v16 = vpop.f32.mrf.mxu3 }
 0x5f7   :  { %v7200_v36 = vadd.f32 %v12789_v3, %v7199_v16 }
 0x5f8   :  { %v7344_v27 = vpop.f32.mrf.mxu2 }
 0x5f9   :  { %v12835_v18 = vadd.f32 %v7344_v27, %v7296_v2  ;;  %v7249_v8 = vadd.f32 %v7248_v54, %v7200_v36  ;;  %v7297_v47 = vpop.f32.mrf.mxu1  ;;  %v7407_v25 = vpop.f32.mrf.mxu0  ;;  %v9996_v54 = vld [vmem:[#allocation3 + $0x218] sm:$0xf]  ;;  %v10805_v27 = vld [vmem:[#allocation3 + $0x238] sm:$0xf0] }
 0x5fb   :  { %v7298_v29 = vadd.f32 %v7297_v47, %v7249_v8  ;;  %7553 = vmatmul.bf16.vlgmr.msra.gmra.mxu3 %v9745_v39 }
 0x5fe   :  { %v7358_v42 = vpop.f32.mrf.mxu3 }
 0x5ff   :  { %v12838_v22 = vadd.f32 %v7358_v42, %v12793_v59 }
 0x600   :  { %v7346_v45 = vpop.f32.mrf.mxu2 }
 0x601   :  { %v12840_v5 = vadd.f32 %v7346_v45, %v7298_v29  ;;  %v7456_v2 = vpop.f32.mrf.mxu1  ;;  %v7409_v16 = vpop.f32.mrf.mxu0 }
 0x606   :  { %v7360_v7 = vpop.f32.mrf.mxu3 }
 0x607   :  { %v12843_v3 = vadd.f32 %v7360_v7, %v12796_v10  ;;  %v7408_v7 = vadd.f32 %v7407_v25, %v12838_v22 }
 0x608   :  { %v7505_v4 = vpop.f32.mrf.mxu2 }
 0x609   :  { %v7458_v15 = vpop.f32.mrf.mxu1  ;;  %v7412_v8 = vpop.f32.mrf.mxu0  ;;  %v7410_v9 = vadd.f32 %v7409_v16, %v12843_v3  ;;  %v12915_v16 = vstv %s13228_s3 }
 0x60b   :  { %7558 = vmatmul.bf16.gmra.mxu3 %v9781_v58 }
 0x60e   :  { %v7363_v20 = vpop.f32.mrf.mxu3 }
 0x60f   :  { %v12846_v46 = vadd.f32 %v7363_v20, %v12799_v61  ;;  %v9853_v61 = vor.u32 %v10769_v32, %v9852_v48 }
 0x610   :  { %v7507_v36 = vpop.f32.mrf.mxu2 }
 0x611   :  { %v7461_v47 = vpop.f32.mrf.mxu1 }
 0x616   :  { %v7365_v28 = vpop.f32.mrf.mxu3 }
 0x617   :  { %v12849_v59 = vadd.f32 %v7365_v28, %v12802_v31 }
 0x618   :  { %v7510_v42 = vpop.f32.mrf.mxu2 }
 0x619   :  { %v7463_v30 = vpop.f32.mrf.mxu1 }
 0x61b   :  { %7563 = vmatmul.bf16.gmra.mxu3 %v9817_v21 }
 0x61e   :  { %v7368_v40 = vpop.f32.mrf.mxu3 }
 0x61f   :  { %v12852_v11 = vadd.f32 %v7368_v40, %v12805_v12  ;;  %v9889_v12 = vor.u32 %v10778_v52, %v9888_v43  ;;  %v7459_v40 = vadd.f32 %v7458_v15, %v7410_v9 }
 0x620   :  { %v7512_v58 = vpop.f32.mrf.mxu2 }
 0x621   :  { %v7508_v22 = vadd.f32 %v7507_v36, %v7459_v40 }
 0x626   :  { %v7370_v10 = vpop.f32.mrf.mxu3 }
 0x627   :  { %v12855_v60 = vadd.f32 %v7370_v10, %v12808_v44  ;;  %v7466_v10 = vpop.f32.mrf.mxu1 }
 0x628   :  { %v7515_v48 = vpop.f32.mrf.mxu2 }
 0x62b   :  { %7568 = vmatmul.bf16.gmra.mxu3 %v9853_v61 }
 0x62e   :  { %v7373_v23 = vpop.f32.mrf.mxu3 }
 0x62f   :  { %v12858_v6 = vadd.f32 %v7373_v23, %v12811_v1  ;;  %v9925_v1 = vor.u32 %v10787_v34, %v9924_v35 }
 0x636   :  { %v7375_v31 = vpop.f32.mrf.mxu3 }
 0x637   :  { %v12861_v37 = vadd.f32 %v7375_v31, %v12813_v53 }
 0x63b   :  { %7573 = vmatmul.bf16.gmra.mxu3 %v9889_v12 }
 0x63e   :  { %v7378_v33 = vpop.f32.mrf.mxu3 }
 0x63f   :  { %v12864_v13 = vadd.f32 %v7378_v33, %v12817_v63  ;;  %v9960_v63 = vld [vmem:[#allocation3 + $0x1d0] sm:$0xf]  ;;  %v12896_v33 = vpop.f32.mrf.mxu1 }
 0x640   :  { %v9961_v19 = vor.u32 %v10796_v38, %v9960_v63 }
 0x646   :  { %v7380_v44 = vpop.f32.mrf.mxu3 }
 0x647   :  { %v12867_v14 = vadd.f32 %v7380_v44, %v12820_v26  ;;  %v12898_v44 = vpop.f32.mrf.mxu2 }
 0x64b   :  { %7578 = vmatmul.bf16.gmra.mxu3 %v9925_v1 }
 0x64e   :  { %v7383_v55 = vpop.f32.mrf.mxu3 }
 0x64f   :  { %v12870_v50 = vadd.f32 %v7383_v55, %v12823_v49 }
 0x656   :  { %v7385_v53 = vpop.f32.mrf.mxu3 }
 0x657   :  { %v12873_v51 = vadd.f32 %v7385_v53, %v12826_v62  ;;  %v9997_v62 = vor.u32 %v10805_v27, %v9996_v54  ;;  %v12918_v54 = vpop.f32.mrf.mxu1 }
 0x65b   :  { %7583 = vmatmul.bf16.gmra.mxu3 %v9961_v19 }
 0x65e   :  { %v7388_v26 = vpop.f32.mrf.mxu3 }
 0x65f   :  { %v12876_v57 = vadd.f32 %v7388_v26, %v12829_v41  ;;  %v7414_v41 = vpop.f32.mrf.mxu0 }
 0x660   :  { %v7415_v35 = vadd.f32 %v7414_v41, %v12849_v59 }
 0x662   :  { %v7464_v25 = vadd.f32 %v7463_v30, %v7415_v35 }
 0x666   :  { %v7390_v49 = vpop.f32.mrf.mxu3 }
 0x667   :  { %v12879_v0 = vadd.f32 %v7390_v49, %v12832_v56  ;;  %v7457_v56 = vadd.f32 %v7456_v2, %v7408_v7  ;;  %v7417_v24 = vpop.f32.mrf.mxu0  ;;  %v7513_v2 = vadd.f32 %v7512_v58, %v7464_v25 }
 0x668   :  { %v7418_v15 = vadd.f32 %v7417_v24, %v12852_v11 }
 0x669   :  { %v7506_v20 = vadd.f32 %v7505_v4, %v7457_v56  ;;  %v13507_v4 = vlaneseq }
 0x66a   :  { %v7467_v7 = vadd.f32 %v7466_v10, %v7418_v15 }
 0x66b   :  { %7588 = vmatmul.bf16.gmra.mxu3 %v9997_v62  ;;  %v12910_v26 = vand.u32 127, %v13507_v4 }
 0x66c   :  { %v7516_v24 = vadd.f32 %v7515_v48, %v7467_v7 }
 0x66d   :  { %vm7901_vm15 = vcmp.lt.s32.totalorder %v12910_v26, 10  ;;  %vm7596_vm9 = vcmp.lt.s32.totalorder %v12910_v26, 2 }
 0x66e   :  { %v7393_v39 = vpop.f32.mrf.mxu3 }
 0x66f   :  { %v12882_v29 = vadd.f32 %v7393_v39, %v12835_v18  ;;  %v7419_v31 = vpop.f32.mrf.mxu0  ;;  %v12922_v39 = vpop.f32.mrf.mxu2 }
 0x676   :  { %v7395_v45 = vpop.f32.mrf.mxu3 }
 0x677   :  { %v12886_v17 = vadd.f32 %v7395_v45, %v12840_v5  ;;  %v7413_v5 = vadd.f32 %v7412_v8, %v12846_v46  ;;  %v12906_v63 = vpop.f32.mrf.mxu0  ;;  %v12955_v35 = vpop.f32.mrf.mxu2 }
 0x679   :  { %v7462_v43 = vadd.f32 %v7461_v47, %v7413_v5 }
 0x67b   :  { %v7511_v12 = vadd.f32 %v7510_v42, %v7462_v43  ;;  %v12950_v43 = vpop.f32.mrf.mxu1 }
 0x67e   :  { %v7554_v28 = vpop.f32.mrf.mxu3 }
 0x67f   :  { %v12889_v21 = vadd.f32 %v7554_v28, %v7506_v20 }
 0x681   :  { %v10286_v18 = vmul.f32 -1.442695, %v12889_v21  ;;  %v7904_v47 = vmul.f32 %v12915_v16, %v12889_v21 }
 0x683   :  { %10890 = vpow2.f32 %v10286_v18  ;;  %v7920_v9 = vsel %vm7901_vm15, %v7904_v47, %v12889_v21  ;;  %v12936_v18 = vpop.f32.mrf.mxu0  ;;  %v7476_v7 = vpop.f32.mrf.mxu1 }
 0x686   :  { %v7556_v32 = vpop.f32.mrf.mxu3 }
 0x687   :  { %v12893_v61 = vadd.f32 %v7556_v32, %v7508_v22  ;;  %v7420_v22 = vadd.f32 %v7419_v31, %v12855_v60 }
 0x689   :  { %v10891_v23 = vpop.eup %10890  ;;  %v10287_v52 = vmul.f32 -1.442695, %v12893_v61 }
 0x68a   :  { %v7645_v3 = vadd.f32 1.0, %v10891_v23 }
 0x68b   :  { %10892 = vpow2.f32 %v10287_v52  ;;  %v7905_v52 = vmul.f32 %v12915_v16, %v12893_v61 }
 0x68c   :  { %10894 = vrcp.f32 %v7645_v3  ;;  %v7672_v36 = vand.u32 2147483648, %v7645_v3  ;;  %v7670_v62 = vand.u32 2147483647, %v7645_v3  ;;  %vm7666_vm14 = vweird.f32 %v7645_v3 }
 0x68e   :  { %v7559_v34 = vpop.f32.mrf.mxu3  ;;  %v7673_v30 = vor.u32 1.1754944e-38, %v7672_v36  ;;  %vm7671_vm0 = vcmp.eq.f32.partialorder %v7670_v62, 8.507059e+37 }
 0x68f   :  { %v12901_v1 = vadd.f32 %v7559_v34, %v7511_v12  ;;  %v7469_v34 = vadd.f32 %v12896_v33, %v7420_v22 }
 0x691   :  { %v10893_v46 = vpop.eup %10892  ;;  %v10288_v55 = vmul.f32 -1.442695, %v12901_v1  ;;  %v7518_v33 = vadd.f32 %v12898_v44, %v7469_v34  ;;  %v7906_v62 = vmul.f32 %v12915_v16, %v12901_v1 }
 0x692   :  { %v10895_v53 = vpop.eup %10894  ;;  %v12904_v38 = vadd.f32 1.0, %v10893_v46 }
 0x693   :  { %v7662_v19 = vmul.f32 %v10895_v53, %v7645_v3  ;;  %10896 = vpow2.f32 %v10288_v55  ;;  %vm7667_vm4 = vweird.f32 %v10895_v53 }
 0x694   :  { %10898 = vrcp.f32 %v12904_v38  ;;  %vm7668_vm1 = vmor %vm7666_vm14, %vm7667_vm4  ;;  %v7687_v32 = vand.u32 2147483648, %v12904_v38  ;;  %v7685_v21 = vand.u32 2147483647, %v12904_v38  ;;  %vm7681_vm5 = vweird.f32 %v12904_v38 }
 0x695   :  { %v7663_v59 = vsub.f32 1.0, %v7662_v19 }
 0x696   :  { %v7561_v49 = vpop.f32.mrf.mxu3  ;;  %v7688_v46 = vor.u32 1.1754944e-38, %v7687_v32  ;;  %vm7686_vm6 = vcmp.eq.f32.partialorder %v7685_v21, 8.507059e+37 }
 0x697   :  { %v7664_v27 = vmul.f32 %v10895_v53, %v7663_v59  ;;  %v12920_v8 = vadd.f32 %v7561_v49, %v7513_v2  ;;  %v7423_v59 = vadd.f32 %v12906_v63, %v12858_v6  ;;  %v7427_v49 = vpop.f32.mrf.mxu0 }
 0x699   :  { %v10897_v42 = vpop.eup %10896  ;;  %v7665_v41 = vadd.f32 %v10895_v53, %v7664_v27  ;;  %v10289_v11 = vmul.f32 -1.442695, %v12920_v8 }
 0x69a   :  { %v10899_v45 = vpop.eup %10898  ;;  %v12929_v58 = vadd.f32 1.0, %v10897_v42 }
 0x69b   :  { %v7669_v56 = vsel %vm7668_vm1, %v10895_v53, %v7665_v41  ;;  %v7677_v20 = vmul.f32 %v10899_v45, %v12904_v38  ;;  %10900 = vpow2.f32 %v10289_v11  ;;  %vm7682_vm2 = vweird.f32 %v10899_v45 }
 0x69c   :  { %v7674_v28 = vsel %vm7671_vm0, %v7673_v30, %v7669_v56  ;;  %10902 = vrcp.f32 %v12929_v58  ;;  %vm7683_vm8 = vmor %vm7681_vm5, %vm7682_vm2  ;;  %v7921_v38 = vsel %vm7901_vm15, %v7905_v52, %v12893_v61  ;;  %v7702_v15 = vand.u32 2147483648, %v12929_v58 }
 0x69d   :  { %v7936_v40 = vsel %vm7596_vm9, %v7674_v28, %v7920_v9  ;;  %v7678_v10 = vsub.f32 1.0, %v7677_v20  ;;  %v7700_v27 = vand.u32 2147483647, %v12929_v58  ;;  %vm7696_vm7 = vweird.f32 %v12929_v58  ;;  %v12984_v20 = vpop.f32.mrf.mxu2 }
 0x69e   :  { %7952 = vst [vmem:[%s13229_s4] sm:$0xff] %v7936_v40  ;;  %v7564_v5 = vpop.f32.mrf.mxu3  ;;  %v7472_v41 = vadd.f32 %v12918_v54, %v7423_v59  ;;  %v7703_v11 = vor.u32 1.1754944e-38, %v7702_v15  ;;  %v7425_v40 = vadd.f32 %v12936_v18, %v12861_v37 }
 0x69f   :  { %v7679_v23 = vmul.f32 %v10899_v45, %v7678_v10  ;;  %v12946_v48 = vadd.f32 %v7564_v5, %v7516_v24  ;;  %vm7701_vm3 = vcmp.eq.f32.partialorder %v7700_v27, 8.507059e+37  ;;  %v7429_v21 = vpop.f32.mrf.mxu0 }
 0x6a0   :  { %v7521_v54 = vadd.f32 %v12922_v39, %v7472_v41  ;;  %v7907_v39 = vmul.f32 %v12915_v16, %v12920_v8 }
 0x6a1   :  { %v10901_v3 = vpop.eup %10900  ;;  %v7680_v60 = vadd.f32 %v10899_v45, %v7679_v23  ;;  %v10290_v31 = vmul.f32 -1.442695, %v12946_v48  ;;  %v7908_v15 = vmul.f32 %v12915_v16, %v12946_v48 }
 0x6a2   :  { %v10903_v12 = vpop.eup %10902  ;;  %v12957_v55 = vadd.f32 1.0, %v10901_v3  ;;  %v7474_v3 = vadd.f32 %v12950_v43, %v7425_v40 }
 0x6a3   :  { %v7684_v53 = vsel %vm7683_vm8, %v10899_v45, %v7680_v60  ;;  %v7692_v25 = vmul.f32 %v10903_v12, %v12929_v58  ;;  %10904 = vpow2.f32 %v10290_v31  ;;  %vm7697_vm11 = vweird.f32 %v10903_v12 }
 0x6a4   :  { %v7689_v19 = vsel %vm7686_vm6, %v7688_v46, %v7684_v53  ;;  %10906 = vrcp.f32 %v12957_v55  ;;  %vm7698_vm13 = vmor %vm7696_vm7, %vm7697_vm11  ;;  %v7922_v58 = vsel %vm7901_vm15, %v7906_v62, %v12901_v1  ;;  %v7717_v10 = vand.u32 2147483648, %v12957_v55 }
 0x6a5   :  { %v7937_v2 = vsel %vm7596_vm9, %v7689_v19, %v7921_v38  ;;  %v7693_v4 = vsub.f32 1.0, %v7692_v25  ;;  %v7715_v1 = vand.u32 2147483647, %v12957_v55  ;;  %vm7711_vm12 = vweird.f32 %v12957_v55  ;;  %v7478_v25 = vpop.f32.mrf.mxu1 }
 0x6a6   :  { %7953 = vst [vmem:[%s13229_s4 + $0x8] sm:$0xff] %v7937_v2  ;;  %v7566_v36 = vpop.f32.mrf.mxu3  ;;  %v7718_v60 = vor.u32 1.1754944e-38, %v7717_v10  ;;  %v7923_v53 = vsel %vm7901_vm15, %v7907_v39, %v12920_v8  ;;  %v7428_v38 = vadd.f32 %v7427_v49, %v12864_v13 }
 0x6a7   :  { %v7694_v61 = vmul.f32 %v10903_v12, %v7693_v4  ;;  %v12974_v44 = vadd.f32 %v7566_v36, %v7518_v33  ;;  %vm7716_vm14 = vcmp.eq.f32.partialorder %v7715_v1, 8.507059e+37  ;;  %v7527_v33 = vpop.f32.mrf.mxu2 }
 0x6a8   :  { %v7477_v27 = vadd.f32 %v7476_v7, %v7428_v38 }
 0x6a9   :  { %v10905_v47 = vpop.eup %10904  ;;  %v7695_v42 = vadd.f32 %v10903_v12, %v7694_v61  ;;  %v10291_v6 = vmul.f32 -1.442695, %v12974_v44  ;;  %v7909_v40 = vmul.f32 %v12915_v16, %v12974_v44 }
 0x6aa   :  { %v10907_v63 = vpop.eup %10906  ;;  %v12981_v45 = vadd.f32 1.0, %v10905_v47 }
 0x6ab   :  { %v7699_v30 = vsel %vm7698_vm13, %v10903_v12, %v7695_v42  ;;  %v7707_v56 = vmul.f32 %v10907_v63, %v12957_v55  ;;  %10908 = vpow2.f32 %v10291_v6  ;;  %vm7712_vm10 = vweird.f32 %v10907_v63  ;;  %v7432_v42 = vpop.f32.mrf.mxu0 }
 0x6ac   :  { %v7704_v28 = vsel %vm7701_vm3, %v7703_v11, %v7699_v30  ;;  %10910 = vrcp.f32 %v12981_v45  ;;  %vm7713_vm4 = vmor %vm7711_vm12, %vm7712_vm10  ;;  %v7523_v55 = vadd.f32 %v12955_v35, %v7474_v3  ;;  %v7732_v2 = vand.u32 2147483648, %v12981_v45 }
 0x6ad   :  { %v7938_v9 = vsel %vm7596_vm9, %v7704_v28, %v7922_v58  ;;  %v7708_v24 = vsub.f32 1.0, %v7707_v56  ;;  %v7730_v59 = vand.u32 2147483647, %v12981_v45  ;;  %vm7726_vm0 = vweird.f32 %v12981_v45 }
 0x6ae   :  { %7954 = vst [vmem:[%s13229_s4 + $0x10] sm:$0xff] %v7938_v9  ;;  %v7569_v22 = vpop.f32.mrf.mxu3  ;;  %v7733_v62 = vor.u32 1.1754944e-38, %v7732_v2  ;;  %v7924_v11 = vsel %vm7901_vm15, %v7908_v15, %v12946_v48  ;;  %v7430_v56 = vadd.f32 %v7429_v21, %v12867_v14 }
 0x6af   :  { %v7709_v32 = vmul.f32 %v10907_v63, %v7708_v24  ;;  %v13000_v5 = vadd.f32 %v7569_v22, %v7521_v54  ;;  %vm7731_vm5 = vcmp.eq.f32.partialorder %v7730_v59, 8.507059e+37  ;;  %v7481_v54 = vpop.f32.mrf.mxu1 }
 0x6b0   :  { %v7479_v1 = vadd.f32 %v7478_v25, %v7430_v56 }
 0x6b1   :  { %v10909_v23 = vpop.eup %10908  ;;  %v7710_v52 = vadd.f32 %v10907_v63, %v7709_v32  ;;  %v10292_v37 = vmul.f32 -1.442695, %v13000_v5 }
 0x6b2   :  { %v10911_v18 = vpop.eup %10910  ;;  %v13007_v31 = vadd.f32 1.0, %v10909_v23 }
 0x6b3   :  { %v7714_v12 = vsel %vm7713_vm4, %v10907_v63, %v7710_v52  ;;  %v7722_v34 = vmul.f32 %v10911_v18, %v12981_v45  ;;  %10912 = vpow2.f32 %v10292_v37  ;;  %vm7727_vm1 = vweird.f32 %v10911_v18  ;;  %v7434_v3 = vpop.f32.mrf.mxu0 }
 0x6b4   :  { %v7719_v46 = vsel %vm7716_vm14, %v7718_v60, %v7714_v12  ;;  %10914 = vrcp.f32 %v13007_v31  ;;  %vm7728_vm2 = vmor %vm7726_vm0, %vm7727_vm1  ;;  %v7526_v45 = vadd.f32 %v12984_v20, %v7477_v27  ;;  %v7747_v28 = vand.u32 2147483648, %v13007_v31  ;;  %v7530_v20 = vpop.f32.mrf.mxu2 }
 0x6b5   :  { %v7939_v43 = vsel %vm7596_vm9, %v7719_v46, %v7923_v53  ;;  %v7723_v19 = vsub.f32 1.0, %v7722_v34  ;;  %v7745_v48 = vand.u32 2147483647, %v13007_v31  ;;  %vm7741_vm6 = vweird.f32 %v13007_v31 }
 0x6b6   :  { %7955 = vst [vmem:[%s13229_s4 + $0x18] sm:$0xff] %v7939_v43  ;;  %v7571_v4 = vpop.f32.mrf.mxu3  ;;  %v7748_v39 = vor.u32 1.1754944e-38, %v7747_v28  ;;  %v7528_v60 = vadd.f32 %v7527_v33, %v7479_v1  ;;  %v7433_v34 = vadd.f32 %v7432_v42, %v12870_v50  ;;  %v7910_v43 = vmul.f32 %v12915_v16, %v13000_v5 }
 0x6b7   :  { %v7724_v8 = vmul.f32 %v10911_v18, %v7723_v19  ;;  %v13023_v35 = vadd.f32 %v7571_v4, %v7523_v55  ;;  %vm7746_vm7 = vcmp.eq.f32.partialorder %v7745_v48, 8.507059e+37  ;;  %v7483_v38 = vpop.f32.mrf.mxu1  ;;  %v7435_v42 = vadd.f32 %v7434_v3, %v12873_v51 }
 0x6b8   :  { %v7482_v4 = vadd.f32 %v7481_v54, %v7433_v34 }
 0x6b9   :  { %v10913_v36 = vpop.eup %10912  ;;  %v7725_v61 = vadd.f32 %v10911_v18, %v7724_v8  ;;  %v10293_v13 = vmul.f32 -1.442695, %v13023_v35 }
 0x6ba   :  { %v10915_v49 = vpop.eup %10914  ;;  %v13029_v47 = vadd.f32 1.0, %v10913_v36  ;;  %v7531_v27 = vadd.f32 %v7530_v20, %v7482_v4 }
 0x6bb   :  { %v7729_v6 = vsel %vm7728_vm2, %v10911_v18, %v7725_v61  ;;  %v7737_v63 = vmul.f32 %v10915_v49, %v13007_v31  ;;  %10916 = vpow2.f32 %v10293_v13  ;;  %vm7742_vm8 = vweird.f32 %v10915_v49 }
 0x6bc   :  { %v7734_v41 = vsel %vm7731_vm5, %v7733_v62, %v7729_v6  ;;  %10918 = vrcp.f32 %v13029_v47  ;;  %vm7743_vm11 = vmor %vm7741_vm6, %vm7742_vm8  ;;  %v7925_v18 = vsel %vm7901_vm15, %v7909_v40, %v12974_v44  ;;  %v7762_v46 = vand.u32 2147483648, %v13029_v47  ;;  %v7532_v8 = vpop.f32.mrf.mxu2 }
 0x6bd   :  { %v7940_v7 = vsel %vm7596_vm9, %v7734_v41, %v7924_v11  ;;  %v7738_v30 = vsub.f32 1.0, %v7737_v63  ;;  %v7760_v44 = vand.u32 2147483647, %v13029_v47  ;;  %vm7756_vm3 = vweird.f32 %v13029_v47  ;;  %v7437_v41 = vpop.f32.mrf.mxu0 }
 0x6be   :  { %7956 = vst [vmem:[%s13229_s4 + $0x20] sm:$0xff] %v7940_v7  ;;  %v7574_v58 = vpop.f32.mrf.mxu3  ;;  %v7763_v59 = vor.u32 1.1754944e-38, %v7762_v46  ;;  %v7911_v7 = vmul.f32 %v12915_v16, %v13023_v35 }
 0x6bf   :  { %v7739_v9 = vmul.f32 %v10915_v49, %v7738_v30  ;;  %v13045_v24 = vadd.f32 %v7574_v58, %v7526_v45  ;;  %vm7761_vm12 = vcmp.eq.f32.partialorder %v7760_v44, 8.507059e+37  ;;  %v7484_v58 = vadd.f32 %v7483_v38, %v7435_v42  ;;  %v7486_v48 = vpop.f32.mrf.mxu1 }
 0x6c1   :  { %v10917_v10 = vpop.eup %10916  ;;  %v7740_v14 = vadd.f32 %v10915_v49, %v7739_v9  ;;  %v10294_v22 = vmul.f32 -1.442695, %v13045_v24  ;;  %v7912_v3 = vmul.f32 %v12915_v16, %v13045_v24 }
 0x6c2   :  { %v10919_v32 = vpop.eup %10918  ;;  %v13051_v23 = vadd.f32 1.0, %v10917_v10 }
 0x6c3   :  { %v7744_v21 = vsel %vm7743_vm11, %v10915_v49, %v7740_v14  ;;  %v7752_v52 = vmul.f32 %v10919_v32, %v13029_v47  ;;  %10920 = vpow2.f32 %v10294_v22  ;;  %vm7757_vm13 = vweird.f32 %v10919_v32 }
 0x6c4   :  { %v7749_v37 = vsel %vm7746_vm7, %v7748_v39, %v7744_v21  ;;  %10922 = vrcp.f32 %v13051_v23  ;;  %vm7758_vm10 = vmor %vm7756_vm3, %vm7757_vm13  ;;  %v7926_v49 = vsel %vm7901_vm15, %v7910_v43, %v13000_v5  ;;  %v7777_v6 = vand.u32 2147483648, %v13051_v23  ;;  %v7535_v10 = vpop.f32.mrf.mxu2 }
 0x6c5   :  { %v7941_v31 = vsel %vm7596_vm9, %v7749_v37, %v7925_v18  ;;  %v7753_v12 = vsub.f32 1.0, %v7752_v52  ;;  %v7775_v5 = vand.u32 2147483647, %v13051_v23  ;;  %vm7771_vm14 = vweird.f32 %v13051_v23 }
 0x6c6   :  { %7957 = vst [vmem:[%s13229_s4 + $0x28] sm:$0xff] %v7941_v31  ;;  %v7576_v53 = vpop.f32.mrf.mxu3  ;;  %v7778_v54 = vor.u32 1.1754944e-38, %v7777_v6  ;;  %v7927_v22 = vsel %vm7901_vm15, %v7911_v7, %v13023_v35  ;;  %v7439_v31 = vpop.f32.mrf.mxu0  ;;  %v7928_v38 = vsel %vm7901_vm15, %v7912_v3, %v13045_v24 }
 0x6c7   :  { %v7754_v55 = vmul.f32 %v10919_v32, %v7753_v12  ;;  %v13066_v25 = vadd.f32 %v7576_v53, %v7528_v60  ;;  %vm7776_vm0 = vcmp.eq.f32.partialorder %v7775_v5, 8.507059e+37 }
 0x6c9   :  { %v10921_v19 = vpop.eup %10920  ;;  %v7755_v33 = vadd.f32 %v10919_v32, %v7754_v55  ;;  %v10295_v50 = vmul.f32 -1.442695, %v13066_v25 }
 0x6ca   :  { %v10923_v2 = vpop.eup %10922  ;;  %v13072_v15 = vadd.f32 1.0, %v10921_v19 }
 0x6cb   :  { %v7759_v36 = vsel %vm7758_vm10, %v10919_v32, %v7755_v33  ;;  %v7767_v61 = vmul.f32 %v10923_v2, %v13051_v23  ;;  %10924 = vpow2.f32 %v10295_v50  ;;  %vm7772_vm4 = vweird.f32 %v10923_v2  ;;  %v7488_v50 = vpop.f32.mrf.mxu1 }
 0x6cc   :  { %v7764_v13 = vsel %vm7761_vm12, %v7763_v59, %v7759_v36  ;;  %10926 = vrcp.f32 %v13072_v15  ;;  %vm7773_vm1 = vmor %vm7771_vm14, %vm7772_vm4  ;;  %v7533_v32 = vadd.f32 %v7532_v8, %v7484_v58  ;;  %v7438_v23 = vadd.f32 %v7437_v41, %v12876_v57  ;;  %v7537_v59 = vpop.f32.mrf.mxu2 }
 0x6cd   :  { %v7942_v62 = vsel %vm7596_vm9, %v7764_v13, %v7926_v49  ;;  %v7768_v47 = vsub.f32 1.0, %v7767_v61  ;;  %v7792_v21 = vand.u32 2147483648, %v13072_v15  ;;  %v7790_v35 = vand.u32 2147483647, %v13072_v15 }
 0x6ce   :  { %7958 = vst [vmem:[%s13229_s4 + $0x30] sm:$0xff] %v7942_v62  ;;  %v7579_v63 = vpop.f32.mrf.mxu3  ;;  %vm7786_vm5 = vweird.f32 %v13072_v15  ;;  %v7487_v46 = vadd.f32 %v7486_v48, %v7438_v23  ;;  %v7440_v8 = vadd.f32 %v7439_v31, %v12879_v0  ;;  %v7913_v49 = vmul.f32 %v12915_v16, %v13066_v25  ;;  %v7442_v41 = vpop.f32.mrf.mxu0 }
 0x6cf   :  { %v7769_v11 = vmul.f32 %v10923_v2, %v7768_v47  ;;  %v13087_v45 = vadd.f32 %v7579_v63, %v7531_v27  ;;  %v7793_v53 = vor.u32 1.1754944e-38, %v7792_v21  ;;  %vm7791_vm6 = vcmp.eq.f32.partialorder %v7790_v35, 8.507059e+37 }
 0x6d0   :  { %v7536_v33 = vadd.f32 %v7535_v10, %v7487_v46  ;;  %v7489_v42 = vadd.f32 %v7488_v50, %v7440_v8  ;;  %v7443_v58 = vadd.f32 %v7442_v41, %v12882_v29 }
 0x6d1   :  { %v10925_v30 = vpop.eup %10924  ;;  %v7770_v56 = vadd.f32 %v10923_v2, %v7769_v11  ;;  %v10296_v51 = vmul.f32 -1.442695, %v13087_v45 }
 0x6d2   :  { %v10927_v28 = vpop.eup %10926  ;;  %v13093_v9 = vadd.f32 1.0, %v10925_v30  ;;  %v7929_v30 = vsel %vm7901_vm15, %v7913_v49, %v13066_v25 }
 0x6d3   :  { %v7774_v20 = vsel %vm7773_vm1, %v10923_v2, %v7770_v56  ;;  %v7782_v40 = vmul.f32 %v10927_v28, %v13072_v15  ;;  %10928 = vpow2.f32 %v10296_v51  ;;  %vm7787_vm2 = vweird.f32 %v10927_v28  ;;  %v7491_v48 = vpop.f32.mrf.mxu1 }
 0x6d4   :  { %v7779_v14 = vsel %vm7776_vm0, %v7778_v54, %v7774_v20  ;;  %10930 = vrcp.f32 %v13093_v9  ;;  %vm7788_vm8 = vmor %vm7786_vm5, %vm7787_vm2  ;;  %v7807_v15 = vand.u32 2147483648, %v13093_v9  ;;  %v7805_v24 = vand.u32 2147483647, %v13093_v9  ;;  %v7540_v10 = vpop.f32.mrf.mxu2 }
 0x6d5   :  { %v7943_v1 = vsel %vm7596_vm9, %v7779_v14, %v7927_v22  ;;  %v7783_v39 = vsub.f32 1.0, %v7782_v40  ;;  %vm7801_vm7 = vweird.f32 %v13093_v9  ;;  %v7538_v56 = vadd.f32 %v7537_v59, %v7489_v42 }
 0x6d6   :  { %7959 = vst [vmem:[%s13229_s4 + $0x38] sm:$0xff] %v7943_v1  ;;  %v7581_v52 = vpop.f32.mrf.mxu3  ;;  %v7808_v6 = vor.u32 1.1754944e-38, %v7807_v15  ;;  %vm7806_vm3 = vcmp.eq.f32.partialorder %v7805_v24, 8.507059e+37  ;;  %v7914_v14 = vmul.f32 %v12915_v16, %v13087_v45 }
 0x6d7   :  { %v7784_v37 = vmul.f32 %v10927_v28, %v7783_v39  ;;  %v13108_v18 = vadd.f32 %v7581_v52, %v7533_v32  ;;  %v7492_v39 = vadd.f32 %v7491_v48, %v7443_v58 }
 0x6d8   :  { %v7930_v3 = vsel %vm7901_vm15, %v7914_v14, %v13087_v45 }
 0x6d9   :  { %v10929_v60 = vpop.eup %10928  ;;  %v7785_v12 = vadd.f32 %v10927_v28, %v7784_v37  ;;  %v10297_v57 = vmul.f32 -1.442695, %v13108_v18  ;;  %v7541_v31 = vadd.f32 %v7540_v10, %v7492_v39 }
 0x6da   :  { %v10931_v34 = vpop.eup %10930  ;;  %v13114_v55 = vadd.f32 1.0, %v10929_v60  ;;  %v7444_v60 = vpop.f32.mrf.mxu0 }
 0x6db   :  { %v7789_v44 = vsel %vm7788_vm8, %v10927_v28, %v7785_v12  ;;  %v7797_v43 = vmul.f32 %v10931_v34, %v13093_v9  ;;  %10932 = vpow2.f32 %v10297_v57  ;;  %vm7802_vm11 = vweird.f32 %v10931_v34 }
 0x6dc   :  { %v7794_v19 = vsel %vm7791_vm6, %v7793_v53, %v7789_v44  ;;  %10934 = vrcp.f32 %v13114_v55  ;;  %vm7803_vm13 = vmor %vm7801_vm7, %vm7802_vm11  ;;  %v7822_v54 = vand.u32 2147483648, %v13114_v55  ;;  %v7820_v25 = vand.u32 2147483647, %v13114_v55 }
 0x6dd   :  { %v7944_v2 = vsel %vm7596_vm9, %v7794_v19, %v7928_v38  ;;  %v7798_v4 = vsub.f32 1.0, %v7797_v43  ;;  %vm7816_vm12 = vweird.f32 %v13114_v55  ;;  %v7915_v43 = vmul.f32 %v12915_v16, %v13108_v18  ;;  %v7493_v38 = vpop.f32.mrf.mxu1 }
 0x6de   :  { %7960 = vst [vmem:[%s13229_s4 + $0x40] sm:$0xff] %v7944_v2  ;;  %v7584_v36 = vpop.f32.mrf.mxu3  ;;  %v7823_v23 = vor.u32 1.1754944e-38, %v7822_v54  ;;  %vm7821_vm14 = vcmp.eq.f32.partialorder %v7820_v25, 8.507059e+37 }
 0x6df   :  { %v7799_v61 = vmul.f32 %v10931_v34, %v7798_v4  ;;  %v13129_v13 = vadd.f32 %v7584_v36, %v7536_v33  ;;  %v7542_v4 = vpop.f32.mrf.mxu2  ;;  %v7931_v24 = vsel %vm7901_vm15, %v7915_v43, %v13108_v18 }
 0x6e1   :  { %v10933_v27 = vpop.eup %10932  ;;  %v7800_v62 = vadd.f32 %v10931_v34, %v7799_v61  ;;  %v10298_v0 = vmul.f32 -1.442695, %v13129_v13  ;;  %v7916_v18 = vmul.f32 %v12915_v16, %v13129_v13 }
 0x6e2   :  { %v10935_v47 = vpop.eup %10934  ;;  %v13135_v63 = vadd.f32 1.0, %v10933_v27 }
 0x6e3   :  { %v7804_v11 = vsel %vm7803_vm13, %v10931_v34, %v7800_v62  ;;  %v7812_v5 = vmul.f32 %v10935_v47, %v13114_v55  ;;  %10936 = vpow2.f32 %v10298_v0  ;;  %vm7817_vm10 = vweird.f32 %v10935_v47 }
 0x6e4   :  { %v7809_v7 = vsel %vm7806_vm3, %v7808_v6, %v7804_v11  ;;  %10938 = vrcp.f32 %v13135_v63  ;;  %vm7818_vm4 = vmor %vm7816_vm12, %vm7817_vm10  ;;  %v7445_v34 = vadd.f32 %v7444_v60, %v12886_v17  ;;  %v7837_v46 = vand.u32 2147483648, %v13135_v63 }
 0x6e5   :  { %v7945_v51 = vsel %vm7596_vm9, %v7809_v7, %v7929_v30  ;;  %v7813_v28 = vsub.f32 1.0, %v7812_v5  ;;  %v7835_v45 = vand.u32 2147483647, %v13135_v63  ;;  %vm7831_vm0 = vweird.f32 %v13135_v63 }
 0x6e6   :  { %7961 = vst [vmem:[%s13229_s4 + $0x48] sm:$0xff] %v7945_v51  ;;  %v7586_v9 = vpop.f32.mrf.mxu3  ;;  %v7494_v2 = vadd.f32 %v7493_v38, %v7445_v34  ;;  %v7838_v8 = vor.u32 1.1754944e-38, %v7837_v46  ;;  %v7932_v54 = vsel %vm7901_vm15, %v7916_v18, %v13129_v13 }
 0x6e7   :  { %v7814_v20 = vmul.f32 %v10935_v47, %v7813_v28  ;;  %v13150_v40 = vadd.f32 %v7586_v9, %v7538_v56  ;;  %vm7836_vm5 = vcmp.eq.f32.partialorder %v7835_v45, 8.507059e+37 }
 0x6e8   :  { %v7543_v49 = vadd.f32 %v7542_v4, %v7494_v2 }
 0x6e9   :  { %v10937_v22 = vpop.eup %10936  ;;  %v7815_v29 = vadd.f32 %v10935_v47, %v7814_v20  ;;  %v10299_v32 = vmul.f32 -1.442695, %v13150_v40  ;;  %v7917_v14 = vmul.f32 %v12915_v16, %v13150_v40 }
 0x6ea   :  { %v10939_v1 = vpop.eup %10938  ;;  %v7657_v21 = vadd.f32 1.0, %v10937_v22 }
 0x6eb   :  { %v7819_v52 = vsel %vm7818_vm4, %v10935_v47, %v7815_v29  ;;  %v7827_v37 = vmul.f32 %v10939_v1, %v13135_v63  ;;  %10940 = vpow2.f32 %v10299_v32  ;;  %vm7832_vm1 = vweird.f32 %v10939_v1 }
 0x6ec   :  { %v7824_v35 = vsel %vm7821_vm14, %v7823_v23, %v7819_v52  ;;  %10942 = vrcp.f32 %v7657_v21  ;;  %vm7833_vm2 = vmor %vm7831_vm0, %vm7832_vm1  ;;  %v7852_v0 = vand.u32 2147483648, %v7657_v21  ;;  %v7850_v6 = vand.u32 2147483647, %v7657_v21 }
 0x6ed   :  { %v7946_v12 = vsel %vm7596_vm9, %v7824_v35, %v7930_v3  ;;  %v7828_v57 = vsub.f32 1.0, %v7827_v37  ;;  %vm7846_vm6 = vweird.f32 %v7657_v21  ;;  %v7933_v52 = vsel %vm7901_vm15, %v7917_v14, %v13150_v40 }
 0x6ee   :  { %7962 = vst [vmem:[%s13229_s4 + $0x50] sm:$0xff] %v7946_v12  ;;  %v7589_v53 = vpop.f32.mrf.mxu3  ;;  %v7853_v30 = vor.u32 1.1754944e-38, %v7852_v0  ;;  %vm7851_vm7 = vcmp.eq.f32.partialorder %v7850_v6, 8.507059e+37 }
 0x6ef   :  { %v7829_v55 = vmul.f32 %v10939_v1, %v7828_v57  ;;  %v13168_v44 = vadd.f32 %v7589_v53, %v7541_v31 }
 0x6f1   :  { %v10941_v19 = vpop.eup %10940  ;;  %v7830_v33 = vadd.f32 %v10939_v1, %v7829_v55  ;;  %v10300_v17 = vmul.f32 -1.442695, %v13168_v44  ;;  %v7918_v12 = vmul.f32 %v12915_v16, %v13168_v44 }
 0x6f2   :  { %v10943_v50 = vpop.eup %10942  ;;  %v7658_v59 = vadd.f32 1.0, %v10941_v19 }
 0x6f3   :  { %v7834_v15 = vsel %vm7833_vm2, %v10939_v1, %v7830_v33  ;;  %v7842_v36 = vmul.f32 %v10943_v50, %v7657_v21  ;;  %10944 = vpow2.f32 %v10300_v17  ;;  %vm7847_vm8 = vweird.f32 %v10943_v50 }
 0x6f4   :  { %v7839_v61 = vsel %vm7836_vm5, %v7838_v8, %v7834_v15  ;;  %10946 = vrcp.f32 %v7658_v59  ;;  %vm7848_vm11 = vmor %vm7846_vm6, %vm7847_vm8  ;;  %v7867_v20 = vand.u32 2147483648, %v7658_v59  ;;  %v7865_v10 = vand.u32 2147483647, %v7658_v59 }
 0x6f5   :  { %v7947_v27 = vsel %vm7596_vm9, %v7839_v61, %v7931_v24  ;;  %v7843_v62 = vsub.f32 1.0, %v7842_v36  ;;  %vm7861_vm3 = vweird.f32 %v7658_v59  ;;  %v7934_v45 = vsel %vm7901_vm15, %v7918_v12, %v13168_v44 }
 0x6f6   :  { %7963 = vst [vmem:[%s13229_s4 + $0x58] sm:$0xff] %v7947_v27  ;;  %v7591_v47 = vpop.f32.mrf.mxu3  ;;  %v7868_v32 = vor.u32 1.1754944e-38, %v7867_v20  ;;  %vm7866_vm12 = vcmp.eq.f32.partialorder %v7865_v10, 8.507059e+37 }
 0x6f7   :  { %v7844_v42 = vmul.f32 %v10943_v50, %v7843_v62  ;;  %v13182_v63 = vadd.f32 %v7591_v47, %v7543_v49 }
 0x6f9   :  { %v10945_v41 = vpop.eup %10944  ;;  %v7845_v11 = vadd.f32 %v10943_v50, %v7844_v42  ;;  %v10301_v5 = vmul.f32 -1.442695, %v13182_v63 }
 0x6fa   :  { %v10947_v7 = vpop.eup %10946  ;;  %v7659_v56 = vadd.f32 1.0, %v10945_v41 }
 0x6fb   :  { %v7849_v51 = vsel %vm7848_vm11, %v10943_v50, %v7845_v11  ;;  %v7857_v28 = vmul.f32 %v10947_v7, %v7658_v59  ;;  %10948 = vpow2.f32 %v10301_v5  ;;  %vm7862_vm13 = vweird.f32 %v10947_v7 }
 0x6fc   :  { %v7854_v58 = vsel %vm7851_vm7, %v7853_v30, %v7849_v51  ;;  %10950 = vrcp.f32 %v7659_v56  ;;  %vm7863_vm10 = vmor %vm7861_vm3, %vm7862_vm13  ;;  %v7882_v3 = vand.u32 2147483648, %v7659_v56  ;;  %v7880_v31 = vand.u32 2147483647, %v7659_v56 }
 0x6fd   :  { %v7948_v9 = vsel %vm7596_vm9, %v7854_v58, %v7932_v54  ;;  %v7858_v48 = vsub.f32 1.0, %v7857_v28  ;;  %vm7876_vm14 = vweird.f32 %v7659_v56  ;;  %v7919_v50 = vmul.f32 %v12915_v16, %v13182_v63 }
 0x6fe   :  { %7964 = vst [vmem:[%s13229_s4 + $0x60] sm:$0xff] %v7948_v9  ;;  %v7883_v40 = vor.u32 1.1754944e-38, %v7882_v3  ;;  %vm7881_vm0 = vcmp.eq.f32.partialorder %v7880_v31, 8.507059e+37 }
 0x6ff   :  { %v7859_v25 = vmul.f32 %v10947_v7, %v7858_v48  ;;  %v7935_v59 = vsel %vm7901_vm15, %v7919_v50, %v13182_v63 }
 0x701   :  { %v10949_v22 = vpop.eup %10948  ;;  %v7860_v29 = vadd.f32 %v10947_v7, %v7859_v25 }
 0x702   :  { %v10951_v13 = vpop.eup %10950  ;;  %v7660_v1 = vadd.f32 1.0, %v10949_v22 }
 0x703   :  { %v7864_v39 = vsel %vm7863_vm10, %v10947_v7, %v7860_v29  ;;  %v7872_v23 = vmul.f32 %v10951_v13, %v7659_v56  ;;  %vm7877_vm4 = vweird.f32 %v10951_v13 }
 0x704   :  { %v7869_v21 = vsel %vm7866_vm12, %v7868_v32, %v7864_v39  ;;  %10952 = vrcp.f32 %v7660_v1  ;;  %vm7878_vm1 = vmor %vm7876_vm14, %vm7877_vm4  ;;  %v7897_v38 = vand.u32 2147483648, %v7660_v1  ;;  %v7895_v17 = vand.u32 2147483647, %v7660_v1 }
 0x705   :  { %v7949_v37 = vsel %vm7596_vm9, %v7869_v21, %v7933_v52  ;;  %v7873_v35 = vsub.f32 1.0, %v7872_v23  ;;  %vm7891_vm5 = vweird.f32 %v7660_v1 }
 0x706   :  { %7965 = vst [vmem:[%s13229_s4 + $0x68] sm:$0xff] %v7949_v37  ;;  %v7898_v4 = vor.u32 1.1754944e-38, %v7897_v38  ;;  %vm7896_vm6 = vcmp.eq.f32.partialorder %v7895_v17, 8.507059e+37 }
 0x707   :  { %v7874_v60 = vmul.f32 %v10951_v13, %v7873_v35 }
 0x709   :  { %v7875_v57 = vadd.f32 %v10951_v13, %v7874_v60 }
 0x70a   :  { %v10953_v34 = vpop.eup %10952 }
 0x70b   :  { %v7879_v46 = vsel %vm7878_vm1, %v10951_v13, %v7875_v57  ;;  %v7887_v53 = vmul.f32 %v10953_v34, %v7660_v1  ;;  %vm7892_vm2 = vweird.f32 %v10953_v34 }
 0x70c   :  { %v7884_v55 = vsel %vm7881_vm0, %v7883_v40, %v7879_v46  ;;  %vm7893_vm8 = vmor %vm7891_vm5, %vm7892_vm2 }
 0x70d   :  { %v7950_v43 = vsel %vm7596_vm9, %v7884_v55, %v7934_v45  ;;  %v7888_v19 = vsub.f32 1.0, %v7887_v53 }
 0x70e   :  { %7966 = vst [vmem:[%s13229_s4 + $0x70] sm:$0xff] %v7950_v43 }
 0x70f   :  { %v7889_v33 = vmul.f32 %v10953_v34, %v7888_v19 }
 0x711   :  { %v7890_v2 = vadd.f32 %v10953_v34, %v7889_v33 }
 0x713   :  { %v7894_v44 = vsel %vm7893_vm8, %v10953_v34, %v7890_v2 }
 0x714   :  { %v7899_v8 = vsel %vm7896_vm6, %v7898_v4, %v7894_v44 }
 0x715   :  { %v7951_v15 = vsel %vm7596_vm9, %v7899_v8, %v7935_v59 }
 0x716   :  { %7967 = vst [vmem:[%s13229_s4 + $0x78] sm:$0xff] %v7951_v15 }
 0x717   :  { %7972 = vsyncpa [#allocation6], 1 }
 0x718   :  { %7973 = vsyncpa [#allocation8], 1 }

</bundles_post_ra>
